<compile_context>
chip_gen: v7x
topology: tpu7x:2x2x1
jax: 0.10.0
libtpu: 0.0.40
codegen_flags: <defaults>
</compile_context>

<pallas_src>
import functools

import jax
import jax.numpy as jnp
from jax.experimental import pallas as pl
from jax.experimental.pallas import tpu as pltpu


# Set to jnp.bfloat16 on v6e / v7x to halve matmul-operand HBM/VMEM traffic and
# hit the MXU's native dtype (accumulation stays f32).  float32 keeps exact
# parity with the PyTorch reference numerics, so it is the default.
_MXU_DTYPE = jnp.float32

_CNT_LANES = 128  # lane-dense int32 zero-count accumulator, shape (1, 128)


def _round_up(x, m):
    return (x + m - 1) // m * m


def _bn_fold(bias, gamma, beta, mean, var, eps):
    s = gamma / jnp.sqrt(var + eps)
    return s, bias * s + (beta - mean * s)


# ----------------------------------------------------------------------------
# Kernel A: fused [b1 | b2-reduce | b3-reduce] 1x1 Conv+BN+ReLU  + sparsity of
#           x and of the two post-ReLU reduce outputs.
# ----------------------------------------------------------------------------
def _fused_1x1_kernel(x_ref, w_ref, b_ref,
                      ys_ref, yt_ref, yu_ref,
                      xmap_ref, tmap_ref, umap_ref, cnt_ref,
                      *, tm, m_total, c_s, c_t, c_u):
    i = pl.program_id(0)

    @pl.when(i == 0)
    def _init():
        cnt_ref[...] = jnp.zeros_like(cnt_ref)

    x = x_ref[...]                                            # (TM, Cin) f32
    # rows >= m_total are M-padding rows -> exclude them from the zero counts
    row = i * tm + jax.lax.broadcasted_iota(jnp.int32, (tm, 1), 0)
    valid = (row < m_total).astype(jnp.int32)                 # (TM, 1)

    # sparsity of the raw input x
    x_is0 = (x == 0.0)
    xmap_ref[...] = jnp.where(x_is0, 1.0, 0.0).astype(jnp.int8)
    zx = jnp.sum(jnp.where(x_is0, 1, 0) * valid)

    # one MXU matmul for the three concatenated 1x1 branches (+ folded BN)
    y = jnp.dot(x.astype(_MXU_DTYPE), w_ref[...],
                preferred_element_type=jnp.float32)
    y = jnp.maximum(y + b_ref[...], 0.0)                      # (TM, Ctot)

    y_s = y[:, 0:c_s]
    y_t = y[:, c_s:c_s + c_t]
    y_u = y[:, c_s + c_t:c_s + c_t + c_u]
    ys_ref[...] = y_s
    yt_ref[...] = y_t
    yu_ref[...] = y_u

    # sparsity of the post-ReLU reduce outputs (t, u)
    t_is0 = (y_t == 0.0)
    u_is0 = (y_u == 0.0)
    tmap_ref[...] = jnp.where(t_is0, 1.0, 0.0).astype(jnp.int8)
    umap_ref[...] = jnp.where(u_is0, 1.0, 0.0).astype(jnp.int8)
    zt = jnp.sum(jnp.where(t_is0, 1, 0) * valid)
    zu = jnp.sum(jnp.where(u_is0, 1, 0) * valid)

    lane = jax.lax.broadcasted_iota(jnp.int32, cnt_ref.shape, 1)
    cnt_ref[...] += (jnp.where(lane == 0, zx, 0)
                     + jnp.where(lane == 1, zt, 0)
                     + jnp.where(lane == 2, zu, 0))


def fused_1x1_branches(x2d, w_cat, b_cat, c_s, c_t, c_u, *, tm=256):
    """relu(x2d @ w_cat + b_cat) split into the three branch slices plus
    int8 zero-maps and int32 zero-counts of x and of the t / u slices."""
    m, cin = x2d.shape
    tm = min(tm, _round_up(m, 8))
    grid_m = pl.cdiv(m, tm)
    m_pad = grid_m * tm
    if m_pad != m:
        x2d = jnp.pad(x2d, ((0, m_pad - m), (0, 0)))

    kernel = functools.partial(_fused_1x1_kernel, tm=tm, m_total=m,
                               c_s=c_s, c_t=c_t, c_u=c_u)

    def row_spec(c):
        return pl.BlockSpec((tm, c), lambda i: (i, 0))

    out_shape = (
        jax.ShapeDtypeStruct((m_pad, c_s), jnp.float32),
        jax.ShapeDtypeStruct((m_pad, c_t), jnp.float32),
        jax.ShapeDtypeStruct((m_pad, c_u), jnp.float32),
        jax.ShapeDtypeStruct((m_pad, cin), jnp.int8),
        jax.ShapeDtypeStruct((m_pad, c_t), jnp.int8),
        jax.ShapeDtypeStruct((m_pad, c_u), jnp.int8),
        jax.ShapeDtypeStruct((1, _CNT_LANES), jnp.int32),
    )
    outs = pl.pallas_call(
        kernel,
        out_shape=out_shape,
        grid_spec=pltpu.PrefetchScalarGridSpec(
            num_scalar_prefetch=0,
            grid=(grid_m,),
            in_specs=[
                pl.BlockSpec((tm, cin), lambda i: (i, 0)),
                pl.BlockSpec(w_cat.shape, lambda i: (0, 0)),
                pl.BlockSpec(b_cat.shape, lambda i: (0, 0)),
            ],
            out_specs=(
                row_spec(c_s), row_spec(c_t), row_spec(c_u),
                row_spec(cin), row_spec(c_t), row_spec(c_u),
                pl.BlockSpec((1, _CNT_LANES), lambda i: (0, 0)),
            ),
        ),
        # count accumulator is revisited across M tiles -> sequential axis
        compiler_params=pltpu.CompilerParams(
            dimension_semantics=("arbitrary",)),
    )(x2d, w_cat, b_cat)

    y_s, y_t, y_u, xmap, tmap, umap, cnt = outs
    if m_pad != m:
        y_s, y_t, y_u = y_s[:m], y_t[:m], y_u[:m]
        xmap, tmap, umap = xmap[:m], tmap[:m], umap[:m]
    return y_s, y_t, y_u, xmap, tmap, umap, cnt[0, 0], cnt[0, 1], cnt[0, 2]


# ----------------------------------------------------------------------------
# Kernel B: 3x3 Conv (padding=1) + folded BN + ReLU, optionally emitting the
#           zero-map / zero-count of its post-ReLU output.
# ----------------------------------------------------------------------------
def _conv3x3_kernel(pw_ref, w_ref, b_ref, *out_refs, hw, h, with_sparsity):
    if with_sparsity:
        y_ref, map_ref, cnt_ref = out_refs
    else:
        (y_ref,) = out_refs

    cout = y_ref.shape[-1]
    acc = jnp.zeros((hw, cout), jnp.float32)
    for dh in range(3):
        # slice only along a major axis -> no relayout; width taps already
        # concatenated along channels.
        xs = pw_ref[0, dh:dh + h, :, :]                 # (H, W, 3*Cin)
        acc = acc + jnp.dot(xs.reshape(hw, -1).astype(_MXU_DTYPE), w_ref[dh],
                            preferred_element_type=jnp.float32)
    y = jnp.maximum(acc + b_ref[...], 0.0)              # (HW, Cout)
    y_ref[0] = y

    if with_sparsity:
        n = pl.program_id(0)

        @pl.when(n == 0)
        def _init():
            cnt_ref[...] = jnp.zeros_like(cnt_ref)

        y_is0 = (y == 0.0)
        map_ref[0] = jnp.where(y_is0, 1.0, 0.0).astype(jnp.int8)
        z = jnp.sum(jnp.where(y_is0, 1, 0))
        lane = jax.lax.broadcasted_iota(jnp.int32, cnt_ref.shape, 1)
        cnt_ref[...] += jnp.where(lane == 0, z, 0)


def conv3x3_bn_relu(x_nhwc, p, *, with_sparsity=False):
    """Conv2d(k=3, padding=1) + BatchNorm (folded, inference) + ReLU."""
    n, h, w, cin = x_nhwc.shape
    cout = p["w"].shape[-1]
    scale, b_eff = _bn_fold(p["b"], p["gamma"], p["beta"], p["mean"],
                            p["var"], p["eps"])
    # (3, 3, Cin, Cout) -> (3, 3*Cin, Cout); row dh holds the three dw taps.
    w_eff = (p["w"] * scale).reshape(3, 3 * cin, cout).astype(_MXU_DTYPE)
    b_eff = b_eff.reshape(1, cout)

    # zero-pad H/W by 1 and pre-concatenate the three width shifts along the
    # channel axis (3x the activation bytes instead of a 9x im2col); the
    # height shifts are taken in-kernel.
    # TODO(synk): build the width shifts in VMEM as well (roll / halo DMA) to
    # drop the remaining 3x patch materialization.
    xp = jnp.pad(x_nhwc, ((0, 0), (1, 1), (1, 1), (0, 0)))
    pw = jnp.concatenate([xp[:, :, dw:dw + w, :] for dw in range(3)], axis=-1)
    if _MXU_DTYPE != jnp.float32:
        pw = pw.astype(_MXU_DTYPE)

    hw = h * w
    kernel = functools.partial(_conv3x3_kernel, hw=hw, h=h,
                               with_sparsity=with_sparsity)

    out_shape = [jax.ShapeDtypeStruct((n, hw, cout), jnp.float32)]
    out_specs = [pl.BlockSpec((1, hw, cout), lambda i: (i, 0, 0))]
    if with_sparsity:
        out_shape += [jax.ShapeDtypeStruct((n, hw, cout), jnp.int8),
                      jax.ShapeDtypeStruct((1, _CNT_LANES), jnp.int32)]
        out_specs += [pl.BlockSpec((1, hw, cout), lambda i: (i, 0, 0)),
                      pl.BlockSpec((1, _CNT_LANES), lambda i: (0, 0))]

    outs = pl.pallas_call(
        kernel,
        out_shape=tuple(out_shape),
        grid_spec=pltpu.PrefetchScalarGridSpec(
            num_scalar_prefetch=0,
            grid=(n,),
            in_specs=[
                pl.BlockSpec((1, h + 2, w, 3 * cin), lambda i: (i, 0, 0, 0)),
                pl.BlockSpec((3, 3 * cin, cout), lambda i: (0, 0, 0)),
                pl.BlockSpec((1, cout), lambda i: (0, 0)),
            ],
            out_specs=tuple(out_specs),
        ),
        compiler_params=pltpu.CompilerParams(
            dimension_semantics=("arbitrary",) if with_sparsity
            else ("parallel",)),
    )(pw, w_eff, b_eff)

    if with_sparsity:
        y, ymap, cnt = outs
        return (y.reshape(n, h, w, cout),
                ymap.reshape(n, h, w, cout),
                cnt[0, 0])
    (y,) = outs
    return y.reshape(n, h, w, cout)


# ----------------------------------------------------------------------------
# Kernel C: MaxPool2d(3, s=1, p=1) + sparsity of the pooled activation +
#           1x1 Conv + folded BN + ReLU, fused per image.
# ----------------------------------------------------------------------------
def _pool_conv1x1_kernel(xp_ref, w_ref, b_ref, y_ref, vmap_ref, cnt_ref,
                         *, h, w):
    n = pl.program_id(0)

    @pl.when(n == 0)
    def _init():
        cnt_ref[...] = jnp.zeros_like(cnt_ref)

    x = xp_ref[0]                                   # (H+2, W+2, Cin), -inf pad
    m = jnp.full((h, w, x.shape[-1]), -jnp.inf, dtype=jnp.float32)
    for dh in range(3):
        for dw in range(3):
            m = jnp.maximum(m, x[dh:dh + h, dw:dw + w, :])
    v = m.reshape(h * w, x.shape[-1])               # pooled activation (HW, Cin)

    v_is0 = (v == 0.0)
    vmap_ref[0] = jnp.where(v_is0, 1.0, 0.0).astype(jnp.int8)
    z = jnp.sum(jnp.where(v_is0, 1, 0))
    lane = jax.lax.broadcasted_iota(jnp.int32, cnt_ref.shape, 1)
    cnt_ref[...] += jnp.where(lane == 0, z, 0)

    y = jnp.dot(v.astype(_MXU_DTYPE), w_ref[...],
                preferred_element_type=jnp.float32)
    y_ref[0] = jnp.maximum(y + b_ref[...], 0.0)


def maxpool_sparsity_conv1x1(x_nhwc, p):
    n, h, w, cin = x_nhwc.shape
    cout = p["w"].shape[-1]
    scale, b_eff = _bn_fold(p["b"], p["gamma"], p["beta"], p["mean"],
                            p["var"], p["eps"])
    w_eff = (p["w"] * scale[None, :]).astype(_MXU_DTYPE)     # (Cin, Cout)
    b_eff = b_eff.reshape(1, cout)

    # -inf padding == PyTorch MaxPool2d padding semantics
    xp = jnp.pad(x_nhwc, ((0, 0), (1, 1), (1, 1), (0, 0)),
                 constant_values=-jnp.inf)
    hw = h * w
    kernel = functools.partial(_pool_conv1x1_kernel, h=h, w=w)

    y, vmap, cnt = pl.pallas_call(
        kernel,
        out_shape=(jax.ShapeDtypeStruct((n, hw, cout), jnp.float32),
                   jax.ShapeDtypeStruct((n, hw, cin), jnp.int8),
                   jax.ShapeDtypeStruct((1, _CNT_LANES), jnp.int32)),
        grid_spec=pltpu.PrefetchScalarGridSpec(
            num_scalar_prefetch=0,
            grid=(n,),
            in_specs=[
                pl.BlockSpec((1, h + 2, w + 2, cin), lambda i: (i, 0, 0, 0)),
                pl.BlockSpec((cin, cout), lambda i: (0, 0)),
                pl.BlockSpec((1, cout), lambda i: (0, 0)),
            ],
            out_specs=(pl.BlockSpec((1, hw, cout), lambda i: (i, 0, 0)),
                       pl.BlockSpec((1, hw, cin), lambda i: (i, 0, 0)),
                       pl.BlockSpec((1, _CNT_LANES), lambda i: (0, 0))),
        ),
        compiler_params=pltpu.CompilerParams(
            dimension_semantics=("arbitrary",)),
    )(xp, w_eff, b_eff)
    return y.reshape(n, h, w, cout), vmap.reshape(n, h, w, cin), cnt[0, 0]


# ----------------------------------------------------------------------------
# Parameters
# ----------------------------------------------------------------------------
def _init_conv_bn(key, cin, cout, ksize, eps=1e-5):
    k = jax.random.split(key, 6)
    if ksize == 1:
        w = jax.random.normal(k[0], (cin, cout), jnp.float32) * 0.1
    else:
        w = jax.random.normal(k[0], (ksize, ksize, cin, cout), jnp.float32) * 0.1
    return dict(
        w=w,
        b=jax.random.normal(k[1], (cout,), jnp.float32) * 0.1,
        gamma=1.0 + 0.1 * jax.random.normal(k[2], (cout,), jnp.float32),
        beta=0.1 * jax.random.normal(k[3], (cout,), jnp.float32),
        mean=0.1 * jax.random.normal(k[4], (cout,), jnp.float32),
        var=0.5 + jax.random.uniform(k[5], (cout,), jnp.float32),
        eps=eps,
    )


def init_inception_params(key, input_channels, n1x1, n3x3_reduce, n3x3,
                          n5x5_reduce, n5x5, pool_proj):
    # NOTE: BatchNorm is implemented with inference-mode (running-stats)
    # semantics.  self.my_fc layers from __init__ are never used in forward()
    # and are therefore omitted.
    keys = jax.random.split(key, 8)
    return dict(
        b1_0=_init_conv_bn(keys[0], input_channels, n1x1, 1),
        b2_0=_init_conv_bn(keys[1], input_channels, n3x3_reduce, 1),
        b2_1=_init_conv_bn(keys[2], n3x3_reduce, n3x3, 3),
        b3_0=_init_conv_bn(keys[3], input_channels, n5x5_reduce, 1),
        # nn.BatchNorm2d(n5x5, n5x5): second positional arg is eps -> keep the
        # reference module's eps=n5x5 "bug" for faithful semantics.
        b3_1=_init_conv_bn(keys[4], n5x5_reduce, n5x5, 3, eps=float(n5x5)),
        b3_2=_init_conv_bn(keys[5], n5x5, n5x5, 3),
        b4_1=_init_conv_bn(keys[6], input_channels, pool_proj, 1),
    )


# ----------------------------------------------------------------------------
# Forward pass (mirrors Inception.forward)
# ----------------------------------------------------------------------------
def _to_nchw_map(map_nhwc_i8):
    # transpose the 1-byte zero-map (not the 4-byte activation) and cast to
    # the uint8 dtype the PyTorch module returns.
    return jnp.transpose(map_nhwc_i8, (0, 3, 1, 2)).astype(jnp.uint8)


def inception_forward(x_nchw, params):
    n, cin, h, w = x_nchw.shape
    x = jnp.transpose(x_nchw, (0, 2, 3, 1))            # NCHW -> NHWC (once)

    def fold1x1(p):
        s, b_eff = _bn_fold(p["b"], p["gamma"], p["beta"], p["mean"],
                            p["var"], p["eps"])
        return p["w"] * s[None, :], b_eff

    # fuse the three 1x1 branches that all read x into one matmul
    w1, b1 = fold1x1(params["b1_0"])
    w2, b2 = fold1x1(params["b2_0"])
    w3, b3 = fold1x1(params["b3_0"])
    c_s, c_t, c_u = w1.shape[1], w2.shape[1], w3.shape[1]
    w_cat = jnp.concatenate([w1, w2, w3], axis=1).astype(_MXU_DTYPE)
    b_cat = jnp.concatenate([b1, b2, b3]).reshape(1, c_s + c_t + c_u)

    (y_s, y_t, y_u, xmap, tmap, umap,
     zeros_x, zeros_t, zeros_u1) = fused_1x1_branches(
        x.reshape(-1, cin), w_cat, b_cat, c_s, c_t, c_u)

    s_act = y_s.reshape(n, h, w, c_s)
    t_act = y_t.reshape(n, h, w, c_t)
    u_act = y_u.reshape(n, h, w, c_u)

    # branch 2: 3x3 conv on t
    t_out = conv3x3_bn_relu(t_act, params["b2_1"])

    # branch 3: 3x3 (+ sparsity of its post-ReLU output), then another 3x3
    u1, u1map, zeros_u2 = conv3x3_bn_relu(u_act, params["b3_1"],
                                          with_sparsity=True)
    u_out = conv3x3_bn_relu(u1, params["b3_2"])

    # branch 4: maxpool (+ sparsity of the pooled activation) + 1x1 conv
    v_out, vmap, zeros_v = maxpool_sparsity_conv1x1(x, params["b4_1"])

    out = jnp.concatenate([s_act, t_out, u_out, v_out], axis=-1)
    out_nchw = jnp.transpose(out, (0, 3, 1, 2))        # == torch.cat(dim=1)

    smaps = [
        _to_nchw_map(xmap.reshape(n, h, w, cin)),
        _to_nchw_map(tmap.reshape(n, h, w, c_t)),
        _to_nchw_map(umap.reshape(n, h, w, c_u)),
        _to_nchw_map(u1map),
        _to_nchw_map(vmap),
    ]
    zeros = [zeros_x, zeros_t, zeros_u1, zeros_u2, zeros_v]
    sizes = [n * cin * h * w, n * c_t * h * w, n * c_u * h * w,
             int(u1map.size), int(vmap.size)]
    return out_nchw, zeros, sizes, smaps


# ----------------------------------------------------------------------------
if __name__ == "__main__":
    input_channels, n1x1, n3x3_reduce, n3x3 = 4, 8, 8, 16
    n5x5_reduce, n5x5, pool_proj, fc_in = 8, 8, 8, 16
    N, H, W = 2, fc_in, fc_in

    key = jax.random.PRNGKey(0)
    kx, kp = jax.random.split(key)
    x = jax.random.normal(kx, (N, input_channels, H, W), jnp.float32)
    # inject some exact zeros so the sparsity stats are non-trivial
    x = jnp.where(x > 1.0, 0.0, x)

    params = init_inception_params(kp, input_channels, n1x1, n3x3_reduce,
                                   n3x3, n5x5_reduce, n5x5, pool_proj)

    fwd = jax.jit(inception_forward)
    out, zeros, sizes, smaps = fwd(x, params)
    out = jax.block_until_ready(out)
    zeros = [int(z) for z in zeros]
    sizes = [int(sz) for sz in sizes]
    smaps = [jax.block_until_ready(m) for m in smaps]

    # shape / dtype checks (match the PyTorch module's outputs)
    assert out.shape == (N, n1x1 + n3x3 + n5x5 + pool_proj, H, W)
    assert out.dtype == jnp.float32
    assert len(zeros) == len(sizes) == len(smaps) == 5
    assert all(m.dtype == jnp.uint8 for m in smaps)
    assert smaps[0].shape == (N, input_channels, H, W)
    assert smaps[1].shape == (N, n3x3_reduce, H, W)
    assert smaps[2].shape == (N, n5x5_reduce, H, W)
    assert smaps[3].shape == (N, n5x5, H, W)
    assert smaps[4].shape == (N, input_channels, H, W)
    assert sizes[0] == N * input_channels * H * W

    # the fused in-kernel zero counts must agree with the emitted zero maps
    for z, m in zip(zeros, smaps):
        assert z == int(jnp.sum(m.astype(jnp.int32)))
    # and with an independent XLA-side count for the raw input
    assert zeros[0] == int(jnp.sum(x == 0.0))

    print("KERNEL_OK")
</pallas_src>

<mosaic_0001>
module attributes {stable_mosaic.version = 11 : i64} {
  func.func @_pool_conv1x1_kernel(%arg0: i32, %arg1: memref<1x18x18x4xf32, #tpu.memory_space<vmem>>, %arg2: memref<4x8xf32, #tpu.memory_space<vmem>>, %arg3: memref<1x8xf32, #tpu.memory_space<vmem>>, %arg4: memref<1x256x8xf32, #tpu.memory_space<vmem>>, %arg5: memref<1x256x4xi8, #tpu.memory_space<vmem>>, %arg6: memref<1x128xi32, #tpu.memory_space<vmem>>) attributes {dimension_semantics = [#tpu.dimension_semantics<arbitrary>], iteration_bounds = array<i64: 2>, scalar_prefetch = 0 : i64, scratch_operands = 0 : i64, tpu.core_type = #tpu.core_type<tc>, window_params = [{transform_indices = @transform_0, window_bounds = array<i64: 1, 18, 18, 4>}, {pipeline_mode = #tpu.pipeline_mode<synchronous>, transform_indices = @transform_1, window_bounds = array<i64: 4, 8>}, {pipeline_mode = #tpu.pipeline_mode<synchronous>, transform_indices = @transform_2, window_bounds = array<i64: 1, 8>}, {transform_indices = @transform_3, window_bounds = array<i64: 1, 256, 8>}, {transform_indices = @transform_4, window_bounds = array<i64: 1, 256, 4>}, {pipeline_mode = #tpu.pipeline_mode<synchronous>, transform_indices = @transform_5, window_bounds = array<i64: 1, 128>}]} {
    %c0_i32 = arith.constant 0 : i32
    %0 = arith.cmpi eq, %arg0, %c0_i32 : i32
    %1 = arith.extui %0 : i1 to i32
    %c0_i32_0 = arith.constant 0 : i32
    %2 = arith.cmpi ne, %1, %c0_i32_0 : i32
    scf.if %2 {
      %c0_i32_27 = arith.constant 0 : i32
      %60 = vector.broadcast %c0_i32_27 : i32 to vector<1x128xi32>
      %c0_28 = arith.constant 0 : index
      %c0_29 = arith.constant 0 : index
      %61 = vector.load %arg6[%c0_28, %c0_29] : memref<1x128xi32, #tpu.memory_space<vmem>>, vector<1x128xi32>
      tpu.vector_store %arg6[%c0_28, %c0_29], %60 {strides = array<i32>} : memref<1x128xi32, #tpu.memory_space<vmem>>, vector<1x128xi32>,
    } else {
    }
    %c0 = arith.constant 0 : index
    %c0_1 = arith.constant 0 : index
    %c0_2 = arith.constant 0 : index
    %c0_3 = arith.constant 0 : index
    %3 = vector.load %arg1[%c0, %c0_1, %c0_2, %c0_3] : memref<1x18x18x4xf32, #tpu.memory_space<vmem>>, vector<1x18x18x4xf32>
    %4 = vector.shape_cast %3 : vector<1x18x18x4xf32> to vector<18x18x4xf32>
    %cst = arith.constant 0xFF800000 : f32
    %5 = vector.broadcast %cst : f32 to vector<16x16x4xf32>
    %6 = vector.extract_strided_slice %4 {offsets = [0, 0, 0], sizes = [16, 16, 4], strides = [1, 1, 1]} : vector<18x18x4xf32> to vector<16x16x4xf32>
    %7 = arith.maximumf %5, %6 : vector<16x16x4xf32>
    %8 = vector.extract_strided_slice %4 {offsets = [0, 1, 0], sizes = [16, 16, 4], strides = [1, 1, 1]} : vector<18x18x4xf32> to vector<16x16x4xf32>
    %9 = arith.maximumf %7, %8 : vector<16x16x4xf32>
    %10 = vector.extract_strided_slice %4 {offsets = [0, 2, 0], sizes = [16, 16, 4], strides = [1, 1, 1]} : vector<18x18x4xf32> to vector<16x16x4xf32>
    %11 = arith.maximumf %9, %10 : vector<16x16x4xf32>
    %12 = vector.extract_strided_slice %4 {offsets = [1, 0, 0], sizes = [16, 16, 4], strides = [1, 1, 1]} : vector<18x18x4xf32> to vector<16x16x4xf32>
    %13 = arith.maximumf %11, %12 : vector<16x16x4xf32>
    %14 = vector.extract_strided_slice %4 {offsets = [1, 1, 0], sizes = [16, 16, 4], strides = [1, 1, 1]} : vector<18x18x4xf32> to vector<16x16x4xf32>
    %15 = arith.maximumf %13, %14 : vector<16x16x4xf32>
    %16 = vector.extract_strided_slice %4 {offsets = [1, 2, 0], sizes = [16, 16, 4], strides = [1, 1, 1]} : vector<18x18x4xf32> to vector<16x16x4xf32>
    %17 = arith.maximumf %15, %16 : vector<16x16x4xf32>
    %18 = vector.extract_strided_slice %4 {offsets = [2, 0, 0], sizes = [16, 16, 4], strides = [1, 1, 1]} : vector<18x18x4xf32> to vector<16x16x4xf32>
    %19 = arith.maximumf %17, %18 : vector<16x16x4xf32>
    %20 = vector.extract_strided_slice %4 {offsets = [2, 1, 0], sizes = [16, 16, 4], strides = [1, 1, 1]} : vector<18x18x4xf32> to vector<16x16x4xf32>
    %21 = arith.maximumf %19, %20 : vector<16x16x4xf32>
    %22 = vector.extract_strided_slice %4 {offsets = [2, 2, 0], sizes = [16, 16, 4], strides = [1, 1, 1]} : vector<18x18x4xf32> to vector<16x16x4xf32>
    %23 = arith.maximumf %21, %22 : vector<16x16x4xf32>
    %24 = vector.shape_cast %23 : vector<16x16x4xf32> to vector<256x4xf32>
    %cst_4 = arith.constant 0.000000e+00 : f32
    %25 = vector.broadcast %cst_4 : f32 to vector<256x4xf32>
    %26 = arith.cmpf oeq, %24, %25 : vector<256x4xf32>
    %cst_5 = arith.constant 1.000000e+00 : f32
    %cst_6 = arith.constant 0.000000e+00 : f32
    %27 = vector.broadcast %cst_5 : f32 to vector<256x4xf32>
    %28 = vector.broadcast %cst_6 : f32 to vector<256x4xf32>
    %29 = arith.select %26, %27, %28 : vector<256x4xi1>, vector<256x4xf32>
    %30 = arith.fptosi %29 : vector<256x4xf32> to vector<256x4xi8>
    %c0_7 = arith.constant 0 : index
    %c0_8 = arith.constant 0 : index
    %c0_9 = arith.constant 0 : index
    %31 = vector.load %arg5[%c0_7, %c0_8, %c0_9] : memref<1x256x4xi8, #tpu.memory_space<vmem>>, vector<1x256x4xi8>
    %32 = vector.shape_cast %31 : vector<1x256x4xi8> to vector<256x4xi8>
    %33 = vector.shape_cast %30 : vector<256x4xi8> to vector<1x256x4xi8>
    tpu.vector_store %arg5[%c0_7, %c0_8, %c0_9], %33 {strides = array<i32>} : memref<1x256x4xi8, #tpu.memory_space<vmem>>, vector<1x256x4xi8>,
    %c1_i32 = arith.constant 1 : i32
    %c0_i32_10 = arith.constant 0 : i32
    %34 = vector.broadcast %c1_i32 : i32 to vector<256x4xi32>
    %35 = vector.broadcast %c0_i32_10 : i32 to vector<256x4xi32>
    %36 = arith.select %26, %34, %35 : vector<256x4xi1>, vector<256x4xi32>
    %37 = vector.shape_cast %36 : vector<256x4xi32> to vector<1x256x4xi32>
    %cst_11 = arith.constant dense<0> : vector<1xi32>
    %38 = vector.multi_reduction <add>, %37, %cst_11 [1, 2] : vector<1x256x4xi32> to vector<1xi32>
    %39 = vector.shape_cast %38 : vector<1xi32> to vector<1x1x1xi32>
    %40 = vector.extract %39[0, 0, 0] : i32 from vector<1x1x1xi32>
    %41 = tpu.iota {dimensions = array<i32: 1>} : vector<1x128xi32>
    %c0_12 = arith.constant 0 : index
    %c0_13 = arith.constant 0 : index
    %42 = vector.load %arg6[%c0_12, %c0_13] : memref<1x128xi32, #tpu.memory_space<vmem>>, vector<1x128xi32>
    %c0_i32_14 = arith.constant 0 : i32
    %43 = vector.broadcast %c0_i32_14 : i32 to vector<1x128xi32>
    %44 = arith.cmpi eq, %41, %43 : vector<1x128xi32>
    %c0_i32_15 = arith.constant 0 : i32
    %45 = vector.broadcast %40 : i32 to vector<1x128xi32>
    %46 = vector.broadcast %c0_i32_15 : i32 to vector<1x128xi32>
    %47 = arith.select %44, %45, %46 : vector<1x128xi1>, vector<1x128xi32>
    %48 = arith.addi %42, %47 : vector<1x128xi32>
    %c0_16 = arith.constant 0 : index
    %c0_17 = arith.constant 0 : index
    %49 = vector.load %arg6[%c0_16, %c0_17] : memref<1x128xi32, #tpu.memory_space<vmem>>, vector<1x128xi32>
    tpu.vector_store %arg6[%c0_16, %c0_17], %48 {strides = array<i32>} : memref<1x128xi32, #tpu.memory_space<vmem>>, vector<1x128xi32>,
    %c0_18 = arith.constant 0 : index
    %c0_19 = arith.constant 0 : index
    %50 = vector.load %arg2[%c0_18, %c0_19] : memref<4x8xf32, #tpu.memory_space<vmem>>, vector<4x8xf32>
    %cst_20 = arith.constant dense<0.000000e+00> : vector<256x8xf32>
    %51 = tpu.matmul %24, %50, %cst_20 {dimension_numbers = #tpu.dot_dimension_numbers<[1], [0], [0], [1], [0, 0, 1, 1], [], []>} : vector<256x4xf32>, vector<4x8xf32>, vector<256x8xf32> -> vector<256x8xf32>
    %c0_21 = arith.constant 0 : index
    %c0_22 = arith.constant 0 : index
    %52 = vector.load %arg3[%c0_21, %c0_22] : memref<1x8xf32, #tpu.memory_space<vmem>>, vector<1x8xf32>
    %53 = vector.broadcast %52 : vector<1x8xf32> to vector<256x8xf32>
    %54 = arith.addf %51, %53 : vector<256x8xf32>
    %cst_23 = arith.constant 0.000000e+00 : f32
    %55 = vector.broadcast %cst_23 : f32 to vector<256x8xf32>
    %56 = arith.maximumf %54, %55 : vector<256x8xf32>
    %c0_24 = arith.constant 0 : index
    %c0_25 = arith.constant 0 : index
    %c0_26 = arith.constant 0 : index
    %57 = vector.load %arg4[%c0_24, %c0_25, %c0_26] : memref<1x256x8xf32, #tpu.memory_space<vmem>>, vector<1x256x8xf32>
    %58 = vector.shape_cast %57 : vector<1x256x8xf32> to vector<256x8xf32>
    %59 = vector.shape_cast %56 : vector<256x8xf32> to vector<1x256x8xf32>
    tpu.vector_store %arg4[%c0_24, %c0_25, %c0_26], %59 {strides = array<i32>} : memref<1x256x8xf32, #tpu.memory_space<vmem>>, vector<1x256x8xf32>,
    return
  }
  func.func @transform_0(%arg0: i32) -> (i32, i32, i32, i32) {
    %c0_i32 = arith.constant 0 : i32
    %c0_i32_0 = arith.constant 0 : i32
    %c0_i32_1 = arith.constant 0 : i32
    %c0_i32_2 = arith.constant 0 : i32
    return %arg0, %c0_i32, %c0_i32_0, %c0_i32_1 : i32, i32, i32, i32
  }
  func.func @transform_1(%arg0: i32) -> (i32, i32) {
    %c0_i32 = arith.constant 0 : i32
    %c0_i32_0 = arith.constant 0 : i32
    %c0_i32_1 = arith.constant 0 : i32
    return %c0_i32, %c0_i32_0 : i32, i32
  }
  func.func @transform_2(%arg0: i32) -> (i32, i32) {
    %c0_i32 = arith.constant 0 : i32
    %c0_i32_0 = arith.constant 0 : i32
    %c0_i32_1 = arith.constant 0 : i32
    return %c0_i32, %c0_i32_0 : i32, i32
  }
  func.func @transform_3(%arg0: i32) -> (i32, i32, i32) {
    %c0_i32 = arith.constant 0 : i32
    %c0_i32_0 = arith.constant 0 : i32
    %c0_i32_1 = arith.constant 0 : i32
    return %arg0, %c0_i32, %c0_i32_0 : i32, i32, i32
  }
  func.func @transform_4(%arg0: i32) -> (i32, i32, i32) {
    %c0_i32 = arith.constant 0 : i32
    %c0_i32_0 = arith.constant 0 : i32
    %c0_i32_1 = arith.constant 0 : i32
    return %arg0, %c0_i32, %c0_i32_0 : i32, i32, i32
  }
  func.func @transform_5(%arg0: i32) -> (i32, i32) {
    %c0_i32 = arith.constant 0 : i32
    %c0_i32_0 = arith.constant 0 : i32
    %c0_i32_1 = arith.constant 0 : i32
    return %c0_i32, %c0_i32_0 : i32, i32
  }
}

module attributes {stable_mosaic.version = 11 : i64} {
  func.func @_fused_1x1_kernel(%arg0: i32, %arg1: memref<256x4xf32, #tpu.memory_space<vmem>>, %arg2: memref<4x24xf32, #tpu.memory_space<vmem>>, %arg3: memref<1x24xf32, #tpu.memory_space<vmem>>, %arg4: memref<256x8xf32, #tpu.memory_space<vmem>>, %arg5: memref<256x8xf32, #tpu.memory_space<vmem>>, %arg6: memref<256x8xf32, #tpu.memory_space<vmem>>, %arg7: memref<256x4xi8, #tpu.memory_space<vmem>>, %arg8: memref<256x8xi8, #tpu.memory_space<vmem>>, %arg9: memref<256x8xi8, #tpu.memory_space<vmem>>, %arg10: memref<1x128xi32, #tpu.memory_space<vmem>>) attributes {dimension_semantics = [#tpu.dimension_semantics<arbitrary>], iteration_bounds = array<i64: 2>, scalar_prefetch = 0 : i64, scratch_operands = 0 : i64, tpu.core_type = #tpu.core_type<tc>, window_params = [{transform_indices = @transform_0, window_bounds = array<i64: 256, 4>}, {pipeline_mode = #tpu.pipeline_mode<synchronous>, transform_indices = @transform_1, window_bounds = array<i64: 4, 24>}, {pipeline_mode = #tpu.pipeline_mode<synchronous>, transform_indices = @transform_2, window_bounds = array<i64: 1, 24>}, {transform_indices = @transform_3, window_bounds = array<i64: 256, 8>}, {transform_indices = @transform_4, window_bounds = array<i64: 256, 8>}, {transform_indices = @transform_5, window_bounds = array<i64: 256, 8>}, {transform_indices = @transform_6, window_bounds = array<i64: 256, 4>}, {transform_indices = @transform_7, window_bounds = array<i64: 256, 8>}, {transform_indices = @transform_8, window_bounds = array<i64: 256, 8>}, {pipeline_mode = #tpu.pipeline_mode<synchronous>, transform_indices = @transform_9, window_bounds = array<i64: 1, 128>}]} {
    %c0_i32 = arith.constant 0 : i32
    %0 = arith.cmpi eq, %arg0, %c0_i32 : i32
    %1 = arith.extui %0 : i1 to i32
    %c0_i32_0 = arith.constant 0 : i32
    %2 = arith.cmpi ne, %1, %c0_i32_0 : i32
    scf.if %2 {
      %c0_i32_45 = arith.constant 0 : i32
      %93 = vector.broadcast %c0_i32_45 : i32 to vector<1x128xi32>
      %c0_46 = arith.constant 0 : index
      %c0_47 = arith.constant 0 : index
      %94 = vector.load %arg10[%c0_46, %c0_47] : memref<1x128xi32, #tpu.memory_space<vmem>>, vector<1x128xi32>
      tpu.vector_store %arg10[%c0_46, %c0_47], %93 {strides = array<i32>} : memref<1x128xi32, #tpu.memory_space<vmem>>, vector<1x128xi32>,
    } else {
    }
    %c0 = arith.constant 0 : index
    %c0_1 = arith.constant 0 : index
    %3 = vector.load %arg1[%c0, %c0_1] : memref<256x4xf32, #tpu.memory_space<vmem>>, vector<256x4xf32>
    %c256_i32 = arith.constant 256 : i32
    %4 = arith.muli %arg0, %c256_i32 : i32
    %5 = tpu.iota {dimensions = array<i32: 0>} : vector<256x1xi32>
    %6 = vector.broadcast %4 : i32 to vector<256x1xi32>
    %7 = arith.addi %6, %5 : vector<256x1xi32>
    %c512_i32 = arith.constant 512 : i32
    %8 = vector.broadcast %c512_i32 : i32 to vector<256x1xi32>
    %9 = arith.cmpi slt, %7, %8 : vector<256x1xi32>
    %10 = arith.extui %9 : vector<256x1xi1> to vector<256x1xi32>
    %cst = arith.constant 0.000000e+00 : f32
    %11 = vector.broadcast %cst : f32 to vector<256x4xf32>
    %12 = arith.cmpf oeq, %3, %11 : vector<256x4xf32>
    %cst_2 = arith.constant 1.000000e+00 : f32
    %cst_3 = arith.constant 0.000000e+00 : f32
    %13 = vector.broadcast %cst_2 : f32 to vector<256x4xf32>
    %14 = vector.broadcast %cst_3 : f32 to vector<256x4xf32>
    %15 = arith.select %12, %13, %14 : vector<256x4xi1>, vector<256x4xf32>
    %16 = arith.fptosi %15 : vector<256x4xf32> to vector<256x4xi8>
    %c0_4 = arith.constant 0 : index
    %c0_5 = arith.constant 0 : index
    %17 = vector.load %arg7[%c0_4, %c0_5] : memref<256x4xi8, #tpu.memory_space<vmem>>, vector<256x4xi8>
    tpu.vector_store %arg7[%c0_4, %c0_5], %16 {strides = array<i32>} : memref<256x4xi8, #tpu.memory_space<vmem>>, vector<256x4xi8>,
    %c1_i32 = arith.constant 1 : i32
    %c0_i32_6 = arith.constant 0 : i32
    %18 = vector.broadcast %c1_i32 : i32 to vector<256x4xi32>
    %19 = vector.broadcast %c0_i32_6 : i32 to vector<256x4xi32>
    %20 = arith.select %12, %18, %19 : vector<256x4xi1>, vector<256x4xi32>
    %21 = vector.broadcast %10 : vector<256x1xi32> to vector<256x4xi32>
    %22 = arith.muli %20, %21 : vector<256x4xi32>
    %23 = vector.shape_cast %22 : vector<256x4xi32> to vector<1x256x4xi32>
    %cst_7 = arith.constant dense<0> : vector<1xi32>
    %24 = vector.multi_reduction <add>, %23, %cst_7 [1, 2] : vector<1x256x4xi32> to vector<1xi32>
    %25 = vector.shape_cast %24 : vector<1xi32> to vector<1x1x1xi32>
    %26 = vector.extract %25[0, 0, 0] : i32 from vector<1x1x1xi32>
    %c0_8 = arith.constant 0 : index
    %c0_9 = arith.constant 0 : index
    %27 = vector.load %arg2[%c0_8, %c0_9] : memref<4x24xf32, #tpu.memory_space<vmem>>, vector<4x24xf32>
    %cst_10 = arith.constant dense<0.000000e+00> : vector<256x24xf32>
    %28 = tpu.matmul %3, %27, %cst_10 {dimension_numbers = #tpu.dot_dimension_numbers<[1], [0], [0], [1], [0, 0, 1, 1], [], []>} : vector<256x4xf32>, vector<4x24xf32>, vector<256x24xf32> -> vector<256x24xf32>
    %c0_11 = arith.constant 0 : index
    %c0_12 = arith.constant 0 : index
    %29 = vector.load %arg3[%c0_11, %c0_12] : memref<1x24xf32, #tpu.memory_space<vmem>>, vector<1x24xf32>
    %30 = vector.broadcast %29 : vector<1x24xf32> to vector<256x24xf32>
    %31 = arith.addf %28, %30 : vector<256x24xf32>
    %cst_13 = arith.constant 0.000000e+00 : f32
    %32 = vector.broadcast %cst_13 : f32 to vector<256x24xf32>
    %33 = arith.maximumf %31, %32 : vector<256x24xf32>
    %34 = vector.extract_strided_slice %33 {offsets = [0, 0], sizes = [256, 8], strides = [1, 1]} : vector<256x24xf32> to vector<256x8xf32>
    %35 = vector.extract_strided_slice %33 {offsets = [0, 8], sizes = [256, 8], strides = [1, 1]} : vector<256x24xf32> to vector<256x8xf32>
    %36 = vector.extract_strided_slice %33 {offsets = [0, 16], sizes = [256, 8], strides = [1, 1]} : vector<256x24xf32> to vector<256x8xf32>
    %c0_14 = arith.constant 0 : index
    %c0_15 = arith.constant 0 : index
    %37 = vector.load %arg4[%c0_14, %c0_15] : memref<256x8xf32, #tpu.memory_space<vmem>>, vector<256x8xf32>
    tpu.vector_store %arg4[%c0_14, %c0_15], %34 {strides = array<i32>} : memref<256x8xf32, #tpu.memory_space<vmem>>, vector<256x8xf32>,
    %c0_16 = arith.constant 0 : index
    %c0_17 = arith.constant 0 : index
    %38 = vector.load %arg5[%c0_16, %c0_17] : memref<256x8xf32, #tpu.memory_space<vmem>>, vector<256x8xf32>
    tpu.vector_store %arg5[%c0_16, %c0_17], %35 {strides = array<i32>} : memref<256x8xf32, #tpu.memory_space<vmem>>, vector<256x8xf32>,
    %c0_18 = arith.constant 0 : index
    %c0_19 = arith.constant 0 : index
    %39 = vector.load %arg6[%c0_18, %c0_19] : memref<256x8xf32, #tpu.memory_space<vmem>>, vector<256x8xf32>
    tpu.vector_store %arg6[%c0_18, %c0_19], %36 {strides = array<i32>} : memref<256x8xf32, #tpu.memory_space<vmem>>, vector<256x8xf32>,
    %cst_20 = arith.constant 0.000000e+00 : f32
    %40 = vector.broadcast %cst_20 : f32 to vector<256x8xf32>
    %41 = arith.cmpf oeq, %35, %40 : vector<256x8xf32>
    %cst_21 = arith.constant 0.000000e+00 : f32
    %42 = vector.broadcast %cst_21 : f32 to vector<256x8xf32>
    %43 = arith.cmpf oeq, %36, %42 : vector<256x8xf32>
    %cst_22 = arith.constant 1.000000e+00 : f32
    %cst_23 = arith.constant 0.000000e+00 : f32
    %44 = vector.broadcast %cst_22 : f32 to vector<256x8xf32>
    %45 = vector.broadcast %cst_23 : f32 to vector<256x8xf32>
    %46 = arith.select %41, %44, %45 : vector<256x8xi1>, vector<256x8xf32>
    %47 = arith.fptosi %46 : vector<256x8xf32> to vector<256x8xi8>
    %c0_24 = arith.constant 0 : index
    %c0_25 = arith.constant 0 : index
    %48 = vector.load %arg8[%c0_24, %c0_25] : memref<256x8xi8, #tpu.memory_space<vmem>>, vector<256x8xi8>
    tpu.vector_store %arg8[%c0_24, %c0_25], %47 {strides = array<i32>} : memref<256x8xi8, #tpu.memory_space<vmem>>, vector<256x8xi8>,
    %cst_26 = arith.constant 1.000000e+00 : f32
    %cst_27 = arith.constant 0.000000e+00 : f32
    %49 = vector.broadcast %cst_26 : f32 to vector<256x8xf32>
    %50 = vector.broadcast %cst_27 : f32 to vector<256x8xf32>
    %51 = arith.select %43, %49, %50 : vector<256x8xi1>, vector<256x8xf32>
    %52 = arith.fptosi %51 : vector<256x8xf32> to vector<256x8xi8>
    %c0_28 = arith.constant 0 : index
    %c0_29 = arith.constant 0 : index
    %53 = vector.load %arg9[%c0_28, %c0_29] : memref<256x8xi8, #tpu.memory_space<vmem>>, vector<256x8xi8>
    tpu.vector_store %arg9[%c0_28, %c0_29], %52 {strides = array<i32>} : memref<256x8xi8, #tpu.memory_space<vmem>>, vector<256x8xi8>,
    %c1_i32_30 = arith.constant 1 : i32
    %c0_i32_31 = arith.constant 0 : i32
    %54 = vector.broadcast %c1_i32_30 : i32 to vector<256x8xi32>
    %55 = vector.broadcast %c0_i32_31 : i32 to vector<256x8xi32>
    %56 = arith.select %41, %54, %55 : vector<256x8xi1>, vector<256x8xi32>
    %57 = vector.broadcast %10 : vector<256x1xi32> to vector<256x8xi32>
    %58 = arith.muli %56, %57 : vector<256x8xi32>
    %59 = vector.shape_cast %58 : vector<256x8xi32> to vector<1x256x8xi32>
    %cst_32 = arith.constant dense<0> : vector<1xi32>
    %60 = vector.multi_reduction <add>, %59, %cst_32 [1, 2] : vector<1x256x8xi32> to vector<1xi32>
    %61 = vector.shape_cast %60 : vector<1xi32> to vector<1x1x1xi32>
    %62 = vector.extract %61[0, 0, 0] : i32 from vector<1x1x1xi32>
    %c1_i32_33 = arith.constant 1 : i32
    %c0_i32_34 = arith.constant 0 : i32
    %63 = vector.broadcast %c1_i32_33 : i32 to vector<256x8xi32>
    %64 = vector.broadcast %c0_i32_34 : i32 to vector<256x8xi32>
    %65 = arith.select %43, %63, %64 : vector<256x8xi1>, vector<256x8xi32>
    %66 = vector.broadcast %10 : vector<256x1xi32> to vector<256x8xi32>
    %67 = arith.muli %65, %66 : vector<256x8xi32>
    %68 = vector.shape_cast %67 : vector<256x8xi32> to vector<1x256x8xi32>
    %cst_35 = arith.constant dense<0> : vector<1xi32>
    %69 = vector.multi_reduction <add>, %68, %cst_35 [1, 2] : vector<1x256x8xi32> to vector<1xi32>
    %70 = vector.shape_cast %69 : vector<1xi32> to vector<1x1x1xi32>
    %71 = vector.extract %70[0, 0, 0] : i32 from vector<1x1x1xi32>
    %72 = tpu.iota {dimensions = array<i32: 1>} : vector<1x128xi32>
    %c0_36 = arith.constant 0 : index
    %c0_37 = arith.constant 0 : index
    %73 = vector.load %arg10[%c0_36, %c0_37] : memref<1x128xi32, #tpu.memory_space<vmem>>, vector<1x128xi32>
    %c0_i32_38 = arith.constant 0 : i32
    %74 = vector.broadcast %c0_i32_38 : i32 to vector<1x128xi32>
    %75 = arith.cmpi eq, %72, %74 : vector<1x128xi32>
    %c0_i32_39 = arith.constant 0 : i32
    %76 = vector.broadcast %26 : i32 to vector<1x128xi32>
    %77 = vector.broadcast %c0_i32_39 : i32 to vector<1x128xi32>
    %78 = arith.select %75, %76, %77 : vector<1x128xi1>, vector<1x128xi32>
    %c1_i32_40 = arith.constant 1 : i32
    %79 = vector.broadcast %c1_i32_40 : i32 to vector<1x128xi32>
    %80 = arith.cmpi eq, %72, %79 : vector<1x128xi32>
    %c0_i32_41 = arith.constant 0 : i32
    %81 = vector.broadcast %62 : i32 to vector<1x128xi32>
    %82 = vector.broadcast %c0_i32_41 : i32 to vector<1x128xi32>
    %83 = arith.select %80, %81, %82 : vector<1x128xi1>, vector<1x128xi32>
    %84 = arith.addi %78, %83 : vector<1x128xi32>
    %c2_i32 = arith.constant 2 : i32
    %85 = vector.broadcast %c2_i32 : i32 to vector<1x128xi32>
    %86 = arith.cmpi eq, %72, %85 : vector<1x128xi32>
    %c0_i32_42 = arith.constant 0 : i32
    %87 = vector.broadcast %71 : i32 to vector<1x128xi32>
    %88 = vector.broadcast %c0_i32_42 : i32 to vector<1x128xi32>
    %89 = arith.select %86, %87, %88 : vector<1x128xi1>, vector<1x128xi32>
    %90 = arith.addi %84, %89 : vector<1x128xi32>
    %91 = arith.addi %73, %90 : vector<1x128xi32>
    %c0_43 = arith.constant 0 : index
    %c0_44 = arith.constant 0 : index
    %92 = vector.load %arg10[%c0_43, %c0_44] : memref<1x128xi32, #tpu.memory_space<vmem>>, vector<1x128xi32>
    tpu.vector_store %arg10[%c0_43, %c0_44], %91 {strides = array<i32>} : memref<1x128xi32, #tpu.memory_space<vmem>>, vector<1x128xi32>,
    return
  }
  func.func @transform_0(%arg0: i32) -> (i32, i32) {
    %c0_i32 = arith.constant 0 : i32
    %c0_i32_0 = arith.constant 0 : i32
    return %arg0, %c0_i32 : i32, i32
  }
  func.func @transform_1(%arg0: i32) -> (i32, i32) {
    %c0_i32 = arith.constant 0 : i32
    %c0_i32_0 = arith.constant 0 : i32
    %c0_i32_1 = arith.constant 0 : i32
    return %c0_i32, %c0_i32_0 : i32, i32
  }
  func.func @transform_2(%arg0: i32) -> (i32, i32) {
    %c0_i32 = arith.constant 0 : i32
    %c0_i32_0 = arith.constant 0 : i32
    %c0_i32_1 = arith.constant 0 : i32
    return %c0_i32, %c0_i32_0 : i32, i32
  }
  func.func @transform_3(%arg0: i32) -> (i32, i32) {
    %c0_i32 = arith.constant 0 : i32
    %c0_i32_0 = arith.constant 0 : i32
    return %arg0, %c0_i32 : i32, i32
  }
  func.func @transform_4(%arg0: i32) -> (i32, i32) {
    %c0_i32 = arith.constant 0 : i32
    %c0_i32_0 = arith.constant 0 : i32
    return %arg0, %c0_i32 : i32, i32
  }
  func.func @transform_5(%arg0: i32) -> (i32, i32) {
    %c0_i32 = arith.constant 0 : i32
    %c0_i32_0 = arith.constant 0 : i32
    return %arg0, %c0_i32 : i32, i32
  }
  func.func @transform_6(%arg0: i32) -> (i32, i32) {
    %c0_i32 = arith.constant 0 : i32
    %c0_i32_0 = arith.constant 0 : i32
    return %arg0, %c0_i32 : i32, i32
  }
  func.func @transform_7(%arg0: i32) -> (i32, i32) {
    %c0_i32 = arith.constant 0 : i32
    %c0_i32_0 = arith.constant 0 : i32
    return %arg0, %c0_i32 : i32, i32
  }
  func.func @transform_8(%arg0: i32) -> (i32, i32) {
    %c0_i32 = arith.constant 0 : i32
    %c0_i32_0 = arith.constant 0 : i32
    return %arg0, %c0_i32 : i32, i32
  }
  func.func @transform_9(%arg0: i32) -> (i32, i32) {
    %c0_i32 = arith.constant 0 : i32
    %c0_i32_0 = arith.constant 0 : i32
    %c0_i32_1 = arith.constant 0 : i32
    return %c0_i32, %c0_i32_0 : i32, i32
  }
}

module attributes {stable_mosaic.version = 11 : i64} {
  func.func @_conv3x3_kernel(%arg0: i32, %arg1: memref<1x18x16x24xf32, #tpu.memory_space<vmem>>, %arg2: memref<3x24x16xf32, #tpu.memory_space<vmem>>, %arg3: memref<1x16xf32, #tpu.memory_space<vmem>>, %arg4: memref<1x256x16xf32, #tpu.memory_space<vmem>>) attributes {dimension_semantics = [#tpu.dimension_semantics<parallel>], iteration_bounds = array<i64: 2>, scalar_prefetch = 0 : i64, scratch_operands = 0 : i64, tpu.core_type = #tpu.core_type<tc>, window_params = [{transform_indices = @transform_0, window_bounds = array<i64: 1, 18, 16, 24>}, {pipeline_mode = #tpu.pipeline_mode<synchronous>, transform_indices = @transform_1, window_bounds = array<i64: 3, 24, 16>}, {pipeline_mode = #tpu.pipeline_mode<synchronous>, transform_indices = @transform_2, window_bounds = array<i64: 1, 16>}, {transform_indices = @transform_3, window_bounds = array<i64: 1, 256, 16>}]} {
    %cst = arith.constant 0.000000e+00 : f32
    %0 = vector.broadcast %cst : f32 to vector<256x16xf32>
    %c0 = arith.constant 0 : index
    %c0_0 = arith.constant 0 : index
    %c0_1 = arith.constant 0 : index
    %c0_2 = arith.constant 0 : index
    %1 = vector.load %arg1[%c0, %c0_0, %c0_1, %c0_2] : memref<1x18x16x24xf32, #tpu.memory_space<vmem>>, vector<1x16x16x24xf32>
    %2 = vector.shape_cast %1 : vector<1x16x16x24xf32> to vector<16x16x24xf32>
    %3 = vector.shape_cast %2 : vector<16x16x24xf32> to vector<256x24xf32>
    %c0_3 = arith.constant 0 : index
    %c0_4 = arith.constant 0 : index
    %c0_5 = arith.constant 0 : index
    %4 = vector.load %arg2[%c0_3, %c0_4, %c0_5] : memref<3x24x16xf32, #tpu.memory_space<vmem>>, vector<1x24x16xf32>
    %5 = vector.shape_cast %4 : vector<1x24x16xf32> to vector<24x16xf32>
    %cst_6 = arith.constant dense<0.000000e+00> : vector<256x16xf32>
    %6 = tpu.matmul %3, %5, %cst_6 {dimension_numbers = #tpu.dot_dimension_numbers<[1], [0], [0], [1], [0, 0, 1, 1], [], []>} : vector<256x24xf32>, vector<24x16xf32>, vector<256x16xf32> -> vector<256x16xf32>
    %7 = arith.addf %0, %6 : vector<256x16xf32>
    %c0_7 = arith.constant 0 : index
    %c1 = arith.constant 1 : index
    %c0_8 = arith.constant 0 : index
    %c0_9 = arith.constant 0 : index
    %8 = vector.load %arg1[%c0_7, %c1, %c0_8, %c0_9] : memref<1x18x16x24xf32, #tpu.memory_space<vmem>>, vector<1x16x16x24xf32>
    %9 = vector.shape_cast %8 : vector<1x16x16x24xf32> to vector<16x16x24xf32>
    %10 = vector.shape_cast %9 : vector<16x16x24xf32> to vector<256x24xf32>
    %c1_10 = arith.constant 1 : index
    %c0_11 = arith.constant 0 : index
    %c0_12 = arith.constant 0 : index
    %11 = vector.load %arg2[%c1_10, %c0_11, %c0_12] : memref<3x24x16xf32, #tpu.memory_space<vmem>>, vector<1x24x16xf32>
    %12 = vector.shape_cast %11 : vector<1x24x16xf32> to vector<24x16xf32>
    %cst_13 = arith.constant dense<0.000000e+00> : vector<256x16xf32>
    %13 = tpu.matmul %10, %12, %cst_13 {dimension_numbers = #tpu.dot_dimension_numbers<[1], [0], [0], [1], [0, 0, 1, 1], [], []>} : vector<256x24xf32>, vector<24x16xf32>, vector<256x16xf32> -> vector<256x16xf32>
    %14 = arith.addf %7, %13 : vector<256x16xf32>
    %c0_14 = arith.constant 0 : index
    %c2 = arith.constant 2 : index
    %c0_15 = arith.constant 0 : index
    %c0_16 = arith.constant 0 : index
    %15 = vector.load %arg1[%c0_14, %c2, %c0_15, %c0_16] : memref<1x18x16x24xf32, #tpu.memory_space<vmem>>, vector<1x16x16x24xf32>
    %16 = vector.shape_cast %15 : vector<1x16x16x24xf32> to vector<16x16x24xf32>
    %17 = vector.shape_cast %16 : vector<16x16x24xf32> to vector<256x24xf32>
    %c2_17 = arith.constant 2 : index
    %c0_18 = arith.constant 0 : index
    %c0_19 = arith.constant 0 : index
    %18 = vector.load %arg2[%c2_17, %c0_18, %c0_19] : memref<3x24x16xf32, #tpu.memory_space<vmem>>, vector<1x24x16xf32>
    %19 = vector.shape_cast %18 : vector<1x24x16xf32> to vector<24x16xf32>
    %cst_20 = arith.constant dense<0.000000e+00> : vector<256x16xf32>
    %20 = tpu.matmul %17, %19, %cst_20 {dimension_numbers = #tpu.dot_dimension_numbers<[1], [0], [0], [1], [0, 0, 1, 1], [], []>} : vector<256x24xf32>, vector<24x16xf32>, vector<256x16xf32> -> vector<256x16xf32>
    %21 = arith.addf %14, %20 : vector<256x16xf32>
    %c0_21 = arith.constant 0 : index
    %c0_22 = arith.constant 0 : index
    %22 = vector.load %arg3[%c0_21, %c0_22] : memref<1x16xf32, #tpu.memory_space<vmem>>, vector<1x16xf32>
    %23 = vector.broadcast %22 : vector<1x16xf32> to vector<256x16xf32>
    %24 = arith.addf %21, %23 : vector<256x16xf32>
    %cst_23 = arith.constant 0.000000e+00 : f32
    %25 = vector.broadcast %cst_23 : f32 to vector<256x16xf32>
    %26 = arith.maximumf %24, %25 : vector<256x16xf32>
    %c0_24 = arith.constant 0 : index
    %c0_25 = arith.constant 0 : index
    %c0_26 = arith.constant 0 : index
    %27 = vector.load %arg4[%c0_24, %c0_25, %c0_26] : memref<1x256x16xf32, #tpu.memory_space<vmem>>, vector<1x256x16xf32>
    %28 = vector.shape_cast %27 : vector<1x256x16xf32> to vector<256x16xf32>
    %29 = vector.shape_cast %26 : vector<256x16xf32> to vector<1x256x16xf32>
    tpu.vector_store %arg4[%c0_24, %c0_25, %c0_26], %29 {strides = array<i32>} : memref<1x256x16xf32, #tpu.memory_space<vmem>>, vector<1x256x16xf32>,
    return
  }
  func.func @transform_0(%arg0: i32) -> (i32, i32, i32, i32) {
    %c0_i32 = arith.constant 0 : i32
    %c0_i32_0 = arith.constant 0 : i32
    %c0_i32_1 = arith.constant 0 : i32
    %c0_i32_2 = arith.constant 0 : i32
    return %arg0, %c0_i32, %c0_i32_0, %c0_i32_1 : i32, i32, i32, i32
  }
  func.func @transform_1(%arg0: i32) -> (i32, i32, i32) {
    %c0_i32 = arith.constant 0 : i32
    %c0_i32_0 = arith.constant 0 : i32
    %c0_i32_1 = arith.constant 0 : i32
    %c0_i32_2 = arith.constant 0 : i32
    return %c0_i32, %c0_i32_0, %c0_i32_1 : i32, i32, i32
  }
  func.func @transform_2(%arg0: i32) -> (i32, i32) {
    %c0_i32 = arith.constant 0 : i32
    %c0_i32_0 = arith.constant 0 : i32
    %c0_i32_1 = arith.constant 0 : i32
    return %c0_i32, %c0_i32_0 : i32, i32
  }
  func.func @transform_3(%arg0: i32) -> (i32, i32, i32) {
    %c0_i32 = arith.constant 0 : i32
    %c0_i32_0 = arith.constant 0 : i32
    %c0_i32_1 = arith.constant 0 : i32
    return %arg0, %c0_i32, %c0_i32_0 : i32, i32, i32
  }
}

module attributes {stable_mosaic.version = 11 : i64} {
  func.func @_conv3x3_kernel(%arg0: i32, %arg1: memref<1x18x16x24xf32, #tpu.memory_space<vmem>>, %arg2: memref<3x24x8xf32, #tpu.memory_space<vmem>>, %arg3: memref<1x8xf32, #tpu.memory_space<vmem>>, %arg4: memref<1x256x8xf32, #tpu.memory_space<vmem>>, %arg5: memref<1x256x8xi8, #tpu.memory_space<vmem>>, %arg6: memref<1x128xi32, #tpu.memory_space<vmem>>) attributes {dimension_semantics = [#tpu.dimension_semantics<arbitrary>], iteration_bounds = array<i64: 2>, scalar_prefetch = 0 : i64, scratch_operands = 0 : i64, tpu.core_type = #tpu.core_type<tc>, window_params = [{transform_indices = @transform_0, window_bounds = array<i64: 1, 18, 16, 24>}, {pipeline_mode = #tpu.pipeline_mode<synchronous>, transform_indices = @transform_1, window_bounds = array<i64: 3, 24, 8>}, {pipeline_mode = #tpu.pipeline_mode<synchronous>, transform_indices = @transform_2, window_bounds = array<i64: 1, 8>}, {transform_indices = @transform_3, window_bounds = array<i64: 1, 256, 8>}, {transform_indices = @transform_4, window_bounds = array<i64: 1, 256, 8>}, {pipeline_mode = #tpu.pipeline_mode<synchronous>, transform_indices = @transform_5, window_bounds = array<i64: 1, 128>}]} {
    %cst = arith.constant 0.000000e+00 : f32
    %0 = vector.broadcast %cst : f32 to vector<256x8xf32>
    %c0 = arith.constant 0 : index
    %c0_0 = arith.constant 0 : index
    %c0_1 = arith.constant 0 : index
    %c0_2 = arith.constant 0 : index
    %1 = vector.load %arg1[%c0, %c0_0, %c0_1, %c0_2] : memref<1x18x16x24xf32, #tpu.memory_space<vmem>>, vector<1x16x16x24xf32>
    %2 = vector.shape_cast %1 : vector<1x16x16x24xf32> to vector<16x16x24xf32>
    %3 = vector.shape_cast %2 : vector<16x16x24xf32> to vector<256x24xf32>
    %c0_3 = arith.constant 0 : index
    %c0_4 = arith.constant 0 : index
    %c0_5 = arith.constant 0 : index
    %4 = vector.load %arg2[%c0_3, %c0_4, %c0_5] : memref<3x24x8xf32, #tpu.memory_space<vmem>>, vector<1x24x8xf32>
    %5 = vector.shape_cast %4 : vector<1x24x8xf32> to vector<24x8xf32>
    %cst_6 = arith.constant dense<0.000000e+00> : vector<256x8xf32>
    %6 = tpu.matmul %3, %5, %cst_6 {dimension_numbers = #tpu.dot_dimension_numbers<[1], [0], [0], [1], [0, 0, 1, 1], [], []>} : vector<256x24xf32>, vector<24x8xf32>, vector<256x8xf32> -> vector<256x8xf32>
    %7 = arith.addf %0, %6 : vector<256x8xf32>
    %c0_7 = arith.constant 0 : index
    %c1 = arith.constant 1 : index
    %c0_8 = arith.constant 0 : index
    %c0_9 = arith.constant 0 : index
    %8 = vector.load %arg1[%c0_7, %c1, %c0_8, %c0_9] : memref<1x18x16x24xf32, #tpu.memory_space<vmem>>, vector<1x16x16x24xf32>
    %9 = vector.shape_cast %8 : vector<1x16x16x24xf32> to vector<16x16x24xf32>
    %10 = vector.shape_cast %9 : vector<16x16x24xf32> to vector<256x24xf32>
    %c1_10 = arith.constant 1 : index
    %c0_11 = arith.constant 0 : index
    %c0_12 = arith.constant 0 : index
    %11 = vector.load %arg2[%c1_10, %c0_11, %c0_12] : memref<3x24x8xf32, #tpu.memory_space<vmem>>, vector<1x24x8xf32>
    %12 = vector.shape_cast %11 : vector<1x24x8xf32> to vector<24x8xf32>
    %cst_13 = arith.constant dense<0.000000e+00> : vector<256x8xf32>
    %13 = tpu.matmul %10, %12, %cst_13 {dimension_numbers = #tpu.dot_dimension_numbers<[1], [0], [0], [1], [0, 0, 1, 1], [], []>} : vector<256x24xf32>, vector<24x8xf32>, vector<256x8xf32> -> vector<256x8xf32>
    %14 = arith.addf %7, %13 : vector<256x8xf32>
    %c0_14 = arith.constant 0 : index
    %c2 = arith.constant 2 : index
    %c0_15 = arith.constant 0 : index
    %c0_16 = arith.constant 0 : index
    %15 = vector.load %arg1[%c0_14, %c2, %c0_15, %c0_16] : memref<1x18x16x24xf32, #tpu.memory_space<vmem>>, vector<1x16x16x24xf32>
    %16 = vector.shape_cast %15 : vector<1x16x16x24xf32> to vector<16x16x24xf32>
    %17 = vector.shape_cast %16 : vector<16x16x24xf32> to vector<256x24xf32>
    %c2_17 = arith.constant 2 : index
    %c0_18 = arith.constant 0 : index
    %c0_19 = arith.constant 0 : index
    %18 = vector.load %arg2[%c2_17, %c0_18, %c0_19] : memref<3x24x8xf32, #tpu.memory_space<vmem>>, vector<1x24x8xf32>
    %19 = vector.shape_cast %18 : vector<1x24x8xf32> to vector<24x8xf32>
    %cst_20 = arith.constant dense<0.000000e+00> : vector<256x8xf32>
    %20 = tpu.matmul %17, %19, %cst_20 {dimension_numbers = #tpu.dot_dimension_numbers<[1], [0], [0], [1], [0, 0, 1, 1], [], []>} : vector<256x24xf32>, vector<24x8xf32>, vector<256x8xf32> -> vector<256x8xf32>
    %21 = arith.addf %14, %20 : vector<256x8xf32>
    %c0_21 = arith.constant 0 : index
    %c0_22 = arith.constant 0 : index
    %22 = vector.load %arg3[%c0_21, %c0_22] : memref<1x8xf32, #tpu.memory_space<vmem>>, vector<1x8xf32>
    %23 = vector.broadcast %22 : vector<1x8xf32> to vector<256x8xf32>
    %24 = arith.addf %21, %23 : vector<256x8xf32>
    %cst_23 = arith.constant 0.000000e+00 : f32
    %25 = vector.broadcast %cst_23 : f32 to vector<256x8xf32>
    %26 = arith.maximumf %24, %25 : vector<256x8xf32>
    %c0_24 = arith.constant 0 : index
    %c0_25 = arith.constant 0 : index
    %c0_26 = arith.constant 0 : index
    %27 = vector.load %arg4[%c0_24, %c0_25, %c0_26] : memref<1x256x8xf32, #tpu.memory_space<vmem>>, vector<1x256x8xf32>
    %28 = vector.shape_cast %27 : vector<1x256x8xf32> to vector<256x8xf32>
    %29 = vector.shape_cast %26 : vector<256x8xf32> to vector<1x256x8xf32>
    tpu.vector_store %arg4[%c0_24, %c0_25, %c0_26], %29 {strides = array<i32>} : memref<1x256x8xf32, #tpu.memory_space<vmem>>, vector<1x256x8xf32>,
    %c0_i32 = arith.constant 0 : i32
    %30 = arith.cmpi eq, %arg0, %c0_i32 : i32
    %31 = arith.extui %30 : i1 to i32
    %c0_i32_27 = arith.constant 0 : i32
    %32 = arith.cmpi ne, %31, %c0_i32_27 : i32
    scf.if %32 {
      %c0_i32_42 = arith.constant 0 : i32
      %58 = vector.broadcast %c0_i32_42 : i32 to vector<1x128xi32>
      %c0_43 = arith.constant 0 : index
      %c0_44 = arith.constant 0 : index
      %59 = vector.load %arg6[%c0_43, %c0_44] : memref<1x128xi32, #tpu.memory_space<vmem>>, vector<1x128xi32>
      tpu.vector_store %arg6[%c0_43, %c0_44], %58 {strides = array<i32>} : memref<1x128xi32, #tpu.memory_space<vmem>>, vector<1x128xi32>,
    } else {
    }
    %cst_28 = arith.constant 0.000000e+00 : f32
    %33 = vector.broadcast %cst_28 : f32 to vector<256x8xf32>
    %34 = arith.cmpf oeq, %26, %33 : vector<256x8xf32>
    %cst_29 = arith.constant 1.000000e+00 : f32
    %cst_30 = arith.constant 0.000000e+00 : f32
    %35 = vector.broadcast %cst_29 : f32 to vector<256x8xf32>
    %36 = vector.broadcast %cst_30 : f32 to vector<256x8xf32>
    %37 = arith.select %34, %35, %36 : vector<256x8xi1>, vector<256x8xf32>
    %38 = arith.fptosi %37 : vector<256x8xf32> to vector<256x8xi8>
    %c0_31 = arith.constant 0 : index
    %c0_32 = arith.constant 0 : index
    %c0_33 = arith.constant 0 : index
    %39 = vector.load %arg5[%c0_31, %c0_32, %c0_33] : memref<1x256x8xi8, #tpu.memory_space<vmem>>, vector<1x256x8xi8>
    %40 = vector.shape_cast %39 : vector<1x256x8xi8> to vector<256x8xi8>
    %41 = vector.shape_cast %38 : vector<256x8xi8> to vector<1x256x8xi8>
    tpu.vector_store %arg5[%c0_31, %c0_32, %c0_33], %41 {strides = array<i32>} : memref<1x256x8xi8, #tpu.memory_space<vmem>>, vector<1x256x8xi8>,
    %c1_i32 = arith.constant 1 : i32
    %c0_i32_34 = arith.constant 0 : i32
    %42 = vector.broadcast %c1_i32 : i32 to vector<256x8xi32>
    %43 = vector.broadcast %c0_i32_34 : i32 to vector<256x8xi32>
    %44 = arith.select %34, %42, %43 : vector<256x8xi1>, vector<256x8xi32>
    %45 = vector.shape_cast %44 : vector<256x8xi32> to vector<1x256x8xi32>
    %cst_35 = arith.constant dense<0> : vector<1xi32>
    %46 = vector.multi_reduction <add>, %45, %cst_35 [1, 2] : vector<1x256x8xi32> to vector<1xi32>
    %47 = vector.shape_cast %46 : vector<1xi32> to vector<1x1x1xi32>
    %48 = vector.extract %47[0, 0, 0] : i32 from vector<1x1x1xi32>
    %49 = tpu.iota {dimensions = array<i32: 1>} : vector<1x128xi32>
    %c0_36 = arith.constant 0 : index
    %c0_37 = arith.constant 0 : index
    %50 = vector.load %arg6[%c0_36, %c0_37] : memref<1x128xi32, #tpu.memory_space<vmem>>, vector<1x128xi32>
    %c0_i32_38 = arith.constant 0 : i32
    %51 = vector.broadcast %c0_i32_38 : i32 to vector<1x128xi32>
    %52 = arith.cmpi eq, %49, %51 : vector<1x128xi32>
    %c0_i32_39 = arith.constant 0 : i32
    %53 = vector.broadcast %48 : i32 to vector<1x128xi32>
    %54 = vector.broadcast %c0_i32_39 : i32 to vector<1x128xi32>
    %55 = arith.select %52, %53, %54 : vector<1x128xi1>, vector<1x128xi32>
    %56 = arith.addi %50, %55 : vector<1x128xi32>
    %c0_40 = arith.constant 0 : index
    %c0_41 = arith.constant 0 : index
    %57 = vector.load %arg6[%c0_40, %c0_41] : memref<1x128xi32, #tpu.memory_space<vmem>>, vector<1x128xi32>
    tpu.vector_store %arg6[%c0_40, %c0_41], %56 {strides = array<i32>} : memref<1x128xi32, #tpu.memory_space<vmem>>, vector<1x128xi32>,
    return
  }
  func.func @transform_0(%arg0: i32) -> (i32, i32, i32, i32) {
    %c0_i32 = arith.constant 0 : i32
    %c0_i32_0 = arith.constant 0 : i32
    %c0_i32_1 = arith.constant 0 : i32
    %c0_i32_2 = arith.constant 0 : i32
    return %arg0, %c0_i32, %c0_i32_0, %c0_i32_1 : i32, i32, i32, i32
  }
  func.func @transform_1(%arg0: i32) -> (i32, i32, i32) {
    %c0_i32 = arith.constant 0 : i32
    %c0_i32_0 = arith.constant 0 : i32
    %c0_i32_1 = arith.constant 0 : i32
    %c0_i32_2 = arith.constant 0 : i32
    return %c0_i32, %c0_i32_0, %c0_i32_1 : i32, i32, i32
  }
  func.func @transform_2(%arg0: i32) -> (i32, i32) {
    %c0_i32 = arith.constant 0 : i32
    %c0_i32_0 = arith.constant 0 : i32
    %c0_i32_1 = arith.constant 0 : i32
    return %c0_i32, %c0_i32_0 : i32, i32
  }
  func.func @transform_3(%arg0: i32) -> (i32, i32, i32) {
    %c0_i32 = arith.constant 0 : i32
    %c0_i32_0 = arith.constant 0 : i32
    %c0_i32_1 = arith.constant 0 : i32
    return %arg0, %c0_i32, %c0_i32_0 : i32, i32, i32
  }
  func.func @transform_4(%arg0: i32) -> (i32, i32, i32) {
    %c0_i32 = arith.constant 0 : i32
    %c0_i32_0 = arith.constant 0 : i32
    %c0_i32_1 = arith.constant 0 : i32
    return %arg0, %c0_i32, %c0_i32_0 : i32, i32, i32
  }
  func.func @transform_5(%arg0: i32) -> (i32, i32) {
    %c0_i32 = arith.constant 0 : i32
    %c0_i32_0 = arith.constant 0 : i32
    %c0_i32_1 = arith.constant 0 : i32
    return %c0_i32, %c0_i32_0 : i32, i32
  }
}

module attributes {stable_mosaic.version = 11 : i64} {
  func.func @_conv3x3_kernel(%arg0: i32, %arg1: memref<1x18x16x24xf32, #tpu.memory_space<vmem>>, %arg2: memref<3x24x8xf32, #tpu.memory_space<vmem>>, %arg3: memref<1x8xf32, #tpu.memory_space<vmem>>, %arg4: memref<1x256x8xf32, #tpu.memory_space<vmem>>) attributes {dimension_semantics = [#tpu.dimension_semantics<parallel>], iteration_bounds = array<i64: 2>, scalar_prefetch = 0 : i64, scratch_operands = 0 : i64, tpu.core_type = #tpu.core_type<tc>, window_params = [{transform_indices = @transform_0, window_bounds = array<i64: 1, 18, 16, 24>}, {pipeline_mode = #tpu.pipeline_mode<synchronous>, transform_indices = @transform_1, window_bounds = array<i64: 3, 24, 8>}, {pipeline_mode = #tpu.pipeline_mode<synchronous>, transform_indices = @transform_2, window_bounds = array<i64: 1, 8>}, {transform_indices = @transform_3, window_bounds = array<i64: 1, 256, 8>}]} {
    %cst = arith.constant 0.000000e+00 : f32
    %0 = vector.broadcast %cst : f32 to vector<256x8xf32>
    %c0 = arith.constant 0 : index
    %c0_0 = arith.constant 0 : index
    %c0_1 = arith.constant 0 : index
    %c0_2 = arith.constant 0 : index
    %1 = vector.load %arg1[%c0, %c0_0, %c0_1, %c0_2] : memref<1x18x16x24xf32, #tpu.memory_space<vmem>>, vector<1x16x16x24xf32>
    %2 = vector.shape_cast %1 : vector<1x16x16x24xf32> to vector<16x16x24xf32>
    %3 = vector.shape_cast %2 : vector<16x16x24xf32> to vector<256x24xf32>
    %c0_3 = arith.constant 0 : index
    %c0_4 = arith.constant 0 : index
    %c0_5 = arith.constant 0 : index
    %4 = vector.load %arg2[%c0_3, %c0_4, %c0_5] : memref<3x24x8xf32, #tpu.memory_space<vmem>>, vector<1x24x8xf32>
    %5 = vector.shape_cast %4 : vector<1x24x8xf32> to vector<24x8xf32>
    %cst_6 = arith.constant dense<0.000000e+00> : vector<256x8xf32>
    %6 = tpu.matmul %3, %5, %cst_6 {dimension_numbers = #tpu.dot_dimension_numbers<[1], [0], [0], [1], [0, 0, 1, 1], [], []>} : vector<256x24xf32>, vector<24x8xf32>, vector<256x8xf32> -> vector<256x8xf32>
    %7 = arith.addf %0, %6 : vector<256x8xf32>
    %c0_7 = arith.constant 0 : index
    %c1 = arith.constant 1 : index
    %c0_8 = arith.constant 0 : index
    %c0_9 = arith.constant 0 : index
    %8 = vector.load %arg1[%c0_7, %c1, %c0_8, %c0_9] : memref<1x18x16x24xf32, #tpu.memory_space<vmem>>, vector<1x16x16x24xf32>
    %9 = vector.shape_cast %8 : vector<1x16x16x24xf32> to vector<16x16x24xf32>
    %10 = vector.shape_cast %9 : vector<16x16x24xf32> to vector<256x24xf32>
    %c1_10 = arith.constant 1 : index
    %c0_11 = arith.constant 0 : index
    %c0_12 = arith.constant 0 : index
    %11 = vector.load %arg2[%c1_10, %c0_11, %c0_12] : memref<3x24x8xf32, #tpu.memory_space<vmem>>, vector<1x24x8xf32>
    %12 = vector.shape_cast %11 : vector<1x24x8xf32> to vector<24x8xf32>
    %cst_13 = arith.constant dense<0.000000e+00> : vector<256x8xf32>
    %13 = tpu.matmul %10, %12, %cst_13 {dimension_numbers = #tpu.dot_dimension_numbers<[1], [0], [0], [1], [0, 0, 1, 1], [], []>} : vector<256x24xf32>, vector<24x8xf32>, vector<256x8xf32> -> vector<256x8xf32>
    %14 = arith.addf %7, %13 : vector<256x8xf32>
    %c0_14 = arith.constant 0 : index
    %c2 = arith.constant 2 : index
    %c0_15 = arith.constant 0 : index
    %c0_16 = arith.constant 0 : index
    %15 = vector.load %arg1[%c0_14, %c2, %c0_15, %c0_16] : memref<1x18x16x24xf32, #tpu.memory_space<vmem>>, vector<1x16x16x24xf32>
    %16 = vector.shape_cast %15 : vector<1x16x16x24xf32> to vector<16x16x24xf32>
    %17 = vector.shape_cast %16 : vector<16x16x24xf32> to vector<256x24xf32>
    %c2_17 = arith.constant 2 : index
    %c0_18 = arith.constant 0 : index
    %c0_19 = arith.constant 0 : index
    %18 = vector.load %arg2[%c2_17, %c0_18, %c0_19] : memref<3x24x8xf32, #tpu.memory_space<vmem>>, vector<1x24x8xf32>
    %19 = vector.shape_cast %18 : vector<1x24x8xf32> to vector<24x8xf32>
    %cst_20 = arith.constant dense<0.000000e+00> : vector<256x8xf32>
    %20 = tpu.matmul %17, %19, %cst_20 {dimension_numbers = #tpu.dot_dimension_numbers<[1], [0], [0], [1], [0, 0, 1, 1], [], []>} : vector<256x24xf32>, vector<24x8xf32>, vector<256x8xf32> -> vector<256x8xf32>
    %21 = arith.addf %14, %20 : vector<256x8xf32>
    %c0_21 = arith.constant 0 : index
    %c0_22 = arith.constant 0 : index
    %22 = vector.load %arg3[%c0_21, %c0_22] : memref<1x8xf32, #tpu.memory_space<vmem>>, vector<1x8xf32>
    %23 = vector.broadcast %22 : vector<1x8xf32> to vector<256x8xf32>
    %24 = arith.addf %21, %23 : vector<256x8xf32>
    %cst_23 = arith.constant 0.000000e+00 : f32
    %25 = vector.broadcast %cst_23 : f32 to vector<256x8xf32>
    %26 = arith.maximumf %24, %25 : vector<256x8xf32>
    %c0_24 = arith.constant 0 : index
    %c0_25 = arith.constant 0 : index
    %c0_26 = arith.constant 0 : index
    %27 = vector.load %arg4[%c0_24, %c0_25, %c0_26] : memref<1x256x8xf32, #tpu.memory_space<vmem>>, vector<1x256x8xf32>
    %28 = vector.shape_cast %27 : vector<1x256x8xf32> to vector<256x8xf32>
    %29 = vector.shape_cast %26 : vector<256x8xf32> to vector<1x256x8xf32>
    tpu.vector_store %arg4[%c0_24, %c0_25, %c0_26], %29 {strides = array<i32>} : memref<1x256x8xf32, #tpu.memory_space<vmem>>, vector<1x256x8xf32>,
    return
  }
  func.func @transform_0(%arg0: i32) -> (i32, i32, i32, i32) {
    %c0_i32 = arith.constant 0 : i32
    %c0_i32_0 = arith.constant 0 : i32
    %c0_i32_1 = arith.constant 0 : i32
    %c0_i32_2 = arith.constant 0 : i32
    return %arg0, %c0_i32, %c0_i32_0, %c0_i32_1 : i32, i32, i32, i32
  }
  func.func @transform_1(%arg0: i32) -> (i32, i32, i32) {
    %c0_i32 = arith.constant 0 : i32
    %c0_i32_0 = arith.constant 0 : i32
    %c0_i32_1 = arith.constant 0 : i32
    %c0_i32_2 = arith.constant 0 : i32
    return %c0_i32, %c0_i32_0, %c0_i32_1 : i32, i32, i32
  }
  func.func @transform_2(%arg0: i32) -> (i32, i32) {
    %c0_i32 = arith.constant 0 : i32
    %c0_i32_0 = arith.constant 0 : i32
    %c0_i32_1 = arith.constant 0 : i32
    return %c0_i32, %c0_i32_0 : i32, i32
  }
  func.func @transform_3(%arg0: i32) -> (i32, i32, i32) {
    %c0_i32 = arith.constant 0 : i32
    %c0_i32_0 = arith.constant 0 : i32
    %c0_i32_1 = arith.constant 0 : i32
    return %arg0, %c0_i32, %c0_i32_0 : i32, i32, i32
  }
}

</mosaic_0001>

<bundles_post_ra>
// kernel: inception_forward.9
= control target key start
LH: loop header
LB: loop body
LE: loop exit
PB: predicated region body
PF: predicated region fallthrough
CT: control target
= control target key end

     0   :  { %11 = vsyncpa [#allocation3], 0  ;;  %s2029_s18 = smov 0   ;;  %s3268_s0 = inlined_call_operand.vmem [shape: f32[2,18,18,4], index: 0, kind: input, shape index: {}]   ;;  %s3269_s1 = inlined_call_operand.vmem [shape: f32[4,8], index: 1, kind: input, shape index: {}]   ;;  %s3270_s2 = inlined_call_operand.vmem [shape: f32[1,8], index: 2, kind: input, shape index: {}]   ;;  %s3271_s3 = inlined_call_operand.vmem [shape: f32[2,256,8], index: 3, kind: output, shape index: {0}]   ;;  %s3272_s4 = inlined_call_operand.vmem [shape: s8[2,256,4], index: 4, kind: output, shape index: {1}]   ;;  %s3273_s5 = inlined_call_operand.hbm [shape: s32[1,128], index: 5, kind: output, shape index: {2}]  }
   0x1 LB: > { %s2035_s19 = sadd.s32 4294967295, %s1993_s18   ;;  %p1801_p0 = scmp.ge.s32.totalorder %s1993_s18, 1  ;;  %s1993_s18 = sphi %s2029_s18, %s17_s18  }
   0x2   : > { %p188_p1 = scmp.lt.s32.totalorder %s1993_s18, 3 }
   0x4   : > { %p189_p2 = pnand %p1801_p0, %p188_p1 }
   0x6   : > { %192 = sbr.rel (%p189_p2) target bundleno = 467 (0x1d3), region = 32 }
   0xd   : > { %p221_p3 = scmp.lt.s32.totalorder %s2035_s19, 1  ;;  %p1807_p4 = scmp.ne.s32.totalorder %s2035_s19, 0 }
   0xe   : > { %v1995_v0 = vmov (!%p1807_p4), 0  }
   0xf   : > { %s222_s20 = scalar_select %p221_p3, %s2035_s19, 1 }
  0x10   : > { %239 = sbr.rel (%p1807_p4) target bundleno = 23 (0x17), region = 36  ;;  %240 = vst [vmem:[#allocation2] sm:$0x1] (!%p1807_p4), %v1995_v0 }
  0x11   : > { %s1933_s21 = smul.u32 432, %s222_s20  ;;  %s1846_s22 = sshll.u32 %s222_s20, 8 }
  0x12   : > { %s2044_s25 = scalar_lea.vmem %s3271_s3, %s1846_s22  ;;  %s1847_s26 = sshll.u32 %s222_s20, 6 }
  0x13   : > { %s2049_s29 = scalar_lea.vmem %s3268_s0, %s1933_s21  ;;  %s2054_s7 = scalar_lea.vmem %s3272_s4, %s1847_s26 }
  0x17 PF: > { %v1287_v1 = vld [vmem:[%s3269_s1] sm:$0xf]  ;;  %vm1391_vm0 = vcmask 1043456   ;;  %v2064_v3 = vld [vmem:[%s2049_s29 + $0x8] sm:$0xff]  ;;  %vm343_vm1 = vcmask 1046528   ;;  %v2068_v5 = vld [vmem:[%s2049_s29 + $0x18] sm:$0xff] }
  0x18   : > { %v2061_v2 = vld [vmem:[%s2049_s29] sm:$0xff]  ;;  %1881 = vmatprep.subr.msk.mxu0 %vm1391_vm0, %v1287_v1  ;;  %1931 = vmatprep.subr.msk.mxu1 %vm1391_vm0, %v1287_v1  ;;  %v243_v4 = vld [vmem:[%s2049_s29 + $0x10] sm:$0x3]  ;;  %v345_v8 = vrot.slane %v2064_v3, 1  ;;  %v246_v9 = vld [vmem:[%s2049_s29 + $0x28] sm:$0x3] }
  0x19   : > { %v2071_v6 = vld [vmem:[%s2049_s29 + $0x20] sm:$0xff]  ;;  %v344_v7 = vrot.slane %v2061_v2, 1  ;;  %1882 = vmatpush3.msk.msra.mxu0 %vm1391_vm0, %v1287_v1  ;;  %1932 = vmatpush3.msk.msra.mxu1 %vm1391_vm0, %v1287_v1  ;;  %v2077_v10 = vld [vmem:[%s2049_s29 + $0x30] sm:$0xff]  ;;  %v2080_v11 = vld [vmem:[%s2049_s29 + $0x38] sm:$0xff]  ;;  %v347_v12 = vrot.slane %v243_v4, 1  ;;  %v349_v13 = vrot.slane %v2068_v5, 1 }
  0x1a   : > { %v249_v14 = vld [vmem:[%s2049_s29 + $0x40] sm:$0x3]  ;;  %v2085_v15 = vld [vmem:[%s2049_s29 + $0x48] sm:$0xff]  ;;  %v2088_v16 = vld [vmem:[%s2049_s29 + $0x50] sm:$0xff]  ;;  %v350_v17 = vrot.slane %v2071_v6, 1  ;;  %v352_v18 = vrot.slane %v246_v9, 1 }
  0x1b   : > { %v2092_v19 = vld [vmem:[%s2049_s29 + $0x60] sm:$0xff]  ;;  %v2095_v20 = vld [vmem:[%s2049_s29 + $0x68] sm:$0xff]  ;;  %v354_v21 = vrot.slane %v2077_v10, 1  ;;  %v355_v22 = vrot.slane %v2080_v11, 1  ;;  %v357_v23 = vrot.slane %v249_v14, 1  ;;  %v346_v24 = vsel %vm343_vm1, %v344_v7, %v345_v8  ;;  %s1998_s13 = smov [#allocation2]  }
  0x1c   : > { %v348_v25 = vsel %vm343_vm1, %v345_v8, %v347_v12  ;;  %v359_v26 = vrot.slane %v2085_v15, 1  ;;  %v3280_v27 = vrot.slane %v2088_v16, 1  ;;  %v364_v28 = vrot.slane %v2092_v19, 1  ;;  %v2164_v12 = vld [vmem:[%s2049_s29 + $0x80] sm:$0xff]  ;;  %s1708_s14 = sshll.u32 %s1998_s13, 4  ;;  %p1940_p5 = scmp.eq.s32.totalorder %s2035_s19, 1  ;;  %s1709_s14 = int_to_ptr.vmem [resolvable:$true] %s1708_s14 }
  0x1d   : > { %v3278_v29 = vrot.slane %v2095_v20, 1  ;;  %v351_v30 = vsel %vm343_vm1, %v349_v13, %v350_v17  ;;  %v353_v31 = vsel %vm343_vm1, %v350_v17, %v352_v18  ;;  %v2108_v32 = vsel %vm343_vm1, %v354_v21, %v355_v22  ;;  %3299 = vst [vmem:[#allocation6_spill] sm:$0xff] %v2164_v12  ;;  %s1957_s15 = scalar_lea.vmem %s1709_s14, 16  ;;  %s1963_s16 = scalar_lea.vmem %s1709_s14, 32 }
  0x1e   : > { %v2111_v33 = vsel %vm343_vm1, %v355_v22, %v357_v23  ;;  %v2116_v34 = vsel %vm343_vm1, %v359_v26, %v3280_v27  ;;  %v456_v35 = vmax.f32 %v2061_v2, %v346_v24  ;;  %v457_v36 = vmax.f32 %v2064_v3, %v348_v25  ;;  %v2186_v23 = vld [vmem:[%s2049_s29 + $0x90] sm:$0xff]  ;;  %v2189_v24 = vld [vmem:[%s2049_s29 + $0x98] sm:$0xff]  ;;  %p1958_p6 = scmp.ne.s32.totalorder %s1709_s14, %s1957_s15  ;;  %p1964_p9 = scmp.lt.s32.totalorder %s1709_s14, %s1709_s14 }
  0x1f   : > { %v2123_v37 = vsel %vm343_vm1, %v364_v28, %v3278_v29  ;;  %v458_v38 = vmax.f32 %v2068_v5, %v351_v30  ;;  %vm488_vm2 = vcmask 1045504   ;;  %v489_v39 = vrot.slane %v2061_v2, 2  ;;  %3301 = vst [vmem:[#allocation8_spill] sm:$0xff] %v2189_v24  ;;  %p1965_p10 = scmp.lt.s32.totalorder %s1963_s16, %s1957_s15 }
  0x20   : > { %3298 = vst [vmem:[#allocation5_spill] sm:$0xff] %v2123_v37  ;;  %v490_v40 = vrot.slane %v2064_v3, 2  ;;  %v492_v41 = vrot.slane %v243_v4, 2  ;;  %v494_v42 = vrot.slane %v2068_v5, 2  ;;  %v495_v43 = vrot.slane %v2071_v6, 2  ;;  %v2155_v3 = vld [vmem:[%s2049_s29 + $0x78] sm:$0xff]  ;;  %p1959_p7 = pnand %p1958_p6, %p1940_p5 }
  0x21   : > { %v459_v44 = vmax.f32 %v2071_v6, %v353_v31  ;;  %v460_v45 = vmax.f32 %v2077_v10, %v2108_v32  ;;  %v499_v46 = vrot.slane %v2077_v10, 2  ;;  %v500_v47 = vrot.slane %v2080_v11, 2  ;;  %p1966_p11 = por %p1965_p10, %p1964_p9 }
  0x22   : > { %v491_v48 = vsel %vm488_vm2, %v489_v39, %v490_v40  ;;  %v493_v49 = vsel %vm488_vm2, %v490_v40, %v492_v41  ;;  %v497_v50 = vrot.slane %v246_v9, 2  ;;  %v502_v51 = vrot.slane %v249_v14, 2  ;;  %v2201_v39 = vld [vmem:[%s2049_s29 + $0xa8] sm:$0xff]  ;;  %p1960_p8 = pneg %p1959_p7 }
  0x23   : > { %v496_v52 = vsel %vm488_vm2, %v494_v42, %v495_v43  ;;  %v2139_v53 = vsel %vm488_vm2, %v499_v46, %v500_v47  ;;  %v504_v54 = vrot.slane %v2085_v15, 2  ;;  %v3279_v55 = vrot.slane %v2088_v16, 2  ;;  %v2210_v46 = vld [vmem:[%s2049_s29 + $0xb0] sm:$0xff] }
  0x24   : > { %v509_v56 = vrot.slane %v2092_v19, 2  ;;  %v3277_v57 = vrot.slane %v2095_v20, 2  ;;  %v601_v58 = vmax.f32 %v456_v35, %v491_v48  ;;  %v602_v59 = vmax.f32 %v457_v36, %v493_v49  ;;  %3302 = vst [vmem:[#allocation9_spill] sm:$0xff] %v2210_v46  ;;  %v2219_v48 = vld [vmem:[%s2049_s29 + $0xc0] sm:$0xff]  ;;  %v2222_v49 = vld [vmem:[%s2049_s29 + $0xc8] sm:$0xff]  ;;  %p1967_p12 = pnand %p1966_p11, %p1960_p8 }
  0x25   : > { %v461_v60 = vmax.f32 %v2080_v11, %v2111_v33  ;;  %v462_v61 = vmax.f32 %v2085_v15, %v2116_v34  ;;  %v603_v62 = vmax.f32 %v458_v38, %v496_v52  ;;  %v605_v63 = vmax.f32 %v460_v45, %v2139_v53 }
  0x26   : > { %v464_v0 = vmax.f32 %v2092_v19, %v2123_v37  ;;  %v498_v1 = vsel %vm488_vm2, %v495_v43, %v497_v50  ;;  %v633_v2 = vmax.f32 %v601_v58, %v2068_v5  ;;  %v2158_v4 = vsel %vm488_vm2, %v500_v47, %v502_v51  ;;  %v2231_v58 = vld [vmem:[%s2049_s29 + $0xd0] sm:$0x3] }
  0x27   : > { %v634_v7 = vmax.f32 %v602_v59, %v2071_v6  ;;  %v635_v8 = vmax.f32 %v603_v62, %v2077_v10  ;;  %v637_v9 = vmax.f32 %v605_v63, %v2085_v15  ;;  %v2169_v13 = vsel %vm488_vm2, %v504_v54, %v3279_v55 }
  0x28   : > { %v2174_v5 = vsel %vm488_vm2, %v509_v56, %v3277_v57  ;;  %v2176_v14 = vmax.f32 %v459_v44, %v498_v1  ;;  %v675_v6 = vmax.f32 %v633_v2, %v351_v30  ;;  %v2179_v17 = vmax.f32 %v461_v60, %v2158_v4 }
  0x29   : > { %3300 = vst [vmem:[#allocation7_spill] sm:$0xff] %v2174_v5  ;;  %v2182_v18 = vmax.f32 %v462_v61, %v2169_v13  ;;  %v676_v21 = vmax.f32 %v634_v7, %v353_v31  ;;  %v679_v22 = vmax.f32 %v637_v9, %v2116_v34  ;;  %v466_v26 = vmax.f32 %v2155_v3, %v2186_v23 }
  0x2a   : > { %v714_v25 = vmax.f32 %v675_v6, %v496_v52  ;;  %v369_v28 = vrot.slane %v2155_v3, 1  ;;  %v3276_v30 = vrot.slane %v2164_v12, 1  ;;  %v2196_v35 = vmax.f32 %v464_v0, %v2174_v5 }
  0x2b   : > { %v677_v31 = vmax.f32 %v635_v8, %v2108_v32  ;;  %v715_v36 = vmax.f32 %v676_v21, %v498_v1  ;;  %v718_v38 = vmax.f32 %v679_v22, %v2169_v13  ;;  %v611_v41 = vmax.f32 %v466_v26, %v2201_v39  ;;  %v2249_v1 = vld [vmem:[%s2049_s29 + $0xe0] sm:$0xff]  ;;  %v2261_v26 = vld [vmem:[%s2049_s29 + $0xe8] sm:$0x3] }
  0x2c   : > { %v746_v40 = vmax.f32 %v714_v25, %v2077_v10  ;;  %v374_v42 = vrot.slane %v2186_v23, 1  ;;  %v3274_v43 = vrot.slane %v2189_v24, 1  ;;  %v2215_v47 = vsel %vm343_vm1, %v369_v28, %v3276_v30 }
  0x2d   : > { %v747_v44 = vmax.f32 %v715_v36, %v2080_v11  ;;  %v750_v45 = vmax.f32 %v718_v38, %v2092_v19  ;;  %vm1196_vm3 = vcmask 31744   ;;  %v643_v50 = vmax.f32 %v611_v41, %v2215_v47 }
  0x2e   : > { %v788_v10 = vmax.f32 %v746_v40, %v2108_v32  ;;  %v716_v52 = vmax.f32 %v677_v31, %v2139_v53  ;;  %v2234_v32 = vld [vmem:[%s2049_s29 + $0xd8] sm:$0xff]  ;;  %v2240_v60 = vsel %vm343_vm1, %v374_v42, %v3274_v43  ;;  %v379_v61 = vrot.slane %v2201_v39, 1 }
  0x2f   : > { %v789_v54 = vmax.f32 %v747_v44, %v2111_v33  ;;  %v792_v56 = vmax.f32 %v750_v45, %v2123_v37  ;;  %v3275_v62 = vrot.slane %v2210_v46, 1  ;;  %v384_v2 = vrot.slane %v2219_v48, 1 }
  0x30   : > { %v827_v59 = vmax.f32 %v788_v10, %v2139_v53  ;;  %v385_v53 = vrot.slane %v2222_v49, 1  ;;  %v685_v7 = vmax.f32 %v643_v50, %v2240_v60  ;;  %v387_v8 = vrot.slane %v2231_v58, 1  ;;  %v2275_v50 = vld [vmem:[%s2049_s29 + $0xf0] sm:$0xff] }
  0x31   : > { %v828_v63 = vmax.f32 %v789_v54, %v2158_v4  ;;  %v2246_v0 = vmax.f32 %v792_v56, %v2174_v5  ;;  %v389_v9 = vrot.slane %v2234_v32, 1  ;;  %v3283_v6 = vmov 0.0   ;;  %v2278_v54 = vld [vmem:[%s2049_s29 + $0xf8] sm:$0xff] }
  0x32   : > { %vm859_vm4 = vcmp.eq.f32.partialorder %v827_v59, 0.0  ;;  %1883 = vmatprep.mubr.msk.f32.mxu0 %vm1196_vm3, %v827_v59  ;;  %v3281_v22 = vmov 0   ;;  %v390_v38 = vrot.slane %v2249_v1, 1  ;;  %v2283_v56 = vsel %vm343_vm1, %v379_v61, %v3275_v62 }
  0x33   : > { %vm860_vm5 = vcmp.eq.f32.partialorder %v828_v63, 0.0  ;;  %vm863_vm6 = vcmp.eq.f32.partialorder %v2246_v0, 0.0  ;;  %v891_v21 = vsel %vm859_vm4, 1.0, %v3283_v6  ;;  %v1164_v25 = vsel %vm859_vm4, 1, %v3281_v22  ;;  %1884 = vmatmul.mubr.msk.f32.vlgmr.msra.gmra.mrb[0].mxu0 %vm1196_vm3, %v828_v63 }
  0x34   : > { %v892_v28 = vsel %vm860_vm5, 1.0, %v3283_v6  ;;  %v923_v31 = vtrunc.f32 %v891_v21  ;;  %v1165_v36 = vsel %vm860_vm5, 1, %v3281_v22  ;;  %v2268_v40 = vsel %vm863_vm6, 1.0, %v3283_v6 }
  0x35   : > { %3303 = vst [vmem:[#allocation10_spill] sm:$0xff] %v2268_v40  ;;  %v924_v41 = vtrunc.f32 %v892_v28  ;;  %v1168_v42 = vsel %vm863_vm6, 1, %v3281_v22  ;;  %v1197_v44 = vsel %vm1196_vm3, %v1164_v25, 0  ;;  %v1198_v45 = vsel %vm1196_vm3, %v1165_v36, 0  ;;  %v2290_v25 = vld [vmem:[%s2049_s29 + $0x100] sm:$0x3] }
  0x36   : > { %v1201_v10 = vsel %vm1196_vm3, %v1168_v42, 0  ;;  %v392_v59 = vrot.slane %v2261_v26, 1  ;;  %v2287_v63 = vmax.f32 %v716_v52, %v2085_v15  ;;  %v2293_v28 = vld [vmem:[%s2049_s29 + $0x108] sm:$0xff]  ;;  %v2296_v36 = vld [vmem:[%s2049_s29 + $0x110] sm:$0xff]  ;;  %v724_v42 = vmax.f32 %v685_v7, %v2283_v56 }
  0x37   : > { %v1202_v21 = vadd.s32 %v1201_v10, %v1197_v44  ;;  %v2300_v43 = vsel %vm343_vm1, %v384_v2, %v385_v53  ;;  %v2303_v62 = vpack.c.f32.eXmY %v923_v31, %v924_v41, 312  ;;  %v2306_v30 = vsel %vm343_vm1, %v385_v53, %v387_v8 }
  0x38   : > { %3304 = vst [vmem:[#allocation11_spill] sm:$0xff] %v2306_v30  ;;  %v2309_v15 = vsel %vm343_vm1, %v389_v9, %v390_v38  ;;  %v2314_v44 = vsel %vm343_vm1, %v390_v38, %v392_v59  ;;  %v394_v7 = vrot.slane %v2275_v50, 1  ;;  %v395_v2 = vrot.slane %v2278_v54, 1 }
  0x39   : > { %v2311_v52 = vadd.s32 %v1202_v21, %v1198_v45  ;;  %v397_v10 = vrot.slane %v2290_v25, 1  ;;  %v399_v31 = vrot.slane %v2293_v28, 1  ;;  %v468_v53 = vmax.f32 %v2186_v23, %v2240_v60 }
  0x3a   : > { %v470_v8 = vmax.f32 %v2201_v39, %v2283_v56  ;;  %v472_v9 = vmax.f32 %v2219_v48, %v2300_v43  ;;  %v473_v38 = vmax.f32 %v2222_v49, %v2306_v30  ;;  %v514_v45 = vrot.slane %v2155_v3, 2 }
  0x3b   : > { %v3288_v59 = vrot.slane %v2164_v12, 2  ;;  %v519_v21 = vrot.slane %v2186_v23, 2  ;;  %v3289_v61 = vrot.slane %v2189_v24, 2  ;;  %v524_v57 = vrot.slane %v2201_v39, 2 }
  0x3c   : > { %v529_v55 = vrot.slane %v2219_v48, 2  ;;  %v530_v27 = vrot.slane %v2222_v49, 2  ;;  %v532_v22 = vrot.slane %v2231_v58, 2  ;;  %v534_v41 = vrot.slane %v2234_v32, 2 }
  0x3d   : > { %v2341_v6 = vsel %vm488_vm2, %v514_v45, %v3288_v59  ;;  %v521_v51 = vsel %vm488_vm2, %v519_v21, %v3289_v61  ;;  %v535_v30 = vrot.slane %v2249_v1, 2  ;;  %v474_v29 = vmax.f32 %v2234_v32, %v2309_v15 }
  0x3e   : > { %v756_v49 = vmax.f32 %v724_v42, %v2341_v6  ;;  %v531_v58 = vsel %vm488_vm2, %v529_v55, %v530_v27  ;;  %v2353_v40 = vsel %vm488_vm2, %v530_v27, %v532_v22  ;;  %v396_v45 = vsel %vm343_vm1, %v394_v7, %v395_v2 }
  0x3f   : > { %v3305_v59 = vrot.slane %v2210_v46, 2  ;;  %v536_v61 = vsel %vm488_vm2, %v534_v41, %v535_v30  ;;  %v537_v24 = vrot.slane %v2261_v26, 2  ;;  %v539_v5 = vrot.slane %v2275_v50, 2 }
  0x40   : > { %v540_v37 = vrot.slane %v2278_v54, 2  ;;  %v613_v42 = vmax.f32 %v468_v53, %v521_v51  ;;  %v2364_v55 = vsel %vm343_vm1, %v395_v2, %v397_v10  ;;  %v3306_v27 = vrot.slane %v2296_v36, 1 }
  0x41   : > { %v526_v21 = vsel %vm488_vm2, %v524_v57, %v3305_v59  ;;  %v617_v7 = vmax.f32 %v472_v9, %v531_v58  ;;  %v618_v57 = vmax.f32 %v473_v38, %v2353_v40  ;;  %v476_v41 = vmax.f32 %v2275_v50, %v396_v45 }
  0x42   : > { %v615_v12 = vmax.f32 %v470_v8, %v526_v21  ;;  %v2369_v22 = vsel %vm343_vm1, %v399_v31, %v3306_v27  ;;  %v798_v26 = vmax.f32 %v756_v49, %v521_v51  ;;  %v542_v59 = vrot.slane %v2290_v25, 2 }
  0x43   : > { %v619_v46 = vmax.f32 %v474_v29, %v536_v61  ;;  %v2375_v53 = vsel %vm488_vm2, %v535_v30, %v537_v24  ;;  %v645_v2 = vmax.f32 %v613_v42, %v2201_v39  ;;  %v649_v8 = vmax.f32 %v617_v7, %v2234_v32 }
  0x44   : > { %v647_v10 = vmax.f32 %v615_v12, %v2219_v48  ;;  %v541_v31 = vsel %vm488_vm2, %v539_v5, %v540_v37  ;;  %v650_v9 = vmax.f32 %v618_v57, %v2249_v1  ;;  %v3307_v25 = vmax.f32 %v2196_v35, %v2155_v3 }
  0x45   : > { %v651_v38 = vmax.f32 %v619_v46, %v2275_v50  ;;  %v687_v24 = vmax.f32 %v645_v2, %v2283_v56  ;;  %v691_v39 = vmax.f32 %v649_v8, %v2309_v15  ;;  %v790_v12 = vmax.f32 %v2287_v63, %v2116_v34 }
  0x46   : > { %v683_v29 = vmax.f32 %v3307_v25, %v2215_v47  ;;  %v689_v30 = vmax.f32 %v647_v10, %v2300_v43  ;;  %v621_v49 = vmax.f32 %v476_v41, %v541_v31  ;;  %v692_v5 = vmax.f32 %v650_v9, %v2314_v44 }
  0x47   : > { %v693_v42 = vmax.f32 %v651_v38, %v396_v45  ;;  %v726_v27 = vmax.f32 %v687_v24, %v526_v21  ;;  %v730_v57 = vmax.f32 %v691_v39, %v536_v61  ;;  %v829_v35 = vmax.f32 %v790_v12, %v2169_v13 }
  0x48   : > { %v722_v46 = vmax.f32 %v683_v29, %v2341_v6  ;;  %v728_v7 = vmax.f32 %v689_v30, %v531_v58  ;;  %v477_v56 = vmax.f32 %v2278_v54, %v2364_v55  ;;  %v731_v2 = vmax.f32 %v692_v5, %v2375_v53 }
  0x49   : > { %v732_v10 = vmax.f32 %v693_v42, %v541_v31  ;;  %v2399_v34 = vmax.f32 %v798_v26, %v526_v21  ;;  %v758_v63 = vmax.f32 %v726_v27, %v2219_v48  ;;  %v762_v9 = vmax.f32 %v730_v57, %v2275_v50  ;;  %1886 = vmatprep.mubr.msk.f32.mxu0 %vm1196_vm3, %v829_v35  ;;  %v252_v57 = vld [vmem:[%s2049_s29 + $0x58] sm:$0x3] }
  0x4a   : > { %v754_v8 = vmax.f32 %v722_v46, %v2186_v23  ;;  %v760_v41 = vmax.f32 %v728_v7, %v2234_v32  ;;  %v653_v13 = vmax.f32 %v621_v49, %v2293_v28  ;;  %v763_v38 = vmax.f32 %v731_v2, %v2278_v54 }
  0x4b   : > { %vm861_vm7 = vcmp.eq.f32.partialorder %v829_v35, 0.0  ;;  %v2409_v29 = vsel %vm488_vm2, %v540_v37, %v542_v59  ;;  %v800_v23 = vmax.f32 %v758_v63, %v2300_v43  ;;  %v804_v21 = vmax.f32 %v762_v9, %v396_v45 }
  0x4c   : > { %v796_v25 = vmax.f32 %v754_v8, %v2240_v60  ;;  %v802_v48 = vmax.f32 %v760_v41, %v2309_v15  ;;  %v764_v32 = vmax.f32 %v732_v10, %v2293_v28  ;;  %v805_v50 = vmax.f32 %v763_v38, %v2364_v55 }
  0x4d   : > { %v3308_v24 = vmov 0.0   ;;  %v2420_v39 = vmax.f32 %v800_v23, %v531_v58  ;;  %v843_v37 = vmax.f32 %v804_v21, %v541_v31  ;;  %v3309_v59 = vmov 0  }
  0x4e   : > { %v2415_v26 = vmax.f32 %v796_v25, %v521_v51  ;;  %v2418_v30 = vsel %vm861_vm7, 1.0, %v3308_v24  ;;  %v2422_v60 = vmax.f32 %v802_v48, %v536_v61  ;;  %v1166_v12 = vsel %vm861_vm7, 1, %v3309_v59 }
  0x4f   : > { %v2426_v43 = vmax.f32 %v477_v56, %v2409_v29  ;;  %v2429_v15 = vmax.f32 %v653_v13, %v2369_v22  ;;  %v844_v45 = vmax.f32 %v805_v50, %v2409_v29  ;;  %v478_v51 = vmax.f32 %v2293_v28, %v2369_v22  ;;  %1907 = vmatprep.mubr.msk.f32.mxu1 %vm1196_vm3, %v843_v37 }
  0x50   : > { %vm867_vm8 = vcmp.eq.f32.partialorder %v2415_v26, 0.0  ;;  %vm871_vm9 = vcmp.eq.f32.partialorder %v2420_v39, 0.0  ;;  %v925_v61 = vtrunc.f32 %v2418_v30  ;;  %v544_v58 = vrot.slane %v2293_v28, 2 }
  0x51   : > { %vm875_vm10 = vcmp.eq.f32.partialorder %v843_v37, 0.0  ;;  %1908 = vmatmul.mubr.msk.f32.vlgmr.msra.gmra.mrb[0].mxu1 %vm1196_vm3, %v844_v45  ;;  %v1199_v31 = vsel %vm1196_vm3, %v1166_v12, 0  ;;  %v545_v49 = vrot.slane %v2296_v36, 2  ;;  %v806_v5 = vmax.f32 %v764_v32, %v2369_v22 }
  0x52   : > { %vm873_vm11 = vcmp.eq.f32.partialorder %v2422_v60, 0.0  ;;  %vm876_vm12 = vcmp.eq.f32.partialorder %v844_v45, 0.0  ;;  %v2447_v42 = vsel %vm871_vm9, 1.0, %v3308_v24  ;;  %v907_v46 = vsel %vm875_vm10, 1.0, %v3308_v24 }
  0x53   : > { %v2453_v28 = vsel %vm867_vm8, 1.0, %v3308_v24  ;;  %v2458_v27 = vsel %vm873_vm11, 1.0, %v3308_v24  ;;  %v1172_v22 = vsel %vm867_vm8, 1, %v3309_v59  ;;  %v1176_v7 = vsel %vm871_vm9, 1, %v3309_v59 }
  0x54   : > { %v908_v35 = vsel %vm876_vm12, 1.0, %v3308_v24  ;;  %v1180_v56 = vsel %vm875_vm10, 1, %v3309_v59  ;;  %v1209_v2 = vsel %vm1196_vm3, %v1172_v22, 0  ;;  %v1217_v10 = vsel %vm1196_vm3, %v1176_v7, 0 }
  0x55   : > { %v935_v8 = vtrunc.f32 %v2447_v42  ;;  %v939_v63 = vtrunc.f32 %v907_v46  ;;  %v1181_v41 = vsel %vm876_vm12, 1, %v3309_v59  ;;  %v1218_v9 = vadd.s32 %v2311_v52, %v1209_v2 }
  0x56   : > { %v1225_v13 = vsel %vm1196_vm3, %v1180_v56, 0  ;;  %v546_v38 = vsel %vm488_vm2, %v544_v58, %v545_v49  ;;  %v362_v25 = vrot.slane %v252_v57, 1  ;;  %v636_v23 = vmax.f32 %v2176_v14, %v2080_v11 }
  0x57   : > { %v940_v48 = vtrunc.f32 %v908_v35  ;;  %v1226_v21 = vadd.s32 %v1218_v9, %v1217_v10  ;;  %v845_v32 = vmax.f32 %v806_v5, %v546_v38  ;;  %v507_v50 = vrot.slane %v252_v57, 2  ;;  %v276_v5 = vld [vmem:[%s2049_s29 + $0x118] sm:$0x3] }
  0x58   : > { %v937_v37 = vtrunc.f32 %v2458_v27  ;;  %v1227_v12 = vsel %vm1196_vm3, %v1181_v41, 0  ;;  %v3310_v52 = vrot.slane %v2088_v16, 1  ;;  %v678_v46 = vmax.f32 %v636_v23, %v2111_v33  ;;  %v2513_v23 = vld [vmem:[%s2049_s29 + $0x128] sm:$0xff] }
  0x59   : > { %v2489_v58 = vsel %vm873_vm11, 1, %v3309_v59  ;;  %v1204_v11 = vadd.s32 %v1226_v21, %v1225_v13  ;;  %vm877_vm13 = vcmp.eq.f32.partialorder %v845_v32, 0.0  ;;  %1910 = vmatprep.mubr.msk.f32.mxu1 %vm1196_vm3, %v845_v32  ;;  %v638_v14 = vmax.f32 %v2179_v17, %v2088_v16 }
  0x5a   : > { %v363_v45 = vsel %vm343_vm1, %v3310_v52, %v362_v25  ;;  %v2495_v22 = vmax.f32 %v478_v51, %v546_v38  ;;  %v1182_v7 = vsel %vm877_vm13, 1, %v3309_v59  ;;  %v717_v57 = vmax.f32 %v678_v46, %v2158_v4  ;;  %v277_v4 = vld [vmem:[%s2049_s29 + $0x120] sm:$0xff] }
  0x5b   : > { %v463_v33 = vmax.f32 %v2088_v16, %v363_v45  ;;  %v2500_v35 = vpack.c.f32.eXmY %v939_v63, %v940_v48, 312  ;;  %v1206_v56 = vadd.s32 %v1227_v12, %v1204_v11  ;;  %v2503_v2 = vsel %vm877_vm13, 1.0, %v3308_v24  ;;  %v255_v11 = vld [vmem:[%s2049_s29 + $0x70] sm:$0x3] }
  0x5c   : > { %v3311_v10 = vrot.slane %v2088_v16, 2  ;;  %v734_v41 = vmax.f32 %v2429_v15, %v546_v38  ;;  %v1229_v51 = vsel %vm1196_vm3, %v1182_v7, 0  ;;  %v749_v9 = vmax.f32 %v717_v57, %v2088_v16 }
  0x5d   : > { %v402_v13 = vrot.slane %v276_v5, 1  ;;  %v1208_v25 = vadd.s32 %v1206_v56, %v1199_v31  ;;  %v680_v63 = vmax.f32 %v638_v14, %v363_v45  ;;  %v475_v48 = vmax.f32 %v2249_v1, %v2314_v44 }
  0x5e   : > { %v508_v17 = vsel %vm488_vm2, %v3311_v10, %v507_v50  ;;  %v547_v21 = vrot.slane %v276_v5, 2  ;;  %v655_v32 = vmax.f32 %v2495_v22, %v277_v4  ;;  %v941_v50 = vtrunc.f32 %v2503_v2 }
  0x5f   : > { %v608_v15 = vmax.f32 %v463_v33, %v508_v17  ;;  %v791_v38 = vmax.f32 %v749_v9, %v363_v45  ;;  %v1212_v12 = vadd.s32 %v1229_v51, %v1208_v25  ;;  %v3312_v16 = vrot.slane %v2296_v36, 1 }
  0x60   : > { %v620_v31 = vmax.f32 %v475_v48, %v2375_v53  ;;  %v654_v46 = vmax.f32 %v2426_v43, %v2296_v36  ;;  %v404_v5 = vrot.slane %v277_v4, 1  ;;  %v405_v22 = vrot.slane %v2513_v23, 1 }
  0x61   : > { %v403_v52 = vsel %vm343_vm1, %v3312_v16, %v402_v13  ;;  %v830_v14 = vmax.f32 %v791_v38, %v508_v17  ;;  %v719_v7 = vmax.f32 %v680_v63, %v508_v17  ;;  %v2531_v45 = vsel %vm488_vm2, %v545_v49, %v547_v21 }
  0x62   : > { %v479_v1 = vmax.f32 %v2296_v36, %v403_v52  ;;  %v652_v33 = vmax.f32 %v620_v31, %v2278_v54  ;;  %v766_v57 = vmax.f32 %v734_v41, %v277_v4  ;;  %v549_v43 = vrot.slane %v277_v4, 2 }
  0x63   : > { %vm862_vm14 = vcmp.eq.f32.partialorder %v830_v14, 0.0  ;;  %1887 = vmatmul.mubr.msk.f32.gmra.mrb[2].mxu0 %vm1196_vm3, %v830_v14  ;;  %v550_v56 = vrot.slane %v2513_v23, 2  ;;  %v367_v10 = vrot.slane %v255_v11, 1  ;;  %v696_v13 = vmax.f32 %v654_v46, %v403_v52 }
  0x64   : > { %v894_v51 = vsel %vm862_vm14, 1.0, %v3308_v24  ;;  %v1167_v9 = vsel %vm862_vm14, 1, %v3309_v59  ;;  %v694_v17 = vmax.f32 %v652_v33, %v2364_v55  ;;  %1889 = vmatprep.mubr.msk.f32.mxu0 %vm1196_vm3, %v2246_v0  ;;  %v2543_v41 = vmax.f32 %v479_v1, %v2531_v45 }
  0x65   : > { %v926_v49 = vtrunc.f32 %v894_v51  ;;  %v1200_v54 = vsel %vm1196_vm3, %v1167_v9, 0  ;;  %v406_v25 = vsel %vm343_vm1, %v404_v5, %v405_v22  ;;  %vm1131_vm15 = vcmask 25600  }
  0x66   : > { %v1214_v63 = vadd.s32 %v1212_v12, %v1200_v54  ;;  %v733_v48 = vmax.f32 %v694_v17, %v2409_v29  ;;  %v808_v21 = vmax.f32 %v766_v57, %v406_v25  ;;  %v2554_v0 = vsel %vm488_vm2, %v549_v43, %v550_v56  ;;  %v279_v54 = vld [vmem:[%s2049_s29 + $0x130] sm:$0x3] }
  0x67   : > { %v959_v55 = vpack.c.f32.eXmY %v925_v61, %v926_v49, 312  ;;  %v3313_v38 = vrot.slane %v2095_v20, 1  ;;  %v512_v31 = vrot.slane %v255_v11, 2  ;;  %v640_v46 = vmax.f32 %v608_v15, %v2095_v20 }
  0x68   : > { %v765_v12 = vmax.f32 %v733_v48, %v2296_v36  ;;  %v480_v14 = vmax.f32 %v277_v4, %v406_v25  ;;  %v2562_v29 = vmax.f32 %v808_v21, %v2554_v0  ;;  %v656_v61 = vmax.f32 %v2543_v41, %v2513_v23 }
  0x69   : > { %v368_v16 = vsel %vm343_vm1, %v3313_v38, %v367_v10  ;;  %v963_v30 = vpack.c.b8 %v959_v55, %v2303_v62  ;;  %v735_v1 = vmax.f32 %v696_v13, %v2531_v45  ;;  %v2568_v5 = vmax.f32 %v655_v32, %v406_v25 }
  0x6a   : > { %v807_v33 = vmax.f32 %v765_v12, %v403_v52  ;;  %v465_v11 = vmax.f32 %v2095_v20, %v368_v16  ;;  %v3314_v15 = vrot.slane %v2095_v20, 2  ;;  %v751_v4 = vmax.f32 %v719_v7, %v2095_v20 }
  0x6b   : > { %v1035_v57 = vunpack.c.0.s8 %v963_v30  ;;  %v1036_v62 = vunpack.c.1.s8 %v963_v30  ;;  %v1037_v43 = vunpack.c.2.s8 %v963_v30  ;;  %v1038_v10 = vunpack.c.3.s8 %v963_v30 }
  0x6c   : > { %v2574_v36 = vsel %vm488_vm2, %v3314_v15, %v512_v31  ;;  %v846_v51 = vmax.f32 %v807_v33, %v2531_v45  ;;  %v2579_v32 = vmax.f32 %v480_v14, %v2554_v0  ;;  %vm879_vm0 = vcmp.eq.f32.partialorder %v2562_v29, 0.0 }
  0x6d   : > { %v2582_v52 = vmax.f32 %v640_v46, %v368_v16  ;;  %v1067_v9 = vpack.c.b16 %v1035_v57, %v1035_v57  ;;  %v1069_v17 = vpack.c.b16 %v1036_v62, %v1036_v62  ;;  %v1071_v13 = vpack.c.b16 %v1037_v43, %v1037_v43  ;;  %v2618_v62 = vld [vmem:[%s2049_s29 + $0x138] sm:$0xff] }
  0x6e   : > { %v1073_v49 = vpack.c.b16 %v1038_v10, %v1038_v10  ;;  %vm878_vm4 = vcmp.eq.f32.partialorder %v846_v51, 0.0  ;;  %1911 = vmatmul.mubr.msk.f32.gmra.mrb[2].mxu1 %vm1196_vm3, %v846_v51  ;;  %v2589_v20 = vsel %vm879_vm0, 1.0, %v3308_v24  ;;  %v2592_v7 = vmax.f32 %v465_v11, %v2574_v36  ;;  %v3315_v51 = vld [vmem:[#allocation6_spill] sm:$0xff] }
  0x6f   : > { %v793_v45 = vmax.f32 %v751_v4, %v368_v16  ;;  %v1068_v25 = vpack.c.b8 %v1067_v9, %v1067_v9  ;;  %v1070_v48 = vpack.c.b8 %v1069_v17, %v1069_v17  ;;  %v1072_v21 = vpack.c.b8 %v1071_v13, %v1071_v13  ;;  %1913 = vmatprep.mubr.msk.f32.mxu1 %vm1196_vm3, %v2562_v29  ;;  %v2633_v9 = vld [vmem:[%s2049_s29 + $0x140] sm:$0xff] }
  0x70   : > { %v1074_v55 = vpack.c.b8 %v1073_v49, %v1073_v49  ;;  %v910_v38 = vsel %vm878_vm4, 1.0, %v3308_v24  ;;  %v1183_v31 = vsel %vm878_vm4, 1, %v3309_v59  ;;  %v407_v12 = vrot.slane %v279_v54, 1  ;;  %v3316_v13 = vld [vmem:[#allocation5_spill] sm:$0xff] }
  0x71   : > { %v832_v46 = vmax.f32 %v793_v45, %v2574_v36  ;;  %1132 = vst.msk [vmem:[%s2054_s7] sm:$0x3] %vm1131_vm15, %v1068_v25  ;;  %1133 = vst.msk [vmem:[%s2054_s7 + $0x2] sm:$0x3] %vm1131_vm15, %v1070_v48  ;;  %v942_v16 = vtrunc.f32 %v910_v38  ;;  %v1231_v14 = vsel %vm1196_vm3, %v1183_v31, 0  ;;  %v552_v30 = vrot.slane %v279_v54, 2 }
  0x72   : > { %1134 = vst.msk [vmem:[%s2054_s7 + $0x4] sm:$0x3] %vm1131_vm15, %v1072_v21  ;;  %1135 = vst.msk [vmem:[%s2054_s7 + $0x6] sm:$0x3] %vm1131_vm15, %v1074_v55  ;;  %v767_v33 = vmax.f32 %v735_v1, %v2513_v23  ;;  %v1216_v11 = vadd.s32 %v1231_v14, %v1214_v63  ;;  %v408_v15 = vsel %vm343_vm1, %v405_v22, %v407_v12  ;;  %v943_v22 = vtrunc.f32 %v2589_v20  ;;  %v3317_v21 = vld [vmem:[#allocation7_spill] sm:$0xff] }
  0x73   : > { %vm864_vm5 = vcmp.eq.f32.partialorder %v832_v46, 0.0  ;;  %1890 = vmatmul.mubr.msk.f32.gmra.mrb[4].mxu0 %vm1196_vm3, %v832_v46  ;;  %v639_v4 = vmax.f32 %v2182_v18, %v2092_v19  ;;  %v999_v57 = vpack.c.f32.eXmY %v941_v50, %v942_v16, 312  ;;  %v736_v1 = vmax.f32 %v2568_v5, %v2554_v0 }
  0x74   : > { %v896_v63 = vsel %vm864_vm5, 1.0, %v3308_v24  ;;  %v1169_v43 = vsel %vm864_vm5, 1, %v3309_v59  ;;  %v657_v10 = vmax.f32 %v2579_v32, %v2618_v62  ;;  %v642_v19 = vmax.f32 %v2592_v7, %v3315_v51 }
  0x75   : > { %v721_v18 = vmax.f32 %v2582_v52, %v2574_v36  ;;  %v1003_v2 = vpack.c.b8 %v999_v57, %v2500_v35  ;;  %v928_v50 = vtrunc.f32 %v896_v63  ;;  %v481_v0 = vmax.f32 %v2513_v23, %v408_v15 }
  0x76   : > { %v809_v5 = vmax.f32 %v767_v33, %v408_v15  ;;  %v1203_v17 = vsel %vm1196_vm3, %v1169_v43, 0  ;;  %v2640_v32 = vsel %vm488_vm2, %v550_v56, %v552_v30  ;;  %v681_v49 = vmax.f32 %v639_v4, %v3316_v13  ;;  %v282_v13 = vld [vmem:[%s2049_s29 + $0x148] sm:$0x3] }
  0x77   : > { %v409_v54 = vrot.slane %v2618_v62, 1  ;;  %v1051_v36 = vunpack.c.0.s8 %v1003_v2  ;;  %v1052_v52 = vunpack.c.1.s8 %v1003_v2  ;;  %v1053_v35 = vunpack.c.2.s8 %v1003_v2 }
  0x78   : > { %v1054_v45 = vunpack.c.3.s8 %v1003_v2  ;;  %v2647_v25 = vmax.f32 %v656_v61, %v408_v15  ;;  %v2650_v48 = vmax.f32 %v809_v5, %v2640_v32  ;;  %v720_v56 = vmax.f32 %v681_v49, %v3317_v21  ;;  %v258_v15 = vld [vmem:[%s2049_s29 + $0x88] sm:$0x3] }
  0x79   : > { %v410_v55 = vrot.slane %v2633_v9, 1  ;;  %v1099_v38 = vpack.c.b16 %v1051_v36, %v1051_v36  ;;  %v1101_v31 = vpack.c.b16 %v1052_v52, %v1052_v52  ;;  %v1103_v46 = vpack.c.b16 %v1053_v35, %v1053_v35 }
  0x7a   : > { %v1105_v12 = vpack.c.b16 %v1054_v45, %v1054_v45  ;;  %vm880_vm6 = vcmp.eq.f32.partialorder %v2650_v48, 0.0  ;;  %1914 = vmatmul.mubr.msk.f32.gmra.mrb[4].mxu1 %vm1196_vm3, %v2650_v48  ;;  %v752_v23 = vmax.f32 %v720_v56, %v2155_v3  ;;  %v554_v61 = vrot.slane %v2618_v62, 2  ;;  %v3318_v3 = vld [vmem:[#allocation10_spill] sm:$0xff] }
  0x7b   : > { %v411_v41 = vsel %vm343_vm1, %v409_v54, %v410_v55  ;;  %v1100_v16 = vpack.c.b8 %v1099_v38, %v1099_v38  ;;  %v1102_v14 = vpack.c.b8 %v1101_v31, %v1101_v31  ;;  %v1104_v30 = vpack.c.b8 %v1103_v46, %v1103_v46 }
  0x7c   : > { %v1106_v33 = vpack.c.b8 %v1105_v12, %v1105_v12  ;;  %v1220_v4 = vadd.s32 %v1216_v11, %v1203_v17  ;;  %v912_v57 = vsel %vm880_vm6, 1.0, %v3308_v24  ;;  %v794_v63 = vmax.f32 %v752_v23, %v2215_v47 }
  0x7d   : > { %v482_v43 = vmax.f32 %v2618_v62, %v411_v41  ;;  %1148 = vst.msk [vmem:[%s2054_s7 + $0x20] sm:$0x3] %vm1131_vm15, %v1100_v16  ;;  %1149 = vst.msk [vmem:[%s2054_s7 + $0x22] sm:$0x3] %vm1131_vm15, %v1102_v14  ;;  %v3319_v2 = vtrunc.f32 %v3318_v3  ;;  %v626_v11 = vmax.f32 %v481_v0, %v2640_v32  ;;  %v555_v17 = vrot.slane %v2633_v9, 2  ;;  %v283_v14 = vld [vmem:[%s2049_s29 + $0x150] sm:$0xff] }
  0x7e   : > { %1150 = vst.msk [vmem:[%s2054_s7 + $0x24] sm:$0x3] %vm1131_vm15, %v1104_v30  ;;  %1151 = vst.msk [vmem:[%s2054_s7 + $0x26] sm:$0x3] %vm1131_vm15, %v1106_v33  ;;  %v768_v47 = vmax.f32 %v736_v1, %v2618_v62  ;;  %v944_v49 = vtrunc.f32 %v912_v57  ;;  %v833_v54 = vmax.f32 %v794_v63, %v2341_v6  ;;  %v372_v36 = vrot.slane %v258_v15, 1 }
  0x7f   : > { %v2676_v5 = vpack.c.f32.eXmY %v3319_v2, %v928_v50, 312  ;;  %v517_v52 = vrot.slane %v258_v15, 2  ;;  %v556_v35 = vsel %vm488_vm2, %v554_v61, %v555_v17  ;;  %v699_v45 = vmax.f32 %v657_v10, %v411_v41  ;;  %v2715_v15 = vld [vmem:[%s2049_s29 + $0x158] sm:$0xff] }
  0x80   : > { %v810_v21 = vmax.f32 %v768_v47, %v411_v41  ;;  %v753_v56 = vmax.f32 %v721_v18, %v3315_v51  ;;  %vm865_vm7 = vcmp.eq.f32.partialorder %v833_v54, 0.0  ;;  %1892 = vmatprep.mubr.msk.f32.mxu0 %vm1196_vm3, %v833_v54  ;;  %v627_v50 = vmax.f32 %v482_v43, %v556_v35 }
  0x81   : > { %v3320_v0 = vrot.slane %v3315_v51, 1  ;;  %v412_v1 = vrot.slane %v282_v13, 1  ;;  %v897_v6 = vsel %vm865_vm7, 1.0, %v3308_v24  ;;  %v1170_v38 = vsel %vm865_vm7, 1, %v3309_v59 }
  0x82   : > { %v2691_v31 = vmax.f32 %v810_v21, %v556_v35  ;;  %v658_v18 = vmax.f32 %v626_v11, %v2633_v9  ;;  %v737_v46 = vmax.f32 %v2647_v25, %v2640_v32  ;;  %v1205_v12 = vsel %vm1196_vm3, %v1170_v38, 0 }
  0x83   : > { %v373_v62 = vsel %vm343_vm1, %v3320_v0, %v372_v36  ;;  %v3321_v23 = vrot.slane %v3315_v51, 2  ;;  %v2705_v61 = vpack.c.f32.eXmY %v943_v22, %v944_v49, 312  ;;  %v929_v16 = vtrunc.f32 %v897_v6 }
  0x84   : > { %v467_v10 = vmax.f32 %v3315_v51, %v373_v62  ;;  %v738_v30 = vmax.f32 %v699_v45, %v556_v35  ;;  %vm881_vm8 = vcmp.eq.f32.partialorder %v2691_v31, 0.0  ;;  %1916 = vmatprep.mubr.msk.f32.mxu1 %vm1196_vm3, %v2691_v31  ;;  %v659_v32 = vmax.f32 %v627_v50, %v283_v14  ;;  %v3322_v50 = vld [vmem:[#allocation8_spill] sm:$0xff] }
  0x85   : > { %v2701_v41 = vsel %vm488_vm2, %v3321_v23, %v517_v52  ;;  %v913_v25 = vsel %vm881_vm8, 1.0, %v3308_v24  ;;  %v795_v33 = vmax.f32 %v753_v56, %v373_v62  ;;  %v413_v20 = vsel %vm343_vm1, %v410_v55, %v412_v1  ;;  %v261_v56 = vld [vmem:[%s2049_s29 + $0xa0] sm:$0x3] }
  0x86   : > { %v1222_v22 = vadd.s32 %v1220_v4, %v1205_v12  ;;  %v2719_v57 = vmax.f32 %v467_v10, %v2701_v41  ;;  %v684_v63 = vmax.f32 %v642_v19, %v373_v62  ;;  %v483_v43 = vmax.f32 %v2633_v9, %v413_v20 }
  0x87   : > { %v945_v3 = vtrunc.f32 %v913_v25  ;;  %v834_v2 = vmax.f32 %v795_v33, %v2701_v41  ;;  %v557_v11 = vrot.slane %v282_v13, 2  ;;  %v769_v47 = vmax.f32 %v737_v46, %v2633_v9 }
  0x88   : > { %v414_v49 = vrot.slane %v283_v14, 1  ;;  %v415_v54 = vrot.slane %v2715_v15, 1  ;;  %v559_v55 = vrot.slane %v283_v14, 2  ;;  %v560_v4 = vrot.slane %v2715_v15, 2 }
  0x89   : > { %vm866_vm9 = vcmp.eq.f32.partialorder %v834_v2, 0.0  ;;  %1893 = vmatmul.mubr.msk.f32.gmra.mrb[6].mxu0 %vm1196_vm3, %v834_v2  ;;  %v2731_v7 = vsel %vm488_vm2, %v555_v17, %v557_v11  ;;  %v811_v51 = vmax.f32 %v769_v47, %v413_v20  ;;  %v770_v19 = vmax.f32 %v738_v30, %v283_v14 }
  0x8a   : > { %v898_v36 = vsel %vm866_vm9, 1.0, %v3308_v24  ;;  %v1171_v13 = vsel %vm866_vm9, 1, %v3309_v59  ;;  %v2736_v9 = vmax.f32 %v483_v43, %v2731_v7  ;;  %v2738_v52 = vmax.f32 %v658_v18, %v413_v20  ;;  %1895 = vmatprep.mubr.msk.f32.mxu0 %vm1196_vm3, %v2415_v26 }
  0x8b   : > { %v930_v35 = vtrunc.f32 %v898_v36  ;;  %v1207_v45 = vsel %vm1196_vm3, %v1171_v13, 0  ;;  %v2744_v17 = vmax.f32 %v811_v51, %v2731_v7  ;;  %v416_v21 = vsel %vm343_vm1, %v414_v49, %v415_v54  ;;  %v2790_v36 = vld [vmem:[%s2049_s29 + $0x168] sm:$0xff] }
  0x8c   : > { %v644_v0 = vmax.f32 %v2719_v57, %v3322_v50  ;;  %v723_v62 = vmax.f32 %v684_v63, %v2701_v41  ;;  %v484_v1 = vmax.f32 %v283_v14, %v416_v21  ;;  %v2756_v26 = vsel %vm488_vm2, %v559_v55, %v560_v4 }
  0x8d   : > { %v969_v6 = vpack.c.f32.eXmY %v929_v16, %v930_v35, 312  ;;  %vm882_vm10 = vcmp.eq.f32.partialorder %v2744_v17, 0.0  ;;  %1917 = vmatmul.mubr.msk.f32.gmra.mrb[6].mxu1 %vm1196_vm3, %v2744_v17  ;;  %v2761_v38 = vmax.f32 %v659_v32, %v416_v21  ;;  %v812_v10 = vmax.f32 %v770_v19, %v416_v21 }
  0x8e   : > { %v2763_v18 = vadd.s32 %v1222_v22, %v1207_v45  ;;  %v739_v46 = vmax.f32 %v2738_v52, %v2731_v7  ;;  %v914_v12 = vsel %vm882_vm10, 1.0, %v3308_v24  ;;  %v377_v23 = vrot.slane %v261_v56, 1 }
  0x8f   : > { %v973_v41 = vpack.c.b8 %v969_v6, %v2676_v5  ;;  %v660_v16 = vmax.f32 %v2736_v9, %v2715_v15  ;;  %v946_v14 = vtrunc.f32 %v914_v12  ;;  %v2774_v30 = vmax.f32 %v812_v10, %v2756_v26 }
  0x90   : > { %v2777_v32 = vmax.f32 %v484_v1, %v2756_v26  ;;  %v740_v25 = vmax.f32 %v2761_v38, %v2756_v26  ;;  %v3323_v33 = vrot.slane %v3322_v50, 1  ;;  %v522_v22 = vrot.slane %v261_v56, 2  ;;  %v288_v26 = vld [vmem:[%s2049_s29 + $0x178] sm:$0x3] }
  0x91   : > { %v1039_v5 = vunpack.c.0.s8 %v973_v41  ;;  %v1040_v57 = vunpack.c.1.s8 %v973_v41  ;;  %v1041_v63 = vunpack.c.2.s8 %v973_v41  ;;  %v1042_v43 = vunpack.c.3.s8 %v973_v41  ;;  %1919 = vmatprep.mubr.msk.f32.mxu1 %vm1196_vm3, %v2774_v30  ;;  %v285_v41 = vld [vmem:[%s2049_s29 + $0x160] sm:$0x3] }
  0x92   : > { %v378_v20 = vsel %vm343_vm1, %v3323_v33, %v377_v23  ;;  %v1009_v2 = vpack.c.f32.eXmY %v945_v3, %v946_v14, 312  ;;  %vm883_vm11 = vcmp.eq.f32.partialorder %v2774_v30, 0.0  ;;  %v755_v47 = vmax.f32 %v723_v62, %v3322_v50 }
  0x93   : > { %v469_v11 = vmax.f32 %v3322_v50, %v378_v20  ;;  %v1075_v49 = vpack.c.b16 %v1039_v5, %v1039_v5  ;;  %v1077_v55 = vpack.c.b16 %v1040_v57, %v1040_v57  ;;  %v1079_v51 = vpack.c.b16 %v1041_v63, %v1041_v63 }
  0x94   : > { %v1081_v19 = vpack.c.b16 %v1042_v43, %v1042_v43  ;;  %v1013_v13 = vpack.c.b8 %v1009_v2, %v2705_v61  ;;  %v661_v3 = vmax.f32 %v2777_v32, %v2790_v36  ;;  %v2798_v35 = vsel %vm883_vm11, 1.0, %v3308_v24 }
  0x95   : > { %v3324_v45 = vrot.slane %v3322_v50, 2  ;;  %v1076_v56 = vpack.c.b8 %v1075_v49, %v1075_v49  ;;  %v1078_v62 = vpack.c.b8 %v1077_v55, %v1077_v55  ;;  %v1080_v1 = vpack.c.b8 %v1079_v51, %v1079_v51 }
  0x96   : > { %v1082_v6 = vpack.c.b8 %v1081_v19, %v1081_v19  ;;  %v1055_v10 = vunpack.c.0.s8 %v1013_v13  ;;  %v1056_v61 = vunpack.c.1.s8 %v1013_v13  ;;  %v1057_v12 = vunpack.c.2.s8 %v1013_v13 }
  0x97   : > { %v2803_v21 = vsel %vm488_vm2, %v3324_v45, %v522_v22  ;;  %v1058_v23 = vunpack.c.3.s8 %v1013_v13  ;;  %1136 = vst.msk [vmem:[%s2054_s7 + $0x8] sm:$0x3] %vm1131_vm15, %v1076_v56  ;;  %1137 = vst.msk [vmem:[%s2054_s7 + $0xa] sm:$0x3] %vm1131_vm15, %v1078_v62  ;;  %v947_v50 = vtrunc.f32 %v2798_v35  ;;  %v2818_v33 = vmax.f32 %v644_v0, %v378_v20 }
  0x98   : > { %1138 = vst.msk [vmem:[%s2054_s7 + $0xc] sm:$0x3] %vm1131_vm15, %v1080_v1  ;;  %1139 = vst.msk [vmem:[%s2054_s7 + $0xe] sm:$0x3] %vm1131_vm15, %v1082_v6  ;;  %v2816_v14 = vmax.f32 %v469_v11, %v2803_v21  ;;  %v797_v22 = vmax.f32 %v755_v47, %v378_v20  ;;  %v1107_v5 = vpack.c.b16 %v1055_v10, %v1055_v10  ;;  %v931_v49 = vtrunc.f32 %v2453_v28  ;;  %v3325_v1 = vld [vmem:[#allocation9_spill] sm:$0xff] }
  0x99   : > { %v1109_v57 = vpack.c.b16 %v1056_v61, %v1056_v61  ;;  %v1111_v63 = vpack.c.b16 %v1057_v12, %v1057_v12  ;;  %v1113_v43 = vpack.c.b16 %v1058_v23, %v1058_v23  ;;  %v417_v55 = vrot.slane %v285_v41, 1 }
  0x9a   : > { %v836_v2 = vmax.f32 %v797_v22, %v2803_v21  ;;  %v562_v51 = vrot.slane %v285_v41, 2  ;;  %v1108_v19 = vpack.c.b8 %v1107_v5, %v1107_v5  ;;  %v771_v28 = vmax.f32 %v739_v46, %v2715_v15  ;;  %v2851_v46 = vld [vmem:[%s2049_s29 + $0x170] sm:$0xff]  ;;  %v264_v41 = vld [vmem:[%s2049_s29 + $0xb8] sm:$0x3] }
  0x9b   : > { %v1110_v11 = vpack.c.b8 %v1109_v57, %v1109_v57  ;;  %v1112_v13 = vpack.c.b8 %v1111_v63, %v1111_v63  ;;  %v1114_v0 = vpack.c.b8 %v1113_v43, %v1113_v43  ;;  %v418_v20 = vsel %vm343_vm1, %v415_v54, %v417_v55 }
  0x9c   : > { %vm868_vm12 = vcmp.eq.f32.partialorder %v836_v2, 0.0  ;;  %1896 = vmatmul.mubr.msk.f32.gmra.mrb[8].mxu0 %vm1196_vm3, %v836_v2  ;;  %v563_v47 = vsel %vm488_vm2, %v560_v4, %v562_v51  ;;  %1152 = vst.msk [vmem:[%s2054_s7 + $0x28] sm:$0x3] %vm1131_vm15, %v1108_v19  ;;  %v485_v56 = vmax.f32 %v2715_v15, %v418_v20  ;;  %v702_v4 = vmax.f32 %v660_v16, %v418_v20 }
  0x9d   : > { %1153 = vst.msk [vmem:[%s2054_s7 + $0x2a] sm:$0x3] %vm1131_vm15, %v1110_v11  ;;  %1154 = vst.msk [vmem:[%s2054_s7 + $0x2c] sm:$0x3] %vm1131_vm15, %v1112_v13  ;;  %v900_v45 = vsel %vm868_vm12, 1.0, %v3308_v24  ;;  %v1173_v54 = vsel %vm868_vm12, 1, %v3309_v59  ;;  %1898 = vmatprep.mubr.msk.f32.mxu0 %vm1196_vm3, %v2399_v34  ;;  %v813_v62 = vmax.f32 %v771_v28, %v418_v20  ;;  %v646_v6 = vmax.f32 %v2816_v14, %v3325_v1 }
  0x9e   : > { %1155 = vst.msk [vmem:[%s2054_s7 + $0x2e] sm:$0x3] %vm1131_vm15, %v1114_v0  ;;  %v932_v7 = vtrunc.f32 %v900_v45  ;;  %v1211_v52 = vsel %vm1196_vm3, %v1173_v54, 0  ;;  %vm869_vm13 = vcmp.eq.f32.partialorder %v2399_v34, 0.0  ;;  %v725_v10 = vmax.f32 %v2818_v33, %v2803_v21 }
  0x9f   : > { %v1228_v15 = vadd.s32 %v2763_v18, %v1211_v52  ;;  %v2860_v9 = vsel %vm869_vm13, 1.0, %v3308_v24  ;;  %v630_v16 = vmax.f32 %v485_v56, %v563_v47  ;;  %v741_v61 = vmax.f32 %v702_v4, %v563_v47 }
  0xa0   : > { %v2862_v12 = vmax.f32 %v813_v62, %v563_v47  ;;  %v1174_v23 = vsel %vm869_vm13, 1, %v3309_v59  ;;  %v2866_v22 = vpack.c.f32.eXmY %v931_v49, %v932_v7, 312  ;;  %v933_v34 = vtrunc.f32 %v2860_v9  ;;  %v1954_v47 = vld [vmem:[%s2049_s29 + $0xb0] sm:$0xff] }
  0xa1   : > { %v419_v14 = vrot.slane %v2790_v36, 1  ;;  %v420_v21 = vrot.slane %v2851_v46, 1  ;;  %v1213_v18 = vsel %vm1196_vm3, %v1174_v23, 0  ;;  %v564_v33 = vrot.slane %v2790_v36, 2 }
  0xa2   : > { %vm884_vm14 = vcmp.eq.f32.partialorder %v2862_v12, 0.0  ;;  %1920 = vmatmul.mubr.msk.f32.gmra.mrb[8].mxu1 %vm1196_vm3, %v2862_v12  ;;  %v565_v5 = vrot.slane %v2851_v46, 2  ;;  %v772_v43 = vmax.f32 %v740_v25, %v2790_v36  ;;  %v382_v2 = vrot.slane %v264_v41, 1 }
  0xa3   : > { %v916_v57 = vsel %vm884_vm14, 1.0, %v3308_v24  ;;  %v421_v63 = vsel %vm343_vm1, %v419_v14, %v420_v21  ;;  %v662_v49 = vmax.f32 %v630_v16, %v2851_v46  ;;  %v3326_v13 = vrot.slane %v3325_v1, 1 }
  0xa4   : > { %v948_v55 = vtrunc.f32 %v916_v57  ;;  %v486_v51 = vmax.f32 %v2790_v36, %v421_v63  ;;  %v703_v19 = vmax.f32 %v661_v3, %v421_v63  ;;  %v814_v11 = vmax.f32 %v772_v43, %v421_v63  ;;  %v3328_v57 = vld [vmem:[#allocation11_spill] sm:$0xff] }
  0xa5   : > { %v383_v0 = vsel %vm343_vm1, %v3326_v13, %v382_v2  ;;  %v527_v20 = vrot.slane %v264_v41, 2  ;;  %v757_v28 = vmax.f32 %v725_v10, %v1954_v47  ;;  %v2899_v25 = vadd.s32 %v1228_v15, %v1213_v18  ;;  %v1955_v15 = vld [vmem:[%s2049_s29 + $0xc8] sm:$0xff]  ;;  %v289_v41 = vld [vmem:[%s2049_s29 + $0x180] sm:$0xff] }
  0xa6   : > { %v2897_v38 = vpack.c.f32.eXmY %v947_v50, %v948_v55, 312  ;;  %v566_v45 = vsel %vm488_vm2, %v564_v33, %v565_v5  ;;  %v471_v32 = vmax.f32 %v1954_v47, %v383_v0  ;;  %v3327_v3 = vrot.slane %v3325_v1, 2 }
  0xa7   : > { %v2902_v36 = vmax.f32 %v814_v11, %v566_v45  ;;  %v2909_v56 = vmax.f32 %v646_v6, %v383_v0  ;;  %v799_v4 = vmax.f32 %v757_v28, %v383_v0  ;;  %v422_v50 = vrot.slane %v288_v26, 1 }
  0xa8   : > { %v2907_v54 = vsel %vm488_vm2, %v3327_v3, %v527_v20  ;;  %v567_v7 = vrot.slane %v288_v26, 2  ;;  %v773_v52 = vmax.f32 %v741_v61, %v2851_v46  ;;  %v631_v62 = vmax.f32 %v486_v51, %v566_v45  ;;  %v1956_v26 = vld [vmem:[%s2049_s29 + $0xe0] sm:$0xff] }
  0xa9   : > { %v616_v35 = vmax.f32 %v471_v32, %v2907_v54  ;;  %v742_v10 = vmax.f32 %v703_v19, %v566_v45  ;;  %vm885_vm4 = vcmp.eq.f32.partialorder %v2902_v36, 0.0  ;;  %1922 = vmatprep.mubr.msk.f32.mxu1 %vm1196_vm3, %v2902_v36  ;;  %v838_v1 = vmax.f32 %v799_v4, %v2907_v54 }
  0xaa   : > { %v917_v6 = vsel %vm885_vm4, 1.0, %v3308_v24  ;;  %v727_v23 = vmax.f32 %v2909_v56, %v2907_v54  ;;  %v423_v61 = vsel %vm343_vm1, %v420_v21, %v422_v50  ;;  %v2928_v18 = vsel %vm488_vm2, %v565_v5, %v567_v7  ;;  %v2938_v21 = vld [vmem:[%s2049_s29 + $0x188] sm:$0xff] }
  0xab   : > { %v648_v16 = vmax.f32 %v616_v35, %v1955_v15  ;;  %vm870_vm5 = vcmp.eq.f32.partialorder %v838_v1, 0.0  ;;  %1899 = vmatmul.mubr.msk.f32.gmra.mrb[10].mxu0 %vm1196_vm3, %v838_v1  ;;  %v487_v14 = vmax.f32 %v2851_v46, %v423_v61  ;;  %v2930_v33 = vmax.f32 %v662_v49, %v423_v61 }
  0xac   : > { %v902_v43 = vsel %vm870_vm5, 1.0, %v3308_v24  ;;  %v1175_v2 = vsel %vm870_vm5, 1, %v3309_v59  ;;  %v815_v55 = vmax.f32 %v773_v52, %v423_v61  ;;  %1901 = vmatprep.mubr.msk.f32.mxu0 %vm1196_vm3, %v2420_v39  ;;  %v949_v51 = vtrunc.f32 %v917_v6 }
  0xad   : > { %v690_v63 = vmax.f32 %v648_v16, %v3328_v57  ;;  %v934_v46 = vtrunc.f32 %v902_v43  ;;  %v2941_v5 = vsel %vm1196_vm3, %v1175_v2, 0  ;;  %v663_v49 = vmax.f32 %v631_v62, %v289_v41 }
  0xae   : > { %v2945_v11 = vmax.f32 %v487_v14, %v2928_v18  ;;  %v2948_v13 = vmax.f32 %v815_v55, %v2928_v18  ;;  %v668_v0 = vrot.slane %v289_v41, 1  ;;  %v669_v20 = vrot.slane %v2938_v21, 1 }
  0xaf   : > { %v729_v19 = vmax.f32 %v690_v63, %v2353_v40  ;;  %v979_v39 = vpack.c.f32.eXmY %v933_v34, %v934_v46, 312  ;;  %v707_v47 = vrot.slane %v289_v41, 2  ;;  %v708_v28 = vrot.slane %v2938_v21, 2  ;;  %v2965_v34 = vld [vmem:[%s2049_s29 + $0x198] sm:$0xff] }
  0xb0   : > { %v743_v32 = vmax.f32 %v2930_v33, %v2928_v18  ;;  %vm886_vm7 = vcmp.eq.f32.partialorder %v2948_v13, 0.0  ;;  %1923 = vmatmul.mubr.msk.f32.gmra.mrb[10].mxu1 %vm1196_vm3, %v2948_v13  ;;  %v774_v3 = vmax.f32 %v742_v10, %v289_v41  ;;  %v670_v56 = vsel %vm343_vm1, %v668_v0, %v669_v20 }
  0xb1   : > { %v761_v45 = vmax.f32 %v729_v19, %v1956_v26  ;;  %v983_v54 = vpack.c.b8 %v979_v39, %v2866_v22  ;;  %v918_v9 = vsel %vm886_vm7, 1.0, %v3308_v24  ;;  %v709_v4 = vsel %vm488_vm2, %v707_v47, %v708_v28 }
  0xb2   : > { %v950_v50 = vtrunc.f32 %v918_v9  ;;  %v705_v7 = vmax.f32 %v663_v49, %v670_v56  ;;  %v816_v52 = vmax.f32 %v774_v3, %v670_v56  ;;  %v781_v61 = vrot.slane %v2965_v34, 1  ;;  %v291_v49 = vld [vmem:[%s2049_s29 + $0x190] sm:$0x3] }
  0xb3   : > { %v803_v35 = vmax.f32 %v761_v45, %v2314_v44  ;;  %v1043_v62 = vunpack.c.0.s8 %v983_v54  ;;  %v1044_v10 = vunpack.c.1.s8 %v983_v54  ;;  %v1045_v22 = vunpack.c.2.s8 %v983_v54 }
  0xb4   : > { %v1046_v1 = vunpack.c.3.s8 %v983_v54  ;;  %v1019_v6 = vpack.c.f32.eXmY %v949_v51, %v950_v50, 312  ;;  %v744_v16 = vmax.f32 %v705_v7, %v709_v4  ;;  %v2973_v41 = vmax.f32 %v816_v52, %v709_v4 }
  0xb5   : > { %v1083_v14 = vpack.c.b16 %v1043_v62, %v1043_v62  ;;  %v1085_v63 = vpack.c.b16 %v1044_v10, %v1044_v10  ;;  %v1087_v43 = vpack.c.b16 %v1045_v22, %v1045_v22  ;;  %v759_v51 = vmax.f32 %v727_v23, %v1955_v15 }
  0xb6   : > { %v1089_v2 = vpack.c.b16 %v1046_v1, %v1046_v1  ;;  %v1023_v44 = vpack.c.b8 %v1019_v6, %v2897_v38  ;;  %v2977_v55 = vmax.f32 %v744_v16, %v2965_v34  ;;  %1925 = vmatprep.mubr.msk.f32.mxu1 %vm1196_vm3, %v2973_v41  ;;  %v2982_v46 = vmax.f32 %v803_v35, %v2375_v53 }
  0xb7   : > { %v1084_v19 = vpack.c.b8 %v1083_v14, %v1083_v14  ;;  %v1086_v0 = vpack.c.b8 %v1085_v63, %v1085_v63  ;;  %v1088_v39 = vpack.c.b8 %v1087_v43, %v1087_v43  ;;  %v801_v53 = vmax.f32 %v759_v51, %v3328_v57  ;;  %v293_v57 = vld [vmem:[%s2049_s29 + $0x1a0] sm:$0xff] }
  0xb8   : > { %v1090_v47 = vpack.c.b8 %v1089_v2, %v1089_v2  ;;  %v1059_v26 = vunpack.c.0.s8 %v1023_v44  ;;  %v1060_v45 = vunpack.c.1.s8 %v1023_v44  ;;  %v1061_v38 = vunpack.c.2.s8 %v1023_v44 }
  0xb9   : > { %v1062_v3 = vunpack.c.3.s8 %v1023_v44  ;;  %1140 = vst.msk [vmem:[%s2054_s7 + $0x10] sm:$0x3] %vm1131_vm15, %v1084_v19  ;;  %1141 = vst.msk [vmem:[%s2054_s7 + $0x12] sm:$0x3] %vm1131_vm15, %v1086_v0  ;;  %vm874_vm9 = vcmp.eq.f32.partialorder %v2982_v46, 0.0  ;;  %v664_v15 = vmax.f32 %v2945_v11, %v2938_v21  ;;  %v671_v23 = vrot.slane %v291_v49, 1 }
  0xba   : > { %1142 = vst.msk [vmem:[%s2054_s7 + $0x14] sm:$0x3] %vm1131_vm15, %v1088_v39  ;;  %1143 = vst.msk [vmem:[%s2054_s7 + $0x16] sm:$0x3] %vm1131_vm15, %v1090_v47  ;;  %v1115_v54 = vpack.c.b16 %v1059_v26, %v1059_v26  ;;  %v1117_v9 = vpack.c.b16 %v1060_v45, %v1060_v45  ;;  %v1119_v56 = vpack.c.b16 %v1061_v38, %v1061_v38  ;;  %v906_v50 = vsel %vm874_vm9, 1.0, %v3308_v24 }
  0xbb   : > { %v1121_v4 = vpack.c.b16 %v1062_v3, %v1062_v3  ;;  %v840_v35 = vmax.f32 %v801_v53, %v2353_v40  ;;  %v672_v7 = vsel %vm343_vm1, %v669_v20, %v671_v23  ;;  %v710_v52 = vrot.slane %v291_v49, 2 }
  0xbc   : > { %v1116_v11 = vpack.c.b8 %v1115_v54, %v1115_v54  ;;  %v1118_v62 = vpack.c.b8 %v1117_v9, %v1117_v9  ;;  %v1120_v10 = vpack.c.b8 %v1119_v56, %v1119_v56  ;;  %v938_v1 = vtrunc.f32 %v906_v50 }
  0xbd   : > { %v1122_v22 = vpack.c.b8 %v1121_v4, %v1121_v4  ;;  %vm872_vm12 = vcmp.eq.f32.partialorder %v840_v35, 0.0  ;;  %1902 = vmatmul.mubr.msk.f32.gmra.mrb[12].mxu0 %vm1196_vm3, %v840_v35  ;;  %v706_v40 = vmax.f32 %v664_v15, %v672_v7  ;;  %v711_v6 = vsel %vm488_vm2, %v708_v28, %v710_v52  ;;  %v294_v28 = vld [vmem:[%s2049_s29 + $0x1a8] sm:$0x3] }
  0xbe   : > { %1156 = vst.msk [vmem:[%s2054_s7 + $0x30] sm:$0x3] %vm1131_vm15, %v1116_v11  ;;  %1157 = vst.msk [vmem:[%s2054_s7 + $0x32] sm:$0x3] %vm1131_vm15, %v1118_v62  ;;  %v820_v20 = vrot.slane %v2965_v34, 2  ;;  %v904_v16 = vsel %vm872_vm12, 1.0, %v3308_v24  ;;  %v775_v14 = vmax.f32 %v743_v32, %v2938_v21  ;;  %1904 = vmatprep.mubr.msk.f32.mxu0 %vm1196_vm3, %v2422_v60  ;;  %v1232_v43 = vadd.s32 %v2899_v25, %v2941_v5 }
  0xbf   : > { %1158 = vst.msk [vmem:[%s2054_s7 + $0x34] sm:$0x3] %vm1131_vm15, %v1120_v10  ;;  %1159 = vst.msk [vmem:[%s2054_s7 + $0x36] sm:$0x3] %vm1131_vm15, %v1122_v22  ;;  %v782_v63 = vrot.slane %v293_v57, 1  ;;  %v936_v2 = vtrunc.f32 %v904_v16  ;;  %v989_v44 = vpack.c.f32.eXmY %v937_v37, %v938_v1, 312  ;;  %v745_v51 = vmax.f32 %v706_v40, %v711_v6 }
  0xc0   : > { %v1177_v49 = vsel %vm872_vm12, 1, %v3309_v59  ;;  %v817_v19 = vmax.f32 %v775_v14, %v672_v7  ;;  %v821_v0 = vrot.slane %v293_v57, 2  ;;  %v784_v21 = vrot.slane %v294_v28, 1 }
  0xc1   : > { %v783_v18 = vsel %vm343_vm1, %v781_v61, %v782_v63  ;;  %v985_v60 = vpack.c.f32.eXmY %v935_v8, %v936_v2, 312  ;;  %v777_v33 = vmax.f32 %v745_v51, %v293_v57  ;;  %1905 = vmatmul.mubr.msk.f32.gmra.mrb[14].mxu0 %vm1196_vm3, %v2982_v46  ;;  %v823_v5 = vrot.slane %v294_v28, 2 }
  0xc2   : > { %v818_v25 = vmax.f32 %v2977_v55, %v783_v18  ;;  %v3039_v27 = vmax.f32 %v817_v19, %v711_v6  ;;  %v822_v37 = vsel %vm488_vm2, %v820_v20, %v821_v0  ;;  %vm887_vm13 = vcmp.eq.f32.partialorder %v2973_v41, 0.0 }
  0xc3   : > { %v993_v32 = vpack.c.b8 %v989_v44, %v985_v60  ;;  %v785_v34 = vsel %vm343_vm1, %v782_v63, %v784_v21  ;;  %v919_v42 = vsel %vm887_vm13, 1.0, %v3308_v24  ;;  %v1219_v8 = vsel %vm1196_vm3, %v1177_v49, 0 }
  0xc4   : > { %v3044_v61 = vmax.f32 %v818_v25, %v822_v37  ;;  %1926 = vmatmul.mubr.msk.f32.gmra.mrb[12].mxu1 %vm1196_vm3, %v3039_v27  ;;  %v819_v55 = vmax.f32 %v777_v33, %v785_v34  ;;  %v824_v39 = vsel %vm488_vm2, %v821_v0, %v823_v5  ;;  %vm888_vm5 = vcmp.eq.f32.partialorder %v3039_v27, 0.0 }
  0xc5   : > { %v1047_v47 = vunpack.c.0.s8 %v993_v32  ;;  %v1048_v26 = vunpack.c.1.s8 %v993_v32  ;;  %v1049_v45 = vunpack.c.2.s8 %v993_v32  ;;  %v1050_v38 = vunpack.c.3.s8 %v993_v32 }
  0xc6   : > { %1928 = vmatprep.mubr.msk.f32.mxu1 %vm1196_vm3, %v3044_v61  ;;  %v3056_v3 = vmax.f32 %v819_v55, %v824_v39  ;;  %vm889_vm1 = vcmp.eq.f32.partialorder %v3044_v61, 0.0  ;;  %v920_v53 = vsel %vm888_vm5, 1.0, %v3308_v24  ;;  %v951_v15 = vtrunc.f32 %v919_v42 }
  0xc7   : > { %v1091_v23 = vpack.c.b16 %v1047_v47, %v1047_v47  ;;  %v1093_v54 = vpack.c.b16 %v1048_v26, %v1048_v26  ;;  %v1095_v9 = vpack.c.b16 %v1049_v45, %v1049_v45  ;;  %v1097_v56 = vpack.c.b16 %v1050_v38, %v1050_v38 }
  0xc8   : > { %v1234_v4 = vadd.s32 %v1232_v43, %v1219_v8  ;;  %vm890_vm2 = vcmp.eq.f32.partialorder %v3056_v3, 0.0  ;;  %v921_v35 = vsel %vm889_vm1, 1.0, %v3308_v24  ;;  %v952_v50 = vtrunc.f32 %v920_v53  ;;  %1929 = vmatmul.mubr.msk.f32.gmra.mrb[14].mxu1 %vm1196_vm3, %v3056_v3 }
  0xc9   : > { %v1092_v57 = vpack.c.b8 %v1091_v23, %v1091_v23  ;;  %v1094_v7 = vpack.c.b8 %v1093_v54, %v1093_v54  ;;  %v1096_v52 = vpack.c.b8 %v1095_v9, %v1095_v9  ;;  %v1098_v11 = vpack.c.b8 %v1097_v56, %v1097_v56 }
  0xca   : > { %v922_v62 = vsel %vm890_vm2, 1.0, %v3308_v24  ;;  %v953_v10 = vtrunc.f32 %v921_v35  ;;  %v1179_v22 = vsel %vm874_vm9, 1, %v3309_v59  ;;  %v1025_v40 = vpack.c.f32.eXmY %v951_v15, %v952_v50, 312 }
  0xcb   : > { %1144 = vst.msk [vmem:[%s2054_s7 + $0x18] sm:$0x3] %vm1131_vm15, %v1092_v57  ;;  %1145 = vst.msk [vmem:[%s2054_s7 + $0x1a] sm:$0x3] %vm1131_vm15, %v1094_v7  ;;  %v954_v1 = vtrunc.f32 %v922_v62  ;;  %v1184_v6 = vsel %vm879_vm0, 1, %v3309_v59  ;;  %v1221_v24 = vsel %vm1196_vm3, %v2489_v58, 0 }
  0xcc   : > { %1146 = vst.msk [vmem:[%s2054_s7 + $0x1c] sm:$0x3] %vm1131_vm15, %v1096_v52  ;;  %1147 = vst.msk [vmem:[%s2054_s7 + $0x1e] sm:$0x3] %vm1131_vm15, %v1098_v11  ;;  %v1185_v46 = vsel %vm880_vm6, 1, %v3309_v59  ;;  %v1236_v16 = vadd.s32 %v1234_v4, %v1221_v24  ;;  %v1223_v14 = vsel %vm1196_vm3, %v1179_v22, 0 }
  0xcd   : > { %v1029_v20 = vpack.c.f32.eXmY %v953_v10, %v954_v1, 312  ;;  %v1186_v63 = vsel %vm881_vm8, 1, %v3309_v59  ;;  %v1233_v29 = vsel %vm1196_vm3, %v1184_v6, 0  ;;  %v1187_v58 = vsel %vm882_vm10, 1, %v3309_v59 }
  0xce   : > { %v1238_v43 = vadd.s32 %v1236_v16, %v1223_v14  ;;  %v1235_v2 = vsel %vm1196_vm3, %v1185_v46, 0  ;;  %v1237_v31 = vsel %vm1196_vm3, %v1186_v63, 0  ;;  %v1188_v17 = vsel %vm883_vm11, 1, %v3309_v59 }
  0xcf   : > { %v1033_v28 = vpack.c.b8 %v1029_v20, %v1025_v40  ;;  %v1239_v25 = vsel %vm1196_vm3, %v1187_v58, 0  ;;  %v1189_v42 = vsel %vm884_vm14, 1, %v3309_v59  ;;  %v1241_v30 = vsel %vm1196_vm3, %v1188_v17, 0 }
  0xd0   : > { %v1240_v19 = vadd.s32 %v1238_v43, %v1233_v29  ;;  %v1190_v55 = vsel %vm885_vm4, 1, %v3309_v59  ;;  %v1243_v47 = vsel %vm1196_vm3, %v1189_v42, 0  ;;  %v1191_v12 = vsel %vm886_vm7, 1, %v3309_v59 }
  0xd1   : > { %v1063_v48 = vunpack.c.0.s8 %v1033_v28  ;;  %v1064_v44 = vunpack.c.1.s8 %v1033_v28  ;;  %v1065_v51 = vunpack.c.2.s8 %v1033_v28  ;;  %v1066_v49 = vunpack.c.3.s8 %v1033_v28 }
  0xd2   : > { %v1242_v21 = vadd.s32 %v1240_v19, %v1235_v2  ;;  %v1245_v45 = vsel %vm1196_vm3, %v1190_v55, 0  ;;  %v1192_v38 = vsel %vm887_vm13, 1, %v3309_v59  ;;  %v1247_v15 = vsel %vm1196_vm3, %v1191_v12, 0 }
  0xd3   : > { %v1123_v0 = vpack.c.b16 %v1063_v48, %v1063_v48  ;;  %v1125_v18 = vpack.c.b16 %v1064_v44, %v1064_v44  ;;  %v1127_v60 = vpack.c.b16 %v1065_v51, %v1065_v51  ;;  %v1129_v33 = vpack.c.b16 %v1066_v49, %v1066_v49 }
  0xd4   : > { %v1244_v8 = vadd.s32 %v1242_v21, %v1237_v31  ;;  %v1193_v36 = vsel %vm888_vm5, 1, %v3309_v59  ;;  %v1249_v54 = vsel %vm1196_vm3, %v1192_v38, 0  ;;  %v1194_v13 = vsel %vm889_vm1, 1, %v3309_v59 }
  0xd5   : > { %v1124_v37 = vpack.c.b8 %v1123_v0, %v1123_v0  ;;  %v1126_v5 = vpack.c.b8 %v1125_v18, %v1125_v18  ;;  %v1128_v32 = vpack.c.b8 %v1127_v60, %v1127_v60  ;;  %v1130_v34 = vpack.c.b8 %v1129_v33, %v1129_v33 }
  0xd6   : > { %v1246_v39 = vadd.s32 %v1244_v8, %v1239_v25  ;;  %v1251_v56 = vsel %vm1196_vm3, %v1193_v36, 0  ;;  %v1195_v41 = vsel %vm890_vm2, 1, %v3309_v59  ;;  %v1253_v35 = vsel %vm1196_vm3, %v1194_v13, 0  ;;  %v3144_v59 = vld [vmem:[%s3270_s2] ss:$0 sm:$0xff] }
  0xd7   : > { %1160 = vst.msk [vmem:[%s2054_s7 + $0x38] sm:$0x3] %vm1131_vm15, %v1124_v37  ;;  %1161 = vst.msk [vmem:[%s2054_s7 + $0x3a] sm:$0x3] %vm1131_vm15, %v1126_v5  ;;  %v1255_v27 = vsel %vm1196_vm3, %v1195_v41, 0  ;;  %vm1652_vm3 = vcmask 64512  }
  0xd8   : > { %1162 = vst.msk [vmem:[%s2054_s7 + $0x3c] sm:$0x3] %vm1131_vm15, %v1128_v32  ;;  %1163 = vst.msk [vmem:[%s2054_s7 + $0x3e] sm:$0x3] %vm1131_vm15, %v1130_v34  ;;  %v1248_v26 = vadd.s32 %v1246_v39, %v1241_v30 }
  0xda   : > { %v1250_v53 = vadd.s32 %v1248_v26, %v1243_v47 }
  0xdc   : > { %v1252_v23 = vadd.s32 %v1250_v53, %v1245_v45 }
  0xde   : > { %v1254_v9 = vadd.s32 %v1252_v23, %v1247_v15 }
  0xe0   : > { %v1256_v4 = vadd.s32 %v1254_v9, %v1249_v54 }
  0xe2   : > { %v1257_v50 = vadd.s32 %v1256_v4, %v1251_v56 }
  0xe4   : > { %v1258_v57 = vadd.s32 %v1257_v50, %v1253_v35 }
  0xe6   : > { %v1259_v7 = vadd.s32 %v1258_v57, %v1255_v27 }
  0xe8   : > { %v1261_v52 = vshrl.u32 %v1259_v7, 16  ;;  %v1260_v61 = vand.u32 65535, %v1259_v7 }
  0xea   : > { %v1263_v11 = vcvt.s32.f32 %v1261_v52  ;;  %v1262_v62 = vcvt.s32.f32 %v1260_v61 }
  0xec   : > { %1266 = vadd.xlane.f32.xlu0 %v1263_v11 }
  0xf0   : > { %1264 = vadd.xlane.f32.xlu0 %v1262_v62 }
 0x106   : > { %v1885_v10 = vpop.f32.mrb[0].mxu0 }
 0x107   : > { %v1467_v3 = vadd.f32 %v1885_v10, %v3144_v59  ;;  %v1461_v22 = vpop.f32.mrb[1].mxu0 }
 0x108   : > { %v1462_v1 = vadd.f32 %v3144_v59, %v1461_v22 }
 0x109   : > { %v1621_v40 = vmax.f32 %v1467_v3, 0.0 }
 0x10a   : > { %v1620_v6 = vmax.f32 %v1462_v1, 0.0 }
 0x10b   : > { %1654 = vst.msk [vmem:[%s2044_s25 + $0x8] sm:$0xff] %vm1652_vm3, %v1621_v40 }
 0x10c   : > { %1653 = vst.msk [vmem:[%s2044_s25] sm:$0xff] %vm1652_vm3, %v1620_v6 }
 0x124   : > { %v1909_v24 = vpop.f32.mrb[0].mxu1 }
 0x125   : > { %v1547_v46 = vadd.f32 %v1909_v24, %v3144_v59  ;;  %v1541_v20 = vpop.f32.mrb[1].mxu1 }
 0x126   : > { %v1542_v16 = vadd.f32 %v3144_v59, %v1541_v20 }
 0x127   : > { %v1637_v14 = vmax.f32 %v1547_v46, 0.0 }
 0x128   : > { %v1636_v63 = vmax.f32 %v1542_v16, 0.0 }
 0x129   : > { %1670 = vst.msk [vmem:[%s2044_s25 + $0x88] sm:$0xff] %vm1652_vm3, %v1637_v14 }
 0x12a   : > { %1669 = vst.msk [vmem:[%s2044_s25 + $0x80] sm:$0xff] %vm1652_vm3, %v1636_v63 }
 0x136   : > { %v1888_v28 = vpop.f32.mrb[2].mxu0 }
 0x137   : > { %v1477_v43 = vadd.f32 %v1888_v28, %v3144_v59  ;;  %v1471_v29 = vpop.f32.mrb[3].mxu0 }
 0x138   : > { %v1472_v58 = vadd.f32 %v3144_v59, %v1471_v29 }
 0x139   : > { %v1623_v2 = vmax.f32 %v1477_v43, 0.0 }
 0x13a   : > { %v1622_v48 = vmax.f32 %v1472_v58, 0.0 }
 0x13b   : > { %1656 = vst.msk [vmem:[%s2044_s25 + $0x18] sm:$0xff] %vm1652_vm3, %v1623_v2 }
 0x13c   : > { %1655 = vst.msk [vmem:[%s2044_s25 + $0x10] sm:$0xff] %vm1652_vm3, %v1622_v48 }
 0x141   : > { %v1912_v44 = vpop.f32.mrb[2].mxu1 }
 0x142   : > { %v1557_v51 = vadd.f32 %v1912_v44, %v3144_v59  ;;  %v1551_v49 = vpop.f32.mrb[3].mxu1 }
 0x143   : > { %v1552_v19 = vadd.f32 %v3144_v59, %v1551_v49 }
 0x144   : > { %v1639_v31 = vmax.f32 %v1557_v51, 0.0 }
 0x145   : > { %v1638_v0 = vmax.f32 %v1552_v19, 0.0 }
 0x146   : > { %v1891_v18 = vpop.f32.mrb[4].mxu0  ;;  %1672 = vst.msk [vmem:[%s2044_s25 + $0x98] sm:$0xff] %vm1652_vm3, %v1639_v31 }
 0x147   : > { %v1487_v60 = vadd.f32 %v1891_v18, %v3144_v59  ;;  %v1481_v33 = vpop.f32.mrb[5].mxu0  ;;  %1671 = vst.msk [vmem:[%s2044_s25 + $0x90] sm:$0xff] %vm1652_vm3, %v1638_v0 }
 0x148   : > { %v1482_v17 = vadd.f32 %v3144_v59, %v1481_v33 }
 0x149   : > { %v1625_v21 = vmax.f32 %v1487_v60, 0.0 }
 0x14a   : > { %v1624_v25 = vmax.f32 %v1482_v17, 0.0 }
 0x14b   : > { %1658 = vst.msk [vmem:[%s2044_s25 + $0x28] sm:$0xff] %vm1652_vm3, %v1625_v21 }
 0x14c   : > { %1657 = vst.msk [vmem:[%s2044_s25 + $0x20] sm:$0xff] %vm1652_vm3, %v1624_v25 }
 0x14d   : > { %v1915_v37 = vpop.f32.mrb[4].mxu1 }
 0x14e   : > { %v1567_v5 = vadd.f32 %v1915_v37, %v3144_v59  ;;  %v1561_v32 = vpop.f32.mrb[5].mxu1 }
 0x14f   : > { %v1562_v34 = vadd.f32 %v3144_v59, %v1561_v32 }
 0x150   : > { %v1641_v42 = vmax.f32 %v1567_v5, 0.0 }
 0x151   : > { %v1640_v8 = vmax.f32 %v1562_v34, 0.0 }
 0x152   : > { %1674 = vst.msk [vmem:[%s2044_s25 + $0xa8] sm:$0xff] %vm1652_vm3, %v1641_v42 }
 0x153   : > { %1673 = vst.msk [vmem:[%s2044_s25 + $0xa0] sm:$0xff] %vm1652_vm3, %v1640_v8 }
 0x15c   : > { %v1894_v30 = vpop.f32.mrb[6].mxu0 }
 0x15d   : > { %v1497_v55 = vadd.f32 %v1894_v30, %v3144_v59  ;;  %v1491_v39 = vpop.f32.mrb[7].mxu0 }
 0x15e   : > { %v1492_v47 = vadd.f32 %v3144_v59, %v1491_v39 }
 0x15f   : > { %v1627_v12 = vmax.f32 %v1497_v55, 0.0 }
 0x160   : > { %v1918_v26 = vpop.f32.mrb[6].mxu1  ;;  %v1626_v45 = vmax.f32 %v1492_v47, 0.0 }
 0x161   : > { %1660 = vst.msk [vmem:[%s2044_s25 + $0x38] sm:$0xff] %vm1652_vm3, %v1627_v12  ;;  %v1577_v38 = vadd.f32 %v1918_v26, %v3144_v59  ;;  %v1571_v53 = vpop.f32.mrb[7].mxu1 }
 0x162   : > { %1659 = vst.msk [vmem:[%s2044_s25 + $0x30] sm:$0xff] %vm1652_vm3, %v1626_v45  ;;  %v1572_v15 = vadd.f32 %v3144_v59, %v1571_v53 }
 0x163   : > { %v1643_v36 = vmax.f32 %v1577_v38, 0.0 }
 0x164   : > { %v1642_v23 = vmax.f32 %v1572_v15, 0.0  ;;  %v1279_v15 = vlaneseq }
 0x165   : > { %1676 = vst.msk [vmem:[%s2044_s25 + $0xb8] sm:$0xff] %vm1652_vm3, %v1643_v36 }
 0x166   : > { %1675 = vst.msk [vmem:[%s2044_s25 + $0xb0] sm:$0xff] %vm1652_vm3, %v1642_v23  ;;  %v1280_v36 = vand.u32 127, %v1279_v15  ;;  %v1281_v23 = vld [vmem:[#allocation2] sm:$0x1] }
 0x168   : > { %vm1282_vm15 = vcmp.eq.s32.totalorder %v1280_v36, 0 }
 0x16f   : > { %v1897_v54 = vpop.f32.mrb[8].mxu0 }
 0x170   : > { %v1507_v13 = vadd.f32 %v1897_v54, %v3144_v59  ;;  %v1501_v9 = vpop.f32.mrb[9].mxu0 }
 0x171   : > { %v1502_v56 = vadd.f32 %v3144_v59, %v1501_v9 }
 0x172   : > { %v1629_v41 = vmax.f32 %v1507_v13, 0.0 }
 0x173   : > { %v1628_v4 = vmax.f32 %v1502_v56, 0.0 }
 0x174   : > { %1662 = vst.msk [vmem:[%s2044_s25 + $0x48] sm:$0xff] %vm1652_vm3, %v1629_v41 }
 0x175   : > { %v1921_v35 = vpop.f32.mrb[8].mxu1  ;;  %1661 = vst.msk [vmem:[%s2044_s25 + $0x40] sm:$0xff] %vm1652_vm3, %v1628_v4 }
 0x176   : > { %v1587_v50 = vadd.f32 %v1921_v35, %v3144_v59  ;;  %v1581_v27 = vpop.f32.mrb[9].mxu1 }
 0x177   : > { %v1582_v57 = vadd.f32 %v3144_v59, %v1581_v27 }
 0x178   : > { %v1645_v7 = vmax.f32 %v1587_v50, 0.0 }
 0x179   : > { %v1644_v52 = vmax.f32 %v1582_v57, 0.0  ;;  %v1267_v61 = vpop.xlane.xlu0 %1266 }
 0x17a   : > { %1678 = vst.msk [vmem:[%s2044_s25 + $0xc8] sm:$0xff] %vm1652_vm3, %v1645_v7  ;;  %v1269_v11 = vcvt.f32.s32 %v1267_v61 }
 0x17b   : > { %1677 = vst.msk [vmem:[%s2044_s25 + $0xc0] sm:$0xff] %vm1652_vm3, %v1644_v52 }
 0x17c   : > { %v1270_v1 = vshll.u32 %v1269_v11, 16 }
 0x17d   : > { %v1265_v10 = vpop.xlane.xlu0 %1264 }
 0x17e   : > { %v1900_v62 = vpop.f32.mrb[10].mxu0  ;;  %v1268_v40 = vcvt.f32.s32 %v1265_v10 }
 0x17f   : > { %v1517_v3 = vadd.f32 %v1900_v62, %v3144_v59  ;;  %v1511_v22 = vpop.f32.mrb[11].mxu0 }
 0x180   : > { %v1512_v6 = vadd.f32 %v3144_v59, %v1511_v22  ;;  %v1271_v46 = vadd.s32 %v1270_v1, %v1268_v40 }
 0x181   : > { %v1631_v24 = vmax.f32 %v1517_v3, 0.0 }
 0x182   : > { %v1630_v20 = vmax.f32 %v1512_v6, 0.0  ;;  %v1272_v14 = vrot.slane %v1271_v46, 4 }
 0x183   : > { %1664 = vst.msk [vmem:[%s2044_s25 + $0x58] sm:$0xff] %vm1652_vm3, %v1631_v24  ;;  %v1924_v16 = vpop.f32.mrb[10].mxu1 }
 0x184   : > { %v1597_v63 = vadd.f32 %v1924_v16, %v3144_v59  ;;  %1663 = vst.msk [vmem:[%s2044_s25 + $0x50] sm:$0xff] %vm1652_vm3, %v1630_v20  ;;  %v1591_v28 = vpop.f32.mrb[11].mxu1  ;;  %v1273_v29 = vadd.s32 %v1272_v14, %v1271_v46 }
 0x185   : > { %v1592_v43 = vadd.f32 %v3144_v59, %v1591_v28 }
 0x186   : > { %v1647_v58 = vmax.f32 %v1597_v63, 0.0  ;;  %v1274_v48 = vrot.slane %v1273_v29, 2 }
 0x187   : > { %v1646_v2 = vmax.f32 %v1592_v43, 0.0 }
 0x188   : > { %1680 = vst.msk [vmem:[%s2044_s25 + $0xd8] sm:$0xff] %vm1652_vm3, %v1647_v58  ;;  %v1275_v44 = vadd.s32 %v1274_v48, %v1273_v29 }
 0x189   : > { %1679 = vst.msk [vmem:[%s2044_s25 + $0xd0] sm:$0xff] %vm1652_vm3, %v1646_v2 }
 0x18a   : > { %v1276_v51 = vrot.slane %v1275_v44, 1 }
 0x18c   : > { %v1277_v49 = vadd.s32 %v1276_v51, %v1275_v44 }
 0x18e   : > { %1934 = vpush %v1277_v49 }
 0x190   : > { %v1903_v19 = vpop.f32.mrb[12].mxu0 }
 0x191   : > { %v1527_v31 = vadd.f32 %v1903_v19, %v3144_v59  ;;  %v1521_v0 = vpop.f32.mrb[13].mxu0 }
 0x192   : > { %v1522_v18 = vadd.f32 %v3144_v59, %v1521_v0 }
 0x193   : > { %v1633_v60 = vmax.f32 %v1527_v31, 0.0 }
 0x194   : > { %v1632_v33 = vmax.f32 %v1522_v18, 0.0  ;;  %v1906_v17 = vpop.f32.mrb[14].mxu0 }
 0x195   : > { %1666 = vst.msk [vmem:[%s2044_s25 + $0x68] sm:$0xff] %vm1652_vm3, %v1633_v60  ;;  %v1537_v21 = vadd.f32 %v1906_v17, %v3144_v59  ;;  %v1531_v25 = vpop.f32.mrb[15].mxu0 }
 0x196   : > { %1665 = vst.msk [vmem:[%s2044_s25 + $0x60] sm:$0xff] %vm1652_vm3, %v1632_v33  ;;  %v1532_v37 = vadd.f32 %v3144_v59, %v1531_v25 }
 0x197   : > { %v1927_v5 = vpop.f32.mrb[12].mxu1  ;;  %v1635_v32 = vmax.f32 %v1537_v21, 0.0 }
 0x198   : > { %v1607_v34 = vadd.f32 %v1927_v5, %v3144_v59  ;;  %v1601_v42 = vpop.f32.mrb[13].mxu1  ;;  %v1634_v8 = vmax.f32 %v1532_v37, 0.0 }
 0x199   : > { %v1602_v30 = vadd.f32 %v3144_v59, %v1601_v42  ;;  %1668 = vst.msk [vmem:[%s2044_s25 + $0x78] sm:$0xff] %vm1652_vm3, %v1635_v32 }
 0x19a   : > { %v1649_v55 = vmax.f32 %v1607_v34, 0.0  ;;  %1667 = vst.msk [vmem:[%s2044_s25 + $0x70] sm:$0xff] %vm1652_vm3, %v1634_v8 }
 0x19b   : > { %v1648_v39 = vmax.f32 %v1602_v30, 0.0  ;;  %v1930_v47 = vpop.f32.mrb[14].mxu1 }
 0x19c   : > { %1682 = vst.msk [vmem:[%s2044_s25 + $0xe8] sm:$0xff] %vm1652_vm3, %v1649_v55  ;;  %v1617_v12 = vadd.f32 %v1930_v47, %v3144_v59  ;;  %v1611_v26 = vpop.f32.mrb[15].mxu1 }
 0x19d   : > { %1681 = vst.msk [vmem:[%s2044_s25 + $0xe0] sm:$0xff] %vm1652_vm3, %v1648_v39  ;;  %v1612_v45 = vadd.f32 %v3144_v59, %v1611_v26 }
 0x19e   : > { %v1651_v38 = vmax.f32 %v1617_v12, 0.0 }
 0x19f   : > { %v1650_v53 = vmax.f32 %v1612_v45, 0.0 }
 0x1a0   : > { %1684 = vst.msk [vmem:[%s2044_s25 + $0xf8] sm:$0xff] %vm1652_vm3, %v1651_v38 }
 0x1a1   : > { %1683 = vst.msk [vmem:[%s2044_s25 + $0xf0] sm:$0xff] %vm1652_vm3, %v1650_v53 }
 0x1bf   : > { %s1935_s12 = spop %1934 }
 0x1c0   : > { %v1283_v54 = vstv %s1935_s12 }
 0x1c1   : > { %v1284_v13 = vsel %vm1282_vm15, %v1283_v54, 0 }
 0x1c2   : > { %v1285_v9 = vadd.s32 %v1284_v13, %v1281_v23 }
 0x1c4   : > { %1286 = vst [vmem:[#allocation2] sm:$0x1] %v1285_v9 }
 0x1c5   : > { %1970 = shalt.err (!%p1967_p12)
}
 0x1c6   : > { %s1971_s21 = scalar_lea.hbm %s3273_s5, 16 }
 0x1c7   : > { %p1972_p13 = scmp.ne.s32.totalorder %s3273_s5, %s1971_s21  ;;  %p1977_p2 = scmp.lt.u32.totalorder %s1971_s21, %s3273_s5 }
 0x1c9   : > { %p1973_p0 = pnand %p1972_p13, %p1940_p5 }
 0x1cb   : > { %p1974_p1 = pneg %p1973_p0 }
 0x1cd   : > { %p1979_p3 = pnand %p1977_p2, %p1974_p1 }
 0x1cf   : > { %1982 = shalt.err (!%p1979_p3)
}
 0x1d0   : > { %1937 = dma.vmem_to_hbm [thread:$0]  (%p1940_p5), %s1709_s14, 16, %s3273_s5, [#allocation3]  }
 0x1d1   : > { %1988 = dma.done.wait (%p1940_p5), [#allocation3], 16  }
 0x1d2   : > { %1990 = vsyncadd (%p1940_p5), [#allocation3], 4294967280 }
 0x1d3 PF: > { %s17_s18 = sadd.s32 1, %s1993_s18  }
 0x1d4   : > { %p14_p4 = scmp.ge.s32.totalorder %s17_s18, 4  }
 0x1d6   :  { %16 = sbr.rel (!%p14_p4) target bundleno = 1 (0x1), region = 87 }
 0x1dd   :  { %1737 = vsyncpa [#allocation3], 1 }
 0x1de   :  { %1739 = vsyncpa [#allocation3 + $0x1], 1 }

// kernel: inception_forward.5
= control target key start
LH: loop header
LB: loop body
LE: loop exit
PB: predicated region body
PF: predicated region fallthrough
CT: control target
= control target key end

     0   :  { %s2872_s30 = smov 0   ;;  %s4687_s0 = inlined_call_operand.vmem [shape: f32[512,4], index: 0, kind: input, shape index: {}]   ;;  %s4688_s1 = inlined_call_operand.vmem [shape: f32[4,24], index: 1, kind: input, shape index: {}]   ;;  %s4689_s2 = inlined_call_operand.vmem [shape: f32[1,24], index: 2, kind: input, shape index: {}]   ;;  %s4690_s3 = inlined_call_operand.vmem [shape: f32[512,8], index: 3, kind: output, shape index: {0}]   ;;  %s4691_s4 = inlined_call_operand.vmem [shape: f32[512,8], index: 4, kind: output, shape index: {1}]   ;;  %s4692_s5 = inlined_call_operand.vmem [shape: f32[512,8], index: 5, kind: output, shape index: {2}]   ;;  %s4693_s6 = inlined_call_operand.vmem [shape: s8[512,4], index: 6, kind: output, shape index: {3}]   ;;  %s4694_s7 = inlined_call_operand.vmem [shape: s8[512,8], index: 7, kind: output, shape index: {4}]   ;;  %s4695_s8 = inlined_call_operand.vmem [shape: s8[512,8], index: 8, kind: output, shape index: {5}]   ;;  %s4696_s9 = inlined_call_operand.vmem [shape: s32[1,128], index: 9, kind: output, shape index: {6}]  }
   0x1 LB: > { %s2878_s10 = sadd.s32 4294967295, %s2815_s30   ;;  %p2652_p0 = scmp.ge.s32.totalorder %s2815_s30, 1  ;;  %s2815_s30 = sphi %s2872_s30, %s20_s30  }
   0x2   : > { %p296_p1 = scmp.lt.s32.totalorder %s2815_s30, 3 }
   0x4   : > { %p297_p2 = pnand %p2652_p0, %p296_p1 }
   0x6   : > { %300 = sbr.rel (%p297_p2) target bundleno = 709 (0x2c5), region = 32 }
   0xd   : > { %s2653_s11 = sshll.u32 %s2878_s10, 5  ;;  %p2667_p4 = scmp.ne.s32.totalorder %s2878_s10, 0 }
   0xe   : > { %p358_p3 = scmp.lt.s32.totalorder %s2653_s11, 63  ;;  %v2817_v0 = vmov (!%p2667_p4), 0  }
   0xf   : > { %402 = sbr.rel (%p2667_p4) target bundleno = 22 (0x16), region = 36  ;;  %403 = vst [vmem:[%s4696_s9] sm:$0x1] (!%p2667_p4), %v2817_v0 }
  0x10   : > { %s4735_s11 = smov (!%p358_p3, %s2653_s11), 63 }
  0x11   : > { %s2654_s12 = sshll.u32 %s4735_s11, 3  ;;  %s2662_s13 = sshll.u32 %s4735_s11, 1 }
  0x12   : > { %s2886_s16 = scalar_lea.vmem %s4687_s0, %s2654_s12  ;;  %s2891_s19 = scalar_lea.vmem %s4690_s3, %s2654_s12 }
  0x13   : > { %s2896_s22 = scalar_lea.vmem %s4691_s4, %s2654_s12  ;;  %s2901_s25 = scalar_lea.vmem %s4692_s5, %s2654_s12 }
  0x14   : > { %s2906_s28 = scalar_lea.vmem %s4693_s6, %s2662_s13  ;;  %s2911_s14 = scalar_lea.vmem %s4694_s7, %s2662_s13 }
  0x15   : > { %s2916_s18 = scalar_lea.vmem %s4695_s8, %s2662_s13 }
  0x16 PF: > { %v1019_v1 = vld [vmem:[%s4688_s1] sm:$0xf]  ;;  %vm1123_vm0 = vcmask 1043456   ;;  %s2668_s13 = sshll.u32 %s2878_s10, 8  ;;  %v4697_v3 = vlaneseq  ;;  %vm936_vm2 = vcmask 31744   ;;  %v405_v6 = vld [vmem:[%s2886_s16 + $0x8] sm:$0xff] }
  0x17   : > { %v404_v2 = vld [vmem:[%s2886_s16] sm:$0xff]  ;;  %2738 = vmatprep.subr.msk.mxu0 %vm1123_vm0, %v1019_v1  ;;  %2788 = vmatprep.subr.msk.mxu1 %vm1123_vm0, %v1019_v1  ;;  %v2927_v4 = vstv %s2668_s13  ;;  %v421_v7 = vld [vmem:[%s2886_s16 + $0x88] sm:$0xff]  ;;  %v4700_v9 = vmov 0.0   ;;  %v2937_v11 = vld [vmem:[%s2886_s16 + $0x10] sm:$0xff]  ;;  %v4698_v13 = vmov 0   ;;  %vm568_vm4 = vcmp.eq.f32.partialorder %v405_v6, 0.0 }
  0x18   : > { %vm567_vm1 = vcmp.eq.f32.partialorder %v404_v2, 0.0  ;;  %v420_v5 = vld [vmem:[%s2886_s16 + $0x80] sm:$0xff]  ;;  %2739 = vmatpush3.msk.msra.mxu0 %vm1123_vm0, %v1019_v1  ;;  %2789 = vmatpush3.msk.msra.mxu1 %vm1123_vm0, %v1019_v1  ;;  %v2933_v8 = vshrl.u32 %v4697_v3, 7  ;;  %v2944_v16 = vld [vmem:[%s2886_s16 + $0x90] sm:$0xff]  ;;  %v600_v22 = vsel %vm568_vm4, 1.0, %v4700_v9  ;;  %vm584_vm5 = vcmp.eq.f32.partialorder %v421_v7, 0.0 }
  0x19   : > { %v599_v10 = vsel %vm567_vm1, 1.0, %v4700_v9  ;;  %vm583_vm3 = vcmp.eq.f32.partialorder %v420_v5, 0.0  ;;  %v872_v14 = vsel %vm567_vm1, 1, %v4698_v13  ;;  %2740 = vmatprep.mubr.msk.f32.mxu0 %vm936_vm2, %v404_v2  ;;  %2764 = vmatprep.mubr.msk.f32.mxu1 %vm936_vm2, %v420_v5  ;;  %v407_v24 = vld [vmem:[%s2886_s16 + $0x18] sm:$0xff]  ;;  %v873_v28 = vsel %vm568_vm4, 1, %v4698_v13  ;;  %v2969_v29 = vld [vmem:[%s2886_s16 + $0x20] sm:$0xff] }
  0x1a   : > { %v631_v12 = vtrunc.f32 %v599_v10  ;;  %v615_v15 = vsel %vm583_vm3, 1.0, %v4700_v9  ;;  %v471_v17 = vadd.s32 %v2927_v4, %v2933_v8  ;;  %v454_v18 = vadd.s32 128, %v2933_v8  ;;  %2741 = vmatmul.mubr.msk.f32.vlgmr.msra.gmra.mrb[0].mxu0 %vm936_vm2, %v405_v6  ;;  %2765 = vmatmul.mubr.msk.f32.vlgmr.msra.gmra.mrb[0].mxu1 %vm936_vm2, %v421_v7  ;;  %v2962_v25 = vld [vmem:[%s2886_s16 + $0x98] sm:$0xff]  ;;  %v2972_v30 = vld [vmem:[%s2886_s16 + $0xa0] sm:$0xff]  ;;  %v2995_v40 = vld [vmem:[%s2886_s16 + $0x28] sm:$0xff]  ;;  %s2820_s24 = smov 120  }
  0x1b   : > { %v888_v19 = vsel %vm583_vm3, 1, %v4698_v13  ;;  %v439_v20 = vadd.s32 8, %v2933_v8  ;;  %v647_v21 = vtrunc.f32 %v615_v15  ;;  %v455_v23 = vadd.s32 136, %v2933_v8  ;;  %2743 = vmatprep.mubr.msk.f32.mxu0 %vm936_vm2, %v2937_v11  ;;  %2767 = vmatprep.mubr.msk.f32.mxu1 %vm936_vm2, %v2944_v16  ;;  %v3000_v41 = vld [vmem:[%s2886_s16 + $0xa8] sm:$0xff]  ;;  %v3009_v46 = vld [vmem:[%s2886_s16 + $0x30] sm:$0xff]  ;;  %v3032_v59 = vld [vmem:[%s2886_s16 + $0x38] sm:$0xff] }
  0x1c   : > { %vm503_vm6 = vcmp.lt.s32.totalorder %v471_v17, 512  ;;  %v487_v26 = vadd.s32 %v2927_v4, %v454_v18  ;;  %v632_v32 = vtrunc.f32 %v600_v22  ;;  %v616_v34 = vsel %vm584_vm5, 1.0, %v4700_v9  ;;  %v3012_v47 = vld [vmem:[%s2886_s16 + $0xb0] sm:$0xff]  ;;  %v3037_v60 = vld [vmem:[%s2886_s16 + $0xb8] sm:$0xff]  ;;  %v3042_v0 = vld [vmem:[%s2886_s16 + $0x40] sm:$0xff]  ;;  %s2821_s26 = smov 112  }
  0x1d   : > { %v472_v27 = vadd.s32 %v2927_v4, %v439_v20  ;;  %v2975_v31 = vsel %vm503_vm6, 1, %v4698_v13  ;;  %v488_v33 = vadd.s32 %v2927_v4, %v455_v23  ;;  %v889_v36 = vsel %vm584_vm5, 1, %v4698_v13  ;;  %v3045_v1 = vld [vmem:[%s2886_s16 + $0xc0] sm:$0xff]  ;;  %v3064_v18 = vld [vmem:[%s2886_s16 + $0x48] sm:$0xff]  ;;  %v3075_v22 = vld [vmem:[%s2886_s16 + $0x50] sm:$0xff] }
  0x1e   : > { %v904_v35 = vmul.u32 %v872_v14, %v2975_v31  ;;  %vm519_vm7 = vcmp.lt.s32.totalorder %v487_v26, 512  ;;  %2744 = vmatmul.mubr.msk.f32.gmra.mrb[2].mxu0 %vm936_vm2, %v407_v24  ;;  %2768 = vmatmul.mubr.msk.f32.gmra.mrb[2].mxu1 %vm936_vm2, %v2962_v25  ;;  %v648_v39 = vtrunc.f32 %v616_v34  ;;  %v663_v48 = vpack.c.f32.eXmY %v631_v12, %v632_v32, 312  ;;  %v3078_v23 = vld [vmem:[%s2886_s16 + $0xd0] sm:$0xff] }
  0x1f   : > { %vm504_vm8 = vcmp.lt.s32.totalorder %v472_v27, 512  ;;  %v2987_v37 = vsel %vm519_vm7, 1, %v4698_v13  ;;  %vm520_vm9 = vcmp.lt.s32.totalorder %v488_v33, 512  ;;  %2746 = vmatprep.mubr.msk.f32.mxu0 %vm936_vm2, %v2969_v29  ;;  %2770 = vmatprep.mubr.msk.f32.mxu1 %vm936_vm2, %v2972_v30  ;;  %v440_v50 = vadd.s32 16, %v2933_v8 }
  0x20   : > { %v2990_v38 = vsel %vm504_vm8, 1, %v4698_v13  ;;  %v937_v42 = vsel %vm936_vm2, %v904_v35, 0  ;;  %v920_v43 = vmul.u32 %v888_v19, %v2987_v37  ;;  %v3006_v45 = vsel %vm520_vm9, 1, %v4698_v13  ;;  %v3069_v19 = vld [vmem:[%s2886_s16 + $0xc8] sm:$0xff] }
  0x21   : > { %v905_v44 = vmul.u32 %v873_v28, %v2990_v38  ;;  %v921_v49 = vmul.u32 %v889_v36, %v3006_v45  ;;  %vm569_vm10 = vcmp.eq.f32.partialorder %v2937_v11, 0.0  ;;  %v3019_v53 = vpack.c.f32.eXmY %v647_v21, %v648_v39, 312 }
  0x22   : > { %v965_v51 = vsel %vm936_vm2, %v920_v43, 0  ;;  %v601_v54 = vsel %vm569_vm10, 1.0, %v4700_v9  ;;  %2747 = vmatmul.mubr.msk.f32.gmra.mrb[4].mxu0 %vm936_vm2, %v2995_v40  ;;  %2771 = vmatmul.mubr.msk.f32.gmra.mrb[4].mxu1 %vm936_vm2, %v3000_v41  ;;  %v473_v57 = vadd.s32 %v2927_v4, %v440_v50  ;;  %v874_v58 = vsel %vm569_vm10, 1, %v4698_v13  ;;  %v3107_v50 = vld [vmem:[%s2886_s16 + $0x60] sm:$0xff] }
  0x23   : > { %v938_v52 = vsel %vm936_vm2, %v905_v44, 0  ;;  %v942_v55 = vadd.s32 %v965_v51, %v937_v42  ;;  %v967_v56 = vsel %vm936_vm2, %v921_v49, 0  ;;  %2749 = vmatprep.mubr.msk.f32.mxu0 %vm936_vm2, %v3009_v46  ;;  %2773 = vmatprep.mubr.msk.f32.mxu1 %vm936_vm2, %v3012_v47  ;;  %v633_v61 = vtrunc.f32 %v601_v54  ;;  %v3110_v51 = vld [vmem:[%s2886_s16 + $0xd8] sm:$0xff] }
  0x24   : > { %v441_v62 = vadd.s32 24, %v2933_v8  ;;  %vm570_vm11 = vcmp.eq.f32.partialorder %v407_v24, 0.0  ;;  %v456_v63 = vadd.s32 144, %v2933_v8  ;;  %vm505_vm12 = vcmp.lt.s32.totalorder %v473_v57, 512 }
  0x25   : > { %v944_v2 = vadd.s32 %v942_v55, %v938_v52  ;;  %v602_v5 = vsel %vm570_vm11, 1.0, %v4700_v9  ;;  %v875_v6 = vsel %vm570_vm11, 1, %v4698_v13  ;;  %v3050_v7 = vsel %vm505_vm12, 1, %v4698_v13 }
  0x26   : > { %v474_v10 = vadd.s32 %v2927_v4, %v441_v62  ;;  %v634_v11 = vtrunc.f32 %v602_v5  ;;  %v489_v12 = vadd.s32 %v2927_v4, %v456_v63  ;;  %2750 = vmatmul.mubr.msk.f32.gmra.mrb[6].mxu0 %vm936_vm2, %v3032_v59  ;;  %2774 = vmatmul.mubr.msk.f32.gmra.mrb[6].mxu1 %vm936_vm2, %v3037_v60  ;;  %v906_v15 = vmul.u32 %v874_v58, %v3050_v7 }
  0x27   : > { %v946_v14 = vadd.s32 %v967_v56, %v944_v2  ;;  %vm839_vm13 = vcmask 25600   ;;  %vm585_vm14 = vcmp.eq.f32.partialorder %v2944_v16, 0.0  ;;  %v457_v17 = vadd.s32 152, %v2933_v8  ;;  %2752 = vmatprep.mubr.msk.f32.mxu0 %vm936_vm2, %v3042_v0  ;;  %2776 = vmatprep.mubr.msk.f32.mxu1 %vm936_vm2, %v3045_v1  ;;  %v3102_v16 = vld [vmem:[%s2886_s16 + $0x58] sm:$0xff]  ;;  %v3118_v56 = vld [vmem:[%s2886_s16 + $0xe0] sm:$0xff] }
  0x28   : > { %vm506_vm15 = vcmp.lt.s32.totalorder %v474_v10, 512  ;;  %v667_v20 = vpack.c.f32.eXmY %v633_v61, %v634_v11, 312  ;;  %vm521_vm0 = vcmp.lt.s32.totalorder %v489_v12, 512  ;;  %v617_v21 = vsel %vm585_vm14, 1.0, %v4700_v9  ;;  %v3131_v10 = vld [vmem:[%s2886_s16 + $0x68] sm:$0xff] }
  0x29   : > { %v939_v24 = vsel %vm936_vm2, %v906_v15, 0  ;;  %v3082_v26 = vsel %vm506_vm15, 1, %v4698_v13  ;;  %v3085_v27 = vsel %vm521_vm0, 1, %v4698_v13  ;;  %v649_v28 = vtrunc.f32 %v617_v21 }
  0x2a   : > { %v948_v32 = vadd.s32 %v946_v14, %v939_v24  ;;  %v671_v33 = vpack.c.b8 %v667_v20, %v663_v48  ;;  %v907_v34 = vmul.u32 %v875_v6, %v3082_v26  ;;  %v890_v35 = vsel %vm585_vm14, 1, %v4698_v13  ;;  %2753 = vmatmul.mubr.msk.f32.gmra.mrb[8].mxu0 %vm936_vm2, %v3064_v18  ;;  %2777 = vmatmul.mubr.msk.f32.gmra.mrb[8].mxu1 %vm936_vm2, %v3069_v19 }
  0x2b   : > { %v922_v36 = vmul.u32 %v890_v35, %v3085_v27  ;;  %v490_v39 = vadd.s32 %v2927_v4, %v457_v17  ;;  %vm586_vm1 = vcmp.eq.f32.partialorder %v2962_v25, 0.0  ;;  %v442_v42 = vadd.s32 32, %v2933_v8  ;;  %2755 = vmatprep.mubr.msk.f32.mxu0 %vm936_vm2, %v3075_v22  ;;  %2779 = vmatprep.mubr.msk.f32.mxu1 %vm936_vm2, %v3078_v23  ;;  %v3136_v17 = vld [vmem:[%s2886_s16 + $0x70] sm:$0xff]  ;;  %v3141_v25 = vld [vmem:[%s2886_s16 + $0xe8] sm:$0xff] }
  0x2c   : > { %v743_v43 = vunpack.c.0.s8 %v671_v33  ;;  %v744_v44 = vunpack.c.1.s8 %v671_v33  ;;  %v745_v48 = vunpack.c.2.s8 %v671_v33  ;;  %v746_v49 = vunpack.c.3.s8 %v671_v33  ;;  %v3146_v33 = vld [vmem:[%s2886_s16 + $0xf0] sm:$0xff] }
  0x2d   : > { %v940_v52 = vsel %vm936_vm2, %v907_v34, 0  ;;  %v969_v54 = vsel %vm936_vm2, %v922_v36, 0  ;;  %vm522_vm3 = vcmp.lt.s32.totalorder %v490_v39, 512  ;;  %v618_v55 = vsel %vm586_vm1, 1.0, %v4700_v9 }
  0x2e   : > { %v775_v57 = vpack.c.b16 %v743_v43, %v743_v43  ;;  %v777_v58 = vpack.c.b16 %v744_v44, %v744_v44  ;;  %v779_v61 = vpack.c.b16 %v745_v48, %v745_v48  ;;  %v781_v62 = vpack.c.b16 %v746_v49, %v746_v49  ;;  %2756 = vmatmul.mubr.msk.f32.gmra.mrb[10].mxu0 %vm936_vm2, %v3102_v16  ;;  %v3179_v48 = vld [vmem:[%s2886_s16 + $0xf8] sm:$0xff] }
  0x2f   : > { %v950_v63 = vadd.s32 %v948_v32, %v940_v52  ;;  %v3123_v2 = vsel %vm522_vm3, 1, %v4698_v13  ;;  %v650_v5 = vtrunc.f32 %v618_v55  ;;  %v891_v6 = vsel %vm586_vm1, 1, %v4698_v13  ;;  %2758 = vmatprep.mubr.msk.f32.mxu0 %vm936_vm2, %v3107_v50  ;;  %2780 = vmatmul.mubr.msk.f32.gmra.mrb[10].mxu1 %vm936_vm2, %v3110_v51 }
  0x30   : > { %v776_v11 = vpack.c.b8 %v775_v57, %v775_v57  ;;  %v778_v12 = vpack.c.b8 %v777_v58, %v777_v58  ;;  %v780_v14 = vpack.c.b8 %v779_v61, %v779_v61  ;;  %v782_v15 = vpack.c.b8 %v781_v62, %v781_v62  ;;  %2782 = vmatprep.mubr.msk.f32.mxu1 %vm936_vm2, %v3118_v56 }
  0x31   : > { %v952_v20 = vadd.s32 %v969_v54, %v950_v63  ;;  %v707_v21 = vpack.c.f32.eXmY %v649_v28, %v650_v5, 312  ;;  %v923_v24 = vmul.u32 %v891_v6, %v3123_v2  ;;  %v475_v32 = vadd.s32 %v2927_v4, %v442_v42 }
  0x32   : > { %840 = vst.msk [vmem:[%s2906_s28] sm:$0x3] %vm839_vm13, %v776_v11  ;;  %841 = vst.msk [vmem:[%s2906_s28 + $0x2] sm:$0x3] %vm839_vm13, %v778_v12  ;;  %vm571_vm4 = vcmp.eq.f32.partialorder %v2969_v29, 0.0  ;;  %v443_v34 = vadd.s32 40, %v2933_v8  ;;  %2759 = vmatmul.mubr.msk.f32.gmra.mrb[12].mxu0 %vm936_vm2, %v3131_v10 }
  0x33   : > { %842 = vst.msk [vmem:[%s2906_s28 + $0x4] sm:$0x3] %vm839_vm13, %v780_v14  ;;  %843 = vst.msk [vmem:[%s2906_s28 + $0x6] sm:$0x3] %vm839_vm13, %v782_v15  ;;  %vm572_vm5 = vcmp.eq.f32.partialorder %v2995_v40, 0.0  ;;  %v444_v28 = vadd.s32 48, %v2933_v8  ;;  %v711_v35 = vpack.c.b8 %v707_v21, %v3019_v53  ;;  %2761 = vmatprep.mubr.msk.f32.mxu0 %vm936_vm2, %v3136_v17  ;;  %2783 = vmatmul.mubr.msk.f32.gmra.mrb[12].mxu1 %vm936_vm2, %v3141_v25 }
  0x34   : > { %v971_v36 = vsel %vm936_vm2, %v923_v24, 0  ;;  %vm507_vm6 = vcmp.lt.s32.totalorder %v475_v32, 512  ;;  %v603_v39 = vsel %vm571_vm4, 1.0, %v4700_v9  ;;  %v3168_v29 = vld [vmem:[%s2886_s16 + $0x78] sm:$0xff]  ;;  %v876_v53 = vsel %vm571_vm4, 1, %v4698_v13  ;;  %2785 = vmatprep.mubr.msk.f32.mxu1 %vm936_vm2, %v3146_v33 }
  0x35   : > { %v954_v42 = vadd.s32 %v971_v36, %v952_v20  ;;  %v3173_v43 = vsel %vm507_vm6, 1, %v4698_v13  ;;  %v635_v44 = vtrunc.f32 %v603_v39  ;;  %v759_v49 = vunpack.c.0.s8 %v711_v35 }
  0x36   : > { %v760_v52 = vunpack.c.1.s8 %v711_v35  ;;  %v761_v54 = vunpack.c.2.s8 %v711_v35  ;;  %v762_v55 = vunpack.c.3.s8 %v711_v35  ;;  %v908_v57 = vmul.u32 %v876_v53, %v3173_v43  ;;  %2762 = vmatmul.mubr.msk.f32.gmra.mrb[14].mxu0 %vm936_vm2, %v3168_v29 }
  0x37   : > { %v476_v58 = vadd.s32 %v2927_v4, %v443_v34  ;;  %v604_v61 = vsel %vm572_vm5, 1.0, %v4700_v9  ;;  %v877_v62 = vsel %vm572_vm5, 1, %v4698_v13  ;;  %v807_v63 = vpack.c.b16 %v759_v49, %v759_v49  ;;  %2786 = vmatmul.mubr.msk.f32.gmra.mrb[14].mxu1 %vm936_vm2, %v3179_v48 }
  0x38   : > { %v809_v5 = vpack.c.b16 %v760_v52, %v760_v52  ;;  %v811_v6 = vpack.c.b16 %v761_v54, %v761_v54  ;;  %v813_v11 = vpack.c.b16 %v762_v55, %v762_v55  ;;  %v941_v12 = vsel %vm936_vm2, %v908_v57, 0 }
  0x39   : > { %vm508_vm7 = vcmp.lt.s32.totalorder %v476_v58, 512  ;;  %v636_v14 = vtrunc.f32 %v604_v61  ;;  %v477_v40 = vadd.s32 %v2927_v4, %v444_v28  ;;  %v808_v15 = vpack.c.b8 %v807_v63, %v807_v63 }
  0x3a   : > { %v810_v20 = vpack.c.b8 %v809_v5, %v809_v5  ;;  %v812_v21 = vpack.c.b8 %v811_v6, %v811_v6  ;;  %v814_v24 = vpack.c.b8 %v813_v11, %v813_v11  ;;  %v956_v32 = vadd.s32 %v954_v42, %v941_v12 }
  0x3b   : > { %v3196_v34 = vsel %vm508_vm7, 1, %v4698_v13  ;;  %v673_v35 = vpack.c.f32.eXmY %v635_v44, %v636_v14, 312  ;;  %vm509_vm8 = vcmp.lt.s32.totalorder %v477_v40, 512  ;;  %856 = vst.msk [vmem:[%s2906_s28 + $0x20] sm:$0x3] %vm839_vm13, %v808_v15  ;;  %vm573_vm9 = vcmp.eq.f32.partialorder %v3009_v46, 0.0 }
  0x3c   : > { %857 = vst.msk [vmem:[%s2906_s28 + $0x22] sm:$0x3] %vm839_vm13, %v810_v20  ;;  %858 = vst.msk [vmem:[%s2906_s28 + $0x24] sm:$0x3] %vm839_vm13, %v812_v21  ;;  %v909_v28 = vmul.u32 %v877_v62, %v3196_v34  ;;  %v3208_v36 = vsel %vm509_vm8, 1, %v4698_v13  ;;  %v445_v39 = vadd.s32 56, %v2933_v8 }
  0x3d   : > { %859 = vst.msk [vmem:[%s2906_s28 + $0x26] sm:$0x3] %vm839_vm13, %v814_v24  ;;  %v605_v42 = vsel %vm573_vm9, 1.0, %v4700_v9  ;;  %v878_v44 = vsel %vm573_vm9, 1, %v4698_v13  ;;  %vm574_vm10 = vcmp.eq.f32.partialorder %v3032_v59, 0.0  ;;  %v446_v53 = vadd.s32 64, %v2933_v8 }
  0x3e   : > { %v943_v49 = vsel %vm936_vm2, %v909_v28, 0  ;;  %v637_v52 = vtrunc.f32 %v605_v42  ;;  %v910_v54 = vmul.u32 %v878_v44, %v3208_v36  ;;  %v478_v55 = vadd.s32 %v2927_v4, %v445_v39 }
  0x3f   : > { %v958_v57 = vadd.s32 %v956_v32, %v943_v49  ;;  %v606_v46 = vsel %vm574_vm10, 1.0, %v4700_v9  ;;  %v879_v58 = vsel %vm574_vm10, 1, %v4698_v13  ;;  %v479_v61 = vadd.s32 %v2927_v4, %v446_v53 }
  0x40   : > { %v945_v62 = vsel %vm936_vm2, %v910_v54, 0  ;;  %vm510_vm11 = vcmp.lt.s32.totalorder %v478_v55, 512  ;;  %v638_v59 = vtrunc.f32 %v606_v46  ;;  %vm575_vm12 = vcmp.eq.f32.partialorder %v3042_v0, 0.0 }
  0x41   : > { %v966_v63 = vadd.s32 %v958_v57, %v945_v62  ;;  %v3225_v5 = vsel %vm510_vm11, 1, %v4698_v13  ;;  %vm511_vm14 = vcmp.lt.s32.totalorder %v479_v61, 512  ;;  %v607_v6 = vsel %vm575_vm12, 1.0, %v4700_v9 }
  0x42   : > { %v677_v11 = vpack.c.f32.eXmY %v637_v52, %v638_v59, 312  ;;  %v911_v12 = vmul.u32 %v879_v58, %v3225_v5  ;;  %v3230_v14 = vsel %vm511_vm14, 1, %v4698_v13  ;;  %v639_v40 = vtrunc.f32 %v607_v6 }
  0x43   : > { %v880_v15 = vsel %vm575_vm12, 1, %v4698_v13  ;;  %v458_v20 = vadd.s32 160, %v2933_v8  ;;  %vm587_vm15 = vcmp.eq.f32.partialorder %v2972_v30, 0.0  ;;  %v447_v0 = vadd.s32 72, %v2933_v8 }
  0x44   : > { %v681_v21 = vpack.c.b8 %v677_v11, %v673_v35  ;;  %v947_v24 = vsel %vm936_vm2, %v911_v12, 0  ;;  %v912_v32 = vmul.u32 %v880_v15, %v3230_v14  ;;  %v619_v28 = vsel %vm587_vm15, 1.0, %v4700_v9 }
  0x45   : > { %v960_v39 = vadd.s32 %v966_v63, %v947_v24  ;;  %v491_v42 = vadd.s32 %v2927_v4, %v458_v20  ;;  %v651_v44 = vtrunc.f32 %v619_v28  ;;  %v892_v53 = vsel %vm587_vm15, 1, %v4698_v13 }
  0x46   : > { %v747_v49 = vunpack.c.0.s8 %v681_v21  ;;  %v748_v52 = vunpack.c.1.s8 %v681_v21  ;;  %v749_v54 = vunpack.c.2.s8 %v681_v21  ;;  %v750_v55 = vunpack.c.3.s8 %v681_v21 }
  0x47   : > { %v949_v30 = vsel %vm936_vm2, %v912_v32, 0  ;;  %vm523_vm0 = vcmp.lt.s32.totalorder %v491_v42, 512  ;;  %v480_v35 = vadd.s32 %v2927_v4, %v447_v0  ;;  %vm576_vm1 = vcmp.eq.f32.partialorder %v3064_v18, 0.0 }
  0x48   : > { %v783_v57 = vpack.c.b16 %v747_v49, %v747_v49  ;;  %v785_v46 = vpack.c.b16 %v748_v52, %v748_v52  ;;  %v787_v58 = vpack.c.b16 %v749_v54, %v749_v54  ;;  %v789_v61 = vpack.c.b16 %v750_v55, %v750_v55 }
  0x49   : > { %v968_v62 = vadd.s32 %v960_v39, %v949_v30  ;;  %v3245_v59 = vsel %vm523_vm0, 1, %v4698_v13  ;;  %vm512_vm3 = vcmp.lt.s32.totalorder %v480_v35, 512  ;;  %v608_v63 = vsel %vm576_vm1, 1.0, %v4700_v9 }
  0x4a   : > { %v784_v6 = vpack.c.b8 %v783_v57, %v783_v57  ;;  %v786_v11 = vpack.c.b8 %v785_v46, %v785_v46  ;;  %v788_v12 = vpack.c.b8 %v787_v58, %v787_v58  ;;  %v790_v15 = vpack.c.b8 %v789_v61, %v789_v61 }
  0x4b   : > { %v924_v20 = vmul.u32 %v892_v53, %v3245_v59  ;;  %v3252_v0 = vsel %vm512_vm3, 1, %v4698_v13  ;;  %v640_v21 = vtrunc.f32 %v608_v63  ;;  %v881_v24 = vsel %vm576_vm1, 1, %v4698_v13 }
  0x4c   : > { %844 = vst.msk [vmem:[%s2906_s28 + $0x8] sm:$0x3] %vm839_vm13, %v784_v6  ;;  %845 = vst.msk [vmem:[%s2906_s28 + $0xa] sm:$0x3] %vm839_vm13, %v786_v11  ;;  %v913_v32 = vmul.u32 %v881_v24, %v3252_v0  ;;  %v459_v28 = vadd.s32 168, %v2933_v8  ;;  %vm588_vm4 = vcmp.eq.f32.partialorder %v3000_v41, 0.0 }
  0x4d   : > { %846 = vst.msk [vmem:[%s2906_s28 + $0xc] sm:$0x3] %vm839_vm13, %v788_v12  ;;  %847 = vst.msk [vmem:[%s2906_s28 + $0xe] sm:$0x3] %vm839_vm13, %v790_v15  ;;  %v448_v39 = vadd.s32 80, %v2933_v8  ;;  %v973_v42 = vsel %vm936_vm2, %v924_v20, 0 }
  0x4e   : > { %v683_v18 = vpack.c.f32.eXmY %v639_v40, %v640_v21, 312  ;;  %v620_v53 = vsel %vm588_vm4, 1.0, %v4700_v9  ;;  %v893_v49 = vsel %vm588_vm4, 1, %v4698_v13  ;;  %v962_v52 = vadd.s32 %v973_v42, %v968_v62 }
  0x4f   : > { %v951_v54 = vsel %vm936_vm2, %v913_v32, 0  ;;  %v492_v55 = vadd.s32 %v2927_v4, %v459_v28  ;;  %v652_v30 = vtrunc.f32 %v620_v53  ;;  %v481_v35 = vadd.s32 %v2927_v4, %v448_v39 }
  0x50   : > { %vm577_vm5 = vcmp.eq.f32.partialorder %v3075_v22, 0.0  ;;  %v460_v41 = vadd.s32 176, %v2933_v8  ;;  %vm589_vm6 = vcmp.eq.f32.partialorder %v3012_v47, 0.0  ;;  %v970_v57 = vadd.s32 %v962_v52, %v951_v54 }
  0x51   : > { %vm524_vm7 = vcmp.lt.s32.totalorder %v492_v55, 512  ;;  %v713_v40 = vpack.c.f32.eXmY %v651_v44, %v652_v30, 312  ;;  %v609_v46 = vsel %vm577_vm5, 1.0, %v4700_v9  ;;  %vm513_vm8 = vcmp.lt.s32.totalorder %v481_v35, 512 }
  0x52   : > { %v3280_v58 = vsel %vm524_vm7, 1, %v4698_v13  ;;  %v641_v61 = vtrunc.f32 %v609_v46  ;;  %v882_v62 = vsel %vm577_vm5, 1, %v4698_v13  ;;  %v3285_v22 = vsel %vm513_vm8, 1, %v4698_v13 }
  0x53   : > { %v925_v63 = vmul.u32 %v893_v49, %v3280_v58  ;;  %v493_v6 = vadd.s32 %v2927_v4, %v460_v41  ;;  %v621_v47 = vsel %vm589_vm6, 1.0, %v4700_v9  ;;  %v914_v44 = vmul.u32 %v882_v62, %v3285_v22 }
  0x54   : > { %v653_v11 = vtrunc.f32 %v621_v47  ;;  %v894_v12 = vsel %vm589_vm6, 1, %v4698_v13  ;;  %v449_v15 = vadd.s32 88, %v2933_v8  ;;  %vm578_vm10 = vcmp.eq.f32.partialorder %v3102_v16, 0.0 }
  0x55   : > { %v975_v20 = vsel %vm936_vm2, %v925_v63, 0  ;;  %vm525_vm9 = vcmp.lt.s32.totalorder %v493_v6, 512  ;;  %v461_v21 = vadd.s32 184, %v2933_v8  ;;  %v953_v32 = vsel %vm936_vm2, %v914_v44, 0 }
  0x56   : > { %v964_v24 = vadd.s32 %v975_v20, %v970_v57  ;;  %v3297_v28 = vsel %vm525_vm9, 1, %v4698_v13  ;;  %v482_v39 = vadd.s32 %v2927_v4, %v449_v15  ;;  %v610_v53 = vsel %vm578_vm10, 1.0, %v4700_v9 }
  0x57   : > { %v926_v42 = vmul.u32 %v894_v12, %v3297_v28  ;;  %v883_v49 = vsel %vm578_vm10, 1, %v4698_v13  ;;  %v494_v52 = vadd.s32 %v2927_v4, %v461_v21  ;;  %v642_v16 = vtrunc.f32 %v610_v53 }
  0x58   : > { %v972_v54 = vadd.s32 %v964_v24, %v953_v32  ;;  %vm514_vm11 = vcmp.lt.s32.totalorder %v482_v39, 512  ;;  %vm590_vm12 = vcmp.eq.f32.partialorder %v3037_v60, 0.0  ;;  %v450_v60 = vadd.s32 96, %v2933_v8 }
  0x59   : > { %v977_v55 = vsel %vm936_vm2, %v926_v42, 0  ;;  %v3307_v30 = vsel %vm514_vm11, 1, %v4698_v13  ;;  %vm526_vm14 = vcmp.lt.s32.totalorder %v494_v52, 512  ;;  %v622_v35 = vsel %vm590_vm12, 1.0, %v4700_v9 }
  0x5a   : > { %v974_v41 = vadd.s32 %v977_v55, %v972_v54  ;;  %v687_v57 = vpack.c.f32.eXmY %v641_v61, %v642_v16, 312  ;;  %v915_v46 = vmul.u32 %v883_v49, %v3307_v30  ;;  %v3312_v62 = vsel %vm526_vm14, 1, %v4698_v13 }
  0x5b   : > { %4712 = vst [vmem:[#allocation2_spill] sm:$0xff] %v3312_v62  ;;  %v654_v63 = vtrunc.f32 %v622_v35  ;;  %v895_v6 = vsel %vm590_vm12, 1, %v4698_v13  ;;  %vm579_vm15 = vcmp.eq.f32.partialorder %v3107_v50, 0.0  ;;  %v483_v21 = vadd.s32 %v2927_v4, %v450_v60 }
  0x5c   : > { %v691_v47 = vpack.c.b8 %v687_v57, %v683_v18  ;;  %v955_v44 = vsel %vm936_vm2, %v915_v46, 0  ;;  %v927_v12 = vmul.u32 %v895_v6, %v3312_v62  ;;  %v3322_v61 = vsel %vm579_vm15, 1.0, %v4700_v9 }
  0x5d   : > { %v976_v15 = vadd.s32 %v974_v41, %v955_v44  ;;  %v717_v20 = vpack.c.f32.eXmY %v653_v11, %v654_v63, 312  ;;  %v643_v24 = vtrunc.f32 %v3322_v61  ;;  %vm515_vm0 = vcmp.lt.s32.totalorder %v483_v21, 512 }
  0x5e   : > { %v751_v32 = vunpack.c.0.s8 %v691_v47  ;;  %v752_v39 = vunpack.c.1.s8 %v691_v47  ;;  %v753_v42 = vunpack.c.2.s8 %v691_v47  ;;  %v754_v53 = vunpack.c.3.s8 %v691_v47 }
  0x5f   : > { %v721_v18 = vpack.c.b8 %v717_v20, %v713_v40  ;;  %v979_v49 = vsel %vm936_vm2, %v927_v12, 0  ;;  %v884_v52 = vsel %vm579_vm15, 1, %v4698_v13  ;;  %v3340_v20 = vsel %vm515_vm0, 1, %v4698_v13 }
  0x60   : > { %v791_v54 = vpack.c.b16 %v751_v32, %v751_v32  ;;  %v793_v16 = vpack.c.b16 %v752_v39, %v752_v39  ;;  %v795_v11 = vpack.c.b16 %v753_v42, %v753_v42  ;;  %v797_v55 = vpack.c.b16 %v754_v53, %v754_v53 }
  0x61   : > { %v763_v35 = vunpack.c.0.s8 %v721_v18  ;;  %v764_v41 = vunpack.c.1.s8 %v721_v18  ;;  %v765_v57 = vunpack.c.2.s8 %v721_v18  ;;  %v766_v46 = vunpack.c.3.s8 %v721_v18 }
  0x62   : > { %v792_v40 = vpack.c.b8 %v791_v54, %v791_v54  ;;  %v794_v63 = vpack.c.b8 %v793_v16, %v793_v16  ;;  %v796_v6 = vpack.c.b8 %v795_v11, %v795_v11  ;;  %v798_v60 = vpack.c.b8 %v797_v55, %v797_v55 }
  0x63   : > { %v815_v47 = vpack.c.b16 %v763_v35, %v763_v35  ;;  %v817_v44 = vpack.c.b16 %v764_v41, %v764_v41  ;;  %v819_v50 = vpack.c.b16 %v765_v57, %v765_v57  ;;  %v821_v12 = vpack.c.b16 %v766_v46, %v766_v46 }
  0x64   : > { %848 = vst.msk [vmem:[%s2906_s28 + $0x10] sm:$0x3] %vm839_vm13, %v792_v40  ;;  %849 = vst.msk [vmem:[%s2906_s28 + $0x12] sm:$0x3] %vm839_vm13, %v794_v63  ;;  %v978_v61 = vadd.s32 %v979_v49, %v976_v15  ;;  %v462_v32 = vadd.s32 192, %v2933_v8  ;;  %vm591_vm1 = vcmp.eq.f32.partialorder %v3045_v1, 0.0  ;;  %v916_v54 = vmul.u32 %v884_v52, %v3340_v20 }
  0x65   : > { %850 = vst.msk [vmem:[%s2906_s28 + $0x14] sm:$0x3] %vm839_vm13, %v796_v6  ;;  %851 = vst.msk [vmem:[%s2906_s28 + $0x16] sm:$0x3] %vm839_vm13, %v798_v60  ;;  %v816_v39 = vpack.c.b8 %v815_v47, %v815_v47  ;;  %v818_v42 = vpack.c.b8 %v817_v44, %v817_v44  ;;  %v820_v53 = vpack.c.b8 %v819_v50, %v819_v50  ;;  %v623_v11 = vsel %vm591_vm1, 1.0, %v4700_v9 }
  0x66   : > { %v822_v18 = vpack.c.b8 %v821_v12, %v821_v12  ;;  %v495_v16 = vadd.s32 %v2927_v4, %v462_v32  ;;  %v896_v15 = vsel %vm591_vm1, 1, %v4698_v13  ;;  %v655_v1 = vtrunc.f32 %v623_v11 }
  0x67   : > { %860 = vst.msk [vmem:[%s2906_s28 + $0x28] sm:$0x3] %vm839_vm13, %v816_v39  ;;  %861 = vst.msk [vmem:[%s2906_s28 + $0x2a] sm:$0x3] %vm839_vm13, %v818_v42  ;;  %v451_v21 = vadd.s32 104, %v2933_v8  ;;  %vm580_vm3 = vcmp.eq.f32.partialorder %v3131_v10, 0.0 }
  0x68   : > { %862 = vst.msk [vmem:[%s2906_s28 + $0x2c] sm:$0x3] %vm839_vm13, %v820_v53  ;;  %863 = vst.msk [vmem:[%s2906_s28 + $0x2e] sm:$0x3] %vm839_vm13, %v822_v18  ;;  %v463_v49 = vadd.s32 200, %v2933_v8  ;;  %v957_v52 = vsel %vm936_vm2, %v916_v54, 0 }
  0x69   : > { %vm527_vm4 = vcmp.lt.s32.totalorder %v495_v16, 512  ;;  %v612_v55 = vsel %vm580_vm3, 1.0, %v4700_v9  ;;  %v885_v35 = vsel %vm580_vm3, 1, %v4698_v13  ;;  %v980_v41 = vadd.s32 %v978_v61, %v957_v52 }
  0x6a   : > { %v3363_v57 = vsel %vm527_vm4, 1, %v4698_v13  ;;  %v484_v46 = vadd.s32 %v2927_v4, %v451_v21  ;;  %v644_v40 = vtrunc.f32 %v612_v55  ;;  %v496_v10 = vadd.s32 %v2927_v4, %v463_v49 }
  0x6b   : > { %4713 = vst [vmem:[#allocation3_spill] sm:$0xff] %v3363_v57  ;;  %v928_v63 = vmul.u32 %v896_v15, %v3363_v57  ;;  %vm592_vm5 = vcmp.eq.f32.partialorder %v3069_v19, 0.0  ;;  %v452_v6 = vadd.s32 112, %v2933_v8  ;;  %vm581_vm8 = vcmp.eq.f32.partialorder %v3136_v17, 0.0 }
  0x6c   : > { %vm516_vm6 = vcmp.lt.s32.totalorder %v484_v46, 512  ;;  %v693_v60 = vpack.c.f32.eXmY %v643_v24, %v644_v40, 312  ;;  %v624_v47 = vsel %vm592_vm5, 1.0, %v4700_v9  ;;  %v897_v44 = vsel %vm592_vm5, 1, %v4698_v13 }
  0x6d   : > { %v981_v50 = vsel %vm936_vm2, %v928_v63, 0  ;;  %v3374_v12 = vsel %vm516_vm6, 1, %v4698_v13  ;;  %vm528_vm7 = vcmp.lt.s32.totalorder %v496_v10, 512  ;;  %v656_v61 = vtrunc.f32 %v624_v47 }
  0x6e   : > { %v982_v32 = vadd.s32 %v981_v50, %v980_v41  ;;  %v917_v39 = vmul.u32 %v885_v35, %v3374_v12  ;;  %v3378_v19 = vsel %vm528_vm7, 1, %v4698_v13  ;;  %v485_v42 = vadd.s32 %v2927_v4, %v452_v6 }
  0x6f   : > { %4714 = vst [vmem:[#allocation4_spill] sm:$0xff] %v3378_v19  ;;  %v3381_v24 = vpack.c.f32.eXmY %v655_v1, %v656_v61, 312  ;;  %v929_v53 = vmul.u32 %v897_v44, %v3378_v19  ;;  %v464_v18 = vadd.s32 208, %v2933_v8  ;;  %v613_v16 = vsel %vm581_vm8, 1.0, %v4700_v9 }
  0x70   : > { %v959_v54 = vsel %vm936_vm2, %v917_v39, 0  ;;  %vm517_vm9 = vcmp.lt.s32.totalorder %v485_v42, 512  ;;  %v886_v11 = vsel %vm581_vm8, 1, %v4698_v13  ;;  %v645_v1 = vtrunc.f32 %v613_v16 }
  0x71   : > { %v984_v15 = vadd.s32 %v982_v32, %v959_v54  ;;  %v983_v21 = vsel %vm936_vm2, %v929_v53, 0  ;;  %v3391_v49 = vsel %vm517_vm9, 1, %v4698_v13  ;;  %v497_v17 = vadd.s32 %v2927_v4, %v464_v18 }
  0x72   : > { %v918_v52 = vmul.u32 %v886_v11, %v3391_v49  ;;  %vm593_vm10 = vcmp.eq.f32.partialorder %v3078_v23, 0.0  ;;  %v453_v55 = vadd.s32 120, %v2933_v8  ;;  %vm582_vm11 = vcmp.eq.f32.partialorder %v3168_v29, 0.0 }
  0x73   : > { %v986_v35 = vadd.s32 %v984_v15, %v983_v21  ;;  %v625_v41 = vsel %vm593_vm10, 1.0, %v4700_v9  ;;  %v898_v46 = vsel %vm593_vm10, 1, %v4698_v13  ;;  %vm529_vm12 = vcmp.lt.s32.totalorder %v497_v17, 512 }
  0x74   : > { %v961_v40 = vsel %vm936_vm2, %v918_v52, 0  ;;  %v657_v63 = vtrunc.f32 %v625_v41  ;;  %v486_v10 = vadd.s32 %v2927_v4, %v453_v55  ;;  %v3403_v47 = vsel %vm529_vm12, 1, %v4698_v13 }
  0x75   : > { %v988_v6 = vadd.s32 %v986_v35, %v961_v40  ;;  %4715 = vst [vmem:[#allocation5_spill] sm:$0xff] %v3403_v47  ;;  %v614_v23 = vsel %vm582_vm11, 1.0, %v4700_v9  ;;  %v887_v44 = vsel %vm582_vm11, 1, %v4698_v13  ;;  %v930_v50 = vmul.u32 %v898_v46, %v3403_v47 }
  0x76   : > { %vm518_vm14 = vcmp.lt.s32.totalorder %v486_v10, 512  ;;  %v646_v61 = vtrunc.f32 %v614_v23  ;;  %v465_v29 = vadd.s32 216, %v2933_v8  ;;  %vm594_vm15 = vcmp.eq.f32.partialorder %v3110_v51, 0.0 }
  0x77   : > { %v3410_v32 = vsel %vm518_vm14, 1, %v4698_v13  ;;  %v466_v39 = vadd.s32 224, %v2933_v8  ;;  %vm595_vm0 = vcmp.eq.f32.partialorder %v3118_v56, 0.0  ;;  %v985_v42 = vsel %vm936_vm2, %v930_v50, 0 }
  0x78   : > { %v697_v53 = vpack.c.f32.eXmY %v645_v1, %v646_v61, 312  ;;  %v919_v18 = vmul.u32 %v887_v44, %v3410_v32  ;;  %v498_v54 = vadd.s32 %v2927_v4, %v465_v29  ;;  %v990_v16 = vadd.s32 %v988_v6, %v985_v42 }
  0x79   : > { %v626_v11 = vsel %vm594_vm15, 1.0, %v4700_v9  ;;  %v899_v15 = vsel %vm594_vm15, 1, %v4698_v13  ;;  %v499_v21 = vadd.s32 %v2927_v4, %v466_v39  ;;  %v627_v1 = vsel %vm595_vm0, 1.0, %v4700_v9 }
  0x7a   : > { %v701_v52 = vpack.c.b8 %v697_v53, %v693_v60  ;;  %v963_v51 = vsel %vm936_vm2, %v919_v18, 0  ;;  %vm530_vm1 = vcmp.lt.s32.totalorder %v498_v54, 512  ;;  %v658_v17 = vtrunc.f32 %v626_v11 }
  0x7b   : > { %v992_v55 = vadd.s32 %v990_v16, %v963_v51  ;;  %v3423_v35 = vsel %vm530_vm1, 1, %v4698_v13  ;;  %vm531_vm3 = vcmp.lt.s32.totalorder %v499_v21, 512  ;;  %v659_v44 = vtrunc.f32 %v627_v1 }
  0x7c   : > { %4716 = vst [vmem:[#allocation6_spill] sm:$0xff] %v3423_v35  ;;  %v755_v41 = vunpack.c.0.s8 %v701_v52  ;;  %v756_v46 = vunpack.c.1.s8 %v701_v52  ;;  %v757_v40 = vunpack.c.2.s8 %v701_v52  ;;  %v758_v10 = vunpack.c.3.s8 %v701_v52 }
  0x7d   : > { %v727_v6 = vpack.c.f32.eXmY %v657_v63, %v658_v17, 312  ;;  %v931_v60 = vmul.u32 %v899_v15, %v3423_v35  ;;  %v3430_v23 = vsel %vm531_vm3, 1, %v4698_v13  ;;  %v900_v63 = vsel %vm595_vm0, 1, %v4698_v13 }
  0x7e   : > { %4717 = vst [vmem:[#allocation7_spill] sm:$0xff] %v3430_v23  ;;  %v799_v50 = vpack.c.b16 %v755_v41, %v755_v41  ;;  %v801_v61 = vpack.c.b16 %v756_v46, %v756_v46  ;;  %v803_v29 = vpack.c.b16 %v757_v40, %v757_v40  ;;  %v805_v39 = vpack.c.b16 %v758_v10, %v758_v10 }
  0x7f   : > { %v731_v42 = vpack.c.b8 %v727_v6, %v3381_v24  ;;  %v987_v53 = vsel %vm936_vm2, %v931_v60, 0  ;;  %v467_v18 = vadd.s32 232, %v2933_v8  ;;  %v932_v24 = vmul.u32 %v900_v63, %v3430_v23 }
  0x80   : > { %v800_v54 = vpack.c.b8 %v799_v50, %v799_v50  ;;  %v802_v16 = vpack.c.b8 %v801_v61, %v801_v61  ;;  %v804_v11 = vpack.c.b8 %v803_v29, %v803_v29  ;;  %v806_v15 = vpack.c.b8 %v805_v39, %v805_v39 }
  0x81   : > { %v767_v21 = vunpack.c.0.s8 %v731_v42  ;;  %v768_v52 = vunpack.c.1.s8 %v731_v42  ;;  %v769_v51 = vunpack.c.2.s8 %v731_v42  ;;  %v770_v17 = vunpack.c.3.s8 %v731_v42 }
  0x82   : > { %852 = vst.msk [vmem:[%s2906_s28 + $0x18] sm:$0x3] %vm839_vm13, %v800_v54  ;;  %853 = vst.msk [vmem:[%s2906_s28 + $0x1a] sm:$0x3] %vm839_vm13, %v802_v16  ;;  %v994_v56 = vadd.s32 %v992_v55, %v987_v53  ;;  %v500_v1 = vadd.s32 %v2927_v4, %v467_v18  ;;  %vm596_vm4 = vcmp.eq.f32.partialorder %v3141_v25, 0.0  ;;  %v468_v55 = vadd.s32 240, %v2933_v8 }
  0x83   : > { %854 = vst.msk [vmem:[%s2906_s28 + $0x1c] sm:$0x3] %vm839_vm13, %v804_v11  ;;  %855 = vst.msk [vmem:[%s2906_s28 + $0x1e] sm:$0x3] %vm839_vm13, %v806_v15  ;;  %v823_v41 = vpack.c.b16 %v767_v21, %v767_v21  ;;  %v825_v46 = vpack.c.b16 %v768_v52, %v768_v52  ;;  %v827_v40 = vpack.c.b16 %v769_v51, %v769_v51  ;;  %v628_v6 = vsel %vm596_vm4, 1.0, %v4700_v9 }
  0x84   : > { %v829_v10 = vpack.c.b16 %v770_v17, %v770_v17  ;;  %vm532_vm5 = vcmp.lt.s32.totalorder %v500_v1, 512  ;;  %v901_v60 = vsel %vm596_vm4, 1, %v4698_v13  ;;  %v660_v42 = vtrunc.f32 %v628_v6 }
  0x85   : > { %v824_v50 = vpack.c.b8 %v823_v41, %v823_v41  ;;  %v826_v61 = vpack.c.b8 %v825_v46, %v825_v46  ;;  %v828_v29 = vpack.c.b8 %v827_v40, %v827_v40  ;;  %v3453_v25 = vsel %vm532_vm5, 1, %v4698_v13 }
  0x86   : > { %v830_v39 = vpack.c.b8 %v829_v10, %v829_v10  ;;  %4718 = vst [vmem:[#allocation8_spill] sm:$0xff] %v3453_v25  ;;  %v501_v53 = vadd.s32 %v2927_v4, %v468_v55  ;;  %vm597_vm6 = vcmp.eq.f32.partialorder %v3146_v33, 0.0  ;;  %v933_v63 = vmul.u32 %v901_v60, %v3453_v25 }
  0x87   : > { %864 = vst.msk [vmem:[%s2906_s28 + $0x30] sm:$0x3] %vm839_vm13, %v824_v50  ;;  %865 = vst.msk [vmem:[%s2906_s28 + $0x32] sm:$0x3] %vm839_vm13, %v826_v61  ;;  %v629_v18 = vsel %vm597_vm6, 1.0, %v4700_v9  ;;  %v902_v54 = vsel %vm597_vm6, 1, %v4698_v13 }
  0x88   : > { %866 = vst.msk [vmem:[%s2906_s28 + $0x34] sm:$0x3] %vm839_vm13, %v828_v29  ;;  %867 = vst.msk [vmem:[%s2906_s28 + $0x36] sm:$0x3] %vm839_vm13, %v830_v39  ;;  %v469_v16 = vadd.s32 248, %v2933_v8  ;;  %v733_v11 = vpack.c.f32.eXmY %v659_v44, %v660_v42, 312  ;;  %v661_v15 = vtrunc.f32 %v629_v18 }
  0x89   : > { %vm533_vm7 = vcmp.lt.s32.totalorder %v501_v53, 512  ;;  %vm598_vm8 = vcmp.eq.f32.partialorder %v3179_v48, 0.0  ;;  %v989_v41 = vsel %vm936_vm2, %v932_v24, 0  ;;  %v991_v8 = vsel %vm936_vm2, %v933_v63, 0 }
  0x8a   : > { %v3471_v33 = vsel %vm533_vm7, 1, %v4698_v13  ;;  %v502_v21 = vadd.s32 %v2927_v4, %v469_v16  ;;  %v630_v52 = vsel %vm598_vm8, 1.0, %v4700_v9  ;;  %v903_v51 = vsel %vm598_vm8, 1, %v4698_v13 }
  0x8b   : > { %4719 = vst [vmem:[#allocation9_spill] sm:$0xff] %v3471_v33  ;;  %v934_v17 = vmul.u32 %v902_v54, %v3471_v33  ;;  %v662_v1 = vtrunc.f32 %v630_v52  ;;  %v996_v44 = vadd.s32 %v994_v56, %v989_v41  ;;  %vm2317_vm10 = vcmask 195712  }
  0x8c   : > { %vm534_vm9 = vcmp.lt.s32.totalorder %v502_v21, 512 }
  0x8d   : > { %v3480_v48 = vsel %vm534_vm9, 1, %v4698_v13  ;;  %v737_v46 = vpack.c.f32.eXmY %v661_v15, %v662_v1, 312  ;;  %v993_v40 = vsel %vm936_vm2, %v934_v17, 0  ;;  %v997_v10 = vadd.s32 %v996_v44, %v991_v8  ;;  %v3496_v17 = vld [vmem:[%s4689_s2] ss:$0 sm:$0xff] }
  0x8e   : > { %4720 = vst [vmem:[#allocation10_spill] sm:$0xff] %v3480_v48  ;;  %v935_v4 = vmul.u32 %v903_v51, %v3480_v48 }
  0x8f   : > { %v741_v6 = vpack.c.b8 %v737_v46, %v733_v11  ;;  %v998_v60 = vadd.s32 %v997_v10, %v993_v40 }
  0x90   : > { %v995_v55 = vsel %vm936_vm2, %v935_v4, 0  ;;  %vm1384_vm2 = vcmask 64512  }
  0x91   : > { %v771_v50 = vunpack.c.0.s8 %v741_v6  ;;  %v772_v24 = vunpack.c.1.s8 %v741_v6  ;;  %v773_v61 = vunpack.c.2.s8 %v741_v6  ;;  %v774_v56 = vunpack.c.3.s8 %v741_v6 }
  0x92   : > { %v999_v29 = vadd.s32 %v998_v60, %v995_v55 }
  0x93   : > { %v831_v39 = vpack.c.b16 %v771_v50, %v771_v50  ;;  %v833_v42 = vpack.c.b16 %v772_v24, %v772_v24  ;;  %v835_v53 = vpack.c.b16 %v773_v61, %v773_v61  ;;  %v837_v63 = vpack.c.b16 %v774_v56, %v774_v56 }
  0x94   : > { %v1000_v18 = vand.u32 65535, %v999_v29  ;;  %v1001_v54 = vshrl.u32 %v999_v29, 16 }
  0x95   : > { %v832_v16 = vpack.c.b8 %v831_v39, %v831_v39  ;;  %v834_v11 = vpack.c.b8 %v833_v42, %v833_v42  ;;  %v836_v15 = vpack.c.b8 %v835_v53, %v835_v53  ;;  %v838_v21 = vpack.c.b8 %v837_v63, %v837_v63 }
  0x96   : > { %v1002_v52 = vcvt.s32.f32 %v1000_v18  ;;  %v1003_v51 = vcvt.s32.f32 %v1001_v54 }
  0x97   : > { %868 = vst.msk [vmem:[%s2906_s28 + $0x38] sm:$0x3] %vm839_vm13, %v832_v16  ;;  %869 = vst.msk [vmem:[%s2906_s28 + $0x3a] sm:$0x3] %vm839_vm13, %v834_v11 }
  0x98   : > { %870 = vst.msk [vmem:[%s2906_s28 + $0x3c] sm:$0x3] %vm839_vm13, %v836_v15  ;;  %871 = vst.msk [vmem:[%s2906_s28 + $0x3e] sm:$0x3] %vm839_vm13, %v838_v21  ;;  %1004 = vadd.xlane.f32.xlu0 %v1002_v52  ;;  %vm2234_vm13 = vcmask 130112  }
  0x9c   : > { %1006 = vadd.xlane.f32.xlu0 %v1003_v51 }
  0xed   : > { %v2742_v1 = vpop.f32.mrb[0].mxu0  ;;  %v2766_v41 = vpop.f32.mrb[0].mxu1 }
  0xee   : > { %v1199_v8 = vadd.f32 %v2742_v1, %v3496_v17  ;;  %v1279_v44 = vadd.f32 %v2766_v41, %v3496_v17  ;;  %v1193_v46 = vpop.f32.mrb[1].mxu0  ;;  %v1273_v40 = vpop.f32.mrb[1].mxu1 }
  0xef   : > { %v1194_v4 = vadd.f32 %v3496_v17, %v1193_v46  ;;  %v1274_v10 = vadd.f32 %v3496_v17, %v1273_v40 }
  0xf0   : > { %v1353_v6 = vmax.f32 %v1199_v8, 0.0  ;;  %v1369_v60 = vmax.f32 %v1279_v44, 0.0 }
  0xf1   : > { %v3502_v55 = vmax.f32 %v1194_v4, 0.0  ;;  %v2745_v50 = vpop.f32.mrb[2].mxu0  ;;  %v3504_v24 = vmax.f32 %v1274_v10, 0.0  ;;  %v2769_v61 = vpop.f32.mrb[2].mxu1 }
  0xf2   : > { %1386 = vst.msk [vmem:[%s2891_s19 + $0x8] sm:$0xff] %vm1384_vm2, %v1353_v6  ;;  %vm1706_vm11 = vcmp.eq.f32.partialorder %v1353_v6, 0.0  ;;  %1402 = vst.msk [vmem:[%s2891_s19 + $0x88] sm:$0xff] %vm1384_vm2, %v1369_v60  ;;  %vm1722_vm12 = vcmp.eq.f32.partialorder %v1369_v60, 0.0  ;;  %v1209_v56 = vadd.f32 %v2745_v50, %v3496_v17  ;;  %1451 = vrot.lane.b32.xlu1 %v1353_v6, %s2820_s24  ;;  %v1203_v29 = vpop.f32.mrb[3].mxu0  ;;  %1483 = vrot.lane.b32.xlu0 %v1369_v60, %s2820_s24  ;;  %v1283_v42 = vpop.f32.mrb[3].mxu1 }
  0xf3   : > { %v1289_v39 = vadd.f32 %v2769_v61, %v3496_v17  ;;  %v1738_v53 = vsel %vm1706_vm11, 1.0, %v4700_v9  ;;  %v2171_v63 = vsel %vm1706_vm11, 1, %v4698_v13  ;;  %v1754_v18 = vsel %vm1722_vm12, 1.0, %v4700_v9  ;;  %1385 = vst.msk [vmem:[%s2891_s19] sm:$0xff] %vm1384_vm2, %v3502_v55  ;;  %1401 = vst.msk [vmem:[%s2891_s19 + $0x80] sm:$0xff] %vm1384_vm2, %v3504_v24 }
  0xf4   : > { %v2187_v54 = vsel %vm1722_vm12, 1, %v4698_v13  ;;  %v1770_v16 = vtrunc.f32 %v1738_v53  ;;  %v2203_v11 = vmul.u32 %v2171_v63, %v2990_v38  ;;  %v1786_v15 = vtrunc.f32 %v1754_v18 }
  0xf5   : > { %v2219_v21 = vmul.u32 %v2187_v54, %v3006_v45  ;;  %vm1705_vm14 = vcmp.eq.f32.partialorder %v3502_v55, 0.0  ;;  %v3527_v52 = vmax.f32 %v1209_v56, 0.0  ;;  %vm1721_vm15 = vcmp.eq.f32.partialorder %v3504_v24, 0.0  ;;  %v2748_v1 = vpop.f32.mrb[4].mxu0  ;;  %v3531_v41 = vpop.f32.mrb[4].mxu1 }
  0xf6   : > { %v1204_v51 = vadd.f32 %v3496_v17, %v1203_v29  ;;  %v2236_v8 = vsel %vm2234_vm13, %v2203_v11, 0  ;;  %v2319_v44 = vsel %vm2317_vm10, %v2203_v11, 0  ;;  %v1213_v46 = vpop.f32.mrb[5].mxu0  ;;  %1449 = vrot.lane.b32.xlu1 %v3502_v55, %s2820_s24  ;;  %1579 = vrot.lane.b32.xlu0 %v1353_v6, %s2821_s26  ;;  %v3540_v40 = vpop.f32.mrb[5].mxu1  ;;  %v1737_v50 = vsel %vm1705_vm14, 1.0, %v4700_v9 }
  0xf7   : > { %v2265_v38 = vsel %vm2234_vm13, %v2219_v21, 0  ;;  %v2348_v45 = vsel %vm2317_vm10, %v2219_v21, 0  ;;  %v2170_v61 = vsel %vm1705_vm14, 1, %v4698_v13  ;;  %1388 = vst.msk [vmem:[%s2891_s19 + $0x18] sm:$0xff] %vm1384_vm2, %v3527_v52  ;;  %v1769_v56 = vtrunc.f32 %v1737_v50 }
  0xf8   : > { %v2242_v4 = vadd.s32 %v2265_v38, %v2236_v8  ;;  %v2325_v10 = vadd.s32 %v2348_v45, %v2319_v44  ;;  %v2202_v29 = vmul.u32 %v2170_v61, %v2975_v31  ;;  %vm1708_vm0 = vcmp.eq.f32.partialorder %v3527_v52, 0.0 }
  0xf9   : > { %v1753_v6 = vsel %vm1721_vm15, 1.0, %v4700_v9  ;;  %v1740_v53 = vsel %vm1708_vm0, 1.0, %v4700_v9  ;;  %v2173_v63 = vsel %vm1708_vm0, 1, %v4698_v13  ;;  %v2186_v54 = vsel %vm1721_vm15, 1, %v4698_v13  ;;  %v3561_v11 = vpop.f32.mrb[6].mxu0  ;;  %v3563_v21 = vpop.f32.mrb[6].mxu1 }
  0xfa   : > { %v1785_v18 = vtrunc.f32 %v1753_v6  ;;  %v3565_v31 = vpack.c.f32.eXmY %v1769_v56, %v1770_v16, 312  ;;  %v2235_v8 = vsel %vm2234_vm13, %v2202_v29, 0  ;;  %v2318_v44 = vsel %vm2317_vm10, %v2202_v29, 0  ;;  %1481 = vrot.lane.b32.xlu1 %v3504_v24, %s2820_s24  ;;  %1611 = vrot.lane.b32.xlu0 %v1369_v60, %s2821_s26  ;;  %v3572_v45 = vpop.f32.mrb[7].mxu0  ;;  %v3574_v50 = vpop.f32.mrb[7].mxu1 }
  0xfb   : > { %v1772_v38 = vtrunc.f32 %v1740_v53  ;;  %v2240_v61 = vadd.s32 %v2242_v4, %v2235_v8  ;;  %v2323_v6 = vadd.s32 %v2325_v10, %v2318_v44  ;;  %v2205_v3 = vmul.u32 %v2173_v63, %v3082_v26 }
  0xfc   : > { %v3577_v16 = vpack.c.f32.eXmY %v1785_v18, %v1786_v15, 312  ;;  %v2218_v56 = vmul.u32 %v2186_v54, %v2987_v37  ;;  %v3580_v29 = vmax.f32 %v1204_v51, 0.0  ;;  %v1371_v53 = vmax.f32 %v1289_v39, 0.0 }
  0xfd   : > { %v1284_v13 = vadd.f32 %v3496_v17, %v1283_v42  ;;  %v2238_v60 = vsel %vm2234_vm13, %v2205_v3, 0  ;;  %v2321_v9 = vsel %vm2317_vm10, %v2205_v3, 0  ;;  %v1219_v4 = vadd.f32 %v2748_v1, %v3496_v17  ;;  %v3587_v26 = vpop.f32.mrb[8].mxu0  ;;  %v3589_v15 = vpop.f32.mrb[8].mxu1 }
  0xfe   : > { %v1214_v10 = vadd.f32 %v3496_v17, %v1213_v46  ;;  %v2246_v63 = vadd.s32 %v2240_v61, %v2238_v60  ;;  %v2329_v18 = vadd.s32 %v2323_v6, %v2321_v9  ;;  %v2263_v37 = vsel %vm2234_vm13, %v2218_v56, 0  ;;  %1387 = vst.msk [vmem:[%s2891_s19 + $0x10] sm:$0xff] %vm1384_vm2, %v3580_v29  ;;  %1404 = vst.msk [vmem:[%s2891_s19 + $0x98] sm:$0xff] %vm1384_vm2, %v1371_v53  ;;  %v3598_v3 = vpop.f32.mrb[9].mxu0  ;;  %v3603_v42 = vpop.f32.mrb[9].mxu1 }
  0xff   : > { %v2346_v39 = vsel %vm2317_vm10, %v2218_v56, 0  ;;  %1577 = vrot.lane.b32.xlu1 %v3502_v55, %s2821_s26  ;;  %1487 = vrot.lane.b32.xlu0 %v1371_v53, %s2820_s24  ;;  %vm1707_vm1 = vcmp.eq.f32.partialorder %v3580_v29, 0.0  ;;  %vm1724_vm3 = vcmp.eq.f32.partialorder %v1371_v53, 0.0  ;;  %v3606_v9 = vmax.f32 %v1284_v13, 0.0 }
 0x100   : > { %v3608_v51 = vmax.f32 %v1219_v4, 0.0  ;;  %v2244_v1 = vadd.s32 %v2263_v37, %v2246_v63  ;;  %v2327_v46 = vadd.s32 %v2346_v39, %v2329_v18  ;;  %v4721_v54 = vmov 0.0  }
 0x101   : > { %v1739_v8 = vsel %vm1707_vm1, 1.0, %v4721_v54  ;;  %v4722_v44 = vmov 0   ;;  %v1756_v56 = vsel %vm1724_vm3, 1.0, %v4721_v54  ;;  %1403 = vst.msk [vmem:[%s2891_s19 + $0x90] sm:$0xff] %vm1384_vm2, %v3606_v9  ;;  %v3621_v13 = vpop.f32.mrb[10].mxu0  ;;  %vm1723_vm4 = vcmp.eq.f32.partialorder %v3606_v9, 0.0 }
 0x102   : > { %v2172_v61 = vsel %vm1707_vm1, 1, %v4722_v44  ;;  %v1771_v6 = vtrunc.f32 %v1739_v8  ;;  %v2189_v60 = vsel %vm1724_vm3, 1, %v4722_v44  ;;  %1390 = vst.msk [vmem:[%s2891_s19 + $0x28] sm:$0xff] %vm1384_vm2, %v3608_v51  ;;  %v1788_v4 = vtrunc.f32 %v1756_v56  ;;  %v3632_v18 = vpop.f32.mrb[10].mxu1 }
 0x103   : > { %v2204_v55 = vmul.u32 %v2172_v61, %v3050_v7  ;;  %v2221_v63 = vmul.u32 %v2189_v60, %v3123_v2  ;;  %vm1710_vm5 = vcmp.eq.f32.partialorder %v3608_v51, 0.0  ;;  %1609 = vrot.lane.b32.xlu1 %v3504_v24, %s2821_s26  ;;  %1583 = vrot.lane.b32.xlu0 %v3527_v52, %s2821_s26  ;;  %v3630_v7 = vpop.f32.mrb[11].mxu0  ;;  %v1755_v8 = vsel %vm1723_vm4, 1.0, %v4721_v54  ;;  %v3641_v61 = vpop.f32.mrb[11].mxu1 }
 0x104   : > { %v3634_v37 = vpack.c.f32.eXmY %v1771_v6, %v1772_v38, 312  ;;  %v1787_v33 = vtrunc.f32 %v1755_v8  ;;  %v2188_v38 = vsel %vm1723_vm4, 1, %v4722_v44  ;;  %v1742_v6 = vsel %vm1710_vm5, 1.0, %v4721_v54 }
 0x105   : > { %v2237_v39 = vsel %vm2234_vm13, %v2204_v55, 0  ;;  %v2320_v2 = vsel %vm2317_vm10, %v2204_v55, 0  ;;  %v2269_v60 = vsel %vm2234_vm13, %v2221_v63, 0  ;;  %v2352_v48 = vsel %vm2317_vm10, %v2221_v63, 0  ;;  %v3654_v25 = vpop.f32.mrb[12].mxu0 }
 0x106   : > { %v2250_v24 = vadd.s32 %v2244_v1, %v2237_v39  ;;  %v2333_v56 = vadd.s32 %v2327_v46, %v2320_v2  ;;  %v2175_v55 = vsel %vm1710_vm5, 1, %v4722_v44  ;;  %v2220_v39 = vmul.u32 %v2188_v38, %v3085_v27  ;;  %v3657_v2 = vpop.f32.mrb[13].mxu0  ;;  %v3662_v8 = vpop.f32.mrb[12].mxu1 }
 0x107   : > { %v1774_v63 = vtrunc.f32 %v1742_v6  ;;  %1455 = vrot.lane.b32.xlu1 %v3527_v52, %s2820_s24  ;;  %1615 = vrot.lane.b32.xlu0 %v1371_v53, %s2821_s26  ;;  %v3664_v23 = vpack.c.f32.eXmY %v1787_v33, %v1788_v4, 312  ;;  %v2207_v35 = vmul.u32 %v2175_v55, %v3196_v34  ;;  %v3667_v47 = vmax.f32 %v1214_v10, 0.0 }
 0x108   : > { %v2248_v1 = vadd.s32 %v2269_v60, %v2250_v24  ;;  %v2331_v46 = vadd.s32 %v2352_v48, %v2333_v56  ;;  %v1229_v27 = vadd.f32 %v3561_v11, %v3496_v17  ;;  %v3671_v48 = vpop.f32.mrb[13].mxu1  ;;  %v2267_v24 = vsel %vm2234_vm13, %v2220_v39, 0 }
 0x109   : > { %v2350_v52 = vsel %vm2317_vm10, %v2220_v39, 0  ;;  %v1224_v53 = vadd.f32 %v3496_v17, %v3572_v45  ;;  %v1239_v33 = vadd.f32 %v3587_v26, %v3496_v17  ;;  %v2241_v34 = vsel %vm2234_vm13, %v2207_v35, 0  ;;  %1389 = vst.msk [vmem:[%s2891_s19 + $0x20] sm:$0xff] %vm1384_vm2, %v3667_v47  ;;  %v3684_v11 = vpop.f32.mrb[14].mxu0 }
 0x10a   : > { %v2254_v4 = vadd.s32 %v2267_v24, %v2248_v1  ;;  %v2337_v56 = vadd.s32 %v2350_v52, %v2331_v46  ;;  %v2324_v10 = vsel %vm2317_vm10, %v2207_v35, 0  ;;  %vm1709_vm6 = vcmp.eq.f32.partialorder %v3667_v47, 0.0  ;;  %v3693_v38 = vpop.f32.mrb[15].mxu0  ;;  %v3699_v35 = vpop.f32.mrb[14].mxu1 }
 0x10b   : > { %v3687_v60 = vmax.f32 %v1229_v27, 0.0  ;;  %v3689_v45 = vmax.f32 %v1224_v53, 0.0  ;;  %v3691_v26 = vmax.f32 %v1239_v33, 0.0  ;;  %1485 = vrot.lane.b32.xlu1 %v3606_v9, %s2820_s24  ;;  %1453 = vrot.lane.b32.xlu0 %v3580_v29, %s2820_s24  ;;  %v1741_v1 = vsel %vm1709_vm6, 1.0, %v4721_v54  ;;  %v3703_v39 = vpop.f32.mrb[15].mxu1 }
 0x10c   : > { %v2252_v6 = vadd.s32 %v2254_v4, %v2241_v34  ;;  %v2335_v55 = vadd.s32 %v2337_v56, %v2324_v10  ;;  %v2174_v46 = vsel %vm1709_vm6, 1, %v4722_v44  ;;  %v1773_v27 = vtrunc.f32 %v1741_v1 }
 0x10d   : > { %v2206_v24 = vmul.u32 %v2174_v46, %v3173_v43  ;;  %1392 = vst.msk [vmem:[%s2891_s19 + $0x38] sm:$0xff] %vm1384_vm2, %v3687_v60  ;;  %vm1712_vm7 = vcmp.eq.f32.partialorder %v3687_v60, 0.0  ;;  %1391 = vst.msk [vmem:[%s2891_s19 + $0x30] sm:$0xff] %vm1384_vm2, %v3689_v45  ;;  %vm1711_vm8 = vcmp.eq.f32.partialorder %v3689_v45, 0.0  ;;  %vm1714_vm9 = vcmp.eq.f32.partialorder %v3691_v26, 0.0 }
 0x10e   : > { %1394 = vst.msk [vmem:[%s2891_s19 + $0x48] sm:$0xff] %vm1384_vm2, %v3691_v26  ;;  %v1744_v52 = vsel %vm1712_vm7, 1.0, %v4721_v54  ;;  %v2177_v53 = vsel %vm1712_vm7, 1, %v4722_v44  ;;  %v1743_v33 = vsel %vm1711_vm8, 1.0, %v4721_v54  ;;  %v2176_v43 = vsel %vm1711_vm8, 1, %v4722_v44 }
 0x10f   : > { %v3721_v4 = vpack.c.f32.eXmY %v1773_v27, %v1774_v63, 312  ;;  %v2239_v56 = vsel %vm2234_vm13, %v2206_v24, 0  ;;  %v2322_v34 = vsel %vm2317_vm10, %v2206_v24, 0  ;;  %v1776_v10 = vtrunc.f32 %v1744_v52  ;;  %1581 = vrot.lane.b32.xlu1 %v3580_v29, %s2821_s26 }
 0x110   : > { %v2258_v1 = vadd.s32 %v2252_v6, %v2239_v56  ;;  %v2341_v46 = vadd.s32 %v2335_v55, %v2322_v34  ;;  %v2209_v19 = vmul.u32 %v2177_v53, %v3225_v5  ;;  %v1775_v57 = vtrunc.f32 %v1743_v33 }
 0x111   : > { %v2208_v62 = vmul.u32 %v2176_v43, %v3208_v36  ;;  %v1234_v63 = vadd.f32 %v3496_v17, %v3598_v3  ;;  %v1249_v27 = vadd.f32 %v3621_v13, %v3496_v17  ;;  %v1746_v5 = vsel %vm1714_vm9, 1.0, %v4721_v54 }
 0x112   : > { %v2245_v24 = vsel %vm2234_vm13, %v2209_v19, 0  ;;  %v2328_v52 = vsel %vm2317_vm10, %v2209_v19, 0  ;;  %v3736_v29 = vpack.c.f32.eXmY %v1775_v57, %v1776_v10, 312  ;;  %v2179_v3 = vsel %vm1714_vm9, 1, %v4722_v44 }
 0x113   : > { %v2256_v6 = vadd.s32 %v2258_v1, %v2245_v24  ;;  %v2339_v36 = vadd.s32 %v2341_v46, %v2328_v52  ;;  %v2243_v55 = vsel %vm2234_vm13, %v2208_v62, 0  ;;  %v2326_v53 = vsel %vm2317_vm10, %v2208_v62, 0  ;;  %1613 = vrot.lane.b32.xlu1 %v3606_v9, %s2821_s26 }
 0x114   : > { %v3744_v13 = vmax.f32 %v1234_v63, 0.0  ;;  %v3746_v19 = vmax.f32 %v1249_v27, 0.0  ;;  %v2211_v43 = vmul.u32 %v2179_v3, %v3252_v0  ;;  %v1244_v56 = vadd.f32 %v3496_v17, %v3630_v7 }
 0x115   : > { %v2262_v57 = vadd.s32 %v2256_v6, %v2243_v55  ;;  %v2345_v33 = vadd.s32 %v2339_v36, %v2326_v53  ;;  %v1778_v34 = vtrunc.f32 %v1746_v5  ;;  %v1259_v62 = vadd.f32 %v3654_v25, %v3496_v17 }
 0x116   : > { %1393 = vst.msk [vmem:[%s2891_s19 + $0x40] sm:$0xff] %vm1384_vm2, %v3744_v13  ;;  %vm1713_vm11 = vcmp.eq.f32.partialorder %v3744_v13, 0.0  ;;  %1396 = vst.msk [vmem:[%s2891_s19 + $0x58] sm:$0xff] %vm1384_vm2, %v3746_v19  ;;  %v1299_v9 = vadd.f32 %v3531_v41, %v3496_v17  ;;  %v2249_v0 = vsel %vm2234_vm13, %v2211_v43, 0  ;;  %v2332_v7 = vsel %vm2317_vm10, %v2211_v43, 0 }
 0x117   : > { %v1745_v10 = vsel %vm1713_vm11, 1.0, %v4721_v54  ;;  %v2178_v1 = vsel %vm1713_vm11, 1, %v4722_v44  ;;  %1459 = vrot.lane.b32.xlu1 %v3608_v51, %s2820_s24  ;;  %v2260_v46 = vadd.s32 %v2262_v57, %v2249_v0  ;;  %v2343_v63 = vadd.s32 %v2345_v33, %v2332_v7 }
 0x118   : > { %v1777_v25 = vtrunc.f32 %v1745_v10  ;;  %v2210_v27 = vmul.u32 %v2178_v1, %v3230_v14  ;;  %v3769_v41 = vmax.f32 %v1244_v56, 0.0  ;;  %v3771_v24 = vmax.f32 %v1259_v62, 0.0 }
 0x119   : > { %v3789_v14 = vmax.f32 %v1299_v9, 0.0  ;;  %v1254_v53 = vadd.f32 %v3496_v17, %v3657_v2  ;;  %v1294_v3 = vadd.f32 %v3496_v17, %v3540_v40  ;;  %v1309_v56 = vadd.f32 %v3563_v21, %v3496_v17 }
 0x11a   : > { %v3773_v52 = vpack.c.f32.eXmY %v1777_v25, %v1778_v34, 312  ;;  %v2247_v5 = vsel %vm2234_vm13, %v2210_v27, 0  ;;  %v2330_v6 = vsel %vm2317_vm10, %v2210_v27, 0  ;;  %1395 = vst.msk [vmem:[%s2891_s19 + $0x50] sm:$0xff] %vm1384_vm2, %v3769_v41  ;;  %1398 = vst.msk [vmem:[%s2891_s19 + $0x68] sm:$0xff] %vm1384_vm2, %v3771_v24  ;;  %v1304_v2 = vadd.f32 %v3496_v17, %v3574_v50 }
 0x11b   : > { %v3777_v36 = vadd.s32 %v2260_v46, %v2247_v5  ;;  %v3779_v55 = vadd.s32 %v2343_v63, %v2330_v6  ;;  %1457 = vrot.lane.b32.xlu1 %v3667_v47, %s2820_s24  ;;  %1406 = vst.msk [vmem:[%s2891_s19 + $0xa8] sm:$0xff] %vm1384_vm2, %v3789_v14  ;;  %1491 = vrot.lane.b32.xlu0 %v3789_v14, %s2820_s24  ;;  %vm1726_vm12 = vcmp.eq.f32.partialorder %v3789_v14, 0.0  ;;  %v3806_v33 = vmax.f32 %v1254_v53, 0.0 }
 0x11c   : > { %v1758_v57 = vsel %vm1726_vm12, 1.0, %v4721_v54  ;;  %v3808_v43 = vmax.f32 %v1294_v3, 0.0  ;;  %v1269_v40 = vadd.f32 %v3684_v11, %v3496_v17  ;;  %v1319_v34 = vadd.f32 %v3589_v15, %v3496_v17 }
 0x11d   : > { %v1790_v62 = vtrunc.f32 %v1758_v57  ;;  %1397 = vst.msk [vmem:[%s2891_s19 + $0x60] sm:$0xff] %vm1384_vm2, %v3806_v33  ;;  %v3832_v15 = vmax.f32 %v1309_v56, 0.0  ;;  %v1264_v7 = vadd.f32 %v3496_v17, %v3693_v38  ;;  %v1314_v10 = vadd.f32 %v3496_v17, %v3603_v42 }
 0x11e   : > { %1405 = vst.msk [vmem:[%s2891_s19 + $0xa0] sm:$0xff] %vm1384_vm2, %v3808_v43  ;;  %vm1725_vm14 = vcmp.eq.f32.partialorder %v3808_v43, 0.0  ;;  %v3836_v11 = vmax.f32 %v1269_v40, 0.0  ;;  %v3838_v9 = vmax.f32 %v1319_v34, 0.0  ;;  %v1329_v5 = vadd.f32 %v3632_v18, %v3496_v17 }
 0x11f   : > { %1587 = vrot.lane.b32.xlu0 %v3608_v51, %s2821_s26  ;;  %1489 = vrot.lane.b32.xlu1 %v3808_v43, %s2820_s24  ;;  %v1757_v21 = vsel %vm1725_vm14, 1.0, %v4721_v54  ;;  %v3834_v51 = vmax.f32 %v1304_v2, 0.0  ;;  %1408 = vst.msk [vmem:[%s2891_s19 + $0xb8] sm:$0xff] %vm1384_vm2, %v3832_v15  ;;  %vm1728_vm15 = vcmp.eq.f32.partialorder %v3832_v15, 0.0  ;;  %v3870_v46 = vmax.f32 %v1264_v7, 0.0 }
 0x120   : > { %v1789_v50 = vtrunc.f32 %v1757_v21  ;;  %1400 = vst.msk [vmem:[%s2891_s19 + $0x78] sm:$0xff] %vm1384_vm2, %v3836_v11  ;;  %1410 = vst.msk [vmem:[%s2891_s19 + $0xc8] sm:$0xff] %vm1384_vm2, %v3838_v9  ;;  %v3872_v63 = vmax.f32 %v1314_v10, 0.0  ;;  %vm1730_vm1 = vcmp.eq.f32.partialorder %v3838_v9, 0.0  ;;  %v3900_v3 = vmax.f32 %v1329_v5, 0.0 }
 0x121   : > { %1407 = vst.msk [vmem:[%s2891_s19 + $0xb0] sm:$0xff] %vm1384_vm2, %v3834_v51  ;;  %vm1727_vm0 = vcmp.eq.f32.partialorder %v3834_v51, 0.0  ;;  %v1762_v27 = vsel %vm1730_vm1, 1.0, %v4721_v54  ;;  %1399 = vst.msk [vmem:[%s2891_s19 + $0x70] sm:$0xff] %vm1384_vm2, %v3870_v46  ;;  %v1324_v57 = vadd.f32 %v3496_v17, %v3641_v61  ;;  %vm1716_vm4 = vcmp.eq.f32.partialorder %v3746_v19, 0.0 }
 0x122   : > { %v3840_v0 = vpack.c.f32.eXmY %v1789_v50, %v1790_v62, 312  ;;  %v1759_v42 = vsel %vm1727_vm0, 1.0, %v4721_v54  ;;  %1409 = vst.msk [vmem:[%s2891_s19 + $0xc0] sm:$0xff] %vm1384_vm2, %v3872_v63  ;;  %v1794_v6 = vtrunc.f32 %v1762_v27  ;;  %vm1729_vm3 = vcmp.eq.f32.partialorder %v3872_v63, 0.0  ;;  %1412 = vst.msk [vmem:[%s2891_s19 + $0xd8] sm:$0xff] %vm1384_vm2, %v3900_v3 }
 0x123   : > { %1619 = vrot.lane.b32.xlu0 %v3789_v14, %s2821_s26  ;;  %1585 = vrot.lane.b32.xlu1 %v3667_v47, %s2821_s26  ;;  %v1760_v47 = vsel %vm1728_vm15, 1.0, %v4721_v54  ;;  %v1791_v1 = vtrunc.f32 %v1759_v42  ;;  %v1761_v53 = vsel %vm1729_vm3, 1.0, %v4721_v54  ;;  %v3910_v56 = vmax.f32 %v1324_v57, 0.0 }
 0x124   : > { %v1792_v38 = vtrunc.f32 %v1760_v47  ;;  %v1793_v18 = vtrunc.f32 %v1761_v53  ;;  %v1339_v2 = vadd.f32 %v3662_v8, %v3496_v17  ;;  %v1334_v61 = vadd.f32 %v3496_v17, %v3671_v48 }
 0x125   : > { %1411 = vst.msk [vmem:[%s2891_s19 + $0xd0] sm:$0xff] %vm1384_vm2, %v3910_v56  ;;  %v1349_v40 = vadd.f32 %v3699_v35, %v3496_v17  ;;  %v1344_v34 = vadd.f32 %v3496_v17, %v3703_v39  ;;  %v3927_v62 = vpack.c.b8 %v3634_v37, %v3565_v31  ;;  %v2181_v8 = vsel %vm1716_vm4, 1, %v4722_v44 }
 0x126   : > { %v3876_v25 = vpack.c.f32.eXmY %v1791_v1, %v1792_v38, 312  ;;  %v3932_v48 = vmax.f32 %v1339_v2, 0.0  ;;  %v3934_v21 = vmax.f32 %v1334_v61, 0.0  ;;  %vm1715_vm5 = vcmp.eq.f32.partialorder %v3769_v41, 0.0 }
 0x127   : > { %1495 = vrot.lane.b32.xlu0 %v3832_v15, %s2820_s24  ;;  %1617 = vrot.lane.b32.xlu1 %v3808_v43, %s2821_s26  ;;  %v3938_v35 = vmax.f32 %v1349_v40, 0.0  ;;  %v3940_v17 = vmax.f32 %v1344_v34, 0.0  ;;  %vm1732_vm6 = vcmp.eq.f32.partialorder %v3900_v3, 0.0  ;;  %vm1731_vm7 = vcmp.eq.f32.partialorder %v3910_v56, 0.0 }
 0x128   : > { %1414 = vst.msk [vmem:[%s2891_s19 + $0xe8] sm:$0xff] %vm1384_vm2, %v3932_v48  ;;  %1413 = vst.msk [vmem:[%s2891_s19 + $0xe0] sm:$0xff] %vm1384_vm2, %v3934_v21  ;;  %v3955_v31 = vpack.c.b8 %v3664_v23, %v3577_v16  ;;  %v2213_v37 = vmul.u32 %v2181_v8, %v3307_v30  ;;  %v1764_v39 = vsel %vm1732_vm6, 1.0, %v4721_v54  ;;  %v1763_v50 = vsel %vm1731_vm7, 1.0, %v4721_v54  ;;  %v1005_v30 = vpop.xlane.xlu0 %1004 }
 0x129   : > { %1416 = vst.msk [vmem:[%s2891_s19 + $0xf8] sm:$0xff] %vm1384_vm2, %v3938_v35  ;;  %1415 = vst.msk [vmem:[%s2891_s19 + $0xf0] sm:$0xff] %vm1384_vm2, %v3940_v17  ;;  %v1883_v7 = vunpack.c.2.s8 %v3927_v62  ;;  %v2180_v23 = vsel %vm1715_vm5, 1, %v4722_v44  ;;  %vm1718_vm8 = vcmp.eq.f32.partialorder %v3771_v24, 0.0  ;;  %v1796_v16 = vtrunc.f32 %v1764_v39 }
 0x12a   : > { %v1795_v10 = vtrunc.f32 %v1763_v50  ;;  %v2253_v47 = vsel %vm2234_vm13, %v2213_v37, 0  ;;  %v1898_v38 = vunpack.c.1.s8 %v3955_v31  ;;  %v2212_v1 = vmul.u32 %v2180_v23, %v3285_v22 }
 0x12b   : > { %1591 = vrot.lane.b32.xlu0 %v3687_v60, %s2821_s26  ;;  %1463 = vrot.lane.b32.xlu1 %v3687_v60, %s2820_s24  ;;  %v1861_v60 = vpack.c.f32.eXmY %v1793_v18, %v1794_v6, 312  ;;  %v1917_v42 = vpack.c.b16 %v1883_v7, %v1883_v7  ;;  %v2336_v27 = vsel %vm2317_vm10, %v2213_v37, 0  ;;  %vm4711_vm9 = vcmp.eq.f32.partialorder %v3806_v33, 0.0 }
 0x12c   : > { %v1865_v5 = vpack.c.f32.eXmY %v1795_v10, %v1796_v16, 312  ;;  %v1007_v6 = vpop.xlane.xlu0 %1006  ;;  %v1947_v22 = vpack.c.b16 %v1898_v38, %v1898_v38  ;;  %v1900_v57 = vunpack.c.3.s8 %v3955_v31  ;;  %v2251_v2 = vsel %vm2234_vm13, %v2212_v1, 0 }
 0x12d   : > { %v3992_v53 = vpack.c.b8 %v1917_v42, %v1917_v42  ;;  %v1009_v18 = vcvt.f32.s32 %v1007_v6  ;;  %v2182_v40 = vsel %vm4711_vm9, 1, %v4722_v44  ;;  %v4007_v34 = vpack.c.b8 %v3736_v29, %v3721_v4 }
 0x12e   : > { %v4011_v8 = vpack.c.b8 %v3876_v25, %v3840_v0  ;;  %vm1720_vm11 = vcmp.eq.f32.partialorder %v3836_v11, 0.0  ;;  %v4016_v50 = vpack.c.b8 %v1947_v22, %v1947_v22  ;;  %v1951_v7 = vpack.c.b16 %v1900_v57, %v1900_v57 }
 0x12f   : > { %1623 = vrot.lane.b32.xlu0 %v3832_v15, %s2821_s26  ;;  %1461 = vrot.lane.b32.xlu1 %v3689_v45, %s2820_s24  ;;  %v1010_v37 = vshll.u32 %v1009_v18, 16  ;;  %v1882_v23 = vunpack.c.1.s8 %v3927_v62  ;;  %v2334_v16 = vsel %vm2317_vm10, %v2212_v1, 0  ;;  %v2214_v29 = vmul.u32 %v2182_v40, %v3340_v20 }
 0x130   : > { %v2185_v0 = vsel %vm1720_vm11, 1, %v4722_v44  ;;  %vm1719_vm9 = vcmp.eq.f32.partialorder %v3870_v46, 0.0  ;;  %v1881_v25 = vunpack.c.0.s8 %v3927_v62  ;;  %v1897_v43 = vunpack.c.0.s8 %v3955_v31 }
 0x131   : > { %v1915_v20 = vpack.c.b16 %v1882_v23, %v1882_v23  ;;  %v2255_v38 = vsel %vm2234_vm13, %v2214_v29, 0  ;;  %v2217_v1 = vmul.u32 %v2185_v0, %v3410_v32  ;;  %v2338_v57 = vsel %vm2317_vm10, %v2214_v29, 0 }
 0x132   : > { %v2194_v15 = vsel %vm1729_vm3, 1, %v4722_v44  ;;  %vm2041_vm3 = vcmask 58368  }
 0x133   : > { %1467 = vrot.lane.b32.xlu0 %v3691_v26, %s2820_s24  ;;  %1493 = vrot.lane.b32.xlu1 %v3834_v51, %s2820_s24  ;;  %v1916_v22 = vpack.c.b8 %v1915_v20, %v1915_v20  ;;  %v2261_v18 = vsel %vm2234_vm13, %v2217_v1, 0 }
 0x137   : > { %1499 = vrot.lane.b32.xlu0 %v3838_v9, %s2820_s24  ;;  %1589 = vrot.lane.b32.xlu1 %v3689_v45, %s2821_s26  ;;  %v2183_v45 = vsel %vm1718_vm8, 1, %v4722_v44 }
 0x138   : > { %v2215_v61 = vmul.u32 %v2183_v45, %v3374_v12  ;;  %v1008_v12 = vcvt.f32.s32 %v1005_v30  ;;  %v2184_v45 = vsel %vm1719_vm9, 1, %v4722_v44 }
 0x139   : > { %v2216_v32 = vmul.u32 %v2184_v45, %v3391_v49  ;;  %v2190_v49 = vsel %vm1725_vm14, 1, %v4722_v44  ;;  %vm1734_vm14 = vcmp.eq.f32.partialorder %v3932_v48, 0.0 }
 0x13a   : > { %v2257_v4 = vsel %vm2234_vm13, %v2215_v61, 0  ;;  %v2340_v42 = vsel %vm2317_vm10, %v2215_v61, 0 }
 0x13b   : > { %1595 = vrot.lane.b32.xlu0 %v3691_v26, %s2821_s26  ;;  %1621 = vrot.lane.b32.xlu1 %v3834_v51, %s2821_s26  ;;  %v2266_v26 = vadd.s32 %v3777_v36, %v2253_v47  ;;  %v2349_v36 = vadd.s32 %v3779_v55, %v2336_v27  ;;  %v4014_v55 = vpack.c.b8 %v1865_v5, %v1861_v60  ;;  %v2342_v51 = vsel %vm2317_vm10, %v2216_v32, 0 }
 0x13c   : > { %v1011_v60 = vadd.s32 %v1010_v37, %v1008_v12  ;;  %v4031_v47 = vpack.c.b8 %v1951_v7, %v1951_v7  ;;  %v2259_v7 = vsel %vm2234_vm13, %v2216_v32, 0 }
 0x13d   : > { %v2268_v39 = vadd.s32 %v2266_v26, %v2251_v2  ;;  %v2351_v30 = vadd.s32 %v2349_v36, %v2334_v16  ;;  %v1913_v26 = vpack.c.b16 %v1881_v25, %v1881_v25  ;;  %v2191_v2 = vsel %vm1726_vm12, 1, %v4722_v44 }
 0x13e   : > { %v1012_v27 = vrot.slane %v1011_v60, 4  ;;  %v1884_v36 = vunpack.c.3.s8 %v3927_v62  ;;  %v2223_v23 = vmul.u32 %v2191_v2, %v3280_v58  ;;  %v2192_v62 = vsel %vm1727_vm0, 1, %v4722_v44 }
 0x13f   : > { %1627 = vrot.lane.b32.xlu0 %v3838_v9, %s2821_s26  ;;  %1465 = vrot.lane.b32.xlu1 %v3744_v13, %s2820_s24  ;;  %v2270_v10 = vadd.s32 %v2268_v39, %v2257_v4  ;;  %v2353_v5 = vadd.s32 %v2351_v30, %v2340_v42  ;;  %v4052_v61 = vpack.c.b8 %v1913_v26, %v1913_v26  ;;  %v2344_v39 = vsel %vm2317_vm10, %v2217_v1, 0 }
 0x140   : > { %v2222_v16 = vmul.u32 %v2190_v49, %v3245_v59  ;;  %v2193_v4 = vsel %vm1728_vm15, 1, %v4722_v44  ;;  %v1919_v29 = vpack.c.b16 %v1884_v36, %v1884_v36  ;;  %v2224_v58 = vmul.u32 %v2192_v62, %v3297_v28 }
 0x141   : > { %v2272_v6 = vadd.s32 %v2270_v10, %v2255_v38  ;;  %v2355_v12 = vadd.s32 %v2353_v5, %v2338_v57  ;;  %v4723_v10 = vld [vmem:[#allocation2_spill] sm:$0xff]  ;;  %v2195_v59 = vsel %vm1730_vm1, 1, %v4722_v44  ;;  %v1945_v42 = vpack.c.b16 %v1897_v43, %v1897_v43 }
 0x142   : > { %v2225_v20 = vmul.u32 %v2193_v4, %v4723_v10  ;;  %v4085_v28 = vpack.c.b8 %v1919_v29, %v1919_v29  ;;  %v1899_v38 = vunpack.c.2.s8 %v3955_v31  ;;  %v2271_v1 = vsel %vm2234_vm13, %v2222_v16, 0  ;;  %v4728_v10 = vld [vmem:[#allocation7_spill] sm:$0xff] }
 0x143   : > { %1981 = vrot.lane.b32.xlu0 %v3992_v53, %s2820_s24  ;;  %1497 = vrot.lane.b32.xlu1 %v3872_v63, %s2820_s24  ;;  %v2274_v37 = vadd.s32 %v2272_v6, %v2261_v18  ;;  %v2357_v25 = vadd.s32 %v2355_v12, %v2344_v39  ;;  %v2273_v45 = vsel %vm2234_vm13, %v2223_v23, 0  ;;  %v4725_v6 = vld [vmem:[#allocation4_spill] sm:$0xff]  ;;  %v2196_v31 = vsel %vm1731_vm7, 1, %v4722_v44 }
 0x144   : > { %vm1733_vm12 = vcmp.eq.f32.partialorder %v3934_v21, 0.0  ;;  %v4101_v18 = vpack.c.b8 %v1945_v42, %v1945_v42  ;;  %v1949_v32 = vpack.c.b16 %v1899_v38, %v1899_v38  ;;  %v2354_v2 = vsel %vm2317_vm10, %v2222_v16, 0  ;;  %v4727_v16 = vld [vmem:[#allocation6_spill] sm:$0xff] }
 0x145   : > { %v2359_v26 = vadd.s32 %v2357_v25, %v2342_v51  ;;  %v2197_v36 = vsel %vm1732_vm6, 1, %v4722_v44  ;;  %v2356_v49 = vsel %vm2317_vm10, %v2223_v23, 0  ;;  %v2198_v62 = vsel %vm1733_vm12, 1, %v4722_v44 }
 0x146   : > { %v2229_v4 = vmul.u32 %v2197_v36, %v4727_v16  ;;  %v4121_v29 = vpack.c.b8 %v1949_v32, %v1949_v32  ;;  %v2360_v25 = vsel %vm2317_vm10, %v2225_v20, 0  ;;  %vm4730_vm15 = vcmp.eq.f32.partialorder %v3806_v33, 0.0 }
 0x147   : > { %2011 = vrot.lane.b32.xlu0 %v4016_v50, %s2820_s24  ;;  %1593 = vrot.lane.b32.xlu1 %v3744_v13, %s2821_s26  ;;  %v1013_v13 = vadd.s32 %v1012_v27, %v1011_v60  ;;  %v2276_v60 = vadd.s32 %v2274_v37, %v2259_v7  ;;  %v4724_v27 = vld [vmem:[#allocation3_spill] sm:$0xff]  ;;  %v2361_v12 = vadd.s32 %v2359_v26, %v2354_v2  ;;  %v4726_v37 = vld [vmem:[#allocation5_spill] sm:$0xff]  ;;  %v1886_v2 = vunpack.c.1.s8 %v4007_v34 }
 0x148   : > { %v2226_v5 = vmul.u32 %v2194_v15, %v4724_v27  ;;  %v2228_v39 = vmul.u32 %v2196_v31, %v4726_v37  ;;  %v2285_v26 = vsel %vm2234_vm13, %v2229_v4, 0  ;;  %vm1736_vm0 = vcmp.eq.f32.partialorder %v3938_v35, 0.0 }
 0x149   : > { %v1014_v40 = vrot.slane %v1013_v13, 2  ;;  %v2278_v9 = vadd.s32 %v2276_v60, %v2271_v1  ;;  %v2363_v23 = vadd.s32 %v2361_v12, %v2356_v49  ;;  %v2199_v60 = vsel %vm1734_vm14, 1, %v4722_v44  ;;  %v4729_v1 = vld [vmem:[#allocation8_spill] sm:$0xff] }
 0x14a   : > { %v2279_v7 = vsel %vm2234_vm13, %v2226_v5, 0  ;;  %v2283_v15 = vsel %vm2234_vm13, %v2228_v39, 0  ;;  %v2362_v42 = vsel %vm2317_vm10, %v2226_v5, 0  ;;  %vm1735_vm1 = vcmp.eq.f32.partialorder %v3940_v17, 0.0 }
 0x14b   : > { %2015 = vrot.lane.b32.xlu0 %v4031_v47, %s2820_s24  ;;  %1625 = vrot.lane.b32.xlu1 %v3872_v63, %s2821_s26  ;;  %v1015_v14 = vadd.s32 %v1014_v40, %v1013_v13  ;;  %v2275_v63 = vsel %vm2234_vm13, %v2224_v58, 0  ;;  %v2280_v57 = vadd.s32 %v2278_v9, %v2273_v45  ;;  %v2277_v13 = vsel %vm2234_vm13, %v2225_v20, 0 }
 0x14c   : > { %v2231_v45 = vmul.u32 %v2199_v60, %v4729_v1  ;;  %v1902_v60 = vunpack.c.1.s8 %v4011_v8  ;;  %v1747_v1 = vsel %vm1715_vm5, 1.0, %v4721_v54 }
 0x14d   : > { %v1016_v0 = vrot.slane %v1015_v14, 1  ;;  %v2282_v40 = vadd.s32 %v2280_v57, %v2275_v63  ;;  %v2366_v57 = vsel %vm2317_vm10, %v2228_v39, 0 }
 0x14f   : > { %2076 = vrot.lane.b32.xlu0 %v1916_v22, %s2821_s26  ;;  %1977 = vrot.lane.b32.xlu1 %v4052_v61, %s2820_s24  ;;  %v1017_v30 = vadd.s32 %v1016_v0, %v1015_v14  ;;  %v2358_v14 = vsel %vm2317_vm10, %v2224_v58, 0  ;;  %v2284_v43 = vadd.s32 %v2282_v40, %v2277_v13  ;;  %v2289_v13 = vsel %vm2234_vm13, %v2231_v45, 0 }
 0x150   : > { %v2365_v51 = vadd.s32 %v2363_v23, %v2358_v14  ;;  %v2372_v14 = vsel %vm2317_vm10, %v2231_v45, 0 }
 0x151   : > { %2790 = vpush %v1017_v30  ;;  %v2286_v58 = vadd.s32 %v2284_v43, %v2279_v7 }
 0x152   : > { %v2367_v38 = vadd.s32 %v2365_v51, %v2360_v25 }
 0x153   : > { %1471 = vrot.lane.b32.xlu0 %v3746_v19, %s2820_s24  ;;  %1979 = vrot.lane.b32.xlu1 %v1916_v22, %s2820_s24  ;;  %v2227_v22 = vmul.u32 %v2195_v59, %v4725_v6  ;;  %v2230_v59 = vmul.u32 %v2198_v62, %v4728_v10  ;;  %v1923_v62 = vpack.c.b16 %v1886_v2, %v1886_v2  ;;  %v1904_v10 = vunpack.c.3.s8 %v4011_v8 }
 0x154   : > { %v2369_v63 = vadd.s32 %v2367_v38, %v2362_v42  ;;  %v1748_v38 = vsel %vm1716_vm4, 1.0, %v4721_v54 }
 0x155   : > { %v2281_v0 = vsel %vm2234_vm13, %v2227_v22, 0  ;;  %v2364_v9 = vsel %vm2317_vm10, %v2227_v22, 0  ;;  %v2287_v31 = vsel %vm2234_vm13, %v2230_v59, 0  ;;  %v2370_v37 = vsel %vm2317_vm10, %v2230_v59, 0 }
 0x156   : > { %v2288_v20 = vadd.s32 %v2286_v58, %v2281_v0  ;;  %v2371_v32 = vadd.s32 %v2369_v63, %v2364_v9  ;;  %v4178_v0 = vpack.c.b8 %v1923_v62, %v1923_v62  ;;  %v1780_v9 = vtrunc.f32 %v1748_v38 }
 0x157   : > { %1503 = vrot.lane.b32.xlu0 %v3900_v3, %s2820_s24  ;;  %1983 = vrot.lane.b32.xlu1 %v4085_v28, %s2820_s24 }
 0x158   : > { %v2290_v27 = vadd.s32 %v2288_v20, %v2283_v15  ;;  %v2373_v40 = vadd.s32 %v2371_v32, %v2366_v57  ;;  %v1959_v20 = vpack.c.b16 %v1904_v10, %v1904_v10  ;;  %v1750_v57 = vsel %vm1718_vm8, 1.0, %v4721_v54 }
 0x159   : > { %v1751_v32 = vsel %vm1719_vm9, 1.0, %v4721_v54  ;;  %v1906_v10 = vunpack.c.1.s8 %v4014_v55 }
 0x15a   : > { %v2292_v22 = vadd.s32 %v2290_v27, %v2285_v26  ;;  %v4216_v27 = vpack.c.b8 %v1959_v20, %v1959_v20 }
 0x15b   : > { %1599 = vrot.lane.b32.xlu0 %v3746_v19, %s2821_s26  ;;  %2009 = vrot.lane.b32.xlu1 %v4101_v18, %s2820_s24  ;;  %v1779_v19 = vtrunc.f32 %v1747_v1 }
 0x15c   : > { %v2294_v36 = vadd.s32 %v2292_v22, %v2287_v31  ;;  %v1749_v22 = vsel %vm4730_vm15, 1.0, %v4721_v54 }
 0x15d   : > { %v1781_v2 = vtrunc.f32 %v1749_v22 }
 0x15e   : > { %v4164_v39 = vadd.s32 %v2294_v36, %v2289_v13  ;;  %v1887_v13 = vunpack.c.2.s8 %v4007_v34 }
 0x15f   : > { %1631 = vrot.lane.b32.xlu0 %v3900_v3, %s2821_s26  ;;  %2013 = vrot.lane.b32.xlu1 %v4121_v29, %s2820_s24 }
 0x163   : > { %1475 = vrot.lane.b32.xlu0 %v3771_v24, %s2820_s24  ;;  %2074 = vrot.lane.b32.xlu1 %v4052_v61, %s2821_s26  ;;  %v2368_v61 = vsel %vm2317_vm10, %v2229_v4, 0 }
 0x164   : > { %v1452_v3 = vpop.permute.xlu1 %1451  ;;  %v1484_v30 = vpop.permute.xlu0 %1483  ;;  %v2375_v7 = vadd.s32 %v2373_v40, %v2368_v61  ;;  %v1782_v61 = vtrunc.f32 %v1750_v57 }
 0x165   : > { %1546 = vst.msk [vmem:[%s2896_s22 + $0x8] sm:$0xff] %vm1384_vm2, %v1452_v3  ;;  %1562 = vst.msk [vmem:[%s2896_s22 + $0x88] sm:$0xff] %vm1384_vm2, %v1484_v30  ;;  %v1955_v30 = vpack.c.b16 %v1902_v60, %v1902_v60 }
 0x166   : > { %v2377_v43 = vadd.s32 %v2375_v7, %v2370_v37  ;;  %v1925_v37 = vpack.c.b16 %v1887_v13, %v1887_v13 }
 0x167   : > { %1507 = vrot.lane.b32.xlu0 %v3932_v48, %s2820_s24  ;;  %2078 = vrot.lane.b32.xlu1 %v3992_v53, %s2821_s26  ;;  %v1888_v53 = vunpack.c.3.s8 %v4007_v34  ;;  %v4200_v42 = vpack.c.b8 %v1955_v30, %v1955_v30 }
 0x168   : > { %v1450_v5 = vpop.permute.xlu1 %1449  ;;  %v1580_v6 = vpop.permute.xlu0 %1579  ;;  %v4176_v4 = vadd.s32 %v2377_v43, %v2372_v14  ;;  %v1766_v43 = vsel %vm1734_vm14, 1.0, %v4721_v54 }
 0x169   : > { %1545 = vst.msk [vmem:[%s2896_s22] sm:$0xff] %vm1384_vm2, %v1450_v5  ;;  %1674 = vst.msk [vmem:[%s2901_s25 + $0x8] sm:$0xff] %vm1384_vm2, %v1580_v6  ;;  %v1927_v25 = vpack.c.b16 %v1888_v53, %v1888_v53  ;;  %v1885_v5 = vunpack.c.0.s8 %v4007_v34  ;;  %v1901_v34 = vunpack.c.0.s8 %v4011_v8  ;;  %v1831_v53 = vpack.c.f32.eXmY %v1781_v2, %v1782_v61, 312 }
 0x16b   : > { %1603 = vrot.lane.b32.xlu0 %v3771_v24, %s2821_s26  ;;  %1469 = vrot.lane.b32.xlu1 %v3769_v41, %s2820_s24  ;;  %v4189_v3 = vpack.c.b8 %v1927_v25, %v1927_v25  ;;  %v1921_v24 = vpack.c.b16 %v1885_v5, %v1885_v5  ;;  %v4281_v25 = vpack.c.b8 %v1925_v37, %v1925_v37 }
 0x16c   : > { %v1482_v12 = vpop.permute.xlu1 %1481  ;;  %v1612_v49 = vpop.permute.xlu0 %1611  ;;  %v1953_v60 = vpack.c.b16 %v1901_v34, %v1901_v34 }
 0x16d   : > { %1561 = vst.msk [vmem:[%s2896_s22 + $0x80] sm:$0xff] %vm1384_vm2, %v1482_v12  ;;  %1690 = vst.msk [vmem:[%s2901_s25 + $0x88] sm:$0xff] %vm1384_vm2, %v1612_v49  ;;  %v1783_v12 = vtrunc.f32 %v1751_v32  ;;  %v4260_v49 = vpack.c.b8 %v1921_v24, %v1921_v24 }
 0x16e   : > { %v4296_v38 = vpack.c.b8 %v1953_v60, %v1953_v60 }
 0x16f   : > { %1635 = vrot.lane.b32.xlu0 %v3932_v48, %s2821_s26  ;;  %1501 = vrot.lane.b32.xlu1 %v3910_v56, %s2820_s24  ;;  %v1767_v48 = vsel %vm1735_vm1, 1.0, %v4721_v54 }
 0x171   : > { %v1578_v23 = vpop.permute.xlu1 %1577  ;;  %v1488_v16 = vpop.permute.xlu0 %1487 }
 0x172   : > { %1673 = vst.msk [vmem:[%s2901_s25] sm:$0xff] %vm1384_vm2, %v1578_v23  ;;  %1564 = vst.msk [vmem:[%s2896_s22 + $0x98] sm:$0xff] %vm1384_vm2, %v1488_v16  ;;  %v1765_v23 = vsel %vm1733_vm12, 1.0, %v4721_v54  ;;  %v1768_v16 = vsel %vm1736_vm0, 1.0, %v4721_v54 }
 0x173   : > { %1987 = vrot.lane.b32.xlu0 %v4178_v0, %s2820_s24  ;;  %1597 = vrot.lane.b32.xlu1 %v3769_v41, %s2821_s26 }
 0x175   : > { %v1610_v58 = vpop.permute.xlu1 %1609  ;;  %v1584_v51 = vpop.permute.xlu0 %1583 }
 0x176   : > { %1689 = vst.msk [vmem:[%s2901_s25 + $0x80] sm:$0xff] %vm1384_vm2, %v1610_v58  ;;  %1676 = vst.msk [vmem:[%s2901_s25 + $0x18] sm:$0xff] %vm1384_vm2, %v1584_v51  ;;  %v1903_v58 = vunpack.c.2.s8 %v4011_v8  ;;  %v1800_v8 = vtrunc.f32 %v1768_v16 }
 0x177   : > { %1991 = vrot.lane.b32.xlu0 %v4189_v3, %s2820_s24  ;;  %1629 = vrot.lane.b32.xlu1 %v3910_v56, %s2821_s26  ;;  %v1825_v56 = vpack.c.f32.eXmY %v1779_v19, %v1780_v9, 312  ;;  %v1963_v9 = vpack.c.b16 %v1906_v10, %v1906_v10  ;;  %v1908_v19 = vunpack.c.3.s8 %v4014_v55 }
 0x178   : > { %v1957_v1 = vpack.c.b16 %v1903_v58, %v1903_v58 }
 0x179   : > { %v1456_v59 = vpop.permute.xlu1 %1455  ;;  %v1616_v15 = vpop.permute.xlu0 %1615  ;;  %v4232_v6 = vpack.c.b8 %v1825_v56, %v3773_v52  ;;  %v1752_v52 = vsel %vm1720_vm11, 1.0, %v4721_v54  ;;  %v1799_v54 = vtrunc.f32 %v1767_v48  ;;  %v4313_v22 = vpack.c.b8 %v1963_v9, %v1963_v9 }
 0x17a   : > { %1548 = vst.msk [vmem:[%s2896_s22 + $0x18] sm:$0xff] %vm1384_vm2, %v1456_v59  ;;  %1692 = vst.msk [vmem:[%s2901_s25 + $0x98] sm:$0xff] %vm1384_vm2, %v1616_v15  ;;  %v1784_v40 = vtrunc.f32 %v1752_v52  ;;  %v1798_v59 = vtrunc.f32 %v1766_v43  ;;  %v1797_v15 = vtrunc.f32 %v1765_v23  ;;  %v4311_v5 = vpack.c.b8 %v1957_v1, %v1957_v1 }
 0x17b   : > { %2019 = vrot.lane.b32.xlu0 %v4200_v42, %s2820_s24  ;;  %1473 = vrot.lane.b32.xlu1 %v3806_v33, %s2820_s24  ;;  %v1892_v62 = vunpack.c.3.s8 %v4232_v6  ;;  %v1967_v52 = vpack.c.b16 %v1908_v19, %v1908_v19  ;;  %v1891_v58 = vunpack.c.2.s8 %v4232_v6 }
 0x17c   : > { %v1871_v56 = vpack.c.f32.eXmY %v1797_v15, %v1798_v59, 312  ;;  %v1905_v59 = vunpack.c.0.s8 %v4014_v55 }
 0x17d   : > { %v1486_v45 = vpop.permute.xlu1 %1485  ;;  %v1454_v26 = vpop.permute.xlu0 %1453  ;;  %v1935_v30 = vpack.c.b16 %v1892_v62, %v1892_v62  ;;  %v1889_v62 = vunpack.c.0.s8 %v4232_v6 }
 0x17e   : > { %1563 = vst.msk [vmem:[%s2896_s22 + $0x90] sm:$0xff] %vm1384_vm2, %v1486_v45  ;;  %1547 = vst.msk [vmem:[%s2896_s22 + $0x10] sm:$0xff] %vm1384_vm2, %v1454_v26  ;;  %v1961_v1 = vpack.c.b16 %v1905_v59, %v1905_v59 }
 0x17f   : > { %2023 = vrot.lane.b32.xlu0 %v4216_v27, %s2820_s24  ;;  %1505 = vrot.lane.b32.xlu1 %v3934_v21, %s2820_s24  ;;  %v4298_v26 = vpack.c.b8 %v1935_v30, %v1935_v30  ;;  %v1929_v60 = vpack.c.b16 %v1889_v62, %v1889_v62  ;;  %v4732_v62 = vld [vmem:[#allocation10_spill] sm:$0xff] }
 0x181   : > { %v1582_v41 = vpop.permute.xlu1 %1581  ;;  %v4371_v10 = vpack.c.b8 %v1929_v60, %v1929_v60 }
 0x182   : > { %1675 = vst.msk [vmem:[%s2901_s25 + $0x10] sm:$0xff] %vm1384_vm2, %v1582_v41  ;;  %s2791_s19 = spop %2790 }
 0x183   : > { %1479 = vrot.lane.b32.xlu0 %v3836_v11, %s2820_s24  ;;  %1601 = vrot.lane.b32.xlu1 %v3806_v33, %s2821_s26  ;;  %v1890_v33 = vunpack.c.1.s8 %v4232_v6  ;;  %v1933_v6 = vpack.c.b16 %v1891_v58, %v1891_v58 }
 0x185   : > { %v1614_v63 = vpop.permute.xlu1 %1613  ;;  %v1931_v14 = vpack.c.b16 %v1890_v33, %v1890_v33  ;;  %v4324_v33 = vpack.c.b8 %v1967_v52, %v1967_v52 }
 0x186   : > { %1691 = vst.msk [vmem:[%s2901_s25 + $0x90] sm:$0xff] %vm1384_vm2, %v1614_v63 }
 0x187   : > { %1511 = vrot.lane.b32.xlu0 %v3938_v35, %s2820_s24  ;;  %1633 = vrot.lane.b32.xlu1 %v3934_v21, %s2821_s26  ;;  %v4287_v51 = vpack.c.b8 %v1931_v14, %v1931_v14 }
 0x189   : > { %v1460_v31 = vpop.permute.xlu1 %1459 }
 0x18a   : > { %1550 = vst.msk [vmem:[%s2896_s22 + $0x28] sm:$0xff] %vm1384_vm2, %v1460_v31  ;;  %v1875_v31 = vpack.c.f32.eXmY %v1799_v54, %v1800_v8, 312 }
 0x18b   : > { %1607 = vrot.lane.b32.xlu0 %v3836_v11, %s2821_s26  ;;  %1985 = vrot.lane.b32.xlu1 %v4260_v49, %s2820_s24  ;;  %v1835_v11 = vpack.c.f32.eXmY %v1783_v12, %v1784_v40, 312 }
 0x18d   : > { %v1458_v36 = vpop.permute.xlu1 %1457  ;;  %v1492_v7 = vpop.permute.xlu0 %1491  ;;  %v4303_v41 = vpack.c.b8 %v1835_v11, %v1831_v53 }
 0x18e   : > { %1549 = vst.msk [vmem:[%s2896_s22 + $0x20] sm:$0xff] %vm1384_vm2, %v1458_v36  ;;  %1566 = vst.msk [vmem:[%s2896_s22 + $0xa8] sm:$0xff] %vm1384_vm2, %v1492_v7  ;;  %v4329_v36 = vpack.c.b8 %v1875_v31, %v1871_v56  ;;  %v4393_v56 = vpack.c.b8 %v1961_v1, %v1961_v1 }
 0x18f   : > { %1639 = vrot.lane.b32.xlu0 %v3938_v35, %s2821_s26  ;;  %1989 = vrot.lane.b32.xlu1 %v4281_v25, %s2820_s24  ;;  %v1894_v32 = vunpack.c.1.s8 %v4303_v41  ;;  %v1896_v2 = vunpack.c.3.s8 %v4303_v41  ;;  %v1893_v31 = vunpack.c.0.s8 %v4303_v41 }
 0x190   : > { %v1910_v7 = vunpack.c.1.s8 %v4329_v36  ;;  %v1912_v23 = vunpack.c.3.s8 %v4329_v36  ;;  %v1911_v60 = vunpack.c.2.s8 %v4329_v36 }
 0x191   : > { %v1588_v21 = vpop.permute.xlu0 %1587  ;;  %v1490_v20 = vpop.permute.xlu1 %1489  ;;  %v1939_v61 = vpack.c.b16 %v1894_v32, %v1894_v32  ;;  %v1943_v34 = vpack.c.b16 %v1896_v2, %v1896_v2  ;;  %v4731_v2 = vld [vmem:[#allocation9_spill] sm:$0xff] }
 0x192   : > { %1678 = vst.msk [vmem:[%s2901_s25 + $0x28] sm:$0xff] %vm1384_vm2, %v1588_v21  ;;  %1565 = vst.msk [vmem:[%s2896_s22 + $0xa0] sm:$0xff] %vm1384_vm2, %v1490_v20  ;;  %v1971_v43 = vpack.c.b16 %v1910_v7, %v1910_v7  ;;  %v1975_v30 = vpack.c.b16 %v1912_v23, %v1912_v23  ;;  %v4384_v20 = vpack.c.b8 %v1933_v6, %v1933_v6 }
 0x193   : > { %1995 = vrot.lane.b32.xlu0 %v4287_v51, %s2820_s24  ;;  %2017 = vrot.lane.b32.xlu1 %v4296_v38, %s2820_s24  ;;  %v4337_v37 = vpack.c.b8 %v1939_v61, %v1939_v61  ;;  %v4349_v11 = vpack.c.b8 %v1943_v34, %v1943_v34  ;;  %v1973_v59 = vpack.c.b16 %v1911_v60, %v1911_v60 }
 0x194   : > { %v4361_v21 = vpack.c.b8 %v1971_v43, %v1971_v43  ;;  %v4374_v8 = vpack.c.b8 %v1975_v30, %v1975_v30 }
 0x195   : > { %v1620_v45 = vpop.permute.xlu0 %1619  ;;  %v1586_v63 = vpop.permute.xlu1 %1585 }
 0x196   : > { %1694 = vst.msk [vmem:[%s2901_s25 + $0xa8] sm:$0xff] %vm1384_vm2, %v1620_v45  ;;  %1677 = vst.msk [vmem:[%s2901_s25 + $0x20] sm:$0xff] %vm1384_vm2, %v1586_v63  ;;  %v1907_v45 = vunpack.c.2.s8 %v4014_v55  ;;  %v2200_v55 = vsel %vm1735_vm1, 1, %v4722_v44 }
 0x197   : > { %1999 = vrot.lane.b32.xlu0 %v4298_v26, %s2820_s24  ;;  %2021 = vrot.lane.b32.xlu1 %v4311_v5, %s2820_s24 }
 0x198   : > { %v1965_v63 = vpack.c.b16 %v1907_v45, %v1907_v45 }
 0x199   : > { %v1496_v57 = vpop.permute.xlu0 %1495  ;;  %v1618_v24 = vpop.permute.xlu1 %1617 }
 0x19a   : > { %1568 = vst.msk [vmem:[%s2896_s22 + $0xb8] sm:$0xff] %vm1384_vm2, %v1496_v57  ;;  %1693 = vst.msk [vmem:[%s2901_s25 + $0xa0] sm:$0xff] %vm1384_vm2, %v1618_v24  ;;  %v4405_v32 = vpack.c.b8 %v1965_v63, %v1965_v63  ;;  %v1937_v24 = vpack.c.b16 %v1893_v31, %v1893_v31 }
 0x19b   : > { %2027 = vrot.lane.b32.xlu0 %v4313_v22, %s2820_s24  ;;  %1477 = vrot.lane.b32.xlu1 %v3870_v46, %s2820_s24 }
 0x19c   : > { %v4418_v34 = vpack.c.b8 %v1937_v24, %v1937_v24 }
 0x19d   : > { %v1592_v13 = vpop.permute.xlu0 %1591  ;;  %v1464_v40 = vpop.permute.xlu1 %1463 }
 0x19e   : > { %1680 = vst.msk [vmem:[%s2901_s25 + $0x38] sm:$0xff] %vm1384_vm2, %v1592_v13  ;;  %1552 = vst.msk [vmem:[%s2896_s22 + $0x38] sm:$0xff] %vm1384_vm2, %v1464_v40  ;;  %v1895_v13 = vunpack.c.2.s8 %v4303_v41  ;;  %v2232_v40 = vmul.u32 %v2200_v55, %v4731_v2  ;;  %v1909_v41 = vunpack.c.0.s8 %v4329_v36 }
 0x19f   : > { %2031 = vrot.lane.b32.xlu0 %v4324_v33, %s2820_s24  ;;  %1509 = vrot.lane.b32.xlu1 %v3940_v17, %s2820_s24 }
 0x1a0   : > { %v1941_v7 = vpack.c.b16 %v1895_v13, %v1895_v13  ;;  %v2374_v30 = vsel %vm2317_vm10, %v2232_v40, 0 }
 0x1a1   : > { %v1624_v12 = vpop.permute.xlu0 %1623  ;;  %v1462_v14 = vpop.permute.xlu1 %1461  ;;  %v2379_v36 = vadd.s32 %v4176_v4, %v2374_v30 }
 0x1a2   : > { %1696 = vst.msk [vmem:[%s2901_s25 + $0xb8] sm:$0xff] %vm1384_vm2, %v1624_v12  ;;  %1551 = vst.msk [vmem:[%s2896_s22 + $0x30] sm:$0xff] %vm1384_vm2, %v1462_v14  ;;  %v4429_v43 = vpack.c.b8 %v1941_v7, %v1941_v7 }
 0x1a3   : > { %2003 = vrot.lane.b32.xlu0 %v4337_v37, %s2820_s24  ;;  %1605 = vrot.lane.b32.xlu1 %v3870_v46, %s2821_s26 }
 0x1a5   : > { %v1468_v53 = vpop.permute.xlu0 %1467  ;;  %v1494_v16 = vpop.permute.xlu1 %1493 }
 0x1a6   : > { %1554 = vst.msk [vmem:[%s2896_s22 + $0x48] sm:$0xff] %vm1384_vm2, %v1468_v53  ;;  %1567 = vst.msk [vmem:[%s2896_s22 + $0xb0] sm:$0xff] %vm1384_vm2, %v1494_v16  ;;  %v1969_v16 = vpack.c.b16 %v1909_v41, %v1909_v41 }
 0x1a7   : > { %2007 = vrot.lane.b32.xlu0 %v4349_v11, %s2820_s24  ;;  %1637 = vrot.lane.b32.xlu1 %v3940_v17, %s2821_s26  ;;  %v2201_v17 = vsel %vm1736_vm0, 1, %v4722_v44  ;;  %v2291_v44 = vsel %vm2234_vm13, %v2232_v40, 0 }
 0x1a8   : > { %v2233_v53 = vmul.u32 %v2201_v17, %v4732_v62  ;;  %v2296_v23 = vadd.s32 %v4164_v39, %v2291_v44  ;;  %v4441_v6 = vpack.c.b8 %v1969_v16, %v1969_v16 }
 0x1a9   : > { %v1500_v48 = vpop.permute.xlu0 %1499  ;;  %v1590_v46 = vpop.permute.xlu1 %1589 }
 0x1aa   : > { %1570 = vst.msk [vmem:[%s2896_s22 + $0xc8] sm:$0xff] %vm1384_vm2, %v1500_v48  ;;  %1679 = vst.msk [vmem:[%s2901_s25 + $0x30] sm:$0xff] %vm1384_vm2, %v1590_v46  ;;  %v2293_v48 = vsel %vm2234_vm13, %v2233_v53, 0 }
 0x1ab   : > { %2035 = vrot.lane.b32.xlu0 %v4361_v21, %s2820_s24  ;;  %1993 = vrot.lane.b32.xlu1 %v4371_v10, %s2820_s24  ;;  %v2297_v39 = vadd.s32 %v2296_v23, %v2293_v48 }
 0x1ad   : > { %v1596_v15 = vpop.permute.xlu0 %1595  ;;  %v1622_v54 = vpop.permute.xlu1 %1621  ;;  %v2299_v1 = vshrl.u32 %v2297_v39, 16  ;;  %v2298_v16 = vand.u32 65535, %v2297_v39 }
 0x1ae   : > { %1682 = vst.msk [vmem:[%s2901_s25 + $0x48] sm:$0xff] %vm1384_vm2, %v1596_v15  ;;  %1695 = vst.msk [vmem:[%s2901_s25 + $0xb0] sm:$0xff] %vm1384_vm2, %v1622_v54  ;;  %v2376_v54 = vsel %vm2317_vm10, %v2233_v53, 0 }
 0x1af   : > { %2039 = vrot.lane.b32.xlu0 %v4374_v8, %s2820_s24  ;;  %1997 = vrot.lane.b32.xlu1 %v4384_v20, %s2820_s24  ;;  %v2301_v63 = vcvt.s32.f32 %v2299_v1  ;;  %v2300_v48 = vcvt.s32.f32 %v2298_v16 }
 0x1b1   : > { %v1628_v9 = vpop.permute.xlu0 %1627  ;;  %v1466_v19 = vpop.permute.xlu1 %1465 }
 0x1b2   : > { %1698 = vst.msk [vmem:[%s2901_s25 + $0xc8] sm:$0xff] %vm1384_vm2, %v1628_v9  ;;  %1553 = vst.msk [vmem:[%s2896_s22 + $0x40] sm:$0xff] %vm1384_vm2, %v1466_v19  ;;  %v2380_v9 = vadd.s32 %v2379_v36, %v2376_v54  ;;  %v4451_v19 = vpack.c.b8 %v1973_v59, %v1973_v59 }
 0x1b3   : > { %2025 = vrot.lane.b32.xlu1 %v4393_v56, %s2820_s24 }
 0x1b4   : > { %v2382_v31 = vshrl.u32 %v2380_v9, 16  ;;  %v2381_v24 = vand.u32 65535, %v2380_v9 }
 0x1b5   : > { %v1982_v57 = vpop.permute.xlu0 %1981  ;;  %v1498_v52 = vpop.permute.xlu1 %1497 }
 0x1b6   : > { %2044 = vst.msk [vmem:[%s2911_s14 + $0x4] sm:$0x3] %vm2041_vm3, %v1982_v57  ;;  %v2383_v2 = vcvt.s32.f32 %v2381_v24 }
 0x1b7   : > { %1569 = vst.msk [vmem:[%s2896_s22 + $0xc0] sm:$0xff] %vm1384_vm2, %v1498_v52  ;;  %2029 = vrot.lane.b32.xlu1 %v4405_v32, %s2820_s24  ;;  %v2384_v52 = vcvt.s32.f32 %v2382_v31 }
 0x1b9   : > { %v2012_v61 = vpop.permute.xlu0 %2011  ;;  %v1594_v12 = vpop.permute.xlu1 %1593 }
 0x1ba   : > { %2059 = vst.msk [vmem:[%s2911_s14 + $0x22] sm:$0x3] %vm2041_vm3, %v2012_v61 }
 0x1bb   : > { %1681 = vst.msk [vmem:[%s2901_s25 + $0x40] sm:$0xff] %vm1384_vm2, %v1594_v12  ;;  %2001 = vrot.lane.b32.xlu1 %v4418_v34, %s2820_s24 }
 0x1bd   : > { %v2016_v14 = vpop.permute.xlu0 %2015  ;;  %v1626_v35 = vpop.permute.xlu1 %1625 }
 0x1be   : > { %2061 = vst.msk [vmem:[%s2911_s14 + $0x26] sm:$0x3] %vm2041_vm3, %v2016_v14 }
 0x1bf   : > { %1697 = vst.msk [vmem:[%s2901_s25 + $0xc0] sm:$0xff] %vm1384_vm2, %v1626_v35  ;;  %2005 = vrot.lane.b32.xlu1 %v4429_v43, %s2820_s24 }
 0x1c1   : > { %v2077_v58 = vpop.permute.xlu0 %2076  ;;  %v1978_v46 = vpop.permute.xlu1 %1977 }
 0x1c2   : > { %2139 = vst.msk [vmem:[%s2916_s18 + $0x2] sm:$0x3] %vm2041_vm3, %v2077_v58  ;;  %2042 = vst.msk [vmem:[%s2911_s14] sm:$0x3] %vm2041_vm3, %v1978_v46 }
 0x1c3   : > { %2033 = vrot.lane.b32.xlu1 %v4441_v6, %s2820_s24 }
 0x1c5   : > { %v1472_v15 = vpop.permute.xlu0 %1471  ;;  %v1980_v45 = vpop.permute.xlu1 %1979 }
 0x1c6   : > { %1556 = vst.msk [vmem:[%s2896_s22 + $0x58] sm:$0xff] %vm1384_vm2, %v1472_v15 }
 0x1c7   : > { %2043 = vst.msk [vmem:[%s2911_s14 + $0x2] sm:$0x3] %vm2041_vm3, %v1980_v45  ;;  %2037 = vrot.lane.b32.xlu1 %v4451_v19, %s2820_s24 }
 0x1c9   : > { %v1504_v4 = vpop.permute.xlu0 %1503  ;;  %v1984_v57 = vpop.permute.xlu1 %1983 }
 0x1ca   : > { %1572 = vst.msk [vmem:[%s2896_s22 + $0xd8] sm:$0xff] %vm1384_vm2, %v1504_v4 }
 0x1cb   : > { %2045 = vst.msk [vmem:[%s2911_s14 + $0x6] sm:$0x3] %vm2041_vm3, %v1984_v57 }
 0x1cd   : > { %v1600_v55 = vpop.permute.xlu0 %1599  ;;  %v2010_v13 = vpop.permute.xlu1 %2009 }
 0x1ce   : > { %1684 = vst.msk [vmem:[%s2901_s25 + $0x58] sm:$0xff] %vm1384_vm2, %v1600_v55  ;;  %2304 = vadd.xlane.f32.xlu0 %v2301_v63 }
 0x1cf   : > { %2058 = vst.msk [vmem:[%s2911_s14 + $0x20] sm:$0x3] %vm2041_vm3, %v2010_v13 }
 0x1d1   : > { %v1632_v61 = vpop.permute.xlu0 %1631  ;;  %v2014_v40 = vpop.permute.xlu1 %2013 }
 0x1d2   : > { %1700 = vst.msk [vmem:[%s2901_s25 + $0xd8] sm:$0xff] %vm1384_vm2, %v1632_v61  ;;  %2387 = vadd.xlane.f32.xlu0 %v2384_v52 }
 0x1d3   : > { %2060 = vst.msk [vmem:[%s2911_s14 + $0x24] sm:$0x3] %vm2041_vm3, %v2014_v40 }
 0x1d5   : > { %v1476_v17 = vpop.permute.xlu0 %1475  ;;  %v2075_v12 = vpop.permute.xlu1 %2074 }
 0x1d6   : > { %1558 = vst.msk [vmem:[%s2896_s22 + $0x68] sm:$0xff] %vm1384_vm2, %v1476_v17  ;;  %2385 = vadd.xlane.f32.xlu0 %v2383_v2 }
 0x1d7   : > { %2138 = vst.msk [vmem:[%s2916_s18] sm:$0x3] %vm2041_vm3, %v2075_v12 }
 0x1d9   : > { %v1508_v7 = vpop.permute.xlu0 %1507  ;;  %v2079_v41 = vpop.permute.xlu1 %2078 }
 0x1da   : > { %1574 = vst.msk [vmem:[%s2896_s22 + $0xe8] sm:$0xff] %vm1384_vm2, %v1508_v7 }
 0x1db   : > { %2140 = vst.msk [vmem:[%s2916_s18 + $0x4] sm:$0x3] %vm2041_vm3, %v2079_v41 }
 0x1dd   : > { %v1604_v14 = vpop.permute.xlu0 %1603  ;;  %v1470_v62 = vpop.permute.xlu1 %1469 }
 0x1de   : > { %1686 = vst.msk [vmem:[%s2901_s25 + $0x68] sm:$0xff] %vm1384_vm2, %v1604_v14  ;;  %1555 = vst.msk [vmem:[%s2896_s22 + $0x50] sm:$0xff] %vm1384_vm2, %v1470_v62 }
 0x1e1   : > { %v1636_v53 = vpop.permute.xlu0 %1635  ;;  %v1502_v44 = vpop.permute.xlu1 %1501 }
 0x1e2   : > { %1702 = vst.msk [vmem:[%s2901_s25 + $0xe8] sm:$0xff] %vm1384_vm2, %v1636_v53  ;;  %1571 = vst.msk [vmem:[%s2896_s22 + $0xd0] sm:$0xff] %vm1384_vm2, %v1502_v44 }
 0x1e5   : > { %v1988_v35 = vpop.permute.xlu0 %1987  ;;  %v1598_v23 = vpop.permute.xlu1 %1597 }
 0x1e6   : > { %2047 = vst.msk [vmem:[%s2911_s14 + $0xa] sm:$0x3] %vm2041_vm3, %v1988_v35 }
 0x1e7   : > { %1683 = vst.msk [vmem:[%s2901_s25 + $0x50] sm:$0xff] %vm1384_vm2, %v1598_v23 }
 0x1e9   : > { %v1992_v60 = vpop.permute.xlu0 %1991  ;;  %v1630_v58 = vpop.permute.xlu1 %1629 }
 0x1ea   : > { %2049 = vst.msk [vmem:[%s2911_s14 + $0xe] sm:$0x3] %vm2041_vm3, %v1992_v60 }
 0x1eb   : > { %1699 = vst.msk [vmem:[%s2901_s25 + $0xd0] sm:$0xff] %vm1384_vm2, %v1630_v58  ;;  %2302 = vadd.xlane.f32.xlu1 %v2300_v48 }
 0x1ec   : > { %2080 = vrot.lane.b32.xlu0 %v4085_v28, %s2821_s26 }
 0x1ed   : > { %v2020_v30 = vpop.permute.xlu0 %2019  ;;  %v1474_v46 = vpop.permute.xlu1 %1473 }
 0x1ee   : > { %2063 = vst.msk [vmem:[%s2911_s14 + $0x2a] sm:$0x3] %vm2041_vm3, %v2020_v30 }
 0x1ef   : > { %1557 = vst.msk [vmem:[%s2896_s22 + $0x60] sm:$0xff] %vm1384_vm2, %v1474_v46 }
 0x1f0   : > { %2084 = vrot.lane.b32.xlu0 %v4178_v0, %s2821_s26 }
 0x1f1   : > { %v2024_v39 = vpop.permute.xlu0 %2023  ;;  %v1506_v28 = vpop.permute.xlu1 %1505 }
 0x1f2   : > { %2065 = vst.msk [vmem:[%s2911_s14 + $0x2e] sm:$0x3] %vm2041_vm3, %v2024_v39 }
 0x1f3   : > { %1573 = vst.msk [vmem:[%s2896_s22 + $0xe0] sm:$0xff] %vm1384_vm2, %v1506_v28 }
 0x1f4   : > { %2088 = vrot.lane.b32.xlu0 %v4189_v3, %s2821_s26 }
 0x1f5   : > { %v1480_v36 = vpop.permute.xlu0 %1479  ;;  %v1602_v0 = vpop.permute.xlu1 %1601 }
 0x1f6   : > { %1560 = vst.msk [vmem:[%s2896_s22 + $0x78] sm:$0xff] %vm1384_vm2, %v1480_v36  ;;  %1685 = vst.msk [vmem:[%s2901_s25 + $0x60] sm:$0xff] %vm1384_vm2, %v1602_v0 }
 0x1f8   : > { %2092 = vrot.lane.b32.xlu0 %v4287_v51, %s2821_s26 }
 0x1f9   : > { %v1512_v59 = vpop.permute.xlu0 %1511  ;;  %v1634_v3 = vpop.permute.xlu1 %1633 }
 0x1fa   : > { %1576 = vst.msk [vmem:[%s2896_s22 + $0xf8] sm:$0xff] %vm1384_vm2, %v1512_v59  ;;  %1701 = vst.msk [vmem:[%s2901_s25 + $0xe0] sm:$0xff] %vm1384_vm2, %v1634_v3 }
 0x1fc   : > { %2096 = vrot.lane.b32.xlu0 %v4298_v26, %s2821_s26  ;;  %2082 = vrot.lane.b32.xlu1 %v4260_v49, %s2821_s26 }
 0x1fd   : > { %v1608_v15 = vpop.permute.xlu0 %1607  ;;  %v1986_v51 = vpop.permute.xlu1 %1985 }
 0x1fe   : > { %1688 = vst.msk [vmem:[%s2901_s25 + $0x78] sm:$0xff] %vm1384_vm2, %v1608_v15 }
 0x1ff   : > { %2046 = vst.msk [vmem:[%s2911_s14 + $0x8] sm:$0x3] %vm2041_vm3, %v1986_v51 }
 0x200   : > { %2100 = vrot.lane.b32.xlu0 %v4337_v37, %s2821_s26  ;;  %2086 = vrot.lane.b32.xlu1 %v4281_v25, %s2821_s26 }
 0x201   : > { %v1640_v54 = vpop.permute.xlu0 %1639  ;;  %v1990_v49 = vpop.permute.xlu1 %1989 }
 0x202   : > { %1704 = vst.msk [vmem:[%s2901_s25 + $0xf8] sm:$0xff] %vm1384_vm2, %v1640_v54 }
 0x203   : > { %2048 = vst.msk [vmem:[%s2911_s14 + $0xc] sm:$0x3] %vm2041_vm3, %v1990_v49 }
 0x204   : > { %2104 = vrot.lane.b32.xlu0 %v4349_v11, %s2821_s26  ;;  %2090 = vrot.lane.b32.xlu1 %v4371_v10, %s2821_s26 }
 0x205   : > { %v1996_v26 = vpop.permute.xlu0 %1995  ;;  %v2018_v25 = vpop.permute.xlu1 %2017 }
 0x206   : > { %2051 = vst.msk [vmem:[%s2911_s14 + $0x12] sm:$0x3] %vm2041_vm3, %v1996_v26  ;;  %2062 = vst.msk [vmem:[%s2911_s14 + $0x28] sm:$0x3] %vm2041_vm3, %v2018_v25 }
 0x208   : > { %2108 = vrot.lane.b32.xlu0 %v4016_v50, %s2821_s26  ;;  %2094 = vrot.lane.b32.xlu1 %v4384_v20, %s2821_s26 }
 0x209   : > { %v2000_v37 = vpop.permute.xlu0 %1999  ;;  %v2022_v11 = vpop.permute.xlu1 %2021 }
 0x20a   : > { %2053 = vst.msk [vmem:[%s2911_s14 + $0x16] sm:$0x3] %vm2041_vm3, %v2000_v37  ;;  %2064 = vst.msk [vmem:[%s2911_s14 + $0x2c] sm:$0x3] %vm2041_vm3, %v2022_v11 }
 0x20c   : > { %2112 = vrot.lane.b32.xlu0 %v4031_v47, %s2821_s26  ;;  %2098 = vrot.lane.b32.xlu1 %v4418_v34, %s2821_s26 }
 0x20d   : > { %v2028_v10 = vpop.permute.xlu0 %2027  ;;  %v1478_v50 = vpop.permute.xlu1 %1477 }
 0x20e   : > { %2067 = vst.msk [vmem:[%s2911_s14 + $0x32] sm:$0x3] %vm2041_vm3, %v2028_v10 }
 0x20f   : > { %1559 = vst.msk [vmem:[%s2896_s22 + $0x70] sm:$0xff] %vm1384_vm2, %v1478_v50 }
 0x210   : > { %2116 = vrot.lane.b32.xlu0 %v4200_v42, %s2821_s26  ;;  %2102 = vrot.lane.b32.xlu1 %v4429_v43, %s2821_s26 }
 0x211   : > { %v2032_v20 = vpop.permute.xlu0 %2031  ;;  %v1510_v47 = vpop.permute.xlu1 %1509 }
 0x212   : > { %2069 = vst.msk [vmem:[%s2911_s14 + $0x36] sm:$0x3] %vm2041_vm3, %v2032_v20 }
 0x213   : > { %1575 = vst.msk [vmem:[%s2896_s22 + $0xf0] sm:$0xff] %vm1384_vm2, %v1510_v47 }
 0x214   : > { %2120 = vrot.lane.b32.xlu0 %v4216_v27, %s2821_s26  ;;  %2106 = vrot.lane.b32.xlu1 %v4101_v18, %s2821_s26 }
 0x215   : > { %v2004_v34 = vpop.permute.xlu0 %2003  ;;  %v1606_v42 = vpop.permute.xlu1 %1605 }
 0x216   : > { %2055 = vst.msk [vmem:[%s2911_s14 + $0x1a] sm:$0x3] %vm2041_vm3, %v2004_v34 }
 0x217   : > { %1687 = vst.msk [vmem:[%s2901_s25 + $0x70] sm:$0xff] %vm1384_vm2, %v1606_v42 }
 0x218   : > { %2124 = vrot.lane.b32.xlu0 %v4313_v22, %s2821_s26  ;;  %2110 = vrot.lane.b32.xlu1 %v4121_v29, %s2821_s26 }
 0x219   : > { %v2008_v43 = vpop.permute.xlu0 %2007  ;;  %v1638_v27 = vpop.permute.xlu1 %1637 }
 0x21a   : > { %2057 = vst.msk [vmem:[%s2911_s14 + $0x1e] sm:$0x3] %vm2041_vm3, %v2008_v43 }
 0x21b   : > { %1703 = vst.msk [vmem:[%s2901_s25 + $0xf0] sm:$0xff] %vm1384_vm2, %v1638_v27  ;;  %v4733_v27 = vlaneseq }
 0x21c   : > { %2128 = vrot.lane.b32.xlu0 %v4324_v33, %s2821_s26  ;;  %2114 = vrot.lane.b32.xlu1 %v4296_v38, %s2821_s26 }
 0x21d   : > { %v2036_v18 = vpop.permute.xlu0 %2035  ;;  %v1994_v22 = vpop.permute.xlu1 %1993 }
 0x21e   : > { %2071 = vst.msk [vmem:[%s2911_s14 + $0x3a] sm:$0x3] %vm2041_vm3, %v2036_v18  ;;  %2050 = vst.msk [vmem:[%s2911_s14 + $0x10] sm:$0x3] %vm2041_vm3, %v1994_v22  ;;  %v2401_v18 = vand.u32 127, %v4733_v27  ;;  %v2404_v22 = vstv %s2791_s19 }
 0x220   : > { %2132 = vrot.lane.b32.xlu0 %v4361_v21, %s2821_s26  ;;  %2118 = vrot.lane.b32.xlu1 %v4311_v5, %s2821_s26  ;;  %vm2403_vm2 = vcmp.eq.s32.totalorder %v2401_v18, 0  ;;  %vm2406_vm13 = vcmp.eq.s32.totalorder %v2401_v18, 1  ;;  %vm2410_vm10 = vcmp.eq.s32.totalorder %v2401_v18, 2 }
 0x221   : > { %v2040_v29 = vpop.permute.xlu0 %2039  ;;  %v1998_v33 = vpop.permute.xlu1 %1997 }
 0x222   : > { %2073 = vst.msk [vmem:[%s2911_s14 + $0x3e] sm:$0x3] %vm2041_vm3, %v2040_v29  ;;  %2052 = vst.msk [vmem:[%s2911_s14 + $0x14] sm:$0x3] %vm2041_vm3, %v1998_v33  ;;  %v2405_v33 = vsel %vm2403_vm2, %v2404_v22, 0 }
 0x224   : > { %2136 = vrot.lane.b32.xlu0 %v4374_v8, %s2821_s26  ;;  %2122 = vrot.lane.b32.xlu1 %v4393_v56, %s2821_s26 }
 0x225   : > { %v2026_v38 = vpop.permute.xlu1 %2025 }
 0x226   : > { %2066 = vst.msk [vmem:[%s2911_s14 + $0x30] sm:$0x3] %vm2041_vm3, %v2026_v38 }
 0x228   : > { %2126 = vrot.lane.b32.xlu1 %v4405_v32, %s2821_s26 }
 0x229   : > { %v2030_v21 = vpop.permute.xlu1 %2029 }
 0x22a   : > { %2068 = vst.msk [vmem:[%s2911_s14 + $0x34] sm:$0x3] %vm2041_vm3, %v2030_v21 }
 0x22c   : > { %2130 = vrot.lane.b32.xlu1 %v4441_v6, %s2821_s26 }
 0x22d   : > { %v2002_v5 = vpop.permute.xlu1 %2001 }
 0x22e   : > { %2054 = vst.msk [vmem:[%s2911_s14 + $0x18] sm:$0x3] %vm2041_vm3, %v2002_v5 }
 0x230   : > { %2134 = vrot.lane.b32.xlu1 %v4451_v19, %s2821_s26 }
 0x231   : > { %v2006_v8 = vpop.permute.xlu1 %2005 }
 0x232   : > { %2056 = vst.msk [vmem:[%s2911_s14 + $0x1c] sm:$0x3] %vm2041_vm3, %v2006_v8  ;;  %v2402_v8 = vld [vmem:[%s4696_s9] sm:$0x1] }
 0x235   : > { %v2034_v56 = vpop.permute.xlu1 %2033 }
 0x236   : > { %2070 = vst.msk [vmem:[%s2911_s14 + $0x38] sm:$0x3] %vm2041_vm3, %v2034_v56 }
 0x239   : > { %v2038_v32 = vpop.permute.xlu1 %2037 }
 0x23a   : > { %2072 = vst.msk [vmem:[%s2911_s14 + $0x3c] sm:$0x3] %vm2041_vm3, %v2038_v32 }
 0x25b   : > { %v2305_v1 = vpop.xlane.xlu0 %2304 }
 0x25c   : > { %v2307_v61 = vcvt.f32.s32 %v2305_v1 }
 0x25e   : > { %v2308_v12 = vshll.u32 %v2307_v61, 16 }
 0x25f   : > { %v2388_v6 = vpop.xlane.xlu0 %2387 }
 0x260   : > { %v2390_v19 = vcvt.f32.s32 %v2388_v6 }
 0x262   : > { %v2391_v57 = vshll.u32 %v2390_v19, 16 }
 0x263   : > { %v2386_v45 = vpop.xlane.xlu0 %2385 }
 0x264   : > { %v2389_v63 = vcvt.f32.s32 %v2386_v45 }
 0x266   : > { %v2392_v55 = vadd.s32 %v2391_v57, %v2389_v63 }
 0x267   : > { %v2081_v9 = vpop.permute.xlu0 %2080 }
 0x268   : > { %2141 = vst.msk [vmem:[%s2916_s18 + $0x6] sm:$0x3] %vm2041_vm3, %v2081_v9  ;;  %v2393_v24 = vrot.slane %v2392_v55, 4 }
 0x26a   : > { %v2394_v2 = vadd.s32 %v2393_v24, %v2392_v55 }
 0x26b   : > { %v2085_v4 = vpop.permute.xlu0 %2084 }
 0x26c   : > { %2143 = vst.msk [vmem:[%s2916_s18 + $0xa] sm:$0x3] %vm2041_vm3, %v2085_v4  ;;  %v2395_v53 = vrot.slane %v2394_v2, 2 }
 0x26e   : > { %v2396_v60 = vadd.s32 %v2395_v53, %v2394_v2 }
 0x26f   : > { %v2089_v31 = vpop.permute.xlu0 %2088 }
 0x270   : > { %2145 = vst.msk [vmem:[%s2916_s18 + $0xe] sm:$0x3] %vm2041_vm3, %v2089_v31  ;;  %v2397_v39 = vrot.slane %v2396_v60, 1 }
 0x272   : > { %v2398_v3 = vadd.s32 %v2397_v39, %v2396_v60 }
 0x273   : > { %v2093_v52 = vpop.permute.xlu0 %2092 }
 0x274   : > { %2147 = vst.msk [vmem:[%s2916_s18 + $0x12] sm:$0x3] %vm2041_vm3, %v2093_v52 }
 0x277   : > { %v2097_v13 = vpop.permute.xlu0 %2096 }
 0x278   : > { %2149 = vst.msk [vmem:[%s2916_s18 + $0x16] sm:$0x3] %vm2041_vm3, %v2097_v13  ;;  %v2303_v17 = vpop.xlane.xlu1 %2302 }
 0x279   : > { %v2306_v7 = vcvt.f32.s32 %v2303_v17 }
 0x27b   : > { %v2101_v40 = vpop.permute.xlu0 %2100  ;;  %v2309_v41 = vadd.s32 %v2308_v12, %v2306_v7 }
 0x27c   : > { %2151 = vst.msk [vmem:[%s2916_s18 + $0x1a] sm:$0x3] %vm2041_vm3, %v2101_v40  ;;  %v2083_v62 = vpop.permute.xlu1 %2082 }
 0x27d   : > { %v2310_v44 = vrot.slane %v2309_v41, 4  ;;  %2142 = vst.msk [vmem:[%s2916_s18 + $0x8] sm:$0x3] %vm2041_vm3, %v2083_v62 }
 0x27f   : > { %v2105_v14 = vpop.permute.xlu0 %2104  ;;  %v2311_v35 = vadd.s32 %v2310_v44, %v2309_v41 }
 0x280   : > { %2153 = vst.msk [vmem:[%s2916_s18 + $0x1e] sm:$0x3] %vm2041_vm3, %v2105_v14  ;;  %v2087_v16 = vpop.permute.xlu1 %2086 }
 0x281   : > { %2144 = vst.msk [vmem:[%s2916_s18 + $0xc] sm:$0x3] %vm2041_vm3, %v2087_v16  ;;  %v2312_v58 = vrot.slane %v2311_v35, 2 }
 0x283   : > { %v2109_v23 = vpop.permute.xlu0 %2108  ;;  %v2313_v48 = vadd.s32 %v2312_v58, %v2311_v35 }
 0x284   : > { %2155 = vst.msk [vmem:[%s2916_s18 + $0x22] sm:$0x3] %vm2041_vm3, %v2109_v23  ;;  %v2091_v46 = vpop.permute.xlu1 %2090 }
 0x285   : > { %2146 = vst.msk [vmem:[%s2916_s18 + $0x10] sm:$0x3] %vm2041_vm3, %v2091_v46  ;;  %v2314_v28 = vrot.slane %v2313_v48, 1 }
 0x287   : > { %v2113_v30 = vpop.permute.xlu0 %2112  ;;  %v2315_v36 = vadd.s32 %v2314_v28, %v2313_v48 }
 0x288   : > { %2157 = vst.msk [vmem:[%s2916_s18 + $0x26] sm:$0x3] %vm2041_vm3, %v2113_v30  ;;  %v2095_v59 = vpop.permute.xlu1 %2094 }
 0x289   : > { %2148 = vst.msk [vmem:[%s2916_s18 + $0x14] sm:$0x3] %vm2041_vm3, %v2095_v59 }
 0x28a   : > { %2792 = vpush %v2315_v36 }
 0x28b   : > { %v2117_v0 = vpop.permute.xlu0 %2116  ;;  %2794 = vpush %v2398_v3 }
 0x28c   : > { %2159 = vst.msk [vmem:[%s2916_s18 + $0x2a] sm:$0x3] %vm2041_vm3, %v2117_v0  ;;  %v2099_v51 = vpop.permute.xlu1 %2098 }
 0x28d   : > { %2150 = vst.msk [vmem:[%s2916_s18 + $0x18] sm:$0x3] %vm2041_vm3, %v2099_v51 }
 0x28f   : > { %v2121_v15 = vpop.permute.xlu0 %2120 }
 0x290   : > { %2161 = vst.msk [vmem:[%s2916_s18 + $0x2e] sm:$0x3] %vm2041_vm3, %v2121_v15  ;;  %v2103_v49 = vpop.permute.xlu1 %2102 }
 0x291   : > { %2152 = vst.msk [vmem:[%s2916_s18 + $0x1c] sm:$0x3] %vm2041_vm3, %v2103_v49 }
 0x293   : > { %v2125_v54 = vpop.permute.xlu0 %2124 }
 0x294   : > { %2163 = vst.msk [vmem:[%s2916_s18 + $0x32] sm:$0x3] %vm2041_vm3, %v2125_v54  ;;  %v2107_v25 = vpop.permute.xlu1 %2106 }
 0x295   : > { %2154 = vst.msk [vmem:[%s2916_s18 + $0x20] sm:$0x3] %vm2041_vm3, %v2107_v25 }
 0x297   : > { %v2129_v26 = vpop.permute.xlu0 %2128 }
 0x298   : > { %2165 = vst.msk [vmem:[%s2916_s18 + $0x36] sm:$0x3] %vm2041_vm3, %v2129_v26  ;;  %v2111_v11 = vpop.permute.xlu1 %2110 }
 0x299   : > { %2156 = vst.msk [vmem:[%s2916_s18 + $0x24] sm:$0x3] %vm2041_vm3, %v2111_v11 }
 0x29b   : > { %v2133_v37 = vpop.permute.xlu0 %2132 }
 0x29c   : > { %2167 = vst.msk [vmem:[%s2916_s18 + $0x3a] sm:$0x3] %vm2041_vm3, %v2133_v37  ;;  %v2115_v50 = vpop.permute.xlu1 %2114 }
 0x29d   : > { %2158 = vst.msk [vmem:[%s2916_s18 + $0x28] sm:$0x3] %vm2041_vm3, %v2115_v50 }
 0x29f   : > { %v2137_v10 = vpop.permute.xlu0 %2136 }
 0x2a0   : > { %2169 = vst.msk [vmem:[%s2916_s18 + $0x3e] sm:$0x3] %vm2041_vm3, %v2137_v10  ;;  %v2119_v20 = vpop.permute.xlu1 %2118 }
 0x2a1   : > { %2160 = vst.msk [vmem:[%s2916_s18 + $0x2c] sm:$0x3] %vm2041_vm3, %v2119_v20 }
 0x2a4   : > { %v2123_v47 = vpop.permute.xlu1 %2122 }
 0x2a5   : > { %2162 = vst.msk [vmem:[%s2916_s18 + $0x30] sm:$0x3] %vm2041_vm3, %v2123_v47 }
 0x2a8   : > { %v2127_v34 = vpop.permute.xlu1 %2126 }
 0x2a9   : > { %2164 = vst.msk [vmem:[%s2916_s18 + $0x34] sm:$0x3] %vm2041_vm3, %v2127_v34 }
 0x2ac   : > { %v2131_v42 = vpop.permute.xlu1 %2130 }
 0x2ad   : > { %2166 = vst.msk [vmem:[%s2916_s18 + $0x38] sm:$0x3] %vm2041_vm3, %v2131_v42 }
 0x2b0   : > { %v2135_v43 = vpop.permute.xlu1 %2134 }
 0x2b1   : > { %2168 = vst.msk [vmem:[%s2916_s18 + $0x3c] sm:$0x3] %vm2041_vm3, %v2135_v43 }
 0x2bb   : > { %s2793_s22 = spop %2792 }
 0x2bc   : > { %v2407_v29 = vstv %s2793_s22  ;;  %s2795_s25 = spop %2794 }
 0x2bd   : > { %v2408_v38 = vsel %vm2406_vm13, %v2407_v29, 0  ;;  %v2411_v21 = vstv %s2795_s25 }
 0x2be   : > { %v2409_v5 = vadd.s32 %v2408_v38, %v2405_v33  ;;  %v2412_v56 = vsel %vm2410_vm10, %v2411_v21, 0 }
 0x2c0   : > { %v2413_v32 = vadd.s32 %v2412_v56, %v2409_v5 }
 0x2c2   : > { %v2414_v1 = vadd.s32 %v2413_v32, %v2402_v8 }
 0x2c4   : > { %2415 = vst [vmem:[%s4696_s9] sm:$0x1] %v2414_v1 }
 0x2c5 PF: > { %s20_s30 = sadd.s32 1, %s2815_s30  }
 0x2c6   : > { %p17_p5 = scmp.ge.s32.totalorder %s20_s30, 4  }
 0x2c8   :  { %19 = sbr.rel (!%p17_p5) target bundleno = 1 (0x1), region = 134 }

// kernel: inception_forward.6
= control target key start
LH: loop header
LB: loop body
LE: loop exit
PB: predicated region body
PF: predicated region fallthrough
CT: control target
= control target key end

     0   :  { %s1997_s12 = smov 0   ;;  %s2294_s0 = inlined_call_operand.vmem [shape: f32[2,18,16,24], index: 0, kind: input, shape index: {}]   ;;  %s2295_s1 = inlined_call_operand.vmem [shape: f32[3,24,16], index: 1, kind: input, shape index: {}]   ;;  %s2296_s2 = inlined_call_operand.vmem [shape: f32[1,16], index: 2, kind: input, shape index: {}]   ;;  %s2297_s3 = inlined_call_operand.vmem [shape: f32[2,256,16], index: 3, kind: output, shape index: {}]  }
   0x1 LB: > { %s1435_s13 = sadd.s32 4294967295, %s1975_s12   ;;  %p1439_p0 = scmp.ge.s32.totalorder %s1975_s12, 1  ;;  %s1975_s12 = sphi %s1997_s12, %s13_s12  }
   0x2   : > { %p137_p1 = scmp.lt.s32.totalorder %s1975_s12, 3 }
   0x4   : > { %p138_p2 = pnand %p1439_p0, %p137_p1 }
   0x5   : > { %v1475_v0 = vld [vmem:[%s2295_s1 + $0x18] sm:$0xff] (!%p138_p2)  ;;  %v1476_v1 = vld [vmem:[%s2295_s1 + $0x20] sm:$0xff] (!%p138_p2)  ;;  %p161_p3 = scmp.lt.s32.totalorder (!%p138_p2), %s1435_s13, 1  ;;  %v204_v4 = vld [vmem:[%s2295_s1 + $0x8] sm:$0xff] (!%p138_p2)  ;;  %vm243_vm0 = vcmask (!%p138_p2), 195584   ;;  %vm1347_vm1 = vcmask (!%p138_p2), 130048  }
   0x6   : > { %141 = sbr.rel (%p138_p2) target bundleno = 331 (0x14b), region = 32  ;;  %v203_v2 = vld [vmem:[%s2295_s1] sm:$0xff] (!%p138_p2)  ;;  %v1880_v3 = vpack.c.bf16 (!%p138_p2), %v1476_v1, %v1475_v0  ;;  %v1477_v6 = vld [vmem:[%s2295_s1 + $0x28] sm:$0xff] (!%p138_p2)  ;;  %v205_v7 = vld [vmem:[%s2295_s1 + $0x10] sm:$0xff] (!%p138_p2) }
   0x7   : > { %v1884_v5 = vpack.c.bf16 (!%p138_p2), %v204_v4, %v203_v2  ;;  %v1574_v8 = vld [vmem:[%s2295_s1 + $0x30] sm:$0xff] (!%p138_p2)  ;;  %v1575_v9 = vld [vmem:[%s2295_s1 + $0x38] sm:$0xff] (!%p138_p2)  ;;  %v1576_v17 = vld [vmem:[%s2295_s1 + $0x40] sm:$0xff] (!%p138_p2) }
   0x8   : > { %1881 = vmatprep.subr.bf16.mxu1 (!%p138_p2), %v1880_v3  ;;  %v1888_v13 = vpack.c.bf16 (!%p138_p2), %v1575_v9, %v1574_v8  ;;  %v2183_v1 = vld [vmem:[%s2296_s2] ss:$0 sm:$0xff] (!%p138_p2) }
   0x9   : > { %1885 = vmatprep.subr.bf16.mxu0 (!%p138_p2), %v1884_v5  ;;  %1883 = vmatpush3.bf16.msra.mxu1 (!%p138_p2), %v1880_v3 }
   0xa   : > { %1887 = vmatpush3.bf16.msra.mxu0 (!%p138_p2), %v1884_v5  ;;  %1722 = vmatprep.subr.mxu1 (!%p138_p2), %v1477_v6 }
   0xb   : > { %1776 = vmatprep.subr.mxu0 (!%p138_p2), %v205_v7 }
   0xd   : > { %s2299_s13 = smov (!%p161_p3, %s1435_s13), 1  ;;  %1723 = vmatpush3.msra.mxu1 %v1477_v6 }
   0xe   : > { %s1960_s26 = smul.u32 288, %s2299_s13  ;;  %1777 = vmatpush3.msra.mxu0 %v205_v7  ;;  %1892 = vmatprep.subr.bf16.mxu1 %v1884_v5  ;;  %s1612_s11 = sshll.u32 %s2299_s13, 8 }
   0xf   : > { %1889 = vmatprep.subr.bf16.mxu0 %v1888_v13  ;;  %s2190_s16 = scalar_lea.vmem %s2297_s3, %s1612_s11 }
  0x10   : > { %s2035_s6 = scalar_lea.vmem %s2294_s0, %s1960_s26 }
  0x11   : > { %v1443_v10 = vld [vmem:[%s2035_s6 + $0x10] sm:$0xff]  ;;  %v171_v11 = vld [vmem:[%s2035_s6] sm:$0xff]  ;;  %v1444_v12 = vld [vmem:[%s2035_s6 + $0x18] sm:$0xff] }
  0x12   : > { %1724 = vmatprep.mubr.msk.f32.mxu1 %vm243_vm0, %v1443_v10  ;;  %v172_v14 = vld [vmem:[%s2035_s6 + $0x8] sm:$0xff]  ;;  %1778 = vmatprep.mubr.msk.f32.mxu0 %vm243_vm0, %v171_v11  ;;  %v1445_v15 = vld [vmem:[%s2035_s6 + $0x20] sm:$0xff]  ;;  %v1447_v18 = vld [vmem:[%s2035_s6 + $0x30] sm:$0xff] }
  0x13   : > { %1725 = vmatmul.mubr.msk.f32.vlgmr.msra.gmra.mrb[0].mxu1 %vm243_vm0, %v1444_v12  ;;  %1779 = vmatmul.mubr.msk.f32.vlgmr.msra.gmra.mrb[0].mxu0 %vm243_vm0, %v172_v14  ;;  %v1446_v16 = vld [vmem:[%s2035_s6 + $0x28] sm:$0xff]  ;;  %v1448_v19 = vld [vmem:[%s2035_s6 + $0x38] sm:$0xff]  ;;  %v1449_v20 = vld [vmem:[%s2035_s6 + $0x40] sm:$0xff] }
  0x14   : > { %1894 = vmatpush3.bf16.msra.mxu1 %v1884_v5  ;;  %1891 = vmatpush3.bf16.msra.mxu0 %v1888_v13  ;;  %v1450_v21 = vld [vmem:[%s2035_s6 + $0x48] sm:$0xff]  ;;  %v1451_v22 = vld [vmem:[%s2035_s6 + $0x50] sm:$0xff]  ;;  %v1452_v23 = vld [vmem:[%s2035_s6 + $0x58] sm:$0xff] }
  0x15   : > { %1727 = vmatprep.mubr.msk.f32.mxu1 %vm243_vm0, %v1445_v15  ;;  %1781 = vmatprep.mubr.msk.f32.mxu0 %vm243_vm0, %v1443_v10  ;;  %v1453_v24 = vld [vmem:[%s2035_s6 + $0x60] sm:$0xff]  ;;  %v1454_v25 = vld [vmem:[%s2035_s6 + $0x68] sm:$0xff]  ;;  %v1455_v26 = vld [vmem:[%s2035_s6 + $0x70] sm:$0xff] }
  0x16   : > { %1830 = vmatprep.subr.mxu0 %v1576_v17  ;;  %1893 = vmatprep.subr.mxu1 %v205_v7  ;;  %v1456_v27 = vld [vmem:[%s2035_s6 + $0x78] sm:$0xff]  ;;  %v1457_v28 = vld [vmem:[%s2035_s6 + $0x80] sm:$0xff]  ;;  %v1458_v29 = vld [vmem:[%s2035_s6 + $0x88] sm:$0xff] }
  0x17   : > { %1728 = vmatmul.mubr.msk.f32.gmra.mrb[2].mxu1 %vm243_vm0, %v1446_v16  ;;  %1782 = vmatmul.mubr.msk.f32.gmra.mrb[2].mxu0 %vm243_vm0, %v1444_v12  ;;  %v1459_v30 = vld [vmem:[%s2035_s6 + $0x90] sm:$0xff]  ;;  %v1460_v31 = vld [vmem:[%s2035_s6 + $0x98] sm:$0xff]  ;;  %v1461_v32 = vld [vmem:[%s2035_s6 + $0xa0] sm:$0xff] }
  0x18   : > { %1730 = vmatprep.mubr.msk.f32.mxu1 %vm243_vm0, %v1447_v18  ;;  %1784 = vmatprep.mubr.msk.f32.mxu0 %vm243_vm0, %v1445_v15  ;;  %v1462_v33 = vld [vmem:[%s2035_s6 + $0xa8] sm:$0xff]  ;;  %v1463_v34 = vld [vmem:[%s2035_s6 + $0xb0] sm:$0xff]  ;;  %v1464_v35 = vld [vmem:[%s2035_s6 + $0xb8] sm:$0xff] }
  0x19   : > { %1831 = vmatpush3.msra.mxu0 %v1576_v17  ;;  %1895 = vmatpush3.msra.mxu1 %v205_v7  ;;  %v1465_v36 = vld [vmem:[%s2035_s6 + $0xc0] sm:$0xff]  ;;  %v1466_v37 = vld [vmem:[%s2035_s6 + $0xc8] sm:$0xff]  ;;  %v1467_v38 = vld [vmem:[%s2035_s6 + $0xd0] sm:$0xff] }
  0x1a   : > { %v1468_v39 = vld [vmem:[%s2035_s6 + $0xd8] sm:$0xff]  ;;  %v1469_v40 = vld [vmem:[%s2035_s6 + $0xe0] sm:$0xff]  ;;  %v1470_v41 = vld [vmem:[%s2035_s6 + $0xe8] sm:$0xff] }
  0x1b   : > { %1731 = vmatmul.mubr.msk.f32.gmra.mrb[4].mxu1 %vm243_vm0, %v1448_v19  ;;  %1785 = vmatmul.mubr.msk.f32.gmra.mrb[4].mxu0 %vm243_vm0, %v1446_v16  ;;  %v1471_v42 = vld [vmem:[%s2035_s6 + $0xf0] sm:$0xff]  ;;  %v1472_v43 = vld [vmem:[%s2035_s6 + $0xf8] sm:$0xff]  ;;  %v1473_v44 = vld [vmem:[%s2035_s6 + $0x100] sm:$0xff] }
  0x1c   : > { %1733 = vmatprep.mubr.msk.f32.mxu1 %vm243_vm0, %v1449_v20  ;;  %1787 = vmatprep.mubr.msk.f32.mxu0 %vm243_vm0, %v1447_v18  ;;  %v1474_v45 = vld [vmem:[%s2035_s6 + $0x108] sm:$0xff]  ;;  %v1572_v46 = vld [vmem:[%s2035_s6 + $0x110] sm:$0xff]  ;;  %v1573_v47 = vld [vmem:[%s2035_s6 + $0x118] sm:$0xff] }
  0x1f   : > { %1734 = vmatmul.mubr.msk.f32.gmra.mrb[6].mxu1 %vm243_vm0, %v1450_v21  ;;  %1788 = vmatmul.mubr.msk.f32.gmra.mrb[6].mxu0 %vm243_vm0, %v1448_v19 }
  0x20   : > { %1736 = vmatprep.mubr.msk.f32.mxu1 %vm243_vm0, %v1451_v22  ;;  %1790 = vmatprep.mubr.msk.f32.mxu0 %vm243_vm0, %v1449_v20 }
  0x23   : > { %1737 = vmatmul.mubr.msk.f32.gmra.mrb[8].mxu1 %vm243_vm0, %v1452_v23  ;;  %1791 = vmatmul.mubr.msk.f32.gmra.mrb[8].mxu0 %vm243_vm0, %v1450_v21 }
  0x24   : > { %1739 = vmatprep.mubr.msk.f32.mxu1 %vm243_vm0, %v1453_v24  ;;  %1793 = vmatprep.mubr.msk.f32.mxu0 %vm243_vm0, %v1451_v22 }
  0x27   : > { %1740 = vmatmul.mubr.msk.f32.gmra.mrb[10].mxu1 %vm243_vm0, %v1454_v25  ;;  %1794 = vmatmul.mubr.msk.f32.gmra.mrb[10].mxu0 %vm243_vm0, %v1452_v23 }
  0x28   : > { %1742 = vmatprep.mubr.msk.f32.mxu1 %vm243_vm0, %v1455_v26  ;;  %1796 = vmatprep.mubr.msk.f32.mxu0 %vm243_vm0, %v1453_v24 }
  0x2b   : > { %1743 = vmatmul.mubr.msk.f32.gmra.mrb[12].mxu1 %vm243_vm0, %v1456_v27  ;;  %1797 = vmatmul.mubr.msk.f32.gmra.mrb[12].mxu0 %vm243_vm0, %v1454_v25 }
  0x2c   : > { %1745 = vmatprep.mubr.msk.f32.mxu1 %vm243_vm0, %v1457_v28  ;;  %1799 = vmatprep.mubr.msk.f32.mxu0 %vm243_vm0, %v1455_v26 }
  0x2f   : > { %1746 = vmatmul.mubr.msk.f32.gmra.mrb[14].mxu1 %vm243_vm0, %v1458_v29  ;;  %1800 = vmatmul.mubr.msk.f32.gmra.mrb[14].mxu0 %vm243_vm0, %v1456_v27 }
  0x30   : > { %1748 = vmatprep.mubr.msk.f32.mxu1 %vm243_vm0, %v1459_v30  ;;  %1832 = vmatprep.mubr.msk.f32.mxu0 %vm243_vm0, %v1445_v15 }
  0x33   : > { %1749 = vmatmul.mubr.msk.f32.gmra.mrb[16].mxu1 %vm243_vm0, %v1460_v31  ;;  %1833 = vmatmul.mubr.msk.f32.vlgmr.msra.gmra.mrb[0].mxu0 %vm243_vm0, %v1446_v16 }
  0x34   : > { %1751 = vmatprep.mubr.msk.f32.mxu1 %vm243_vm0, %v1461_v32  ;;  %1835 = vmatprep.mubr.msk.f32.mxu0 %vm243_vm0, %v1447_v18 }
  0x37   : > { %1752 = vmatmul.mubr.msk.f32.gmra.mrb[18].mxu1 %vm243_vm0, %v1462_v33  ;;  %1836 = vmatmul.mubr.msk.f32.gmra.mrb[2].mxu0 %vm243_vm0, %v1448_v19 }
  0x38   : > { %1754 = vmatprep.mubr.msk.f32.mxu1 %vm243_vm0, %v1463_v34  ;;  %1838 = vmatprep.mubr.msk.f32.mxu0 %vm243_vm0, %v1449_v20 }
  0x3b   : > { %1755 = vmatmul.mubr.msk.f32.gmra.mrb[20].mxu1 %vm243_vm0, %v1464_v35  ;;  %1839 = vmatmul.mubr.msk.f32.gmra.mrb[4].mxu0 %vm243_vm0, %v1450_v21 }
  0x3c   : > { %1757 = vmatprep.mubr.msk.f32.mxu1 %vm243_vm0, %v1465_v36  ;;  %1841 = vmatprep.mubr.msk.f32.mxu0 %vm243_vm0, %v1451_v22 }
  0x3f   : > { %1758 = vmatmul.mubr.msk.f32.gmra.mrb[22].mxu1 %vm243_vm0, %v1466_v37  ;;  %1842 = vmatmul.mubr.msk.f32.gmra.mrb[6].mxu0 %vm243_vm0, %v1452_v23 }
  0x40   : > { %1760 = vmatprep.mubr.msk.f32.mxu1 %vm243_vm0, %v1467_v38  ;;  %1844 = vmatprep.mubr.msk.f32.mxu0 %vm243_vm0, %v1453_v24 }
  0x43   : > { %1761 = vmatmul.mubr.msk.f32.gmra.mrb[24].mxu1 %vm243_vm0, %v1468_v39  ;;  %1845 = vmatmul.mubr.msk.f32.gmra.mrb[8].mxu0 %vm243_vm0, %v1454_v25 }
  0x44   : > { %1763 = vmatprep.mubr.msk.f32.mxu1 %vm243_vm0, %v1469_v40  ;;  %1847 = vmatprep.mubr.msk.f32.mxu0 %vm243_vm0, %v1455_v26 }
  0x47   : > { %1764 = vmatmul.mubr.msk.f32.gmra.mrb[26].mxu1 %vm243_vm0, %v1470_v41  ;;  %1848 = vmatmul.mubr.msk.f32.gmra.mrb[10].mxu0 %vm243_vm0, %v1456_v27 }
  0x48   : > { %1766 = vmatprep.mubr.msk.f32.mxu1 %vm243_vm0, %v1471_v42  ;;  %1850 = vmatprep.mubr.msk.f32.mxu0 %vm243_vm0, %v1457_v28 }
  0x4b   : > { %1767 = vmatmul.mubr.msk.f32.gmra.mrb[28].mxu1 %vm243_vm0, %v1472_v43  ;;  %1851 = vmatmul.mubr.msk.f32.gmra.mrb[12].mxu0 %vm243_vm0, %v1458_v29 }
  0x4c   : > { %1769 = vmatprep.mubr.msk.f32.mxu1 %vm243_vm0, %v1473_v44  ;;  %1853 = vmatprep.mubr.msk.f32.mxu0 %vm243_vm0, %v1459_v30 }
  0x4f   : > { %1770 = vmatmul.mubr.msk.f32.gmra.mrb[30].mxu1 %vm243_vm0, %v1474_v45  ;;  %1854 = vmatmul.mubr.msk.f32.gmra.mrb[14].mxu0 %vm243_vm0, %v1460_v31 }
  0x50   : > { %1802 = vmatprep.mubr.msk.f32.mxu1 %vm243_vm0, %v1457_v28  ;;  %1856 = vmatprep.mubr.msk.f32.mxu0 %vm243_vm0, %v1461_v32 }
  0x53   : > { %1803 = vmatmul.mubr.msk.f32.vlgmr.msra.gmra.mrb[16].mxu1 %vm243_vm0, %v1458_v29  ;;  %1857 = vmatmul.mubr.msk.f32.gmra.mrb[16].mxu0 %vm243_vm0, %v1462_v33 }
  0x54   : > { %1805 = vmatprep.mubr.msk.f32.mxu1 %vm243_vm0, %v1459_v30  ;;  %1859 = vmatprep.mubr.msk.f32.mxu0 %vm243_vm0, %v1463_v34 }
  0x57   : > { %1806 = vmatmul.mubr.msk.f32.gmra.mrb[18].mxu1 %vm243_vm0, %v1460_v31  ;;  %1860 = vmatmul.mubr.msk.f32.gmra.mrb[18].mxu0 %vm243_vm0, %v1464_v35 }
  0x58   : > { %1808 = vmatprep.mubr.msk.f32.mxu1 %vm243_vm0, %v1461_v32  ;;  %1862 = vmatprep.mubr.msk.f32.mxu0 %vm243_vm0, %v1465_v36 }
  0x5b   : > { %1809 = vmatmul.mubr.msk.f32.gmra.mrb[20].mxu1 %vm243_vm0, %v1462_v33  ;;  %1863 = vmatmul.mubr.msk.f32.gmra.mrb[20].mxu0 %vm243_vm0, %v1466_v37 }
  0x5c   : > { %1811 = vmatprep.mubr.msk.f32.mxu1 %vm243_vm0, %v1463_v34  ;;  %1865 = vmatprep.mubr.msk.f32.mxu0 %vm243_vm0, %v1467_v38 }
  0x5f   : > { %1812 = vmatmul.mubr.msk.f32.gmra.mrb[22].mxu1 %vm243_vm0, %v1464_v35  ;;  %1866 = vmatmul.mubr.msk.f32.gmra.mrb[22].mxu0 %vm243_vm0, %v1468_v39 }
  0x60   : > { %1814 = vmatprep.mubr.msk.f32.mxu1 %vm243_vm0, %v1465_v36  ;;  %1868 = vmatprep.mubr.msk.f32.mxu0 %vm243_vm0, %v1469_v40 }
  0x63   : > { %1815 = vmatmul.mubr.msk.f32.gmra.mrb[24].mxu1 %vm243_vm0, %v1466_v37  ;;  %1869 = vmatmul.mubr.msk.f32.gmra.mrb[24].mxu0 %vm243_vm0, %v1470_v41 }
  0x64   : > { %1817 = vmatprep.mubr.msk.f32.mxu1 %vm243_vm0, %v1467_v38  ;;  %1871 = vmatprep.mubr.msk.f32.mxu0 %vm243_vm0, %v1471_v42 }
  0x67   : > { %1818 = vmatmul.mubr.msk.f32.gmra.mrb[26].mxu1 %vm243_vm0, %v1468_v39  ;;  %1872 = vmatmul.mubr.msk.f32.gmra.mrb[26].mxu0 %vm243_vm0, %v1472_v43 }
  0x68   : > { %1820 = vmatprep.mubr.msk.f32.mxu1 %vm243_vm0, %v1469_v40  ;;  %1874 = vmatprep.mubr.msk.f32.mxu0 %vm243_vm0, %v1473_v44 }
  0x6b   : > { %1821 = vmatmul.mubr.msk.f32.gmra.mrb[28].mxu1 %vm243_vm0, %v1470_v41  ;;  %1875 = vmatmul.mubr.msk.f32.gmra.mrb[28].mxu0 %vm243_vm0, %v1474_v45 }
  0x6c   : > { %1823 = vmatprep.mubr.msk.f32.mxu1 %vm243_vm0, %v1471_v42  ;;  %1877 = vmatprep.mubr.msk.f32.mxu0 %vm243_vm0, %v1572_v46 }
  0x6f   : > { %1824 = vmatmul.mubr.msk.f32.gmra.mrb[30].mxu1 %vm243_vm0, %v1472_v43  ;;  %1878 = vmatmul.mubr.msk.f32.gmra.mrb[30].mxu0 %vm243_vm0, %v1573_v47 }
  0xe6   : > { %v1726_v48 = vpop.f32.mrb[0].mxu1 }
  0xe7   : > { %v406_v49 = vpop.f32.mrb[1].mxu1 }
  0xea   : > { %v1729_v50 = vpop.f32.mrb[2].mxu1 }
  0xeb   : > { %v416_v51 = vpop.f32.mrb[3].mxu1 }
  0xee   : > { %v1732_v52 = vpop.f32.mrb[4].mxu1 }
  0xef   : > { %v426_v53 = vpop.f32.mrb[5].mxu1 }
  0xf2   : > { %v1735_v54 = vpop.f32.mrb[6].mxu1 }
  0xf3   : > { %v436_v55 = vpop.f32.mrb[7].mxu1 }
  0xf6   : > { %v1738_v56 = vpop.f32.mrb[8].mxu1 }
  0xf7   : > { %v446_v57 = vpop.f32.mrb[9].mxu1 }
  0xfa   : > { %v1741_v58 = vpop.f32.mrb[10].mxu1 }
  0xfb   : > { %v456_v59 = vpop.f32.mrb[11].mxu1 }
  0xfe   : > { %v2172_v60 = vpop.f32.mrb[12].mxu1 }
  0xff   : > { %v2174_v61 = vpop.f32.mrb[13].mxu1 }
 0x102   : > { %v2176_v62 = vpop.f32.mrb[14].mxu1 }
 0x103   : > { %v2178_v63 = vpop.f32.mrb[15].mxu1 }
 0x106   : > { %v1834_v0 = vpop.f32.mrb[0].mxu0 }
 0x107   : > { %v1896_v2 = vadd.f32 %v1834_v0, %v1726_v48  ;;  %v1085_v3 = vpop.f32.mrb[1].mxu0 }
 0x108   : > { %v1897_v4 = vadd.f32 %v1085_v3, %v406_v49 }
 0x109   : > { %v1284_v5 = vadd.f32 %v1896_v2, %v2183_v1 }
 0x10a   : > { %v1283_v6 = vadd.f32 %v1897_v4, %v2183_v1  ;;  %v1837_v7 = vpop.f32.mrb[2].mxu0 }
 0x10b   : > { %v1316_v8 = vmax.f32 %v1284_v5, 0.0  ;;  %v1898_v9 = vadd.f32 %v1837_v7, %v1729_v50  ;;  %v1095_v10 = vpop.f32.mrb[3].mxu0 }
 0x10c   : > { %v1315_v11 = vmax.f32 %v1283_v6, 0.0  ;;  %v1899_v12 = vadd.f32 %v1095_v10, %v416_v51 }
 0x10d   : > { %1349 = vst.msk [vmem:[%s2190_s16 + $0x8] sm:$0xff] %vm1347_vm1, %v1316_v8  ;;  %v1286_v13 = vadd.f32 %v1898_v9, %v2183_v1 }
 0x10e   : > { %1348 = vst.msk [vmem:[%s2190_s16] sm:$0xff] %vm1347_vm1, %v1315_v11  ;;  %v1285_v14 = vadd.f32 %v1899_v12, %v2183_v1  ;;  %v1840_v15 = vpop.f32.mrb[4].mxu0 }
 0x10f   : > { %v1318_v16 = vmax.f32 %v1286_v13, 0.0  ;;  %v1900_v17 = vadd.f32 %v1840_v15, %v1732_v52  ;;  %v1105_v18 = vpop.f32.mrb[5].mxu0 }
 0x110   : > { %v1317_v19 = vmax.f32 %v1285_v14, 0.0  ;;  %v1901_v20 = vadd.f32 %v1105_v18, %v426_v53 }
 0x111   : > { %1351 = vst.msk [vmem:[%s2190_s16 + $0x18] sm:$0xff] %vm1347_vm1, %v1318_v16  ;;  %v1288_v21 = vadd.f32 %v1900_v17, %v2183_v1 }
 0x112   : > { %1350 = vst.msk [vmem:[%s2190_s16 + $0x10] sm:$0xff] %vm1347_vm1, %v1317_v19  ;;  %v1287_v22 = vadd.f32 %v1901_v20, %v2183_v1  ;;  %v1843_v23 = vpop.f32.mrb[6].mxu0 }
 0x113   : > { %v1320_v24 = vmax.f32 %v1288_v21, 0.0  ;;  %v1902_v25 = vadd.f32 %v1843_v23, %v1735_v54  ;;  %v1115_v26 = vpop.f32.mrb[7].mxu0 }
 0x114   : > { %v1319_v27 = vmax.f32 %v1287_v22, 0.0  ;;  %v1903_v28 = vadd.f32 %v1115_v26, %v436_v55 }
 0x115   : > { %1353 = vst.msk [vmem:[%s2190_s16 + $0x28] sm:$0xff] %vm1347_vm1, %v1320_v24  ;;  %v1290_v29 = vadd.f32 %v1902_v25, %v2183_v1 }
 0x116   : > { %1352 = vst.msk [vmem:[%s2190_s16 + $0x20] sm:$0xff] %vm1347_vm1, %v1319_v27  ;;  %v1289_v30 = vadd.f32 %v1903_v28, %v2183_v1  ;;  %v1846_v31 = vpop.f32.mrb[8].mxu0 }
 0x117   : > { %v1322_v32 = vmax.f32 %v1290_v29, 0.0  ;;  %v1904_v33 = vadd.f32 %v1846_v31, %v1738_v56  ;;  %v1125_v34 = vpop.f32.mrb[9].mxu0 }
 0x118   : > { %v1321_v35 = vmax.f32 %v1289_v30, 0.0  ;;  %v1905_v36 = vadd.f32 %v1125_v34, %v446_v57 }
 0x119   : > { %1355 = vst.msk [vmem:[%s2190_s16 + $0x38] sm:$0xff] %vm1347_vm1, %v1322_v32  ;;  %v1292_v37 = vadd.f32 %v1904_v33, %v2183_v1 }
 0x11a   : > { %1354 = vst.msk [vmem:[%s2190_s16 + $0x30] sm:$0xff] %vm1347_vm1, %v1321_v35  ;;  %v1291_v38 = vadd.f32 %v1905_v36, %v2183_v1  ;;  %v1849_v39 = vpop.f32.mrb[10].mxu0 }
 0x11b   : > { %v1324_v40 = vmax.f32 %v1292_v37, 0.0  ;;  %v1906_v41 = vadd.f32 %v1849_v39, %v1741_v58  ;;  %v1135_v42 = vpop.f32.mrb[11].mxu0 }
 0x11c   : > { %v1323_v43 = vmax.f32 %v1291_v38, 0.0  ;;  %v1907_v44 = vadd.f32 %v1135_v42, %v456_v59 }
 0x11d   : > { %1357 = vst.msk [vmem:[%s2190_s16 + $0x48] sm:$0xff] %vm1347_vm1, %v1324_v40  ;;  %v1294_v45 = vadd.f32 %v1906_v41, %v2183_v1 }
 0x11e   : > { %1356 = vst.msk [vmem:[%s2190_s16 + $0x40] sm:$0xff] %vm1347_vm1, %v1323_v43  ;;  %v1293_v46 = vadd.f32 %v1907_v44, %v2183_v1  ;;  %v1852_v47 = vpop.f32.mrb[12].mxu0 }
 0x11f   : > { %v1326_v48 = vmax.f32 %v1294_v45, 0.0  ;;  %v1908_v49 = vadd.f32 %v1852_v47, %v2172_v60  ;;  %v1145_v50 = vpop.f32.mrb[13].mxu0 }
 0x120   : > { %v1325_v51 = vmax.f32 %v1293_v46, 0.0  ;;  %v1909_v52 = vadd.f32 %v1145_v50, %v2174_v61 }
 0x121   : > { %1359 = vst.msk [vmem:[%s2190_s16 + $0x58] sm:$0xff] %vm1347_vm1, %v1326_v48  ;;  %v1296_v53 = vadd.f32 %v1908_v49, %v2183_v1 }
 0x122   : > { %1358 = vst.msk [vmem:[%s2190_s16 + $0x50] sm:$0xff] %vm1347_vm1, %v1325_v51  ;;  %v1295_v54 = vadd.f32 %v1909_v52, %v2183_v1  ;;  %v1855_v55 = vpop.f32.mrb[14].mxu0 }
 0x123   : > { %v1328_v56 = vmax.f32 %v1296_v53, 0.0  ;;  %v1910_v57 = vadd.f32 %v1855_v55, %v2176_v62  ;;  %v1155_v58 = vpop.f32.mrb[15].mxu0 }
 0x124   : > { %v1327_v59 = vmax.f32 %v1295_v54, 0.0  ;;  %v1911_v60 = vadd.f32 %v1155_v58, %v2178_v63 }
 0x125   : > { %1361 = vst.msk [vmem:[%s2190_s16 + $0x68] sm:$0xff] %vm1347_vm1, %v1328_v56  ;;  %v1298_v61 = vadd.f32 %v1910_v57, %v2183_v1 }
 0x126   : > { %v1804_v0 = vpop.f32.mrb[16].mxu1  ;;  %1360 = vst.msk [vmem:[%s2190_s16 + $0x60] sm:$0xff] %vm1347_vm1, %v1327_v59  ;;  %v1297_v2 = vadd.f32 %v1911_v60, %v2183_v1  ;;  %v1858_v3 = vpop.f32.mrb[16].mxu0 }
 0x127   : > { %v807_v4 = vpop.f32.mrb[17].mxu1  ;;  %v1330_v5 = vmax.f32 %v1298_v61, 0.0  ;;  %v1912_v6 = vadd.f32 %v1858_v3, %v1804_v0  ;;  %v1165_v62 = vpop.f32.mrb[17].mxu0 }
 0x128   : > { %v1329_v7 = vmax.f32 %v1297_v2, 0.0  ;;  %v1913_v8 = vadd.f32 %v1165_v62, %v807_v4 }
 0x129   : > { %1363 = vst.msk [vmem:[%s2190_s16 + $0x78] sm:$0xff] %vm1347_vm1, %v1330_v5  ;;  %v1300_v63 = vadd.f32 %v1912_v6, %v2183_v1 }
 0x12a   : > { %v1807_v9 = vpop.f32.mrb[18].mxu1  ;;  %1362 = vst.msk [vmem:[%s2190_s16 + $0x70] sm:$0xff] %vm1347_vm1, %v1329_v7  ;;  %v1299_v10 = vadd.f32 %v1913_v8, %v2183_v1  ;;  %v1861_v11 = vpop.f32.mrb[18].mxu0 }
 0x12b   : > { %v817_v12 = vpop.f32.mrb[19].mxu1  ;;  %v1332_v13 = vmax.f32 %v1300_v63, 0.0  ;;  %v1914_v14 = vadd.f32 %v1861_v11, %v1807_v9  ;;  %v1175_v15 = vpop.f32.mrb[19].mxu0 }
 0x12c   : > { %v1331_v16 = vmax.f32 %v1299_v10, 0.0  ;;  %v1915_v17 = vadd.f32 %v1175_v15, %v817_v12 }
 0x12d   : > { %1365 = vst.msk [vmem:[%s2190_s16 + $0x88] sm:$0xff] %vm1347_vm1, %v1332_v13  ;;  %v1302_v18 = vadd.f32 %v1914_v14, %v2183_v1 }
 0x12e   : > { %v1810_v19 = vpop.f32.mrb[20].mxu1  ;;  %1364 = vst.msk [vmem:[%s2190_s16 + $0x80] sm:$0xff] %vm1347_vm1, %v1331_v16  ;;  %v1301_v20 = vadd.f32 %v1915_v17, %v2183_v1  ;;  %v1864_v21 = vpop.f32.mrb[20].mxu0 }
 0x12f   : > { %v827_v22 = vpop.f32.mrb[21].mxu1  ;;  %v1334_v23 = vmax.f32 %v1302_v18, 0.0  ;;  %v1916_v24 = vadd.f32 %v1864_v21, %v1810_v19  ;;  %v1185_v25 = vpop.f32.mrb[21].mxu0 }
 0x130   : > { %v1333_v26 = vmax.f32 %v1301_v20, 0.0  ;;  %v1917_v27 = vadd.f32 %v1185_v25, %v827_v22 }
 0x131   : > { %1367 = vst.msk [vmem:[%s2190_s16 + $0x98] sm:$0xff] %vm1347_vm1, %v1334_v23  ;;  %v1304_v28 = vadd.f32 %v1916_v24, %v2183_v1 }
 0x132   : > { %v1813_v29 = vpop.f32.mrb[22].mxu1  ;;  %1366 = vst.msk [vmem:[%s2190_s16 + $0x90] sm:$0xff] %vm1347_vm1, %v1333_v26  ;;  %v1303_v30 = vadd.f32 %v1917_v27, %v2183_v1  ;;  %v1867_v31 = vpop.f32.mrb[22].mxu0 }
 0x133   : > { %v837_v32 = vpop.f32.mrb[23].mxu1  ;;  %v1336_v33 = vmax.f32 %v1304_v28, 0.0  ;;  %v1918_v34 = vadd.f32 %v1867_v31, %v1813_v29  ;;  %v1195_v35 = vpop.f32.mrb[23].mxu0 }
 0x134   : > { %v1335_v36 = vmax.f32 %v1303_v30, 0.0  ;;  %v1919_v37 = vadd.f32 %v1195_v35, %v837_v32 }
 0x135   : > { %1369 = vst.msk [vmem:[%s2190_s16 + $0xa8] sm:$0xff] %vm1347_vm1, %v1336_v33  ;;  %v1306_v38 = vadd.f32 %v1918_v34, %v2183_v1 }
 0x136   : > { %v1816_v39 = vpop.f32.mrb[24].mxu1  ;;  %1368 = vst.msk [vmem:[%s2190_s16 + $0xa0] sm:$0xff] %vm1347_vm1, %v1335_v36  ;;  %v1305_v40 = vadd.f32 %v1919_v37, %v2183_v1  ;;  %v1870_v41 = vpop.f32.mrb[24].mxu0 }
 0x137   : > { %v847_v42 = vpop.f32.mrb[25].mxu1  ;;  %v1338_v43 = vmax.f32 %v1306_v38, 0.0  ;;  %v1920_v44 = vadd.f32 %v1870_v41, %v1816_v39  ;;  %v1205_v45 = vpop.f32.mrb[25].mxu0 }
 0x138   : > { %v1337_v46 = vmax.f32 %v1305_v40, 0.0  ;;  %v1921_v47 = vadd.f32 %v1205_v45, %v847_v42 }
 0x139   : > { %1371 = vst.msk [vmem:[%s2190_s16 + $0xb8] sm:$0xff] %vm1347_vm1, %v1338_v43  ;;  %v1308_v48 = vadd.f32 %v1920_v44, %v2183_v1 }
 0x13a   : > { %v1819_v49 = vpop.f32.mrb[26].mxu1  ;;  %1370 = vst.msk [vmem:[%s2190_s16 + $0xb0] sm:$0xff] %vm1347_vm1, %v1337_v46  ;;  %v1307_v50 = vadd.f32 %v1921_v47, %v2183_v1  ;;  %v1873_v51 = vpop.f32.mrb[26].mxu0 }
 0x13b   : > { %v857_v52 = vpop.f32.mrb[27].mxu1  ;;  %v1340_v53 = vmax.f32 %v1308_v48, 0.0  ;;  %v1922_v54 = vadd.f32 %v1873_v51, %v1819_v49  ;;  %v1215_v55 = vpop.f32.mrb[27].mxu0 }
 0x13c   : > { %v1339_v56 = vmax.f32 %v1307_v50, 0.0  ;;  %v1923_v57 = vadd.f32 %v1215_v55, %v857_v52 }
 0x13d   : > { %1373 = vst.msk [vmem:[%s2190_s16 + $0xc8] sm:$0xff] %vm1347_vm1, %v1340_v53  ;;  %v1310_v58 = vadd.f32 %v1922_v54, %v2183_v1 }
 0x13e   : > { %v1822_v59 = vpop.f32.mrb[28].mxu1  ;;  %1372 = vst.msk [vmem:[%s2190_s16 + $0xc0] sm:$0xff] %vm1347_vm1, %v1339_v56  ;;  %v1309_v60 = vadd.f32 %v1923_v57, %v2183_v1  ;;  %v1876_v61 = vpop.f32.mrb[28].mxu0 }
 0x13f   : > { %v867_v0 = vpop.f32.mrb[29].mxu1  ;;  %v1342_v2 = vmax.f32 %v1310_v58, 0.0  ;;  %v1924_v3 = vadd.f32 %v1876_v61, %v1822_v59  ;;  %v1225_v4 = vpop.f32.mrb[29].mxu0 }
 0x140   : > { %v1341_v5 = vmax.f32 %v1309_v60, 0.0  ;;  %v1925_v6 = vadd.f32 %v1225_v4, %v867_v0 }
 0x141   : > { %1375 = vst.msk [vmem:[%s2190_s16 + $0xd8] sm:$0xff] %vm1347_vm1, %v1342_v2  ;;  %v1312_v62 = vadd.f32 %v1924_v3, %v2183_v1 }
 0x142   : > { %v1825_v7 = vpop.f32.mrb[30].mxu1  ;;  %1374 = vst.msk [vmem:[%s2190_s16 + $0xd0] sm:$0xff] %vm1347_vm1, %v1341_v5  ;;  %v1311_v8 = vadd.f32 %v1925_v6, %v2183_v1  ;;  %v1879_v63 = vpop.f32.mrb[30].mxu0 }
 0x143   : > { %v877_v9 = vpop.f32.mrb[31].mxu1  ;;  %v1344_v10 = vmax.f32 %v1312_v62, 0.0  ;;  %v1926_v11 = vadd.f32 %v1879_v63, %v1825_v7  ;;  %v1235_v12 = vpop.f32.mrb[31].mxu0 }
 0x144   : > { %v1343_v13 = vmax.f32 %v1311_v8, 0.0  ;;  %v1927_v14 = vadd.f32 %v1235_v12, %v877_v9 }
 0x145   : > { %1377 = vst.msk [vmem:[%s2190_s16 + $0xe8] sm:$0xff] %vm1347_vm1, %v1344_v10  ;;  %v1314_v15 = vadd.f32 %v1926_v11, %v2183_v1 }
 0x146   : > { %1376 = vst.msk [vmem:[%s2190_s16 + $0xe0] sm:$0xff] %vm1347_vm1, %v1343_v13  ;;  %v1313_v16 = vadd.f32 %v1927_v14, %v2183_v1 }
 0x147   : > { %v1346_v17 = vmax.f32 %v1314_v15, 0.0 }
 0x148   : > { %v1345_v18 = vmax.f32 %v1313_v16, 0.0 }
 0x149   : > { %1379 = vst.msk [vmem:[%s2190_s16 + $0xf8] sm:$0xff] %vm1347_vm1, %v1346_v17 }
 0x14a   : > { %1378 = vst.msk [vmem:[%s2190_s16 + $0xf0] sm:$0xff] %vm1347_vm1, %v1345_v18 }
 0x14b PF: > { %s13_s12 = sadd.s32 1, %s1975_s12  }
 0x14c   : > { %p10_p4 = scmp.ge.s32.totalorder %s13_s12, 4  }
 0x14e   :  { %12 = sbr.rel (!%p10_p4) target bundleno = 1 (0x1), region = 66 }

// kernel: inception_forward.8
= control target key start
LH: loop header
LB: loop body
LE: loop exit
PB: predicated region body
PF: predicated region fallthrough
CT: control target
= control target key end

     0   :  { %s1997_s12 = smov 0   ;;  %s2294_s0 = inlined_call_operand.vmem [shape: f32[2,18,16,24], index: 0, kind: input, shape index: {}]   ;;  %s2295_s1 = inlined_call_operand.vmem [shape: f32[3,24,8], index: 1, kind: input, shape index: {}]   ;;  %s2296_s2 = inlined_call_operand.vmem [shape: f32[1,8], index: 2, kind: input, shape index: {}]   ;;  %s2297_s3 = inlined_call_operand.vmem [shape: f32[2,256,8], index: 3, kind: output, shape index: {}]  }
   0x1 LB: > { %s1435_s13 = sadd.s32 4294967295, %s1975_s12   ;;  %p1439_p0 = scmp.ge.s32.totalorder %s1975_s12, 1  ;;  %s1975_s12 = sphi %s1997_s12, %s13_s12  }
   0x2   : > { %p137_p1 = scmp.lt.s32.totalorder %s1975_s12, 3 }
   0x4   : > { %p138_p2 = pnand %p1439_p0, %p137_p1 }
   0x5   : > { %v1475_v0 = vld [vmem:[%s2295_s1 + $0x18] sm:$0xff] (!%p138_p2)  ;;  %v1476_v1 = vld [vmem:[%s2295_s1 + $0x20] sm:$0xff] (!%p138_p2)  ;;  %p161_p3 = scmp.lt.s32.totalorder (!%p138_p2), %s1435_s13, 1  ;;  %v204_v4 = vld [vmem:[%s2295_s1 + $0x8] sm:$0xff] (!%p138_p2)  ;;  %vm243_vm0 = vcmask (!%p138_p2), 195584   ;;  %vm1347_vm1 = vcmask (!%p138_p2), 64512  }
   0x6   : > { %141 = sbr.rel (%p138_p2) target bundleno = 331 (0x14b), region = 32  ;;  %v203_v2 = vld [vmem:[%s2295_s1] sm:$0xff] (!%p138_p2)  ;;  %v1880_v3 = vpack.c.bf16 (!%p138_p2), %v1476_v1, %v1475_v0  ;;  %v1477_v6 = vld [vmem:[%s2295_s1 + $0x28] sm:$0xff] (!%p138_p2)  ;;  %v205_v7 = vld [vmem:[%s2295_s1 + $0x10] sm:$0xff] (!%p138_p2) }
   0x7   : > { %v1884_v5 = vpack.c.bf16 (!%p138_p2), %v204_v4, %v203_v2  ;;  %v1574_v8 = vld [vmem:[%s2295_s1 + $0x30] sm:$0xff] (!%p138_p2)  ;;  %v1575_v9 = vld [vmem:[%s2295_s1 + $0x38] sm:$0xff] (!%p138_p2)  ;;  %v1576_v17 = vld [vmem:[%s2295_s1 + $0x40] sm:$0xff] (!%p138_p2) }
   0x8   : > { %1881 = vmatprep.subr.bf16.mxu1 (!%p138_p2), %v1880_v3  ;;  %v1888_v13 = vpack.c.bf16 (!%p138_p2), %v1575_v9, %v1574_v8  ;;  %v2183_v1 = vld [vmem:[%s2296_s2] ss:$0 sm:$0xff] (!%p138_p2) }
   0x9   : > { %1885 = vmatprep.subr.bf16.mxu0 (!%p138_p2), %v1884_v5  ;;  %1883 = vmatpush3.bf16.msra.mxu1 (!%p138_p2), %v1880_v3 }
   0xa   : > { %1887 = vmatpush3.bf16.msra.mxu0 (!%p138_p2), %v1884_v5  ;;  %1722 = vmatprep.subr.mxu1 (!%p138_p2), %v1477_v6 }
   0xb   : > { %1776 = vmatprep.subr.mxu0 (!%p138_p2), %v205_v7 }
   0xd   : > { %s2299_s13 = smov (!%p161_p3, %s1435_s13), 1  ;;  %1723 = vmatpush3.msra.mxu1 %v1477_v6 }
   0xe   : > { %s1960_s26 = smul.u32 288, %s2299_s13  ;;  %1777 = vmatpush3.msra.mxu0 %v205_v7  ;;  %1892 = vmatprep.subr.bf16.mxu1 %v1884_v5  ;;  %s1612_s11 = sshll.u32 %s2299_s13, 8 }
   0xf   : > { %1889 = vmatprep.subr.bf16.mxu0 %v1888_v13  ;;  %s2190_s16 = scalar_lea.vmem %s2297_s3, %s1612_s11 }
  0x10   : > { %s2035_s6 = scalar_lea.vmem %s2294_s0, %s1960_s26 }
  0x11   : > { %v1443_v10 = vld [vmem:[%s2035_s6 + $0x10] sm:$0xff]  ;;  %v171_v11 = vld [vmem:[%s2035_s6] sm:$0xff]  ;;  %v1444_v12 = vld [vmem:[%s2035_s6 + $0x18] sm:$0xff] }
  0x12   : > { %1724 = vmatprep.mubr.msk.f32.mxu1 %vm243_vm0, %v1443_v10  ;;  %v172_v14 = vld [vmem:[%s2035_s6 + $0x8] sm:$0xff]  ;;  %1778 = vmatprep.mubr.msk.f32.mxu0 %vm243_vm0, %v171_v11  ;;  %v1445_v15 = vld [vmem:[%s2035_s6 + $0x20] sm:$0xff]  ;;  %v1447_v18 = vld [vmem:[%s2035_s6 + $0x30] sm:$0xff] }
  0x13   : > { %1725 = vmatmul.mubr.msk.f32.vlgmr.msra.gmra.mrb[0].mxu1 %vm243_vm0, %v1444_v12  ;;  %1779 = vmatmul.mubr.msk.f32.vlgmr.msra.gmra.mrb[0].mxu0 %vm243_vm0, %v172_v14  ;;  %v1446_v16 = vld [vmem:[%s2035_s6 + $0x28] sm:$0xff]  ;;  %v1448_v19 = vld [vmem:[%s2035_s6 + $0x38] sm:$0xff]  ;;  %v1449_v20 = vld [vmem:[%s2035_s6 + $0x40] sm:$0xff] }
  0x14   : > { %1894 = vmatpush3.bf16.msra.mxu1 %v1884_v5  ;;  %1891 = vmatpush3.bf16.msra.mxu0 %v1888_v13  ;;  %v1450_v21 = vld [vmem:[%s2035_s6 + $0x48] sm:$0xff]  ;;  %v1451_v22 = vld [vmem:[%s2035_s6 + $0x50] sm:$0xff]  ;;  %v1452_v23 = vld [vmem:[%s2035_s6 + $0x58] sm:$0xff] }
  0x15   : > { %1727 = vmatprep.mubr.msk.f32.mxu1 %vm243_vm0, %v1445_v15  ;;  %1781 = vmatprep.mubr.msk.f32.mxu0 %vm243_vm0, %v1443_v10  ;;  %v1453_v24 = vld [vmem:[%s2035_s6 + $0x60] sm:$0xff]  ;;  %v1454_v25 = vld [vmem:[%s2035_s6 + $0x68] sm:$0xff]  ;;  %v1455_v26 = vld [vmem:[%s2035_s6 + $0x70] sm:$0xff] }
  0x16   : > { %1830 = vmatprep.subr.mxu0 %v1576_v17  ;;  %1893 = vmatprep.subr.mxu1 %v205_v7  ;;  %v1456_v27 = vld [vmem:[%s2035_s6 + $0x78] sm:$0xff]  ;;  %v1457_v28 = vld [vmem:[%s2035_s6 + $0x80] sm:$0xff]  ;;  %v1458_v29 = vld [vmem:[%s2035_s6 + $0x88] sm:$0xff] }
  0x17   : > { %1728 = vmatmul.mubr.msk.f32.gmra.mrb[2].mxu1 %vm243_vm0, %v1446_v16  ;;  %1782 = vmatmul.mubr.msk.f32.gmra.mrb[2].mxu0 %vm243_vm0, %v1444_v12  ;;  %v1459_v30 = vld [vmem:[%s2035_s6 + $0x90] sm:$0xff]  ;;  %v1460_v31 = vld [vmem:[%s2035_s6 + $0x98] sm:$0xff]  ;;  %v1461_v32 = vld [vmem:[%s2035_s6 + $0xa0] sm:$0xff] }
  0x18   : > { %1730 = vmatprep.mubr.msk.f32.mxu1 %vm243_vm0, %v1447_v18  ;;  %1784 = vmatprep.mubr.msk.f32.mxu0 %vm243_vm0, %v1445_v15  ;;  %v1462_v33 = vld [vmem:[%s2035_s6 + $0xa8] sm:$0xff]  ;;  %v1463_v34 = vld [vmem:[%s2035_s6 + $0xb0] sm:$0xff]  ;;  %v1464_v35 = vld [vmem:[%s2035_s6 + $0xb8] sm:$0xff] }
  0x19   : > { %1831 = vmatpush3.msra.mxu0 %v1576_v17  ;;  %1895 = vmatpush3.msra.mxu1 %v205_v7  ;;  %v1465_v36 = vld [vmem:[%s2035_s6 + $0xc0] sm:$0xff]  ;;  %v1466_v37 = vld [vmem:[%s2035_s6 + $0xc8] sm:$0xff]  ;;  %v1467_v38 = vld [vmem:[%s2035_s6 + $0xd0] sm:$0xff] }
  0x1a   : > { %v1468_v39 = vld [vmem:[%s2035_s6 + $0xd8] sm:$0xff]  ;;  %v1469_v40 = vld [vmem:[%s2035_s6 + $0xe0] sm:$0xff]  ;;  %v1470_v41 = vld [vmem:[%s2035_s6 + $0xe8] sm:$0xff] }
  0x1b   : > { %1731 = vmatmul.mubr.msk.f32.gmra.mrb[4].mxu1 %vm243_vm0, %v1448_v19  ;;  %1785 = vmatmul.mubr.msk.f32.gmra.mrb[4].mxu0 %vm243_vm0, %v1446_v16  ;;  %v1471_v42 = vld [vmem:[%s2035_s6 + $0xf0] sm:$0xff]  ;;  %v1472_v43 = vld [vmem:[%s2035_s6 + $0xf8] sm:$0xff]  ;;  %v1473_v44 = vld [vmem:[%s2035_s6 + $0x100] sm:$0xff] }
  0x1c   : > { %1733 = vmatprep.mubr.msk.f32.mxu1 %vm243_vm0, %v1449_v20  ;;  %1787 = vmatprep.mubr.msk.f32.mxu0 %vm243_vm0, %v1447_v18  ;;  %v1474_v45 = vld [vmem:[%s2035_s6 + $0x108] sm:$0xff]  ;;  %v1572_v46 = vld [vmem:[%s2035_s6 + $0x110] sm:$0xff]  ;;  %v1573_v47 = vld [vmem:[%s2035_s6 + $0x118] sm:$0xff] }
  0x1f   : > { %1734 = vmatmul.mubr.msk.f32.gmra.mrb[6].mxu1 %vm243_vm0, %v1450_v21  ;;  %1788 = vmatmul.mubr.msk.f32.gmra.mrb[6].mxu0 %vm243_vm0, %v1448_v19 }
  0x20   : > { %1736 = vmatprep.mubr.msk.f32.mxu1 %vm243_vm0, %v1451_v22  ;;  %1790 = vmatprep.mubr.msk.f32.mxu0 %vm243_vm0, %v1449_v20 }
  0x23   : > { %1737 = vmatmul.mubr.msk.f32.gmra.mrb[8].mxu1 %vm243_vm0, %v1452_v23  ;;  %1791 = vmatmul.mubr.msk.f32.gmra.mrb[8].mxu0 %vm243_vm0, %v1450_v21 }
  0x24   : > { %1739 = vmatprep.mubr.msk.f32.mxu1 %vm243_vm0, %v1453_v24  ;;  %1793 = vmatprep.mubr.msk.f32.mxu0 %vm243_vm0, %v1451_v22 }
  0x27   : > { %1740 = vmatmul.mubr.msk.f32.gmra.mrb[10].mxu1 %vm243_vm0, %v1454_v25  ;;  %1794 = vmatmul.mubr.msk.f32.gmra.mrb[10].mxu0 %vm243_vm0, %v1452_v23 }
  0x28   : > { %1742 = vmatprep.mubr.msk.f32.mxu1 %vm243_vm0, %v1455_v26  ;;  %1796 = vmatprep.mubr.msk.f32.mxu0 %vm243_vm0, %v1453_v24 }
  0x2b   : > { %1743 = vmatmul.mubr.msk.f32.gmra.mrb[12].mxu1 %vm243_vm0, %v1456_v27  ;;  %1797 = vmatmul.mubr.msk.f32.gmra.mrb[12].mxu0 %vm243_vm0, %v1454_v25 }
  0x2c   : > { %1745 = vmatprep.mubr.msk.f32.mxu1 %vm243_vm0, %v1457_v28  ;;  %1799 = vmatprep.mubr.msk.f32.mxu0 %vm243_vm0, %v1455_v26 }
  0x2f   : > { %1746 = vmatmul.mubr.msk.f32.gmra.mrb[14].mxu1 %vm243_vm0, %v1458_v29  ;;  %1800 = vmatmul.mubr.msk.f32.gmra.mrb[14].mxu0 %vm243_vm0, %v1456_v27 }
  0x30   : > { %1748 = vmatprep.mubr.msk.f32.mxu1 %vm243_vm0, %v1459_v30  ;;  %1832 = vmatprep.mubr.msk.f32.mxu0 %vm243_vm0, %v1445_v15 }
  0x33   : > { %1749 = vmatmul.mubr.msk.f32.gmra.mrb[16].mxu1 %vm243_vm0, %v1460_v31  ;;  %1833 = vmatmul.mubr.msk.f32.vlgmr.msra.gmra.mrb[0].mxu0 %vm243_vm0, %v1446_v16 }
  0x34   : > { %1751 = vmatprep.mubr.msk.f32.mxu1 %vm243_vm0, %v1461_v32  ;;  %1835 = vmatprep.mubr.msk.f32.mxu0 %vm243_vm0, %v1447_v18 }
  0x37   : > { %1752 = vmatmul.mubr.msk.f32.gmra.mrb[18].mxu1 %vm243_vm0, %v1462_v33  ;;  %1836 = vmatmul.mubr.msk.f32.gmra.mrb[2].mxu0 %vm243_vm0, %v1448_v19 }
  0x38   : > { %1754 = vmatprep.mubr.msk.f32.mxu1 %vm243_vm0, %v1463_v34  ;;  %1838 = vmatprep.mubr.msk.f32.mxu0 %vm243_vm0, %v1449_v20 }
  0x3b   : > { %1755 = vmatmul.mubr.msk.f32.gmra.mrb[20].mxu1 %vm243_vm0, %v1464_v35  ;;  %1839 = vmatmul.mubr.msk.f32.gmra.mrb[4].mxu0 %vm243_vm0, %v1450_v21 }
  0x3c   : > { %1757 = vmatprep.mubr.msk.f32.mxu1 %vm243_vm0, %v1465_v36  ;;  %1841 = vmatprep.mubr.msk.f32.mxu0 %vm243_vm0, %v1451_v22 }
  0x3f   : > { %1758 = vmatmul.mubr.msk.f32.gmra.mrb[22].mxu1 %vm243_vm0, %v1466_v37  ;;  %1842 = vmatmul.mubr.msk.f32.gmra.mrb[6].mxu0 %vm243_vm0, %v1452_v23 }
  0x40   : > { %1760 = vmatprep.mubr.msk.f32.mxu1 %vm243_vm0, %v1467_v38  ;;  %1844 = vmatprep.mubr.msk.f32.mxu0 %vm243_vm0, %v1453_v24 }
  0x43   : > { %1761 = vmatmul.mubr.msk.f32.gmra.mrb[24].mxu1 %vm243_vm0, %v1468_v39  ;;  %1845 = vmatmul.mubr.msk.f32.gmra.mrb[8].mxu0 %vm243_vm0, %v1454_v25 }
  0x44   : > { %1763 = vmatprep.mubr.msk.f32.mxu1 %vm243_vm0, %v1469_v40  ;;  %1847 = vmatprep.mubr.msk.f32.mxu0 %vm243_vm0, %v1455_v26 }
  0x47   : > { %1764 = vmatmul.mubr.msk.f32.gmra.mrb[26].mxu1 %vm243_vm0, %v1470_v41  ;;  %1848 = vmatmul.mubr.msk.f32.gmra.mrb[10].mxu0 %vm243_vm0, %v1456_v27 }
  0x48   : > { %1766 = vmatprep.mubr.msk.f32.mxu1 %vm243_vm0, %v1471_v42  ;;  %1850 = vmatprep.mubr.msk.f32.mxu0 %vm243_vm0, %v1457_v28 }
  0x4b   : > { %1767 = vmatmul.mubr.msk.f32.gmra.mrb[28].mxu1 %vm243_vm0, %v1472_v43  ;;  %1851 = vmatmul.mubr.msk.f32.gmra.mrb[12].mxu0 %vm243_vm0, %v1458_v29 }
  0x4c   : > { %1769 = vmatprep.mubr.msk.f32.mxu1 %vm243_vm0, %v1473_v44  ;;  %1853 = vmatprep.mubr.msk.f32.mxu0 %vm243_vm0, %v1459_v30 }
  0x4f   : > { %1770 = vmatmul.mubr.msk.f32.gmra.mrb[30].mxu1 %vm243_vm0, %v1474_v45  ;;  %1854 = vmatmul.mubr.msk.f32.gmra.mrb[14].mxu0 %vm243_vm0, %v1460_v31 }
  0x50   : > { %1802 = vmatprep.mubr.msk.f32.mxu1 %vm243_vm0, %v1457_v28  ;;  %1856 = vmatprep.mubr.msk.f32.mxu0 %vm243_vm0, %v1461_v32 }
  0x53   : > { %1803 = vmatmul.mubr.msk.f32.vlgmr.msra.gmra.mrb[16].mxu1 %vm243_vm0, %v1458_v29  ;;  %1857 = vmatmul.mubr.msk.f32.gmra.mrb[16].mxu0 %vm243_vm0, %v1462_v33 }
  0x54   : > { %1805 = vmatprep.mubr.msk.f32.mxu1 %vm243_vm0, %v1459_v30  ;;  %1859 = vmatprep.mubr.msk.f32.mxu0 %vm243_vm0, %v1463_v34 }
  0x57   : > { %1806 = vmatmul.mubr.msk.f32.gmra.mrb[18].mxu1 %vm243_vm0, %v1460_v31  ;;  %1860 = vmatmul.mubr.msk.f32.gmra.mrb[18].mxu0 %vm243_vm0, %v1464_v35 }
  0x58   : > { %1808 = vmatprep.mubr.msk.f32.mxu1 %vm243_vm0, %v1461_v32  ;;  %1862 = vmatprep.mubr.msk.f32.mxu0 %vm243_vm0, %v1465_v36 }
  0x5b   : > { %1809 = vmatmul.mubr.msk.f32.gmra.mrb[20].mxu1 %vm243_vm0, %v1462_v33  ;;  %1863 = vmatmul.mubr.msk.f32.gmra.mrb[20].mxu0 %vm243_vm0, %v1466_v37 }
  0x5c   : > { %1811 = vmatprep.mubr.msk.f32.mxu1 %vm243_vm0, %v1463_v34  ;;  %1865 = vmatprep.mubr.msk.f32.mxu0 %vm243_vm0, %v1467_v38 }
  0x5f   : > { %1812 = vmatmul.mubr.msk.f32.gmra.mrb[22].mxu1 %vm243_vm0, %v1464_v35  ;;  %1866 = vmatmul.mubr.msk.f32.gmra.mrb[22].mxu0 %vm243_vm0, %v1468_v39 }
  0x60   : > { %1814 = vmatprep.mubr.msk.f32.mxu1 %vm243_vm0, %v1465_v36  ;;  %1868 = vmatprep.mubr.msk.f32.mxu0 %vm243_vm0, %v1469_v40 }
  0x63   : > { %1815 = vmatmul.mubr.msk.f32.gmra.mrb[24].mxu1 %vm243_vm0, %v1466_v37  ;;  %1869 = vmatmul.mubr.msk.f32.gmra.mrb[24].mxu0 %vm243_vm0, %v1470_v41 }
  0x64   : > { %1817 = vmatprep.mubr.msk.f32.mxu1 %vm243_vm0, %v1467_v38  ;;  %1871 = vmatprep.mubr.msk.f32.mxu0 %vm243_vm0, %v1471_v42 }
  0x67   : > { %1818 = vmatmul.mubr.msk.f32.gmra.mrb[26].mxu1 %vm243_vm0, %v1468_v39  ;;  %1872 = vmatmul.mubr.msk.f32.gmra.mrb[26].mxu0 %vm243_vm0, %v1472_v43 }
  0x68   : > { %1820 = vmatprep.mubr.msk.f32.mxu1 %vm243_vm0, %v1469_v40  ;;  %1874 = vmatprep.mubr.msk.f32.mxu0 %vm243_vm0, %v1473_v44 }
  0x6b   : > { %1821 = vmatmul.mubr.msk.f32.gmra.mrb[28].mxu1 %vm243_vm0, %v1470_v41  ;;  %1875 = vmatmul.mubr.msk.f32.gmra.mrb[28].mxu0 %vm243_vm0, %v1474_v45 }
  0x6c   : > { %1823 = vmatprep.mubr.msk.f32.mxu1 %vm243_vm0, %v1471_v42  ;;  %1877 = vmatprep.mubr.msk.f32.mxu0 %vm243_vm0, %v1572_v46 }
  0x6f   : > { %1824 = vmatmul.mubr.msk.f32.gmra.mrb[30].mxu1 %vm243_vm0, %v1472_v43  ;;  %1878 = vmatmul.mubr.msk.f32.gmra.mrb[30].mxu0 %vm243_vm0, %v1573_v47 }
  0xe6   : > { %v1726_v48 = vpop.f32.mrb[0].mxu1 }
  0xe7   : > { %v406_v49 = vpop.f32.mrb[1].mxu1 }
  0xea   : > { %v1729_v50 = vpop.f32.mrb[2].mxu1 }
  0xeb   : > { %v416_v51 = vpop.f32.mrb[3].mxu1 }
  0xee   : > { %v1732_v52 = vpop.f32.mrb[4].mxu1 }
  0xef   : > { %v426_v53 = vpop.f32.mrb[5].mxu1 }
  0xf2   : > { %v1735_v54 = vpop.f32.mrb[6].mxu1 }
  0xf3   : > { %v436_v55 = vpop.f32.mrb[7].mxu1 }
  0xf6   : > { %v1738_v56 = vpop.f32.mrb[8].mxu1 }
  0xf7   : > { %v446_v57 = vpop.f32.mrb[9].mxu1 }
  0xfa   : > { %v1741_v58 = vpop.f32.mrb[10].mxu1 }
  0xfb   : > { %v456_v59 = vpop.f32.mrb[11].mxu1 }
  0xfe   : > { %v2172_v60 = vpop.f32.mrb[12].mxu1 }
  0xff   : > { %v2174_v61 = vpop.f32.mrb[13].mxu1 }
 0x102   : > { %v2176_v62 = vpop.f32.mrb[14].mxu1 }
 0x103   : > { %v2178_v63 = vpop.f32.mrb[15].mxu1 }
 0x106   : > { %v1834_v0 = vpop.f32.mrb[0].mxu0 }
 0x107   : > { %v1896_v2 = vadd.f32 %v1834_v0, %v1726_v48  ;;  %v1085_v3 = vpop.f32.mrb[1].mxu0 }
 0x108   : > { %v1897_v4 = vadd.f32 %v1085_v3, %v406_v49 }
 0x109   : > { %v1284_v5 = vadd.f32 %v1896_v2, %v2183_v1 }
 0x10a   : > { %v1283_v6 = vadd.f32 %v1897_v4, %v2183_v1  ;;  %v1837_v7 = vpop.f32.mrb[2].mxu0 }
 0x10b   : > { %v1316_v8 = vmax.f32 %v1284_v5, 0.0  ;;  %v1898_v9 = vadd.f32 %v1837_v7, %v1729_v50  ;;  %v1095_v10 = vpop.f32.mrb[3].mxu0 }
 0x10c   : > { %v1315_v11 = vmax.f32 %v1283_v6, 0.0  ;;  %v1899_v12 = vadd.f32 %v1095_v10, %v416_v51 }
 0x10d   : > { %1349 = vst.msk [vmem:[%s2190_s16 + $0x8] sm:$0xff] %vm1347_vm1, %v1316_v8  ;;  %v1286_v13 = vadd.f32 %v1898_v9, %v2183_v1 }
 0x10e   : > { %1348 = vst.msk [vmem:[%s2190_s16] sm:$0xff] %vm1347_vm1, %v1315_v11  ;;  %v1285_v14 = vadd.f32 %v1899_v12, %v2183_v1  ;;  %v1840_v15 = vpop.f32.mrb[4].mxu0 }
 0x10f   : > { %v1318_v16 = vmax.f32 %v1286_v13, 0.0  ;;  %v1900_v17 = vadd.f32 %v1840_v15, %v1732_v52  ;;  %v1105_v18 = vpop.f32.mrb[5].mxu0 }
 0x110   : > { %v1317_v19 = vmax.f32 %v1285_v14, 0.0  ;;  %v1901_v20 = vadd.f32 %v1105_v18, %v426_v53 }
 0x111   : > { %1351 = vst.msk [vmem:[%s2190_s16 + $0x18] sm:$0xff] %vm1347_vm1, %v1318_v16  ;;  %v1288_v21 = vadd.f32 %v1900_v17, %v2183_v1 }
 0x112   : > { %1350 = vst.msk [vmem:[%s2190_s16 + $0x10] sm:$0xff] %vm1347_vm1, %v1317_v19  ;;  %v1287_v22 = vadd.f32 %v1901_v20, %v2183_v1  ;;  %v1843_v23 = vpop.f32.mrb[6].mxu0 }
 0x113   : > { %v1320_v24 = vmax.f32 %v1288_v21, 0.0  ;;  %v1902_v25 = vadd.f32 %v1843_v23, %v1735_v54  ;;  %v1115_v26 = vpop.f32.mrb[7].mxu0 }
 0x114   : > { %v1319_v27 = vmax.f32 %v1287_v22, 0.0  ;;  %v1903_v28 = vadd.f32 %v1115_v26, %v436_v55 }
 0x115   : > { %1353 = vst.msk [vmem:[%s2190_s16 + $0x28] sm:$0xff] %vm1347_vm1, %v1320_v24  ;;  %v1290_v29 = vadd.f32 %v1902_v25, %v2183_v1 }
 0x116   : > { %1352 = vst.msk [vmem:[%s2190_s16 + $0x20] sm:$0xff] %vm1347_vm1, %v1319_v27  ;;  %v1289_v30 = vadd.f32 %v1903_v28, %v2183_v1  ;;  %v1846_v31 = vpop.f32.mrb[8].mxu0 }
 0x117   : > { %v1322_v32 = vmax.f32 %v1290_v29, 0.0  ;;  %v1904_v33 = vadd.f32 %v1846_v31, %v1738_v56  ;;  %v1125_v34 = vpop.f32.mrb[9].mxu0 }
 0x118   : > { %v1321_v35 = vmax.f32 %v1289_v30, 0.0  ;;  %v1905_v36 = vadd.f32 %v1125_v34, %v446_v57 }
 0x119   : > { %1355 = vst.msk [vmem:[%s2190_s16 + $0x38] sm:$0xff] %vm1347_vm1, %v1322_v32  ;;  %v1292_v37 = vadd.f32 %v1904_v33, %v2183_v1 }
 0x11a   : > { %1354 = vst.msk [vmem:[%s2190_s16 + $0x30] sm:$0xff] %vm1347_vm1, %v1321_v35  ;;  %v1291_v38 = vadd.f32 %v1905_v36, %v2183_v1  ;;  %v1849_v39 = vpop.f32.mrb[10].mxu0 }
 0x11b   : > { %v1324_v40 = vmax.f32 %v1292_v37, 0.0  ;;  %v1906_v41 = vadd.f32 %v1849_v39, %v1741_v58  ;;  %v1135_v42 = vpop.f32.mrb[11].mxu0 }
 0x11c   : > { %v1323_v43 = vmax.f32 %v1291_v38, 0.0  ;;  %v1907_v44 = vadd.f32 %v1135_v42, %v456_v59 }
 0x11d   : > { %1357 = vst.msk [vmem:[%s2190_s16 + $0x48] sm:$0xff] %vm1347_vm1, %v1324_v40  ;;  %v1294_v45 = vadd.f32 %v1906_v41, %v2183_v1 }
 0x11e   : > { %1356 = vst.msk [vmem:[%s2190_s16 + $0x40] sm:$0xff] %vm1347_vm1, %v1323_v43  ;;  %v1293_v46 = vadd.f32 %v1907_v44, %v2183_v1  ;;  %v1852_v47 = vpop.f32.mrb[12].mxu0 }
 0x11f   : > { %v1326_v48 = vmax.f32 %v1294_v45, 0.0  ;;  %v1908_v49 = vadd.f32 %v1852_v47, %v2172_v60  ;;  %v1145_v50 = vpop.f32.mrb[13].mxu0 }
 0x120   : > { %v1325_v51 = vmax.f32 %v1293_v46, 0.0  ;;  %v1909_v52 = vadd.f32 %v1145_v50, %v2174_v61 }
 0x121   : > { %1359 = vst.msk [vmem:[%s2190_s16 + $0x58] sm:$0xff] %vm1347_vm1, %v1326_v48  ;;  %v1296_v53 = vadd.f32 %v1908_v49, %v2183_v1 }
 0x122   : > { %1358 = vst.msk [vmem:[%s2190_s16 + $0x50] sm:$0xff] %vm1347_vm1, %v1325_v51  ;;  %v1295_v54 = vadd.f32 %v1909_v52, %v2183_v1  ;;  %v1855_v55 = vpop.f32.mrb[14].mxu0 }
 0x123   : > { %v1328_v56 = vmax.f32 %v1296_v53, 0.0  ;;  %v1910_v57 = vadd.f32 %v1855_v55, %v2176_v62  ;;  %v1155_v58 = vpop.f32.mrb[15].mxu0 }
 0x124   : > { %v1327_v59 = vmax.f32 %v1295_v54, 0.0  ;;  %v1911_v60 = vadd.f32 %v1155_v58, %v2178_v63 }
 0x125   : > { %1361 = vst.msk [vmem:[%s2190_s16 + $0x68] sm:$0xff] %vm1347_vm1, %v1328_v56  ;;  %v1298_v61 = vadd.f32 %v1910_v57, %v2183_v1 }
 0x126   : > { %v1804_v0 = vpop.f32.mrb[16].mxu1  ;;  %1360 = vst.msk [vmem:[%s2190_s16 + $0x60] sm:$0xff] %vm1347_vm1, %v1327_v59  ;;  %v1297_v2 = vadd.f32 %v1911_v60, %v2183_v1  ;;  %v1858_v3 = vpop.f32.mrb[16].mxu0 }
 0x127   : > { %v807_v4 = vpop.f32.mrb[17].mxu1  ;;  %v1330_v5 = vmax.f32 %v1298_v61, 0.0  ;;  %v1912_v6 = vadd.f32 %v1858_v3, %v1804_v0  ;;  %v1165_v62 = vpop.f32.mrb[17].mxu0 }
 0x128   : > { %v1329_v7 = vmax.f32 %v1297_v2, 0.0  ;;  %v1913_v8 = vadd.f32 %v1165_v62, %v807_v4 }
 0x129   : > { %1363 = vst.msk [vmem:[%s2190_s16 + $0x78] sm:$0xff] %vm1347_vm1, %v1330_v5  ;;  %v1300_v63 = vadd.f32 %v1912_v6, %v2183_v1 }
 0x12a   : > { %v1807_v9 = vpop.f32.mrb[18].mxu1  ;;  %1362 = vst.msk [vmem:[%s2190_s16 + $0x70] sm:$0xff] %vm1347_vm1, %v1329_v7  ;;  %v1299_v10 = vadd.f32 %v1913_v8, %v2183_v1  ;;  %v1861_v11 = vpop.f32.mrb[18].mxu0 }
 0x12b   : > { %v817_v12 = vpop.f32.mrb[19].mxu1  ;;  %v1332_v13 = vmax.f32 %v1300_v63, 0.0  ;;  %v1914_v14 = vadd.f32 %v1861_v11, %v1807_v9  ;;  %v1175_v15 = vpop.f32.mrb[19].mxu0 }
 0x12c   : > { %v1331_v16 = vmax.f32 %v1299_v10, 0.0  ;;  %v1915_v17 = vadd.f32 %v1175_v15, %v817_v12 }
 0x12d   : > { %1365 = vst.msk [vmem:[%s2190_s16 + $0x88] sm:$0xff] %vm1347_vm1, %v1332_v13  ;;  %v1302_v18 = vadd.f32 %v1914_v14, %v2183_v1 }
 0x12e   : > { %v1810_v19 = vpop.f32.mrb[20].mxu1  ;;  %1364 = vst.msk [vmem:[%s2190_s16 + $0x80] sm:$0xff] %vm1347_vm1, %v1331_v16  ;;  %v1301_v20 = vadd.f32 %v1915_v17, %v2183_v1  ;;  %v1864_v21 = vpop.f32.mrb[20].mxu0 }
 0x12f   : > { %v827_v22 = vpop.f32.mrb[21].mxu1  ;;  %v1334_v23 = vmax.f32 %v1302_v18, 0.0  ;;  %v1916_v24 = vadd.f32 %v1864_v21, %v1810_v19  ;;  %v1185_v25 = vpop.f32.mrb[21].mxu0 }
 0x130   : > { %v1333_v26 = vmax.f32 %v1301_v20, 0.0  ;;  %v1917_v27 = vadd.f32 %v1185_v25, %v827_v22 }
 0x131   : > { %1367 = vst.msk [vmem:[%s2190_s16 + $0x98] sm:$0xff] %vm1347_vm1, %v1334_v23  ;;  %v1304_v28 = vadd.f32 %v1916_v24, %v2183_v1 }
 0x132   : > { %v1813_v29 = vpop.f32.mrb[22].mxu1  ;;  %1366 = vst.msk [vmem:[%s2190_s16 + $0x90] sm:$0xff] %vm1347_vm1, %v1333_v26  ;;  %v1303_v30 = vadd.f32 %v1917_v27, %v2183_v1  ;;  %v1867_v31 = vpop.f32.mrb[22].mxu0 }
 0x133   : > { %v837_v32 = vpop.f32.mrb[23].mxu1  ;;  %v1336_v33 = vmax.f32 %v1304_v28, 0.0  ;;  %v1918_v34 = vadd.f32 %v1867_v31, %v1813_v29  ;;  %v1195_v35 = vpop.f32.mrb[23].mxu0 }
 0x134   : > { %v1335_v36 = vmax.f32 %v1303_v30, 0.0  ;;  %v1919_v37 = vadd.f32 %v1195_v35, %v837_v32 }
 0x135   : > { %1369 = vst.msk [vmem:[%s2190_s16 + $0xa8] sm:$0xff] %vm1347_vm1, %v1336_v33  ;;  %v1306_v38 = vadd.f32 %v1918_v34, %v2183_v1 }
 0x136   : > { %v1816_v39 = vpop.f32.mrb[24].mxu1  ;;  %1368 = vst.msk [vmem:[%s2190_s16 + $0xa0] sm:$0xff] %vm1347_vm1, %v1335_v36  ;;  %v1305_v40 = vadd.f32 %v1919_v37, %v2183_v1  ;;  %v1870_v41 = vpop.f32.mrb[24].mxu0 }
 0x137   : > { %v847_v42 = vpop.f32.mrb[25].mxu1  ;;  %v1338_v43 = vmax.f32 %v1306_v38, 0.0  ;;  %v1920_v44 = vadd.f32 %v1870_v41, %v1816_v39  ;;  %v1205_v45 = vpop.f32.mrb[25].mxu0 }
 0x138   : > { %v1337_v46 = vmax.f32 %v1305_v40, 0.0  ;;  %v1921_v47 = vadd.f32 %v1205_v45, %v847_v42 }
 0x139   : > { %1371 = vst.msk [vmem:[%s2190_s16 + $0xb8] sm:$0xff] %vm1347_vm1, %v1338_v43  ;;  %v1308_v48 = vadd.f32 %v1920_v44, %v2183_v1 }
 0x13a   : > { %v1819_v49 = vpop.f32.mrb[26].mxu1  ;;  %1370 = vst.msk [vmem:[%s2190_s16 + $0xb0] sm:$0xff] %vm1347_vm1, %v1337_v46  ;;  %v1307_v50 = vadd.f32 %v1921_v47, %v2183_v1  ;;  %v1873_v51 = vpop.f32.mrb[26].mxu0 }
 0x13b   : > { %v857_v52 = vpop.f32.mrb[27].mxu1  ;;  %v1340_v53 = vmax.f32 %v1308_v48, 0.0  ;;  %v1922_v54 = vadd.f32 %v1873_v51, %v1819_v49  ;;  %v1215_v55 = vpop.f32.mrb[27].mxu0 }
 0x13c   : > { %v1339_v56 = vmax.f32 %v1307_v50, 0.0  ;;  %v1923_v57 = vadd.f32 %v1215_v55, %v857_v52 }
 0x13d   : > { %1373 = vst.msk [vmem:[%s2190_s16 + $0xc8] sm:$0xff] %vm1347_vm1, %v1340_v53  ;;  %v1310_v58 = vadd.f32 %v1922_v54, %v2183_v1 }
 0x13e   : > { %v1822_v59 = vpop.f32.mrb[28].mxu1  ;;  %1372 = vst.msk [vmem:[%s2190_s16 + $0xc0] sm:$0xff] %vm1347_vm1, %v1339_v56  ;;  %v1309_v60 = vadd.f32 %v1923_v57, %v2183_v1  ;;  %v1876_v61 = vpop.f32.mrb[28].mxu0 }
 0x13f   : > { %v867_v0 = vpop.f32.mrb[29].mxu1  ;;  %v1342_v2 = vmax.f32 %v1310_v58, 0.0  ;;  %v1924_v3 = vadd.f32 %v1876_v61, %v1822_v59  ;;  %v1225_v4 = vpop.f32.mrb[29].mxu0 }
 0x140   : > { %v1341_v5 = vmax.f32 %v1309_v60, 0.0  ;;  %v1925_v6 = vadd.f32 %v1225_v4, %v867_v0 }
 0x141   : > { %1375 = vst.msk [vmem:[%s2190_s16 + $0xd8] sm:$0xff] %vm1347_vm1, %v1342_v2  ;;  %v1312_v62 = vadd.f32 %v1924_v3, %v2183_v1 }
 0x142   : > { %v1825_v7 = vpop.f32.mrb[30].mxu1  ;;  %1374 = vst.msk [vmem:[%s2190_s16 + $0xd0] sm:$0xff] %vm1347_vm1, %v1341_v5  ;;  %v1311_v8 = vadd.f32 %v1925_v6, %v2183_v1  ;;  %v1879_v63 = vpop.f32.mrb[30].mxu0 }
 0x143   : > { %v877_v9 = vpop.f32.mrb[31].mxu1  ;;  %v1344_v10 = vmax.f32 %v1312_v62, 0.0  ;;  %v1926_v11 = vadd.f32 %v1879_v63, %v1825_v7  ;;  %v1235_v12 = vpop.f32.mrb[31].mxu0 }
 0x144   : > { %v1343_v13 = vmax.f32 %v1311_v8, 0.0  ;;  %v1927_v14 = vadd.f32 %v1235_v12, %v877_v9 }
 0x145   : > { %1377 = vst.msk [vmem:[%s2190_s16 + $0xe8] sm:$0xff] %vm1347_vm1, %v1344_v10  ;;  %v1314_v15 = vadd.f32 %v1926_v11, %v2183_v1 }
 0x146   : > { %1376 = vst.msk [vmem:[%s2190_s16 + $0xe0] sm:$0xff] %vm1347_vm1, %v1343_v13  ;;  %v1313_v16 = vadd.f32 %v1927_v14, %v2183_v1 }
 0x147   : > { %v1346_v17 = vmax.f32 %v1314_v15, 0.0 }
 0x148   : > { %v1345_v18 = vmax.f32 %v1313_v16, 0.0 }
 0x149   : > { %1379 = vst.msk [vmem:[%s2190_s16 + $0xf8] sm:$0xff] %vm1347_vm1, %v1346_v17 }
 0x14a   : > { %1378 = vst.msk [vmem:[%s2190_s16 + $0xf0] sm:$0xff] %vm1347_vm1, %v1345_v18 }
 0x14b PF: > { %s13_s12 = sadd.s32 1, %s1975_s12  }
 0x14c   : > { %p10_p4 = scmp.ge.s32.totalorder %s13_s12, 4  }
 0x14e   :  { %12 = sbr.rel (!%p10_p4) target bundleno = 1 (0x1), region = 66 }

// kernel: inception_forward.7
= control target key start
LH: loop header
LB: loop body
LE: loop exit
PB: predicated region body
PF: predicated region fallthrough
CT: control target
= control target key end

     0   :  { %11 = vsyncpa [#allocation3], 0  ;;  %s2613_s18 = smov 0   ;;  %s3607_s0 = inlined_call_operand.vmem [shape: f32[2,18,16,24], index: 0, kind: input, shape index: {}]   ;;  %s3608_s1 = inlined_call_operand.vmem [shape: f32[3,24,8], index: 1, kind: input, shape index: {}]   ;;  %s3609_s2 = inlined_call_operand.vmem [shape: f32[1,8], index: 2, kind: input, shape index: {}]   ;;  %s3610_s3 = inlined_call_operand.vmem [shape: f32[2,256,8], index: 3, kind: output, shape index: {0}]   ;;  %s3611_s4 = inlined_call_operand.vmem [shape: s8[2,256,8], index: 4, kind: output, shape index: {1}]   ;;  %s3612_s5 = inlined_call_operand.hbm [shape: s32[1,128], index: 5, kind: output, shape index: {2}]  }
   0x1 LB: > { %s2619_s19 = sadd.s32 4294967295, %s2577_s18   ;;  %p1993_p0 = scmp.ge.s32.totalorder %s2577_s18, 1  ;;  %s2577_s18 = sphi %s2613_s18, %s17_s18  }
   0x2   : > { %p188_p1 = scmp.lt.s32.totalorder %s2577_s18, 3 }
   0x4   : > { %p189_p2 = pnand %p1993_p0, %p188_p1 }
   0x6   : > { %192 = sbr.rel (%p189_p2) target bundleno = 690 (0x2b2), region = 32 }
   0xd   : > { %v2031_v0 = vld [vmem:[%s3608_s1 + $0x18] sm:$0xff]  ;;  %v2032_v1 = vld [vmem:[%s3608_s1 + $0x20] sm:$0xff]  ;;  %p221_p3 = scmp.lt.s32.totalorder %s2619_s19, 1  ;;  %v269_v4 = vld [vmem:[%s3608_s1 + $0x8] sm:$0xff]  ;;  %vm308_vm0 = vcmask 195584   ;;  %vm3618_vm1 = vcmask 64512  }
   0xe   : > { %v268_v2 = vld [vmem:[%s3608_s1] sm:$0xff]  ;;  %v2440_v3 = vpack.c.bf16 %v2032_v1, %v2031_v0  ;;  %v2033_v6 = vld [vmem:[%s3608_s1 + $0x28] sm:$0xff]  ;;  %v270_v7 = vld [vmem:[%s3608_s1 + $0x10] sm:$0xff]  ;;  %p2166_p4 = scmp.ne.s32.totalorder %s2619_s19, 0 }
   0xf   : > { %v2444_v5 = vpack.c.bf16 %v269_v4, %v268_v2  ;;  %s2640_s30 = scalar_select %p221_p3, %s2619_s19, 1  ;;  %v2130_v8 = vld [vmem:[%s3608_s1 + $0x30] sm:$0xff]  ;;  %v2131_v9 = vld [vmem:[%s3608_s1 + $0x38] sm:$0xff]  ;;  %v2132_v17 = vld [vmem:[%s3608_s1 + $0x40] sm:$0xff] }
  0x10   : > { %2441 = vmatprep.subr.bf16.mxu1 %v2440_v3  ;;  %v2448_v13 = vpack.c.bf16 %v2131_v9, %v2130_v8  ;;  %v2809_v1 = vld [vmem:[%s3609_s2] ss:$0 sm:$0xff] }
  0x11   : > { %2445 = vmatprep.subr.bf16.mxu0 %v2444_v5  ;;  %2443 = vmatpush3.bf16.msra.mxu1 %v2440_v3  ;;  %s2520_s8 = smul.u32 288, %s2640_s30  ;;  %s2172_s9 = sshll.u32 %s2640_s30, 6 }
  0x12   : > { %2447 = vmatpush3.bf16.msra.mxu0 %v2444_v5  ;;  %2282 = vmatprep.subr.mxu1 %v2033_v6  ;;  %s2656_s16 = scalar_lea.vmem %s3611_s4, %s2172_s9  ;;  %s2171_s26 = sshll.u32 %s2640_s30, 8 }
  0x13   : > { %2336 = vmatprep.subr.mxu0 %v270_v7  ;;  %s2661_s21 = scalar_lea.vmem %s3607_s0, %s2520_s8  ;;  %s2818_s29 = scalar_lea.vmem %s3610_s3, %s2171_s26 }
  0x14   : > { %v1999_v10 = vld [vmem:[%s2661_s21 + $0x10] sm:$0xff]  ;;  %v236_v11 = vld [vmem:[%s2661_s21] sm:$0xff]  ;;  %v2000_v12 = vld [vmem:[%s2661_s21 + $0x18] sm:$0xff] }
  0x15   : > { %2283 = vmatpush3.msra.mxu1 %v2033_v6  ;;  %2284 = vmatprep.mubr.msk.f32.mxu1 %vm308_vm0, %v1999_v10  ;;  %v237_v14 = vld [vmem:[%s2661_s21 + $0x8] sm:$0xff]  ;;  %v2001_v15 = vld [vmem:[%s2661_s21 + $0x20] sm:$0xff]  ;;  %v2003_v18 = vld [vmem:[%s2661_s21 + $0x30] sm:$0xff] }
  0x16   : > { %2337 = vmatpush3.msra.mxu0 %v270_v7  ;;  %2338 = vmatprep.mubr.msk.f32.mxu0 %vm308_vm0, %v236_v11  ;;  %v2002_v16 = vld [vmem:[%s2661_s21 + $0x28] sm:$0xff]  ;;  %v2004_v19 = vld [vmem:[%s2661_s21 + $0x38] sm:$0xff]  ;;  %v2005_v20 = vld [vmem:[%s2661_s21 + $0x40] sm:$0xff] }
  0x17   : > { %2285 = vmatmul.mubr.msk.f32.vlgmr.msra.gmra.mrb[0].mxu1 %vm308_vm0, %v2000_v12  ;;  %2452 = vmatprep.subr.bf16.mxu1 %v2444_v5  ;;  %v2006_v21 = vld [vmem:[%s2661_s21 + $0x48] sm:$0xff]  ;;  %v2007_v22 = vld [vmem:[%s2661_s21 + $0x50] sm:$0xff]  ;;  %v2008_v23 = vld [vmem:[%s2661_s21 + $0x58] sm:$0xff] }
  0x18   : > { %2339 = vmatmul.mubr.msk.f32.vlgmr.msra.gmra.mrb[0].mxu0 %vm308_vm0, %v237_v14  ;;  %2449 = vmatprep.subr.bf16.mxu0 %v2448_v13  ;;  %v2009_v24 = vld [vmem:[%s2661_s21 + $0x60] sm:$0xff]  ;;  %v2010_v25 = vld [vmem:[%s2661_s21 + $0x68] sm:$0xff]  ;;  %v2011_v26 = vld [vmem:[%s2661_s21 + $0x70] sm:$0xff] }
  0x19   : > { %2454 = vmatpush3.bf16.msra.mxu1 %v2444_v5  ;;  %2451 = vmatpush3.bf16.msra.mxu0 %v2448_v13  ;;  %v2012_v27 = vld [vmem:[%s2661_s21 + $0x78] sm:$0xff]  ;;  %v2013_v28 = vld [vmem:[%s2661_s21 + $0x80] sm:$0xff]  ;;  %v2014_v29 = vld [vmem:[%s2661_s21 + $0x88] sm:$0xff] }
  0x1a   : > { %2287 = vmatprep.mubr.msk.f32.mxu1 %vm308_vm0, %v2001_v15  ;;  %2341 = vmatprep.mubr.msk.f32.mxu0 %vm308_vm0, %v1999_v10  ;;  %v2015_v30 = vld [vmem:[%s2661_s21 + $0x90] sm:$0xff]  ;;  %v2016_v31 = vld [vmem:[%s2661_s21 + $0x98] sm:$0xff]  ;;  %v2017_v32 = vld [vmem:[%s2661_s21 + $0xa0] sm:$0xff] }
  0x1b   : > { %2288 = vmatmul.mubr.msk.f32.gmra.mrb[2].mxu1 %vm308_vm0, %v2002_v16  ;;  %2390 = vmatprep.subr.mxu0 %v2132_v17  ;;  %v2018_v33 = vld [vmem:[%s2661_s21 + $0xa8] sm:$0xff]  ;;  %v2019_v34 = vld [vmem:[%s2661_s21 + $0xb0] sm:$0xff]  ;;  %v2020_v35 = vld [vmem:[%s2661_s21 + $0xb8] sm:$0xff] }
  0x1c   : > { %2342 = vmatmul.mubr.msk.f32.gmra.mrb[2].mxu0 %vm308_vm0, %v2000_v12  ;;  %2290 = vmatprep.mubr.msk.f32.mxu1 %vm308_vm0, %v2003_v18  ;;  %v2021_v36 = vld [vmem:[%s2661_s21 + $0xc0] sm:$0xff]  ;;  %v2022_v37 = vld [vmem:[%s2661_s21 + $0xc8] sm:$0xff]  ;;  %v2023_v38 = vld [vmem:[%s2661_s21 + $0xd0] sm:$0xff] }
  0x1d   : > { %2344 = vmatprep.mubr.msk.f32.mxu0 %vm308_vm0, %v2001_v15  ;;  %2391 = vmatpush3.msra.mxu0 %v2132_v17  ;;  %v2024_v39 = vld [vmem:[%s2661_s21 + $0xd8] sm:$0xff]  ;;  %v2025_v40 = vld [vmem:[%s2661_s21 + $0xe0] sm:$0xff]  ;;  %v2026_v41 = vld [vmem:[%s2661_s21 + $0xe8] sm:$0xff] }
  0x1e   : > { %2453 = vmatprep.subr.mxu1 %v270_v7  ;;  %v2027_v42 = vld [vmem:[%s2661_s21 + $0xf0] sm:$0xff]  ;;  %v2028_v43 = vld [vmem:[%s2661_s21 + $0xf8] sm:$0xff]  ;;  %v2029_v44 = vld [vmem:[%s2661_s21 + $0x100] sm:$0xff] }
  0x1f   : > { %2291 = vmatmul.mubr.msk.f32.gmra.mrb[4].mxu1 %vm308_vm0, %v2004_v19  ;;  %v2030_v45 = vld [vmem:[%s2661_s21 + $0x108] sm:$0xff]  ;;  %v2128_v46 = vld [vmem:[%s2661_s21 + $0x110] sm:$0xff]  ;;  %v2129_v47 = vld [vmem:[%s2661_s21 + $0x118] sm:$0xff] }
  0x20   : > { %2345 = vmatmul.mubr.msk.f32.gmra.mrb[4].mxu0 %vm308_vm0, %v2002_v16  ;;  %2293 = vmatprep.mubr.msk.f32.mxu1 %vm308_vm0, %v2005_v20 }
  0x21   : > { %2347 = vmatprep.mubr.msk.f32.mxu0 %vm308_vm0, %v2003_v18  ;;  %2455 = vmatpush3.msra.mxu1 %v270_v7 }
  0x23   : > { %2294 = vmatmul.mubr.msk.f32.gmra.mrb[6].mxu1 %vm308_vm0, %v2006_v21 }
  0x24   : > { %2348 = vmatmul.mubr.msk.f32.gmra.mrb[6].mxu0 %vm308_vm0, %v2004_v19  ;;  %2296 = vmatprep.mubr.msk.f32.mxu1 %vm308_vm0, %v2007_v22 }
  0x25   : > { %2350 = vmatprep.mubr.msk.f32.mxu0 %vm308_vm0, %v2005_v20 }
  0x27   : > { %2297 = vmatmul.mubr.msk.f32.gmra.mrb[8].mxu1 %vm308_vm0, %v2008_v23 }
  0x28   : > { %2351 = vmatmul.mubr.msk.f32.gmra.mrb[8].mxu0 %vm308_vm0, %v2006_v21  ;;  %2299 = vmatprep.mubr.msk.f32.mxu1 %vm308_vm0, %v2009_v24 }
  0x29   : > { %2353 = vmatprep.mubr.msk.f32.mxu0 %vm308_vm0, %v2007_v22 }
  0x2b   : > { %2300 = vmatmul.mubr.msk.f32.gmra.mrb[10].mxu1 %vm308_vm0, %v2010_v25 }
  0x2c   : > { %2354 = vmatmul.mubr.msk.f32.gmra.mrb[10].mxu0 %vm308_vm0, %v2008_v23  ;;  %2302 = vmatprep.mubr.msk.f32.mxu1 %vm308_vm0, %v2011_v26 }
  0x2d   : > { %2356 = vmatprep.mubr.msk.f32.mxu0 %vm308_vm0, %v2009_v24 }
  0x2f   : > { %2303 = vmatmul.mubr.msk.f32.gmra.mrb[12].mxu1 %vm308_vm0, %v2012_v27 }
  0x30   : > { %2357 = vmatmul.mubr.msk.f32.gmra.mrb[12].mxu0 %vm308_vm0, %v2010_v25  ;;  %2305 = vmatprep.mubr.msk.f32.mxu1 %vm308_vm0, %v2013_v28 }
  0x31   : > { %2359 = vmatprep.mubr.msk.f32.mxu0 %vm308_vm0, %v2011_v26 }
  0x33   : > { %2306 = vmatmul.mubr.msk.f32.gmra.mrb[14].mxu1 %vm308_vm0, %v2014_v29 }
  0x34   : > { %2360 = vmatmul.mubr.msk.f32.gmra.mrb[14].mxu0 %vm308_vm0, %v2012_v27  ;;  %2308 = vmatprep.mubr.msk.f32.mxu1 %vm308_vm0, %v2015_v30 }
  0x35   : > { %2392 = vmatprep.mubr.msk.f32.mxu0 %vm308_vm0, %v2001_v15 }
  0x37   : > { %2309 = vmatmul.mubr.msk.f32.gmra.mrb[16].mxu1 %vm308_vm0, %v2016_v31 }
  0x38   : > { %2393 = vmatmul.mubr.msk.f32.vlgmr.msra.gmra.mrb[0].mxu0 %vm308_vm0, %v2002_v16  ;;  %2311 = vmatprep.mubr.msk.f32.mxu1 %vm308_vm0, %v2017_v32 }
  0x39   : > { %2395 = vmatprep.mubr.msk.f32.mxu0 %vm308_vm0, %v2003_v18 }
  0x3b   : > { %2312 = vmatmul.mubr.msk.f32.gmra.mrb[18].mxu1 %vm308_vm0, %v2018_v33 }
  0x3c   : > { %2396 = vmatmul.mubr.msk.f32.gmra.mrb[2].mxu0 %vm308_vm0, %v2004_v19  ;;  %2314 = vmatprep.mubr.msk.f32.mxu1 %vm308_vm0, %v2019_v34 }
  0x3d   : > { %2398 = vmatprep.mubr.msk.f32.mxu0 %vm308_vm0, %v2005_v20 }
  0x3f   : > { %2315 = vmatmul.mubr.msk.f32.gmra.mrb[20].mxu1 %vm308_vm0, %v2020_v35 }
  0x40   : > { %2399 = vmatmul.mubr.msk.f32.gmra.mrb[4].mxu0 %vm308_vm0, %v2006_v21  ;;  %2317 = vmatprep.mubr.msk.f32.mxu1 %vm308_vm0, %v2021_v36 }
  0x41   : > { %2401 = vmatprep.mubr.msk.f32.mxu0 %vm308_vm0, %v2007_v22 }
  0x43   : > { %2318 = vmatmul.mubr.msk.f32.gmra.mrb[22].mxu1 %vm308_vm0, %v2022_v37 }
  0x44   : > { %2402 = vmatmul.mubr.msk.f32.gmra.mrb[6].mxu0 %vm308_vm0, %v2008_v23  ;;  %2320 = vmatprep.mubr.msk.f32.mxu1 %vm308_vm0, %v2023_v38 }
  0x45   : > { %2404 = vmatprep.mubr.msk.f32.mxu0 %vm308_vm0, %v2009_v24 }
  0x47   : > { %2321 = vmatmul.mubr.msk.f32.gmra.mrb[24].mxu1 %vm308_vm0, %v2024_v39 }
  0x48   : > { %2405 = vmatmul.mubr.msk.f32.gmra.mrb[8].mxu0 %vm308_vm0, %v2010_v25  ;;  %2323 = vmatprep.mubr.msk.f32.mxu1 %vm308_vm0, %v2025_v40 }
  0x49   : > { %2407 = vmatprep.mubr.msk.f32.mxu0 %vm308_vm0, %v2011_v26 }
  0x4b   : > { %2324 = vmatmul.mubr.msk.f32.gmra.mrb[26].mxu1 %vm308_vm0, %v2026_v41 }
  0x4c   : > { %2408 = vmatmul.mubr.msk.f32.gmra.mrb[10].mxu0 %vm308_vm0, %v2012_v27  ;;  %2326 = vmatprep.mubr.msk.f32.mxu1 %vm308_vm0, %v2027_v42 }
  0x4d   : > { %2410 = vmatprep.mubr.msk.f32.mxu0 %vm308_vm0, %v2013_v28 }
  0x4f   : > { %2327 = vmatmul.mubr.msk.f32.gmra.mrb[28].mxu1 %vm308_vm0, %v2028_v43 }
  0x50   : > { %2411 = vmatmul.mubr.msk.f32.gmra.mrb[12].mxu0 %vm308_vm0, %v2014_v29  ;;  %2329 = vmatprep.mubr.msk.f32.mxu1 %vm308_vm0, %v2029_v44 }
  0x51   : > { %2413 = vmatprep.mubr.msk.f32.mxu0 %vm308_vm0, %v2015_v30 }
  0x53   : > { %2330 = vmatmul.mubr.msk.f32.gmra.mrb[30].mxu1 %vm308_vm0, %v2030_v45 }
  0x54   : > { %2414 = vmatmul.mubr.msk.f32.gmra.mrb[14].mxu0 %vm308_vm0, %v2016_v31  ;;  %2362 = vmatprep.mubr.msk.f32.mxu1 %vm308_vm0, %v2013_v28 }
  0x55   : > { %2416 = vmatprep.mubr.msk.f32.mxu0 %vm308_vm0, %v2017_v32 }
  0x57   : > { %2363 = vmatmul.mubr.msk.f32.vlgmr.msra.gmra.mrb[16].mxu1 %vm308_vm0, %v2014_v29 }
  0x58   : > { %2417 = vmatmul.mubr.msk.f32.gmra.mrb[16].mxu0 %vm308_vm0, %v2018_v33  ;;  %2365 = vmatprep.mubr.msk.f32.mxu1 %vm308_vm0, %v2015_v30 }
  0x59   : > { %2419 = vmatprep.mubr.msk.f32.mxu0 %vm308_vm0, %v2019_v34 }
  0x5b   : > { %2366 = vmatmul.mubr.msk.f32.gmra.mrb[18].mxu1 %vm308_vm0, %v2016_v31 }
  0x5c   : > { %2420 = vmatmul.mubr.msk.f32.gmra.mrb[18].mxu0 %vm308_vm0, %v2020_v35  ;;  %2368 = vmatprep.mubr.msk.f32.mxu1 %vm308_vm0, %v2017_v32 }
  0x5d   : > { %2422 = vmatprep.mubr.msk.f32.mxu0 %vm308_vm0, %v2021_v36 }
  0x5f   : > { %2369 = vmatmul.mubr.msk.f32.gmra.mrb[20].mxu1 %vm308_vm0, %v2018_v33 }
  0x60   : > { %2423 = vmatmul.mubr.msk.f32.gmra.mrb[20].mxu0 %vm308_vm0, %v2022_v37  ;;  %2371 = vmatprep.mubr.msk.f32.mxu1 %vm308_vm0, %v2019_v34 }
  0x61   : > { %2425 = vmatprep.mubr.msk.f32.mxu0 %vm308_vm0, %v2023_v38 }
  0x63   : > { %2372 = vmatmul.mubr.msk.f32.gmra.mrb[22].mxu1 %vm308_vm0, %v2020_v35 }
  0x64   : > { %2426 = vmatmul.mubr.msk.f32.gmra.mrb[22].mxu0 %vm308_vm0, %v2024_v39  ;;  %2374 = vmatprep.mubr.msk.f32.mxu1 %vm308_vm0, %v2021_v36 }
  0x65   : > { %2428 = vmatprep.mubr.msk.f32.mxu0 %vm308_vm0, %v2025_v40 }
  0x67   : > { %2375 = vmatmul.mubr.msk.f32.gmra.mrb[24].mxu1 %vm308_vm0, %v2022_v37 }
  0x68   : > { %2429 = vmatmul.mubr.msk.f32.gmra.mrb[24].mxu0 %vm308_vm0, %v2026_v41  ;;  %2377 = vmatprep.mubr.msk.f32.mxu1 %vm308_vm0, %v2023_v38 }
  0x69   : > { %2431 = vmatprep.mubr.msk.f32.mxu0 %vm308_vm0, %v2027_v42 }
  0x6b   : > { %2378 = vmatmul.mubr.msk.f32.gmra.mrb[26].mxu1 %vm308_vm0, %v2024_v39 }
  0x6c   : > { %2432 = vmatmul.mubr.msk.f32.gmra.mrb[26].mxu0 %vm308_vm0, %v2028_v43  ;;  %2380 = vmatprep.mubr.msk.f32.mxu1 %vm308_vm0, %v2025_v40 }
  0x6d   : > { %2434 = vmatprep.mubr.msk.f32.mxu0 %vm308_vm0, %v2029_v44 }
  0x6f   : > { %2381 = vmatmul.mubr.msk.f32.gmra.mrb[28].mxu1 %vm308_vm0, %v2026_v41 }
  0x70   : > { %2435 = vmatmul.mubr.msk.f32.gmra.mrb[28].mxu0 %vm308_vm0, %v2030_v45  ;;  %2383 = vmatprep.mubr.msk.f32.mxu1 %vm308_vm0, %v2027_v42 }
  0x71   : > { %2437 = vmatprep.mubr.msk.f32.mxu0 %vm308_vm0, %v2128_v46 }
  0x73   : > { %2384 = vmatmul.mubr.msk.f32.gmra.mrb[30].mxu1 %vm308_vm0, %v2028_v43 }
  0x74   : > { %2438 = vmatmul.mubr.msk.f32.gmra.mrb[30].mxu0 %vm308_vm0, %v2129_v47 }
  0xea   : > { %v2286_v48 = vpop.f32.mrb[0].mxu1 }
  0xeb   : > { %v471_v49 = vpop.f32.mrb[1].mxu1 }
  0xee   : > { %v2289_v50 = vpop.f32.mrb[2].mxu1 }
  0xef   : > { %v481_v51 = vpop.f32.mrb[3].mxu1 }
  0xf2   : > { %v2292_v52 = vpop.f32.mrb[4].mxu1 }
  0xf3   : > { %v491_v53 = vpop.f32.mrb[5].mxu1 }
  0xf6   : > { %v2295_v54 = vpop.f32.mrb[6].mxu1 }
  0xf7   : > { %v501_v55 = vpop.f32.mrb[7].mxu1 }
  0xfa   : > { %v2298_v56 = vpop.f32.mrb[8].mxu1 }
  0xfb   : > { %v511_v57 = vpop.f32.mrb[9].mxu1 }
  0xfe   : > { %v2301_v58 = vpop.f32.mrb[10].mxu1 }
  0xff   : > { %v521_v59 = vpop.f32.mrb[11].mxu1 }
 0x102   : > { %v2798_v60 = vpop.f32.mrb[12].mxu1 }
 0x103   : > { %v2800_v61 = vpop.f32.mrb[13].mxu1 }
 0x106   : > { %v2802_v62 = vpop.f32.mrb[14].mxu1 }
 0x107   : > { %v2804_v63 = vpop.f32.mrb[15].mxu1 }
 0x10b   : > { %v2394_v0 = vpop.f32.mrb[0].mxu0 }
 0x10c   : > { %v2456_v2 = vadd.f32 %v2394_v0, %v2286_v48  ;;  %v1150_v3 = vpop.f32.mrb[1].mxu0 }
 0x10d   : > { %v2457_v4 = vadd.f32 %v1150_v3, %v471_v49 }
 0x10e   : > { %v2813_v5 = vadd.f32 %v2456_v2, %v2809_v1 }
 0x10f   : > { %v2821_v6 = vadd.f32 %v2457_v4, %v2809_v1  ;;  %v2397_v7 = vpop.f32.mrb[2].mxu0 }
 0x110   : > { %v1381_v8 = vmax.f32 %v2813_v5, 0.0  ;;  %v2458_v9 = vadd.f32 %v2397_v7, %v2289_v50  ;;  %v1160_v10 = vpop.f32.mrb[3].mxu0 }
 0x111   : > { %v3613_v11 = vmax.f32 %v2821_v6, 0.0  ;;  %v2459_v12 = vadd.f32 %v1160_v10, %v481_v51 }
 0x112   : > { %1414 = vst.msk [vmem:[%s2818_s29 + $0x8] sm:$0xff] %vm3618_vm1, %v1381_v8  ;;  %v2830_v13 = vadd.f32 %v2458_v9, %v2809_v1 }
 0x113   : > { %1413 = vst.msk [vmem:[%s2818_s29] sm:$0xff] %vm3618_vm1, %v3613_v11  ;;  %v2837_v14 = vadd.f32 %v2459_v12, %v2809_v1  ;;  %v2400_v15 = vpop.f32.mrb[4].mxu0 }
 0x114   : > { %v1383_v16 = vmax.f32 %v2830_v13, 0.0  ;;  %v2460_v17 = vadd.f32 %v2400_v15, %v2292_v52  ;;  %v1170_v18 = vpop.f32.mrb[5].mxu0 }
 0x115   : > { %v1382_v19 = vmax.f32 %v2837_v14, 0.0  ;;  %v2461_v20 = vadd.f32 %v1170_v18, %v491_v53 }
 0x116   : > { %1416 = vst.msk [vmem:[%s2818_s29 + $0x18] sm:$0xff] %vm3618_vm1, %v1383_v16  ;;  %v2846_v21 = vadd.f32 %v2460_v17, %v2809_v1 }
 0x117   : > { %1415 = vst.msk [vmem:[%s2818_s29 + $0x10] sm:$0xff] %vm3618_vm1, %v1382_v19  ;;  %v2853_v22 = vadd.f32 %v2461_v20, %v2809_v1  ;;  %v2403_v23 = vpop.f32.mrb[6].mxu0 }
 0x118   : > { %v1385_v24 = vmax.f32 %v2846_v21, 0.0  ;;  %v2462_v25 = vadd.f32 %v2403_v23, %v2295_v54  ;;  %v1180_v26 = vpop.f32.mrb[7].mxu0 }
 0x119   : > { %v1384_v27 = vmax.f32 %v2853_v22, 0.0  ;;  %v2463_v28 = vadd.f32 %v1180_v26, %v501_v55 }
 0x11a   : > { %1418 = vst.msk [vmem:[%s2818_s29 + $0x28] sm:$0xff] %vm3618_vm1, %v1385_v24  ;;  %v2862_v29 = vadd.f32 %v2462_v25, %v2809_v1 }
 0x11b   : > { %1417 = vst.msk [vmem:[%s2818_s29 + $0x20] sm:$0xff] %vm3618_vm1, %v1384_v27  ;;  %v2869_v30 = vadd.f32 %v2463_v28, %v2809_v1  ;;  %v2406_v31 = vpop.f32.mrb[8].mxu0 }
 0x11c   : > { %v1387_v32 = vmax.f32 %v2862_v29, 0.0  ;;  %v2464_v33 = vadd.f32 %v2406_v31, %v2298_v56  ;;  %v1190_v34 = vpop.f32.mrb[9].mxu0 }
 0x11d   : > { %v1386_v35 = vmax.f32 %v2869_v30, 0.0  ;;  %v2465_v36 = vadd.f32 %v1190_v34, %v511_v57 }
 0x11e   : > { %1420 = vst.msk [vmem:[%s2818_s29 + $0x38] sm:$0xff] %vm3618_vm1, %v1387_v32  ;;  %v2878_v37 = vadd.f32 %v2464_v33, %v2809_v1 }
 0x11f   : > { %1419 = vst.msk [vmem:[%s2818_s29 + $0x30] sm:$0xff] %vm3618_vm1, %v1386_v35  ;;  %v2885_v38 = vadd.f32 %v2465_v36, %v2809_v1  ;;  %v2409_v39 = vpop.f32.mrb[10].mxu0 }
 0x120   : > { %v1389_v40 = vmax.f32 %v2878_v37, 0.0  ;;  %v2466_v41 = vadd.f32 %v2409_v39, %v2301_v58  ;;  %v1200_v42 = vpop.f32.mrb[11].mxu0 }
 0x121   : > { %v1388_v43 = vmax.f32 %v2885_v38, 0.0  ;;  %v2467_v44 = vadd.f32 %v1200_v42, %v521_v59 }
 0x122   : > { %1422 = vst.msk [vmem:[%s2818_s29 + $0x48] sm:$0xff] %vm3618_vm1, %v1389_v40  ;;  %v2894_v45 = vadd.f32 %v2466_v41, %v2809_v1 }
 0x123   : > { %1421 = vst.msk [vmem:[%s2818_s29 + $0x40] sm:$0xff] %vm3618_vm1, %v1388_v43  ;;  %v2901_v46 = vadd.f32 %v2467_v44, %v2809_v1  ;;  %v2412_v47 = vpop.f32.mrb[12].mxu0 }
 0x124   : > { %v1391_v48 = vmax.f32 %v2894_v45, 0.0  ;;  %v2468_v49 = vadd.f32 %v2412_v47, %v2798_v60  ;;  %v1210_v50 = vpop.f32.mrb[13].mxu0 }
 0x125   : > { %v1390_v51 = vmax.f32 %v2901_v46, 0.0  ;;  %v2469_v52 = vadd.f32 %v1210_v50, %v2800_v61 }
 0x126   : > { %1424 = vst.msk [vmem:[%s2818_s29 + $0x58] sm:$0xff] %vm3618_vm1, %v1391_v48  ;;  %v2912_v53 = vadd.f32 %v2468_v49, %v2809_v1 }
 0x127   : > { %1423 = vst.msk [vmem:[%s2818_s29 + $0x50] sm:$0xff] %vm3618_vm1, %v1390_v51  ;;  %v2919_v54 = vadd.f32 %v2469_v52, %v2809_v1  ;;  %v2415_v55 = vpop.f32.mrb[14].mxu0 }
 0x128   : > { %v1393_v56 = vmax.f32 %v2912_v53, 0.0  ;;  %v2470_v57 = vadd.f32 %v2415_v55, %v2802_v62  ;;  %v1220_v58 = vpop.f32.mrb[15].mxu0 }
 0x129   : > { %v1392_v59 = vmax.f32 %v2919_v54, 0.0  ;;  %v2471_v60 = vadd.f32 %v1220_v58, %v2804_v63 }
 0x12a   : > { %1426 = vst.msk [vmem:[%s2818_s29 + $0x68] sm:$0xff] %vm3618_vm1, %v1393_v56  ;;  %v2930_v61 = vadd.f32 %v2470_v57, %v2809_v1  ;;  %v2364_v0 = vpop.f32.mrb[16].mxu1 }
 0x12b   : > { %1425 = vst.msk [vmem:[%s2818_s29 + $0x60] sm:$0xff] %vm3618_vm1, %v1392_v59  ;;  %v2937_v62 = vadd.f32 %v2471_v60, %v2809_v1  ;;  %v2418_v2 = vpop.f32.mrb[16].mxu0  ;;  %v872_v3 = vpop.f32.mrb[17].mxu1 }
 0x12c   : > { %v1395_v63 = vmax.f32 %v2930_v61, 0.0  ;;  %v2472_v4 = vadd.f32 %v2418_v2, %v2364_v0  ;;  %v1230_v7 = vpop.f32.mrb[17].mxu0 }
 0x12d   : > { %v1394_v9 = vmax.f32 %v2937_v62, 0.0  ;;  %v2473_v10 = vadd.f32 %v1230_v7, %v872_v3 }
 0x12e   : > { %1428 = vst.msk [vmem:[%s2818_s29 + $0x78] sm:$0xff] %vm3618_vm1, %v1395_v63  ;;  %v2946_v12 = vadd.f32 %v2472_v4, %v2809_v1  ;;  %v2367_v15 = vpop.f32.mrb[18].mxu1 }
 0x12f   : > { %1427 = vst.msk [vmem:[%s2818_s29 + $0x70] sm:$0xff] %vm3618_vm1, %v1394_v9  ;;  %v2953_v17 = vadd.f32 %v2473_v10, %v2809_v1  ;;  %v2421_v18 = vpop.f32.mrb[18].mxu0  ;;  %v882_v20 = vpop.f32.mrb[19].mxu1 }
 0x130   : > { %v1397_v23 = vmax.f32 %v2946_v12, 0.0  ;;  %v2474_v25 = vadd.f32 %v2421_v18, %v2367_v15  ;;  %v1240_v26 = vpop.f32.mrb[19].mxu0 }
 0x131   : > { %v1396_v28 = vmax.f32 %v2953_v17, 0.0  ;;  %v2475_v31 = vadd.f32 %v1240_v26, %v882_v20 }
 0x132   : > { %1430 = vst.msk [vmem:[%s2818_s29 + $0x88] sm:$0xff] %vm3618_vm1, %v1397_v23  ;;  %v2962_v33 = vadd.f32 %v2474_v25, %v2809_v1  ;;  %v2370_v34 = vpop.f32.mrb[20].mxu1 }
 0x133   : > { %1429 = vst.msk [vmem:[%s2818_s29 + $0x80] sm:$0xff] %vm3618_vm1, %v1396_v28  ;;  %v2969_v36 = vadd.f32 %v2475_v31, %v2809_v1  ;;  %v2424_v39 = vpop.f32.mrb[20].mxu0  ;;  %v892_v41 = vpop.f32.mrb[21].mxu1 }
 0x134   : > { %v1399_v42 = vmax.f32 %v2962_v33, 0.0  ;;  %v2476_v44 = vadd.f32 %v2424_v39, %v2370_v34  ;;  %v1250_v47 = vpop.f32.mrb[21].mxu0 }
 0x135   : > { %v1398_v49 = vmax.f32 %v2969_v36, 0.0  ;;  %v2477_v50 = vadd.f32 %v1250_v47, %v892_v41 }
 0x136   : > { %1432 = vst.msk [vmem:[%s2818_s29 + $0x98] sm:$0xff] %vm3618_vm1, %v1399_v42  ;;  %v2978_v52 = vadd.f32 %v2476_v44, %v2809_v1  ;;  %v2373_v55 = vpop.f32.mrb[22].mxu1 }
 0x137   : > { %1431 = vst.msk [vmem:[%s2818_s29 + $0x90] sm:$0xff] %vm3618_vm1, %v1398_v49  ;;  %v2985_v57 = vadd.f32 %v2477_v50, %v2809_v1  ;;  %v2427_v58 = vpop.f32.mrb[22].mxu0  ;;  %v902_v60 = vpop.f32.mrb[23].mxu1 }
 0x138   : > { %v3617_v0 = vmax.f32 %v2978_v52, 0.0  ;;  %v2478_v2 = vadd.f32 %v2427_v58, %v2373_v55  ;;  %v1260_v3 = vpop.f32.mrb[23].mxu0 }
 0x139   : > { %v1400_v4 = vmax.f32 %v2985_v57, 0.0  ;;  %v2479_v7 = vadd.f32 %v1260_v3, %v902_v60 }
 0x13a   : > { %1434 = vst.msk [vmem:[%s2818_s29 + $0xa8] sm:$0xff] %vm3618_vm1, %v3617_v0  ;;  %v2994_v10 = vadd.f32 %v2478_v2, %v2809_v1  ;;  %v2376_v15 = vpop.f32.mrb[24].mxu1 }
 0x13b   : > { %1433 = vst.msk [vmem:[%s2818_s29 + $0xa0] sm:$0xff] %vm3618_vm1, %v1400_v4  ;;  %v3001_v18 = vadd.f32 %v2479_v7, %v2809_v1  ;;  %v2430_v20 = vpop.f32.mrb[24].mxu0  ;;  %v912_v25 = vpop.f32.mrb[25].mxu1 }
 0x13c   : > { %v3615_v26 = vmax.f32 %v2994_v10, 0.0  ;;  %v2480_v31 = vadd.f32 %v2430_v20, %v2376_v15  ;;  %v1270_v34 = vpop.f32.mrb[25].mxu0 }
 0x13d   : > { %v3616_v39 = vmax.f32 %v3001_v18, 0.0  ;;  %v2481_v41 = vadd.f32 %v1270_v34, %v912_v25 }
 0x13e   : > { %1436 = vst.msk [vmem:[%s2818_s29 + $0xb8] sm:$0xff] %vm3618_vm1, %v3615_v26  ;;  %v3010_v44 = vadd.f32 %v2480_v31, %v2809_v1  ;;  %v2379_v47 = vpop.f32.mrb[26].mxu1 }
 0x13f   : > { %1435 = vst.msk [vmem:[%s2818_s29 + $0xb0] sm:$0xff] %vm3618_vm1, %v3616_v39  ;;  %v3017_v50 = vadd.f32 %v2481_v41, %v2809_v1  ;;  %v2433_v55 = vpop.f32.mrb[26].mxu0  ;;  %v922_v58 = vpop.f32.mrb[27].mxu1 }
 0x140   : > { %v3614_v60 = vmax.f32 %v3010_v44, 0.0  ;;  %v2482_v2 = vadd.f32 %v2433_v55, %v2379_v47  ;;  %v1280_v3 = vpop.f32.mrb[27].mxu0 }
 0x141   : > { %v1404_v7 = vmax.f32 %v3017_v50, 0.0  ;;  %v2483_v15 = vadd.f32 %v1280_v3, %v922_v58 }
 0x142   : > { %1438 = vst.msk [vmem:[%s2818_s29 + $0xc8] sm:$0xff] %vm3618_vm1, %v3614_v60  ;;  %v1375_v20 = vadd.f32 %v2482_v2, %v2809_v1  ;;  %v2382_v25 = vpop.f32.mrb[28].mxu1 }
 0x143   : > { %1437 = vst.msk [vmem:[%s2818_s29 + $0xc0] sm:$0xff] %vm3618_vm1, %v1404_v7  ;;  %v1374_v31 = vadd.f32 %v2483_v15, %v2809_v1  ;;  %v2436_v34 = vpop.f32.mrb[28].mxu0  ;;  %v932_v41 = vpop.f32.mrb[29].mxu1 }
 0x144   : > { %v1407_v47 = vmax.f32 %v1375_v20, 0.0  ;;  %v2484_v55 = vadd.f32 %v2436_v34, %v2382_v25  ;;  %v1290_v11 = vpop.f32.mrb[29].mxu0 }
 0x145   : > { %v1406_v50 = vmax.f32 %v1374_v31, 0.0  ;;  %v2485_v58 = vadd.f32 %v1290_v11, %v932_v41 }
 0x146   : > { %1440 = vst.msk [vmem:[%s2818_s29 + $0xd8] sm:$0xff] %vm3618_vm1, %v1407_v47  ;;  %v1377_v3 = vadd.f32 %v2484_v55, %v2809_v1  ;;  %v2385_v60 = vpop.f32.mrb[30].mxu1 }
 0x147   : > { %1439 = vst.msk [vmem:[%s2818_s29 + $0xd0] sm:$0xff] %vm3618_vm1, %v1406_v50  ;;  %v1376_v2 = vadd.f32 %v2485_v58, %v2809_v1  ;;  %v2439_v15 = vpop.f32.mrb[30].mxu0  ;;  %v942_v26 = vpop.f32.mrb[31].mxu1 }
 0x148   : > { %v1409_v20 = vmax.f32 %v1377_v3, 0.0  ;;  %v2486_v25 = vadd.f32 %v2439_v15, %v2385_v60  ;;  %v1300_v34 = vpop.f32.mrb[31].mxu0  ;;  %v2579_v60 = vmov (!%p2166_p4), 0  }
 0x149   : > { %v1408_v39 = vmax.f32 %v1376_v2, 0.0  ;;  %v2487_v31 = vadd.f32 %v1300_v34, %v942_v26  ;;  %1448 = sbr.rel (%p2166_p4) target bundleno = 336 (0x150), region = 36  ;;  %1449 = vst [vmem:[#allocation2] sm:$0x1] (!%p2166_p4), %v2579_v60 }
 0x14a   : > { %1442 = vst.msk [vmem:[%s2818_s29 + $0xe8] sm:$0xff] %vm3618_vm1, %v1409_v20  ;;  %v1379_v11 = vadd.f32 %v2486_v25, %v2809_v1 }
 0x14b   : > { %1441 = vst.msk [vmem:[%s2818_s29 + $0xe0] sm:$0xff] %vm3618_vm1, %v1408_v39  ;;  %v1378_v41 = vadd.f32 %v2487_v31, %v2809_v1 }
 0x14c   : > { %v1411_v55 = vmax.f32 %v1379_v11, 0.0 }
 0x14d   : > { %v1410_v0 = vmax.f32 %v1378_v41, 0.0 }
 0x14e   : > { %1444 = vst.msk [vmem:[%s2818_s29 + $0xf8] sm:$0xff] %vm3618_vm1, %v1411_v55 }
 0x14f   : > { %1443 = vst.msk [vmem:[%s2818_s29 + $0xf0] sm:$0xff] %vm3618_vm1, %v1410_v0 }
 0x150 PF: > { %vm3048_vm2 = vcmp.eq.f32.partialorder %v1381_v8, 0.0  ;;  %vm3054_vm3 = vcmp.eq.f32.partialorder %v1382_v19, 0.0  ;;  %vm3060_vm4 = vcmp.eq.f32.partialorder %v1383_v16, 0.0  ;;  %vm3066_vm5 = vcmp.eq.f32.partialorder %v1384_v27, 0.0  ;;  %s2582_s6 = smov [#allocation2]   ;;  %p2527_p5 = scmp.eq.s32.totalorder %s2619_s19, 1 }
 0x151   : > { %v3670_v5 = vmov 0  ;;  %vm3072_vm6 = vcmp.eq.f32.partialorder %v1385_v24, 0.0  ;;  %v3672_v8 = vmov 0  ;;  %vm3078_vm7 = vcmp.eq.f32.partialorder %v1386_v35, 0.0  ;;  %s1900_s7 = sshll.u32 %s2582_s6, 4  ;;  %s1901_s7 = int_to_ptr.vmem [resolvable:$true] %s1900_s7 }
 0x152   : > { %v3671_v5 = vsel %vm3066_vm5, 4294967295, %v3670_v5  ;;  %v3673_v8 = vsel %vm3072_vm6, 4294967295, %v3672_v8  ;;  %v3674_v13 = vmov 0  ;;  %vm3084_vm8 = vcmp.eq.f32.partialorder %v1387_v32, 0.0  ;;  %s2541_s8 = scalar_lea.vmem %s1901_s7, 16  ;;  %s2547_s9 = scalar_lea.vmem %s1901_s7, 32 }
 0x153   : > { %v3675_v13 = vsel %vm3078_vm7, 4294967295, %v3674_v13  ;;  %v3676_v14 = vmov 0  ;;  %vm3090_vm9 = vcmp.eq.f32.partialorder %v1388_v43, 0.0  ;;  %v3678_v16 = vmov 0  ;;  %p2542_p6 = scmp.ne.s32.totalorder %s1901_s7, %s2541_s8  ;;  %p2548_p9 = scmp.lt.s32.totalorder %s1901_s7, %s1901_s7 }
 0x154   : > { %v3677_v14 = vsel %vm3084_vm8, 4294967295, %v3676_v14  ;;  %v3679_v16 = vsel %vm3090_vm9, 4294967295, %v3678_v16  ;;  %vm3096_vm10 = vcmp.eq.f32.partialorder %v1389_v40, 0.0  ;;  %v3680_v19 = vmov 0  ;;  %p2549_p10 = scmp.lt.s32.totalorder %s2547_s9, %s2541_s8 }
 0x155   : > { %v3681_v19 = vsel %vm3096_vm10, 4294967295, %v3680_v19  ;;  %vm3102_vm11 = vcmp.eq.f32.partialorder %v1390_v51, 0.0  ;;  %v3682_v21 = vmov 0  ;;  %vm3108_vm12 = vcmp.eq.f32.partialorder %v1391_v48, 0.0  ;;  %p2543_p7 = pnand %p2542_p6, %p2527_p5 }
 0x156   : > { %v3683_v21 = vsel %vm3102_vm11, 4294967295, %v3682_v21  ;;  %v3684_v22 = vmov 0  ;;  %vm3114_vm13 = vcmp.eq.f32.partialorder %v1392_v59, 0.0  ;;  %v3686_v24 = vmov 0  ;;  %p2550_p11 = por %p2549_p10, %p2548_p9 }
 0x157   : > { %v3685_v22 = vsel %vm3108_vm12, 4294967295, %v3684_v22  ;;  %v3687_v24 = vsel %vm3114_vm13, 4294967295, %v3686_v24  ;;  %vm3120_vm14 = vcmp.eq.f32.partialorder %v1393_v56, 0.0  ;;  %v3688_v27 = vmov 0  ;;  %p2544_p8 = pneg %p2543_p7 }
 0x158   : > { %v3689_v27 = vsel %vm3120_vm14, 4294967295, %v3688_v27  ;;  %vm3126_vm15 = vcmp.eq.f32.partialorder %v1394_v9, 0.0  ;;  %v3690_v29 = vmov 0  ;;  %vm3132_vm0 = vcmp.eq.f32.partialorder %v1395_v63, 0.0 }
 0x159   : > { %v3691_v29 = vsel %vm3126_vm15, 4294967295, %v3690_v29  ;;  %v3692_v30 = vmov 0  ;;  %vm3138_vm1 = vcmp.eq.f32.partialorder %v1396_v28, 0.0  ;;  %v3695_v32 = vmov 0  ;;  %p2551_p12 = pnand %p2550_p11, %p2544_p8 }
 0x15a   : > { %v3693_v30 = vsel %vm3132_vm0, 4294967295, %v3692_v30  ;;  %v3696_v32 = vsel %vm3138_vm1, 4294967295, %v3695_v32  ;;  %vm3144_vm14 = vcmp.eq.f32.partialorder %v1397_v23, 0.0  ;;  %v3698_v35 = vmov 0 }
 0x15b   : > { %3694 = vst [vmem:[#allocation5_spill] sm:$0xff] %v3693_v30  ;;  %3697 = vst [vmem:[#allocation6_spill] sm:$0xff] %v3696_v32  ;;  %v3699_v35 = vsel %vm3144_vm14, 4294967295, %v3698_v35  ;;  %vm3150_vm15 = vcmp.eq.f32.partialorder %v1398_v49, 0.0  ;;  %v3701_v37 = vmov 0  ;;  %vm3156_vm0 = vcmp.eq.f32.partialorder %v1399_v42, 0.0 }
 0x15c   : > { %3700 = vst [vmem:[#allocation7_spill] sm:$0xff] %v3699_v35  ;;  %v3702_v37 = vsel %vm3150_vm15, 4294967295, %v3701_v37  ;;  %v3704_v38 = vmov 0  ;;  %vm3162_vm1 = vcmp.eq.f32.partialorder %v1400_v4, 0.0  ;;  %v3707_v40 = vmov 0 }
 0x15d   : > { %3703 = vst [vmem:[#allocation8_spill] sm:$0xff] %v3702_v37  ;;  %v3705_v38 = vsel %vm3156_vm0, 4294967295, %v3704_v38  ;;  %v3708_v40 = vsel %vm3162_vm1, 4294967295, %v3707_v40  ;;  %v3710_v43 = vmax.f32 %v2978_v52, 0.0  ;;  %v3711_v45 = vmov 0 }
 0x15e   : > { %3706 = vst [vmem:[#allocation9_spill] sm:$0xff] %v3705_v38  ;;  %3709 = vst [vmem:[#allocation10_spill] sm:$0xff] %v3708_v40  ;;  %v3714_v46 = vmax.f32 %v3001_v18, 0.0  ;;  %v3715_v48 = vmov 0  ;;  %v3718_v51 = vmax.f32 %v2994_v10, 0.0  ;;  %v3719_v53 = vmov 0 }
 0x15f   : > { %vm3168_vm14 = vcmp.eq.f32.partialorder %v3710_v43, 0.0  ;;  %vm3184_vm13 = vcmp.eq.f32.partialorder %v1404_v7, 0.0  ;;  %v3722_v54 = vmov 0  ;;  %v3725_v56 = vmax.f32 %v3010_v44, 0.0 }
 0x160   : > { %v3712_v45 = vsel %vm3168_vm14, 4294967295, %v3711_v45  ;;  %vm3174_vm15 = vcmp.eq.f32.partialorder %v3714_v46, 0.0  ;;  %vm3180_vm0 = vcmp.eq.f32.partialorder %v3718_v51, 0.0  ;;  %v3723_v54 = vsel %vm3184_vm13, 4294967295, %v3722_v54 }
 0x161   : > { %3713 = vst [vmem:[#allocation11_spill] sm:$0xff] %v3712_v45  ;;  %v3716_v48 = vsel %vm3174_vm15, 4294967295, %v3715_v48  ;;  %v3720_v53 = vsel %vm3180_vm0, 4294967295, %v3719_v53  ;;  %3724 = vst [vmem:[#allocation14_spill] sm:$0xff] %v3723_v54  ;;  %vm3190_vm1 = vcmp.eq.f32.partialorder %v3725_v56, 0.0  ;;  %v3726_v59 = vmov 0 }
 0x162   : > { %3717 = vst [vmem:[#allocation12_spill] sm:$0xff] %v3716_v48  ;;  %3721 = vst [vmem:[#allocation13_spill] sm:$0xff] %v3720_v53  ;;  %v3727_v59 = vsel %vm3190_vm1, 4294967295, %v3726_v59  ;;  %vm3194_vm14 = vcmp.eq.f32.partialorder %v1406_v50, 0.0  ;;  %v3729_v61 = vmov 0  ;;  %vm3198_vm15 = vcmp.eq.f32.partialorder %v1407_v47, 0.0 }
 0x163   : > { %3728 = vst [vmem:[#allocation15_spill] sm:$0xff] %v3727_v59  ;;  %v3730_v61 = vsel %vm3194_vm14, 4294967295, %v3729_v61  ;;  %v3732_v62 = vmov 0  ;;  %vm3202_vm12 = vcmp.eq.f32.partialorder %v1408_v39, 0.0  ;;  %v3735_v63 = vmov 0 }
 0x164   : > { %3731 = vst [vmem:[#allocation16_spill] sm:$0xff] %v3730_v61  ;;  %v3733_v62 = vsel %vm3198_vm15, 4294967295, %v3732_v62  ;;  %v3736_v63 = vsel %vm3202_vm12, 4294967295, %v3735_v63  ;;  %vm3206_vm0 = vcmp.eq.f32.partialorder %v1409_v20, 0.0  ;;  %v3738_v9 = vmov 0 }
 0x165   : > { %3734 = vst [vmem:[#allocation17_spill] sm:$0xff] %v3733_v62  ;;  %3737 = vst [vmem:[#allocation18_spill] sm:$0xff] %v3736_v63  ;;  %v3739_v9 = vsel %vm3206_vm0, 4294967295, %v3738_v9  ;;  %vm3210_vm13 = vcmp.eq.f32.partialorder %v1410_v0, 0.0  ;;  %v3741_v12 = vmov 0  ;;  %vm3214_vm1 = vcmp.eq.f32.partialorder %v1411_v55, 0.0 }
 0x166   : > { %3740 = vst [vmem:[#allocation19_spill] sm:$0xff] %v3739_v9  ;;  %v3742_v12 = vsel %vm3210_vm13, 4294967295, %v3741_v12  ;;  %v3744_v17 = vmov 0  ;;  %v3657_v23 = vmov 0.0   ;;  %v3758_v20 = vmax.f32 %v2821_v6, 0.0 }
 0x167   : > { %3743 = vst [vmem:[#allocation20_spill] sm:$0xff] %v3742_v12  ;;  %v3745_v17 = vsel %vm3214_vm1, 4294967295, %v3744_v17  ;;  %v3221_v28 = vsel %vm3048_vm2, 1.0, %v3657_v23  ;;  %v3226_v33 = vsel %vm3054_vm3, 1.0, %v3657_v23  ;;  %v3231_v36 = vsel %vm3060_vm4, 1.0, %v3657_v23 }
 0x168   : > { %3746 = vst [vmem:[#allocation21_spill] sm:$0xff] %v3745_v17  ;;  %3747 = vst [vmem:[#allocation22_spill] sm:$0xff] %v3221_v28  ;;  %v1486_v42 = vsel %vm3066_vm5, 1.0, %v3657_v23  ;;  %v1487_v49 = vsel %vm3072_vm6, 1.0, %v3657_v23  ;;  %v1488_v52 = vsel %vm3078_vm7, 1.0, %v3657_v23  ;;  %v1489_v57 = vsel %vm3084_vm8, 1.0, %v3657_v23 }
 0x169   : > { %3748 = vst [vmem:[#allocation23_spill] sm:$0xff] %v3226_v33  ;;  %v1490_v0 = vsel %vm3090_vm9, 1.0, %v3657_v23  ;;  %v1491_v4 = vsel %vm3096_vm10, 1.0, %v3657_v23  ;;  %v1492_v10 = vsel %vm3102_vm11, 1.0, %v3657_v23  ;;  %vm3749_vm6 = vnez %v3685_v22 }
 0x16a   : > { %v1493_v18 = vsel %vm3749_vm6, 1.0, %v3657_v23  ;;  %vm3750_vm7 = vnez %v3687_v24  ;;  %vm3751_vm8 = vnez %v3689_v27  ;;  %vm3752_vm9 = vnez %v3691_v29 }
 0x16b   : > { %v1494_v39 = vsel %vm3750_vm7, 1.0, %v3657_v23  ;;  %v1495_v44 = vsel %vm3751_vm8, 1.0, %v3657_v23  ;;  %v1496_v7 = vsel %vm3752_vm9, 1.0, %v3657_v23  ;;  %vm3753_vm10 = vnez %v3693_v30 }
 0x16c   : > { %v1497_v47 = vsel %vm3753_vm10, 1.0, %v3657_v23  ;;  %vm3754_vm11 = vnez %v3696_v32  ;;  %vm3755_vm6 = vnez %v3699_v35  ;;  %vm3756_vm7 = vnez %v3702_v37 }
 0x16d   : > { %v1498_v50 = vsel %vm3754_vm11, 1.0, %v3657_v23  ;;  %v1499_v3 = vsel %vm3755_vm6, 1.0, %v3657_v23  ;;  %v1500_v2 = vsel %vm3756_vm7, 1.0, %v3657_v23  ;;  %vm3757_vm8 = vnez %v3705_v38 }
 0x16e   : > { %v1501_v15 = vsel %vm3757_vm8, 1.0, %v3657_v23  ;;  %vm3283_vm9 = vcmp.eq.f32.partialorder %v3758_v20, 0.0  ;;  %v3759_v25 = vmov 0  ;;  %vm3761_vm11 = vnez %v3708_v40 }
 0x16f   : > { %v3760_v25 = vsel %vm3283_vm9, 4294967295, %v3759_v25  ;;  %v1502_v34 = vsel %vm3761_vm11, 1.0, %v3657_v23  ;;  %vm3762_vm6 = vnez %v3712_v45  ;;  %vm3763_vm7 = vnez %v3716_v48 }
 0x170   : > { %v1503_v31 = vsel %vm3762_vm6, 1.0, %v3657_v23  ;;  %v1504_v11 = vsel %vm3763_vm7, 1.0, %v3657_v23  ;;  %vm3764_vm8 = vnez %v3720_v53  ;;  %vm3765_vm10 = vnez %v3723_v54 }
 0x171   : > { %v1505_v6 = vsel %vm3764_vm8, 1.0, %v3657_v23  ;;  %v1506_v41 = vsel %vm3765_vm10, 1.0, %v3657_v23  ;;  %vm3766_vm5 = vnez %v3727_v59  ;;  %v1508_v60 = vsel %vm3194_vm14, 1.0, %v3657_v23 }
 0x172   : > { %v1507_v55 = vsel %vm3766_vm5, 1.0, %v3657_v23  ;;  %v1509_v43 = vsel %vm3198_vm15, 1.0, %v3657_v23  ;;  %v1510_v46 = vsel %vm3202_vm12, 1.0, %v3657_v23  ;;  %v1511_v51 = vsel %vm3206_vm0, 1.0, %v3657_v23 }
 0x173   : > { %v1512_v56 = vsel %vm3210_vm13, 1.0, %v3657_v23  ;;  %v1513_v20 = vsel %vm3214_vm1, 1.0, %v3657_v23  ;;  %v1518_v63 = vtrunc.f32 %v1486_v42  ;;  %v1519_v54 = vtrunc.f32 %v1487_v49 }
 0x174   : > { %v1520_v53 = vtrunc.f32 %v1488_v52  ;;  %v1521_v48 = vtrunc.f32 %v1489_v57  ;;  %v1522_v9 = vtrunc.f32 %v1490_v0  ;;  %v1523_v45 = vtrunc.f32 %v1491_v4 }
 0x175   : > { %v1524_v40 = vtrunc.f32 %v1492_v10  ;;  %v1525_v38 = vtrunc.f32 %v1493_v18  ;;  %v1526_v12 = vtrunc.f32 %v1494_v39  ;;  %v1527_v37 = vtrunc.f32 %v1495_v44 }
 0x176   : > { %v1528_v35 = vtrunc.f32 %v1496_v7  ;;  %v1529_v32 = vtrunc.f32 %v1497_v47  ;;  %v1530_v17 = vtrunc.f32 %v1498_v50  ;;  %v1531_v23 = vtrunc.f32 %v1499_v3 }
 0x177   : > { %v1532_v30 = vtrunc.f32 %v1500_v2  ;;  %v1533_v61 = vtrunc.f32 %v1501_v15  ;;  %v1534_v28 = vtrunc.f32 %v1502_v34  ;;  %v1535_v62 = vtrunc.f32 %v1503_v31 }
 0x178   : > { %v1536_v33 = vtrunc.f32 %v1504_v11  ;;  %v1537_v59 = vtrunc.f32 %v1505_v6  ;;  %v1538_v42 = vtrunc.f32 %v1506_v41  ;;  %v1539_v49 = vtrunc.f32 %v1507_v55 }
 0x179   : > { %v1540_v52 = vtrunc.f32 %v1508_v60  ;;  %v1541_v57 = vtrunc.f32 %v1509_v43  ;;  %v1542_v0 = vtrunc.f32 %v1510_v46  ;;  %v1543_v4 = vtrunc.f32 %v1511_v51 }
 0x17a   : > { %v1544_v10 = vtrunc.f32 %v1512_v56  ;;  %v1545_v18 = vtrunc.f32 %v1513_v20  ;;  %v1556_v39 = vpack.c.f32.eXmY %v1518_v63, %v1519_v54, 312  ;;  %v1560_v44 = vpack.c.f32.eXmY %v1520_v53, %v1521_v48, 312 }
 0x17b   : > { %v1566_v7 = vpack.c.f32.eXmY %v1522_v9, %v1523_v45, 312  ;;  %v2581_v47 = vmov 0   ;;  %v1570_v2 = vpack.c.f32.eXmY %v1524_v40, %v1525_v38, 312  ;;  %vm3772_vm1 = vnez %v3681_v19 }
 0x17c   : > { %v3329_v50 = vsel %vm3283_vm9, 1, %v2581_v47  ;;  %v3334_v3 = vsel %vm3048_vm2, 1, %v2581_v47  ;;  %v1576_v15 = vpack.c.f32.eXmY %v1526_v12, %v1527_v37, 312  ;;  %v3339_v34 = vsel %vm3054_vm3, 1, %v2581_v47 }
 0x17d   : > { %v3344_v45 = vsel %vm3060_vm4, 1, %v2581_v47  ;;  %v1564_v48 = vpack.c.b8 %v1560_v44, %v1556_v39  ;;  %v1580_v53 = vpack.c.f32.eXmY %v1528_v35, %v1529_v32, 312  ;;  %v1586_v54 = vpack.c.f32.eXmY %v1530_v17, %v1531_v23, 312 }
 0x17e   : > { %vm3767_vm9 = vnez %v3671_v5  ;;  %v1574_v38 = vpack.c.b8 %v1570_v2, %v1566_v7  ;;  %v1590_v37 = vpack.c.f32.eXmY %v1532_v30, %v1533_v61, 312  ;;  %v1596_v40 = vpack.c.f32.eXmY %v1534_v28, %v1535_v62, 312 }
 0x17f   : > { %v3349_v26 = vsel %vm3767_vm9, 1, %v2581_v47  ;;  %vm3768_vm2 = vnez %v3673_v8  ;;  %v1584_v63 = vpack.c.b8 %v1580_v53, %v1576_v15  ;;  %v1600_v58 = vpack.c.f32.eXmY %v1536_v33, %v1537_v59, 312 }
 0x180   : > { %v3354_v1 = vsel %vm3768_vm2, 1, %v2581_v47  ;;  %v1606_v9 = vpack.c.f32.eXmY %v1538_v42, %v1539_v49, 312  ;;  %v1630_v12 = vunpack.c.0.s8 %v1564_v48  ;;  %v3356_v31 = vpack.c.b8 %v1590_v37, %v1586_v54 }
 0x181   : > { %v1610_v32 = vpack.c.f32.eXmY %v1540_v52, %v1541_v57, 312  ;;  %v1616_v35 = vpack.c.f32.eXmY %v1542_v0, %v1543_v4, 312  ;;  %v1631_v17 = vunpack.c.1.s8 %v1564_v48  ;;  %v3358_v5 = vpack.c.b8 %v1600_v58, %v1596_v40 }
 0x182   : > { %v1620_v23 = vpack.c.f32.eXmY %v1544_v10, %v1545_v18, 312  ;;  %v1632_v11 = vunpack.c.2.s8 %v1564_v48  ;;  %v1633_v30 = vunpack.c.3.s8 %v1564_v48  ;;  %vm1722_vm3 = vcmask 58368  }
 0x183   : > { %v3360_v61 = vpack.c.b8 %v1610_v32, %v1606_v9  ;;  %v1634_v8 = vunpack.c.0.s8 %v1574_v38  ;;  %v1635_v62 = vunpack.c.1.s8 %v1574_v38  ;;  %v1636_v28 = vunpack.c.2.s8 %v1574_v38 }
 0x184   : > { %v3362_v6 = vpack.c.b8 %v1620_v23, %v1616_v35  ;;  %v1637_v59 = vunpack.c.3.s8 %v1574_v38  ;;  %v1638_v33 = vunpack.c.0.s8 %v1584_v63  ;;  %v1639_v41 = vunpack.c.1.s8 %v1584_v63 }
 0x185   : > { %v1640_v55 = vunpack.c.2.s8 %v1584_v63  ;;  %v1641_v60 = vunpack.c.3.s8 %v1584_v63  ;;  %v1642_v43 = vunpack.c.0.s8 %v3356_v31  ;;  %v1643_v46 = vunpack.c.1.s8 %v3356_v31 }
 0x186   : > { %v1644_v51 = vunpack.c.2.s8 %v3356_v31  ;;  %v1645_v56 = vunpack.c.3.s8 %v3356_v31  ;;  %v1646_v20 = vunpack.c.0.s8 %v3358_v5  ;;  %v1647_v42 = vunpack.c.1.s8 %v3358_v5 }
 0x187   : > { %v1648_v49 = vunpack.c.2.s8 %v3358_v5  ;;  %v1649_v52 = vunpack.c.3.s8 %v3358_v5  ;;  %v1650_v57 = vunpack.c.0.s8 %v3360_v61  ;;  %v1651_v0 = vunpack.c.1.s8 %v3360_v61 }
 0x188   : > { %v1652_v4 = vunpack.c.2.s8 %v3360_v61  ;;  %v1653_v10 = vunpack.c.3.s8 %v3360_v61  ;;  %v1654_v18 = vunpack.c.0.s8 %v3362_v6  ;;  %v1655_v39 = vunpack.c.1.s8 %v3362_v6 }
 0x189   : > { %v1656_v44 = vunpack.c.2.s8 %v3362_v6  ;;  %v1657_v7 = vunpack.c.3.s8 %v3362_v6  ;;  %v1666_v2 = vpack.c.b16 %v1630_v12, %v1630_v12  ;;  %v1668_v15 = vpack.c.b16 %v1631_v17, %v1631_v17 }
 0x18a   : > { %v1670_v48 = vpack.c.b16 %v1632_v11, %v1632_v11  ;;  %v1672_v53 = vpack.c.b16 %v1633_v30, %v1633_v30  ;;  %v1674_v54 = vpack.c.b16 %v1634_v8, %v1634_v8  ;;  %v1676_v38 = vpack.c.b16 %v1635_v62, %v1635_v62 }
 0x18b   : > { %v1667_v37 = vpack.c.b8 %v1666_v2, %v1666_v2  ;;  %v1669_v40 = vpack.c.b8 %v1668_v15, %v1668_v15  ;;  %v1678_v63 = vpack.c.b16 %v1636_v28, %v1636_v28  ;;  %v1680_v58 = vpack.c.b16 %v1637_v59, %v1637_v59 }
 0x18c   : > { %v1671_v9 = vpack.c.b8 %v1670_v48, %v1670_v48  ;;  %v1673_v31 = vpack.c.b8 %v1672_v53, %v1672_v53  ;;  %v1675_v32 = vpack.c.b8 %v1674_v54, %v1674_v54  ;;  %v1677_v35 = vpack.c.b8 %v1676_v38, %v1676_v38 }
 0x18d   : > { %v1679_v12 = vpack.c.b8 %v1678_v63, %v1678_v63  ;;  %v1681_v17 = vpack.c.b8 %v1680_v58, %v1680_v58  ;;  %v1682_v5 = vpack.c.b16 %v1638_v33, %v1638_v33  ;;  %v1684_v23 = vpack.c.b16 %v1639_v41, %v1639_v41  ;;  %1727 = vst.msk [vmem:[%s2656_s16 + $0x8] sm:$0x3] %vm1722_vm3, %v1667_v37 }
 0x18e   : > { %1728 = vst.msk [vmem:[%s2656_s16 + $0xa] sm:$0x3] %vm1722_vm3, %v1669_v40  ;;  %v1686_v11 = vpack.c.b16 %v1640_v55, %v1640_v55  ;;  %v1688_v30 = vpack.c.b16 %v1641_v60, %v1641_v60  ;;  %v1690_v61 = vpack.c.b16 %v1642_v43, %v1642_v43  ;;  %v1692_v8 = vpack.c.b16 %v1643_v46, %v1643_v46 }
 0x18f   : > { %1729 = vst.msk [vmem:[%s2656_s16 + $0xc] sm:$0x3] %vm1722_vm3, %v1671_v9  ;;  %1730 = vst.msk [vmem:[%s2656_s16 + $0xe] sm:$0x3] %vm1722_vm3, %v1673_v31  ;;  %v1683_v62 = vpack.c.b8 %v1682_v5, %v1682_v5  ;;  %v1685_v28 = vpack.c.b8 %v1684_v23, %v1684_v23  ;;  %v1694_v59 = vpack.c.b16 %v1644_v51, %v1644_v51  ;;  %vm3769_vm4 = vnez %v3675_v13  ;;  %v3782_v5 = vld [vmem:[#allocation7_spill] sm:$0xff]  ;;  %v3784_v23 = vld [vmem:[#allocation8_spill] sm:$0xff] }
 0x190   : > { %1731 = vst.msk [vmem:[%s2656_s16 + $0x10] sm:$0x3] %vm1722_vm3, %v1675_v32  ;;  %1732 = vst.msk [vmem:[%s2656_s16 + $0x12] sm:$0x3] %vm1722_vm3, %v1677_v35  ;;  %v1696_v33 = vpack.c.b16 %v1645_v56, %v1645_v56  ;;  %v1687_v41 = vpack.c.b8 %v1686_v11, %v1686_v11  ;;  %v1689_v55 = vpack.c.b8 %v1688_v30, %v1688_v30  ;;  %vm3770_vm9 = vnez %v3677_v14  ;;  %v3786_v11 = vld [vmem:[#allocation9_spill] sm:$0xff] }
 0x191   : > { %1733 = vst.msk [vmem:[%s2656_s16 + $0x14] sm:$0x3] %vm1722_vm3, %v1679_v12  ;;  %1734 = vst.msk [vmem:[%s2656_s16 + $0x16] sm:$0x3] %vm1722_vm3, %v1681_v17  ;;  %v1691_v60 = vpack.c.b8 %v1690_v61, %v1690_v61  ;;  %v1693_v43 = vpack.c.b8 %v1692_v8, %v1692_v8  ;;  %v1695_v46 = vpack.c.b8 %v1694_v59, %v1694_v59  ;;  %v1762_v6 = vsel %vm3770_vm9, 1, %v2581_v47  ;;  %v3778_v12 = vld [vmem:[#allocation5_spill] sm:$0xff] }
 0x192   : > { %v1697_v2 = vpack.c.b8 %v1696_v33, %v1696_v33  ;;  %v1698_v15 = vpack.c.b16 %v1646_v20, %v1646_v20  ;;  %v1700_v48 = vpack.c.b16 %v1647_v42, %v1647_v42  ;;  %1735 = vst.msk [vmem:[%s2656_s16 + $0x18] sm:$0x3] %vm1722_vm3, %v1683_v62  ;;  %1736 = vst.msk [vmem:[%s2656_s16 + $0x1a] sm:$0x3] %vm1722_vm3, %v1685_v28  ;;  %vm3771_vm2 = vnez %v3679_v16  ;;  %v3780_v17 = vld [vmem:[#allocation6_spill] sm:$0xff] }
 0x193   : > { %v1702_v51 = vpack.c.b16 %v1648_v49, %v1648_v49  ;;  %v1704_v56 = vpack.c.b16 %v1649_v52, %v1649_v52  ;;  %v1706_v53 = vpack.c.b16 %v1650_v57, %v1650_v57  ;;  %v1708_v54 = vpack.c.b16 %v1651_v0, %v1651_v0  ;;  %1737 = vst.msk [vmem:[%s2656_s16 + $0x1c] sm:$0x3] %vm1722_vm3, %v1687_v41 }
 0x194   : > { %1738 = vst.msk [vmem:[%s2656_s16 + $0x1e] sm:$0x3] %vm1722_vm3, %v1689_v55  ;;  %1739 = vst.msk [vmem:[%s2656_s16 + $0x20] sm:$0x3] %vm1722_vm3, %v1691_v60  ;;  %v1699_v20 = vpack.c.b8 %v1698_v15, %v1698_v15  ;;  %v1701_v42 = vpack.c.b8 %v1700_v48, %v1700_v48  ;;  %v1710_v38 = vpack.c.b16 %v1652_v4, %v1652_v4  ;;  %v1764_v13 = vsel %vm3772_vm1, 1, %v2581_v47 }
 0x195   : > { %1740 = vst.msk [vmem:[%s2656_s16 + $0x22] sm:$0x3] %vm1722_vm3, %v1693_v43  ;;  %v1712_v37 = vpack.c.b16 %v1653_v10, %v1653_v10  ;;  %1741 = vst.msk [vmem:[%s2656_s16 + $0x24] sm:$0x3] %vm1722_vm3, %v1695_v46  ;;  %v1703_v49 = vpack.c.b8 %v1702_v51, %v1702_v51  ;;  %v1705_v52 = vpack.c.b8 %v1704_v56, %v1704_v56  ;;  %vm3774_vm9 = vnez %v3685_v22 }
 0x196   : > { %1742 = vst.msk [vmem:[%s2656_s16 + $0x26] sm:$0x3] %vm1722_vm3, %v1697_v2  ;;  %v1707_v57 = vpack.c.b8 %v1706_v53, %v1706_v53  ;;  %v1709_v0 = vpack.c.b8 %v1708_v54, %v1708_v54  ;;  %v1711_v40 = vpack.c.b8 %v1710_v38, %v1710_v38  ;;  %v1714_v4 = vpack.c.b16 %v1654_v18, %v1654_v18  ;;  %v3798_v38 = vld [vmem:[#allocation20_spill] sm:$0xff] }
 0x197   : > { %v1713_v63 = vpack.c.b8 %v1712_v37, %v1712_v37  ;;  %v1716_v10 = vpack.c.b16 %v1655_v39, %v1655_v39  ;;  %1743 = vst.msk [vmem:[%s2656_s16 + $0x28] sm:$0x3] %vm1722_vm3, %v1699_v20  ;;  %1744 = vst.msk [vmem:[%s2656_s16 + $0x2a] sm:$0x3] %vm1722_vm3, %v1701_v42  ;;  %v1718_v58 = vpack.c.b16 %v1656_v44, %v1656_v44  ;;  %v1761_v18 = vsel %vm3769_vm4, 1, %v2581_v47 }
 0x198   : > { %v1720_v9 = vpack.c.b16 %v1657_v7, %v1657_v7  ;;  %1745 = vst.msk [vmem:[%s2656_s16 + $0x2c] sm:$0x3] %vm1722_vm3, %v1703_v49  ;;  %1746 = vst.msk [vmem:[%s2656_s16 + $0x2e] sm:$0x3] %vm1722_vm3, %v1705_v52  ;;  %v1715_v39 = vpack.c.b8 %v1714_v4, %v1714_v4  ;;  %v1763_v7 = vsel %vm3771_vm2, 1, %v2581_v47  ;;  %vm3773_vm4 = vnez %v3683_v21  ;;  %v3800_v49 = vld [vmem:[#allocation21_spill] sm:$0xff] }
 0x199   : > { %1747 = vst.msk [vmem:[%s2656_s16 + $0x30] sm:$0x3] %vm1722_vm3, %v1707_v57  ;;  %1748 = vst.msk [vmem:[%s2656_s16 + $0x32] sm:$0x3] %vm1722_vm3, %v1709_v0  ;;  %v1717_v44 = vpack.c.b8 %v1716_v10, %v1716_v10  ;;  %v1719_v31 = vpack.c.b8 %v1718_v58, %v1718_v58  ;;  %v1765_v14 = vsel %vm3773_vm4, 1, %v2581_v47  ;;  %v1766_v35 = vsel %vm3774_vm9, 1, %v2581_v47 }
 0x19a   : > { %1749 = vst.msk [vmem:[%s2656_s16 + $0x34] sm:$0x3] %vm1722_vm3, %v1711_v40  ;;  %1750 = vst.msk [vmem:[%s2656_s16 + $0x36] sm:$0x3] %vm1722_vm3, %v1713_v63  ;;  %v1721_v32 = vpack.c.b8 %v1720_v9, %v1720_v9  ;;  %vm3775_vm2 = vnez %v3687_v24  ;;  %vm3776_vm1 = vnez %v3689_v27  ;;  %vm3777_vm13 = vnez %v3691_v29 }
 0x19b   : > { %1751 = vst.msk [vmem:[%s2656_s16 + $0x38] sm:$0x3] %vm1722_vm3, %v1715_v39  ;;  %1752 = vst.msk [vmem:[%s2656_s16 + $0x3a] sm:$0x3] %vm1722_vm3, %v1717_v44  ;;  %v1767_v16 = vsel %vm3775_vm2, 1, %v2581_v47  ;;  %v1768_v19 = vsel %vm3776_vm1, 1, %v2581_v47  ;;  %vm3779_vm4 = vnez %v3778_v12  ;;  %vm3781_vm9 = vnez %v3780_v17 }
 0x19c   : > { %v1769_v21 = vsel %vm3777_vm13, 1, %v2581_v47  ;;  %v1770_v22 = vsel %vm3779_vm4, 1, %v2581_v47  ;;  %1753 = vst.msk [vmem:[%s2656_s16 + $0x3c] sm:$0x3] %vm1722_vm3, %v1719_v31  ;;  %1754 = vst.msk [vmem:[%s2656_s16 + $0x3e] sm:$0x3] %vm1722_vm3, %v1721_v32  ;;  %vm3783_vm2 = vnez %v3782_v5  ;;  %vm3785_vm1 = vnez %v3784_v23 }
 0x19d   : > { %v1771_v24 = vsel %vm3781_vm9, 1, %v2581_v47  ;;  %v1772_v27 = vsel %vm3783_vm2, 1, %v2581_v47  ;;  %v1773_v29 = vsel %vm3785_vm1, 1, %v2581_v47  ;;  %vm3787_vm13 = vnez %v3786_v11 }
 0x19e   : > { %v1774_v30 = vsel %vm3787_vm13, 1, %v2581_v47  ;;  %v1775_v8 = vsel %vm3761_vm11, 1, %v2581_v47  ;;  %v1776_v28 = vsel %vm3762_vm6, 1, %v2581_v47  ;;  %v1777_v33 = vsel %vm3763_vm7, 1, %v2581_v47 }
 0x19f   : > { %v1778_v55 = vsel %vm3764_vm8, 1, %v2581_v47  ;;  %v1779_v43 = vsel %vm3765_vm10, 1, %v2581_v47  ;;  %v1780_v2 = vsel %vm3766_vm5, 1, %v2581_v47  ;;  %v1781_v48 = vsel %vm3194_vm14, 1, %v2581_v47 }
 0x1a0   : > { %v1782_v56 = vsel %vm3198_vm15, 1, %v2581_v47  ;;  %v1783_v54 = vsel %vm3202_vm12, 1, %v2581_v47  ;;  %v1784_v42 = vsel %vm3206_vm0, 1, %v2581_v47  ;;  %vm3799_vm6 = vnez %v3798_v38 }
 0x1a1   : > { %v1785_v37 = vsel %vm3799_vm6, 1, %v2581_v47  ;;  %vm3801_vm5 = vnez %v3800_v49  ;;  %vm3802_vm7 = vcmask 64512  }
 0x1a2   : > { %v1786_v52 = vsel %vm3801_vm5, 1, %v2581_v47  ;;  %v1787_v57 = vsel %vm3802_vm7, %v3329_v50, 0  ;;  %vm3803_vm8 = vmmov %vm3802_vm7 }
 0x1a3   : > { %v1788_v0 = vsel %vm3803_vm8, %v3334_v3, 0  ;;  %vm3804_vm10 = vmmov %vm3802_vm7 }
 0x1a4   : > { %v1789_v40 = vsel %vm3804_vm10, %v3339_v34, 0  ;;  %vm3805_vm11 = vmmov %vm3802_vm7 }
 0x1a5   : > { %v1790_v63 = vsel %vm3805_vm11, %v3344_v45, 0  ;;  %vm3806_vm12 = vmmov %vm3802_vm7 }
 0x1a6   : > { %v1791_v4 = vsel %vm3806_vm12, %v3349_v26, 0  ;;  %vm3807_vm14 = vmmov %vm3802_vm7 }
 0x1a7   : > { %v1793_v10 = vsel %vm3807_vm14, %v3354_v1, 0  ;;  %vm3808_vm15 = vmmov %vm3802_vm7  ;;  %v1792_v50 = vadd.s32 %v1791_v4, %v1787_v57  ;;  %v3833_v4 = vmov 0.0  }
 0x1a8   : > { %v1795_v47 = vsel %vm3808_vm15, %v1761_v18, 0  ;;  %vm3809_vm0 = vmmov %vm3802_vm7  ;;  %v1794_v9 = vadd.s32 %v1793_v10, %v1788_v0  ;;  %v3836_v10 = vld [vmem:[#allocation23_spill] sm:$0xff] }
 0x1a9   : > { %v1797_v58 = vsel %vm3809_vm0, %v1762_v6, 0  ;;  %v1796_v39 = vadd.s32 %v1795_v47, %v1789_v40  ;;  %vm3810_vm4 = vmmov %vm3809_vm0  ;;  %v1827_v60 = vsel %vm3809_vm0, %v1777_v33, 0  ;;  %v3837_v47 = vtrunc.f32 %v3836_v10 }
 0x1aa   : > { %v1798_v3 = vadd.s32 %v1797_v58, %v1790_v63  ;;  %v1799_v44 = vsel %vm3810_vm4, %v1763_v7, 0  ;;  %vm3811_vm9 = vmmov %vm3809_vm0 }
 0x1ab   : > { %v1801_v34 = vsel %vm3811_vm9, %v1764_v13, 0  ;;  %vm3812_vm2 = vmmov %vm3809_vm0  ;;  %v1800_v26 = vadd.s32 %v1799_v44, %v1792_v50 }
 0x1ac   : > { %v1803_v45 = vsel %vm3812_vm2, %v1765_v14, 0  ;;  %vm3813_vm1 = vmmov %vm3809_vm0  ;;  %v1802_v32 = vadd.s32 %v1801_v34, %v1794_v9 }
 0x1ad   : > { %v1805_v31 = vsel %vm3813_vm1, %v1766_v35, 0  ;;  %v1804_v12 = vadd.s32 %v1803_v45, %v1796_v39  ;;  %vm3814_vm13 = vmmov %vm3809_vm0 }
 0x1ae   : > { %v1806_v1 = vadd.s32 %v1805_v31, %v1798_v3  ;;  %v1807_v18 = vsel %vm3814_vm13, %v1767_v16, 0  ;;  %vm3815_vm6 = vmmov %vm3809_vm0 }
 0x1af   : > { %v1809_v6 = vsel %vm3815_vm6, %v1768_v19, 0  ;;  %vm3816_vm5 = vmmov %vm3809_vm0  ;;  %v1808_v23 = vadd.s32 %v1807_v18, %v1800_v26 }
 0x1b0   : > { %v1811_v17 = vsel %vm3816_vm5, %v1769_v21, 0  ;;  %vm3817_vm7 = vmmov %vm3809_vm0  ;;  %v1810_v7 = vadd.s32 %v1809_v6, %v1802_v32 }
 0x1b1   : > { %v1813_v5 = vsel %vm3817_vm7, %v1770_v22, 0  ;;  %v1812_v11 = vadd.s32 %v1811_v17, %v1804_v12  ;;  %vm3818_vm8 = vmmov %vm3809_vm0 }
 0x1b2   : > { %v1814_v13 = vadd.s32 %v1813_v5, %v1806_v1  ;;  %v1815_v14 = vsel %vm3818_vm8, %v1771_v24, 0  ;;  %vm3819_vm10 = vmmov %vm3809_vm0 }
 0x1b3   : > { %v1817_v35 = vsel %vm3819_vm10, %v1772_v27, 0  ;;  %vm3820_vm11 = vmmov %vm3809_vm0  ;;  %v1816_v59 = vadd.s32 %v1815_v14, %v1808_v23  ;;  %vm3834_vm10 = vnez %v3760_v25 }
 0x1b4   : > { %v1819_v61 = vsel %vm3820_vm11, %v1773_v29, 0  ;;  %vm3821_vm12 = vmmov %vm3809_vm0  ;;  %v1818_v16 = vadd.s32 %v1817_v35, %v1810_v7 }
 0x1b5   : > { %v1821_v62 = vsel %vm3821_vm12, %v1774_v30, 0  ;;  %v1820_v41 = vadd.s32 %v1819_v61, %v1812_v11  ;;  %vm3822_vm14 = vmmov %vm3809_vm0 }
 0x1b6   : > { %v1822_v19 = vadd.s32 %v1821_v62, %v1814_v13  ;;  %v1823_v21 = vsel %vm3822_vm14, %v1775_v8, 0  ;;  %vm3823_vm15 = vmmov %vm3809_vm0 }
 0x1b7   : > { %v1825_v22 = vsel %vm3823_vm15, %v1776_v28, 0  ;;  %vm3824_vm4 = vmmov %vm3809_vm0  ;;  %v1824_v15 = vadd.s32 %v1823_v21, %v1816_v59  ;;  %v1828_v51 = vadd.s32 %v1827_v60, %v1820_v41  ;;  %v1869_v60 = vlaneseq }
 0x1b8   : > { %v1829_v46 = vsel %vm3824_vm4, %v1778_v55, 0  ;;  %v1826_v24 = vadd.s32 %v1825_v22, %v1818_v16  ;;  %vm3825_vm9 = vmmov %vm3809_vm0 }
 0x1b9   : > { %v1830_v27 = vadd.s32 %v1829_v46, %v1822_v19  ;;  %v1831_v29 = vsel %vm3825_vm9, %v1779_v43, 0  ;;  %vm3826_vm2 = vmmov %vm3809_vm0  ;;  %v1870_v46 = vand.u32 127, %v1869_v60 }
 0x1ba   : > { %v1833_v30 = vsel %vm3826_vm2, %v1780_v2, 0  ;;  %vm3827_vm1 = vmmov %vm3809_vm0  ;;  %v1832_v38 = vadd.s32 %v1831_v29, %v1824_v15  ;;  %v1871_v15 = vld [vmem:[#allocation2] sm:$0x1] }
 0x1bb   : > { %v1835_v53 = vsel %vm3827_vm1, %v1781_v48, 0  ;;  %vm3828_vm13 = vmmov %vm3809_vm0  ;;  %v1834_v8 = vadd.s32 %v1833_v30, %v1826_v24  ;;  %v1482_v48 = vsel %vm3834_vm10, 1.0, %v3833_v4  ;;  %vm1872_vm11 = vcmp.eq.s32.totalorder %v1870_v46, 0 }
 0x1bc   : > { %v1837_v20 = vsel %vm3828_vm13, %v1782_v56, 0  ;;  %v1836_v49 = vadd.s32 %v1835_v53, %v1828_v51  ;;  %vm3829_vm6 = vmmov %vm3809_vm0  ;;  %v3835_v56 = vtrunc.f32 %v3231_v36 }
 0x1bd   : > { %v1838_v28 = vadd.s32 %v1837_v20, %v1830_v27  ;;  %v1839_v33 = vsel %vm3829_vm6, %v1783_v54, 0  ;;  %vm3830_vm5 = vmmov %vm3809_vm0 }
 0x1be   : > { %v1841_v55 = vsel %vm3830_vm5, %v1784_v42, 0  ;;  %vm3831_vm7 = vmmov %vm3809_vm0  ;;  %v1840_v40 = vadd.s32 %v1839_v33, %v1832_v38  ;;  %v1550_v58 = vpack.c.f32.eXmY %v3837_v47, %v3835_v56, 312  ;;  %v1514_v42 = vtrunc.f32 %v1482_v48 }
 0x1bf   : > { %v1843_v57 = vsel %vm3831_vm7, %v1785_v37, 0  ;;  %vm3832_vm8 = vmmov %vm3809_vm0  ;;  %v1842_v43 = vadd.s32 %v1841_v55, %v1834_v8  ;;  %v3838_v37 = vld [vmem:[#allocation22_spill] sm:$0xff] }
 0x1c0   : > { %v1845_v0 = vsel %vm3832_vm8, %v1786_v52, 0  ;;  %v1844_v63 = vadd.s32 %v1843_v57, %v1836_v49  ;;  %v3839_v39 = vtrunc.f32 %v3838_v37 }
 0x1c1   : > { %v1846_v2 = vadd.s32 %v1845_v0, %v1838_v28  ;;  %v1847_v54 = vadd.s32 %v1842_v43, %v1840_v40 }
 0x1c2   : > { %v1546_v52 = vpack.c.f32.eXmY %v1514_v42, %v3839_v39, 312 }
 0x1c3   : > { %v1848_v50 = vadd.s32 %v1846_v2, %v1844_v63 }
 0x1c4   : > { %v1554_v44 = vpack.c.b8 %v1550_v58, %v1546_v52 }
 0x1c5   : > { %v1849_v9 = vadd.s32 %v1848_v50, %v1847_v54 }
 0x1c6   : > { %v1626_v25 = vunpack.c.0.s8 %v1554_v44  ;;  %v1627_v31 = vunpack.c.1.s8 %v1554_v44  ;;  %v1628_v36 = vunpack.c.2.s8 %v1554_v44  ;;  %v1629_v26 = vunpack.c.3.s8 %v1554_v44 }
 0x1c7   : > { %v1851_v3 = vshrl.u32 %v1849_v9, 16  ;;  %v1850_v34 = vand.u32 65535, %v1849_v9 }
 0x1c8   : > { %v1658_v32 = vpack.c.b16 %v1626_v25, %v1626_v25  ;;  %v1660_v12 = vpack.c.b16 %v1627_v31, %v1627_v31  ;;  %v1662_v1 = vpack.c.b16 %v1628_v36, %v1628_v36  ;;  %v1664_v6 = vpack.c.b16 %v1629_v26, %v1629_v26 }
 0x1c9   : > { %v1853_v45 = vcvt.s32.f32 %v1851_v3  ;;  %v1852_v18 = vcvt.s32.f32 %v1850_v34 }
 0x1ca   : > { %v1659_v17 = vpack.c.b8 %v1658_v32, %v1658_v32  ;;  %v1661_v5 = vpack.c.b8 %v1660_v12, %v1660_v12  ;;  %v1663_v23 = vpack.c.b8 %v1662_v1, %v1662_v1  ;;  %v1665_v7 = vpack.c.b8 %v1664_v6, %v1664_v6 }
 0x1cb   : > { %1856 = vadd.xlane.f32.xlu0 %v1853_v45 }
 0x1cc   : > { %1723 = vst.msk [vmem:[%s2656_s16] sm:$0x3] %vm1722_vm3, %v1659_v17  ;;  %1724 = vst.msk [vmem:[%s2656_s16 + $0x2] sm:$0x3] %vm1722_vm3, %v1661_v5 }
 0x1cd   : > { %1725 = vst.msk [vmem:[%s2656_s16 + $0x4] sm:$0x3] %vm1722_vm3, %v1663_v23  ;;  %1726 = vst.msk [vmem:[%s2656_s16 + $0x6] sm:$0x3] %vm1722_vm3, %v1665_v7 }
 0x1cf   : > { %1854 = vadd.xlane.f32.xlu0 %v1852_v18 }
 0x258   : > { %v1857_v11 = vpop.xlane.xlu0 %1856 }
 0x259   : > { %v1859_v13 = vcvt.f32.s32 %v1857_v11 }
 0x25b   : > { %v1860_v35 = vshll.u32 %v1859_v13, 16 }
 0x25c   : > { %v1855_v14 = vpop.xlane.xlu0 %1854 }
 0x25d   : > { %v1858_v61 = vcvt.f32.s32 %v1855_v14 }
 0x25f   : > { %v1861_v62 = vadd.s32 %v1860_v35, %v1858_v61 }
 0x261   : > { %v1862_v59 = vrot.slane %v1861_v62, 4 }
 0x263   : > { %v1863_v16 = vadd.s32 %v1862_v59, %v1861_v62 }
 0x265   : > { %v1864_v41 = vrot.slane %v1863_v16, 2 }
 0x267   : > { %v1865_v19 = vadd.s32 %v1864_v41, %v1863_v16 }
 0x269   : > { %v1866_v21 = vrot.slane %v1865_v19, 1 }
 0x26b   : > { %v1867_v22 = vadd.s32 %v1866_v21, %v1865_v19 }
 0x26d   : > { %2521 = vpush %v1867_v22 }
 0x29e   : > { %s2522_s30 = spop %2521 }
 0x29f   : > { %v1873_v24 = vstv %s2522_s30 }
 0x2a0   : > { %v1874_v51 = vsel %vm1872_vm11, %v1873_v24, 0 }
 0x2a1   : > { %v1875_v27 = vadd.s32 %v1874_v51, %v1871_v15 }
 0x2a3   : > { %1876 = vst [vmem:[#allocation2] sm:$0x1] %v1875_v27 }
 0x2a4   : > { %2554 = shalt.err (!%p2551_p12)
}
 0x2a5   : > { %s2555_s12 = scalar_lea.hbm %s3612_s5, 16 }
 0x2a6   : > { %p2556_p13 = scmp.ne.s32.totalorder %s3612_s5, %s2555_s12  ;;  %p2561_p2 = scmp.lt.u32.totalorder %s2555_s12, %s3612_s5 }
 0x2a8   : > { %p2557_p0 = pnand %p2556_p13, %p2527_p5 }
 0x2aa   : > { %p2558_p1 = pneg %p2557_p0 }
 0x2ac   : > { %p2563_p3 = pnand %p2561_p2, %p2558_p1 }
 0x2ae   : > { %2566 = shalt.err (!%p2563_p3)
}
 0x2af   : > { %2524 = dma.vmem_to_hbm [thread:$0]  (%p2527_p5), %s1901_s7, 16, %s3612_s5, [#allocation3]  }
 0x2b0   : > { %2572 = dma.done.wait (%p2527_p5), [#allocation3], 16  }
 0x2b1   : > { %2574 = vsyncadd (%p2527_p5), [#allocation3], 4294967280 }
 0x2b2 PF: > { %s17_s18 = sadd.s32 1, %s2577_s18  }
 0x2b3   : > { %p14_p4 = scmp.ge.s32.totalorder %s17_s18, 4  }
 0x2b5   :  { %16 = sbr.rel (!%p14_p4) target bundleno = 1 (0x1), region = 91 }
 0x2bc   :  { %1929 = vsyncpa [#allocation3], 1 }
 0x2bd   :  { %1931 = vsyncpa [#allocation3 + $0x1], 1 }

</bundles_post_ra>
